<compile_context>
chip_gen: v5e
topology: v5e:2x2
jax: 0.10.0
libtpu: 0.0.40
codegen_flags: <defaults>
</compile_context>

<pallas_src>
import functools

import jax
import jax.numpy as jnp
from jax import lax
from jax.experimental import pallas as pl
from jax.experimental.pallas import tpu as pltpu


# ------------------------------ Fused kernel -------------------------------- #

def fused_cnn_kernel(x_ref, w1_ref, b1_ref, wh_ref, bh_ref,
                     fc1w_ref, fc1b_ref, fc2w_ref, fc2b_ref,
                     o_ref, pin_ref, act_ref, *, H, W, Cin, F, n_layers):
    """Whole quickCNN forward for one batch element.

    x_ref  : (1, H, W, Cin)          NHWC input tile
    w1_ref : (9*Cin, F), b1_ref: (1, F)           conv1 (im2col layout)
    wh_ref : (L, 9*F, F), bh_ref: (L, 1, F)       stacked hidden convs
    fc1w_ref: (F, NH), fc1b_ref: (1, NH)
    fc2w_ref: (NH, NO), fc2b_ref: (1, NO)
    o_ref  : (1, H*W, NO)
    pin_ref: (H+2, W+2, Cin) VMEM scratch (zero halo)
    act_ref: (H+2, W+2, F)   VMEM scratch (zero halo), activation stays here
    """
    # Zero the padded scratches; the 1-pixel halo stays zero for every layer.
    pin_ref[...] = jnp.zeros_like(pin_ref)
    act_ref[...] = jnp.zeros_like(act_ref)

    # Input into the interior of the padded input scratch (no XLA pad op).
    pin_ref[pl.ds(1, H), pl.ds(1, W), :] = x_ref[0]

    def im2col(xpad, C):
        # xpad: (H+2, W+2, C) -> (H*W, 9*C), tap order (dy, dx, c) to match
        # the (3,3,Cin,Cout).reshape(9*Cin, Cout) weight layout.
        taps = [xpad[dy:dy + H, dx:dx + W, :]
                for dy in range(3) for dx in range(3)]
        return jnp.concatenate(taps, axis=-1).reshape(H * W, 9 * C)

    # conv1 + tanh: single MXU matmul with K = 9*Cin.
    patch = im2col(pin_ref[...], Cin)
    a = jnp.dot(patch, w1_ref[...], preferred_element_type=jnp.float32)
    a = jnp.tanh(a + b1_ref[...])
    act_ref[pl.ds(1, H), pl.ds(1, W), :] = a.reshape(H, W, F)

    # Hidden convs: weights VMEM-resident, activation never leaves VMEM.
    def layer(l, carry):
        p = im2col(act_ref[...], F)
        h = jnp.dot(p, wh_ref[l], preferred_element_type=jnp.float32)
        h = jnp.tanh(h + bh_ref[l])
        act_ref[pl.ds(1, H), pl.ds(1, W), :] = h.reshape(H, W, F)
        return carry

    if n_layers > 0:
        lax.fori_loop(0, n_layers, layer, 0, unroll=True)

    # Per-pixel MLP fused on the VMEM-resident activation.
    feat = act_ref[pl.ds(1, H), pl.ds(1, W), :].reshape(H * W, F)
    h = jnp.dot(feat, fc1w_ref[...], preferred_element_type=jnp.float32)
    h = jnp.tanh(h + fc1b_ref[...])
    o = jnp.dot(h, fc2w_ref[...], preferred_element_type=jnp.float32)
    o_ref[0] = o + fc2b_ref[...]


# -------------------------------- Wrapper ----------------------------------- #

def quick_cnn_forward(params, x_nchw):
    """Pallas implementation of quickCNN.forward. Input/output are NCHW."""
    B, Cin, H, W = x_nchw.shape
    x = jnp.transpose(x_nchw, (0, 2, 3, 1))  # NCHW -> NHWC
    F = params["conv1_w"].shape[-1]
    NH = params["fc1_w"].shape[1]
    NO = params["fc2_w"].shape[1]
    n_layers = len(params["hidden"])

    # im2col weight layouts (host-side reshapes, done once per trace).
    w1 = params["conv1_w"].reshape(9 * Cin, F)
    b1 = params["conv1_b"].reshape(1, F)
    if n_layers > 0:
        wh = jnp.stack([w.reshape(9 * F, F) for w, _ in params["hidden"]])
        bh = jnp.stack([b.reshape(1, F) for _, b in params["hidden"]])
    else:  # dummy (never read: fori_loop trip count is the static n_layers)
        wh = jnp.zeros((1, 9 * F, F), jnp.float32)
        bh = jnp.zeros((1, 1, F), jnp.float32)
    nl_blk = wh.shape[0]

    kernel = functools.partial(fused_cnn_kernel, H=H, W=W, Cin=Cin, F=F,
                               n_layers=n_layers)

    out = pl.pallas_call(
        kernel,
        out_shape=jax.ShapeDtypeStruct((B, H * W, NO), jnp.float32),
        grid=(B,),
        in_specs=[
            pl.BlockSpec((1, H, W, Cin), lambda i: (i, 0, 0, 0)),
            pl.BlockSpec((9 * Cin, F), lambda i: (0, 0)),
            pl.BlockSpec((1, F), lambda i: (0, 0)),
            pl.BlockSpec((nl_blk, 9 * F, F), lambda i: (0, 0, 0)),
            pl.BlockSpec((nl_blk, 1, F), lambda i: (0, 0, 0)),
            pl.BlockSpec((F, NH), lambda i: (0, 0)),
            pl.BlockSpec((1, NH), lambda i: (0, 0)),
            pl.BlockSpec((NH, NO), lambda i: (0, 0)),
            pl.BlockSpec((1, NO), lambda i: (0, 0)),
        ],
        out_specs=pl.BlockSpec((1, H * W, NO), lambda i: (i, 0, 0)),
        scratch_shapes=[
            pltpu.VMEM((H + 2, W + 2, Cin), jnp.float32),
            pltpu.VMEM((H + 2, W + 2, F), jnp.float32),
        ],
        compiler_params=pltpu.CompilerParams(
            dimension_semantics=("parallel",)),
    )(x, w1, b1, wh, bh,
      params["fc1_w"], params["fc1_b"].reshape(1, NH),
      params["fc2_w"], params["fc2_b"].reshape(1, NO))

    y = out.reshape(B, H, W, NO)
    return jnp.transpose(y, (0, 3, 1, 2))  # NHWC -> NCHW


# ------------------------- Deterministic parameters -------------------------- #

def _uniform(key, shape, fan_in):
    bound = 1.0 / jnp.sqrt(jnp.float32(fan_in))
    return jax.random.uniform(key, shape, jnp.float32, -bound, bound)


def init_params(key, N_input, N_output, N_Hidden, N_layers,
                kernel_size=3, num_filters=16):
    assert kernel_size == 3, "kernel implemented for kernel_size=3, padding=1"
    n_keys = 2 * (1 + N_layers) + 4
    keys = list(jax.random.split(key, n_keys))
    k = iter(keys)

    conv1_fan = N_input * kernel_size * kernel_size
    params = {
        "conv1_w": _uniform(next(k), (3, 3, N_input, num_filters), conv1_fan),
        "conv1_b": _uniform(next(k), (num_filters,), conv1_fan),
        "hidden": [],
    }
    hid_fan = num_filters * kernel_size * kernel_size
    for _ in range(N_layers):
        w = _uniform(next(k), (3, 3, num_filters, num_filters), hid_fan)
        b = _uniform(next(k), (num_filters,), hid_fan)
        params["hidden"].append((w, b))

    params["fc1_w"] = _uniform(next(k), (num_filters, N_Hidden), num_filters)
    params["fc1_b"] = _uniform(next(k), (N_Hidden,), num_filters)
    params["fc2_w"] = _uniform(next(k), (N_Hidden, N_output), N_Hidden)
    params["fc2_b"] = _uniform(next(k), (N_output,), N_Hidden)
    return params


# -------------------------------- Reference ---------------------------------- #

def reference_forward(params, x_nchw):
    """Pure-JAX reference (lax conv) mirroring quickCNN.forward semantics."""
    x = jnp.transpose(x_nchw, (0, 2, 3, 1))  # NHWC

    def conv(x, w, b):
        y = lax.conv_general_dilated(
            x, w, window_strides=(1, 1), padding="SAME",
            dimension_numbers=("NHWC", "HWIO", "NHWC"))
        return jnp.tanh(y + b)

    x = conv(x, params["conv1_w"], params["conv1_b"])
    for w, b in params["hidden"]:
        x = conv(x, w, b)
    h = jnp.tanh(x @ params["fc1_w"] + params["fc1_b"])
    y = h @ params["fc2_w"] + params["fc2_b"]
    return jnp.transpose(y, (0, 3, 1, 2))


# ---------------------------------- Main ------------------------------------- #

if __name__ == "__main__":
    # Small shapes consistent with the module's forward (input is NCHW image).
    B, N_input, H, W = 2, 4, 16, 16
    N_output, N_Hidden, N_layers, num_filters = 3, 32, 2, 16

    key = jax.random.PRNGKey(0)
    k_params, k_x = jax.random.split(key)
    params = init_params(k_params, N_input, N_output, N_Hidden, N_layers,
                         kernel_size=3, num_filters=num_filters)
    x = jax.random.normal(k_x, (B, N_input, H, W), jnp.float32)

    out = jax.block_until_ready(quick_cnn_forward(params, x))
    assert out.shape == (B, N_output, H, W), out.shape

    ref = jax.block_until_ready(reference_forward(params, x))
    assert jnp.allclose(out, ref, atol=1e-4, rtol=1e-4), \
        float(jnp.max(jnp.abs(out - ref)))

    print("KERNEL_OK")
</pallas_src>

<mosaic_0001>
module attributes {stable_mosaic.version = 11 : i64} {
  func.func @fused_cnn_kernel(%arg0: i32, %arg1: memref<1x16x16x4xf32, #tpu.memory_space<vmem>>, %arg2: memref<36x16xf32, #tpu.memory_space<vmem>>, %arg3: memref<1x16xf32, #tpu.memory_space<vmem>>, %arg4: memref<2x144x16xf32, #tpu.memory_space<vmem>>, %arg5: memref<2x1x16xf32, #tpu.memory_space<vmem>>, %arg6: memref<16x32xf32, #tpu.memory_space<vmem>>, %arg7: memref<1x32xf32, #tpu.memory_space<vmem>>, %arg8: memref<32x3xf32, #tpu.memory_space<vmem>>, %arg9: memref<1x3xf32, #tpu.memory_space<vmem>>, %arg10: memref<1x256x3xf32, #tpu.memory_space<vmem>>, %arg11: memref<18x18x4xf32, #tpu.memory_space<vmem>>, %arg12: memref<18x18x16xf32, #tpu.memory_space<vmem>>) attributes {dimension_semantics = [#tpu.dimension_semantics<parallel>], iteration_bounds = array<i64: 2>, scalar_prefetch = 0 : i64, scratch_operands = 2 : i64, tpu.core_type = #tpu.core_type<tc>, window_params = [{transform_indices = @transform_0, window_bounds = array<i64: 1, 16, 16, 4>}, {pipeline_mode = #tpu.pipeline_mode<synchronous>, transform_indices = @transform_1, window_bounds = array<i64: 36, 16>}, {pipeline_mode = #tpu.pipeline_mode<synchronous>, transform_indices = @transform_2, window_bounds = array<i64: 1, 16>}, {pipeline_mode = #tpu.pipeline_mode<synchronous>, transform_indices = @transform_3, window_bounds = array<i64: 2, 144, 16>}, {pipeline_mode = #tpu.pipeline_mode<synchronous>, transform_indices = @transform_4, window_bounds = array<i64: 2, 1, 16>}, {pipeline_mode = #tpu.pipeline_mode<synchronous>, transform_indices = @transform_5, window_bounds = array<i64: 16, 32>}, {pipeline_mode = #tpu.pipeline_mode<synchronous>, transform_indices = @transform_6, window_bounds = array<i64: 1, 32>}, {pipeline_mode = #tpu.pipeline_mode<synchronous>, transform_indices = @transform_7, window_bounds = array<i64: 32, 3>}, {pipeline_mode = #tpu.pipeline_mode<synchronous>, transform_indices = @transform_8, window_bounds = array<i64: 1, 3>}, {transform_indices = @transform_9, window_bounds = array<i64: 1, 256, 3>}]} {
    %cst = arith.constant 0.000000e+00 : f32
    %0 = vector.broadcast %cst : f32 to vector<18x18x4xf32>
    %c0 = arith.constant 0 : index
    %c0_0 = arith.constant 0 : index
    %c0_1 = arith.constant 0 : index
    %1 = vector.load %arg11[%c0, %c0_0, %c0_1] : memref<18x18x4xf32, #tpu.memory_space<vmem>>, vector<18x18x4xf32>
    tpu.vector_store %arg11[%c0, %c0_0, %c0_1], %0 {strides = array<i32>} : memref<18x18x4xf32, #tpu.memory_space<vmem>>, vector<18x18x4xf32>,
    %cst_2 = arith.constant 0.000000e+00 : f32
    %2 = vector.broadcast %cst_2 : f32 to vector<18x18x16xf32>
    %c0_3 = arith.constant 0 : index
    %c0_4 = arith.constant 0 : index
    %c0_5 = arith.constant 0 : index
    %3 = vector.load %arg12[%c0_3, %c0_4, %c0_5] : memref<18x18x16xf32, #tpu.memory_space<vmem>>, vector<18x18x16xf32>
    tpu.vector_store %arg12[%c0_3, %c0_4, %c0_5], %2 {strides = array<i32>} : memref<18x18x16xf32, #tpu.memory_space<vmem>>, vector<18x18x16xf32>,
    %c0_6 = arith.constant 0 : index
    %c0_7 = arith.constant 0 : index
    %c0_8 = arith.constant 0 : index
    %c0_9 = arith.constant 0 : index
    %4 = vector.load %arg1[%c0_6, %c0_7, %c0_8, %c0_9] : memref<1x16x16x4xf32, #tpu.memory_space<vmem>>, vector<1x16x16x4xf32>
    %5 = vector.shape_cast %4 : vector<1x16x16x4xf32> to vector<16x16x4xf32>
    %c1 = arith.constant 1 : index
    %c1_10 = arith.constant 1 : index
    %c0_11 = arith.constant 0 : index
    %6 = vector.load %arg11[%c1, %c1_10, %c0_11] : memref<18x18x4xf32, #tpu.memory_space<vmem>>, vector<16x16x4xf32>
    tpu.vector_store %arg11[%c1, %c1_10, %c0_11], %5 {strides = array<i32>} : memref<18x18x4xf32, #tpu.memory_space<vmem>>, vector<16x16x4xf32>,
    %c0_12 = arith.constant 0 : index
    %c0_13 = arith.constant 0 : index
    %c0_14 = arith.constant 0 : index
    %7 = vector.load %arg11[%c0_12, %c0_13, %c0_14] : memref<18x18x4xf32, #tpu.memory_space<vmem>>, vector<18x18x4xf32>
    %8 = vector.extract_strided_slice %7 {offsets = [0, 0, 0], sizes = [16, 16, 4], strides = [1, 1, 1]} : vector<18x18x4xf32> to vector<16x16x4xf32>
    %9 = vector.extract_strided_slice %7 {offsets = [0, 1, 0], sizes = [16, 16, 4], strides = [1, 1, 1]} : vector<18x18x4xf32> to vector<16x16x4xf32>
    %10 = vector.extract_strided_slice %7 {offsets = [0, 2, 0], sizes = [16, 16, 4], strides = [1, 1, 1]} : vector<18x18x4xf32> to vector<16x16x4xf32>
    %11 = vector.extract_strided_slice %7 {offsets = [1, 0, 0], sizes = [16, 16, 4], strides = [1, 1, 1]} : vector<18x18x4xf32> to vector<16x16x4xf32>
    %12 = vector.extract_strided_slice %7 {offsets = [1, 1, 0], sizes = [16, 16, 4], strides = [1, 1, 1]} : vector<18x18x4xf32> to vector<16x16x4xf32>
    %13 = vector.extract_strided_slice %7 {offsets = [1, 2, 0], sizes = [16, 16, 4], strides = [1, 1, 1]} : vector<18x18x4xf32> to vector<16x16x4xf32>
    %14 = vector.extract_strided_slice %7 {offsets = [2, 0, 0], sizes = [16, 16, 4], strides = [1, 1, 1]} : vector<18x18x4xf32> to vector<16x16x4xf32>
    %15 = vector.extract_strided_slice %7 {offsets = [2, 1, 0], sizes = [16, 16, 4], strides = [1, 1, 1]} : vector<18x18x4xf32> to vector<16x16x4xf32>
    %16 = vector.extract_strided_slice %7 {offsets = [2, 2, 0], sizes = [16, 16, 4], strides = [1, 1, 1]} : vector<18x18x4xf32> to vector<16x16x4xf32>
    %17 = tpu.concatenate %8, %9, %10, %11, %12, %13, %14, %15, %16 in 2 : vector<16x16x4xf32>, vector<16x16x4xf32>, vector<16x16x4xf32>, vector<16x16x4xf32>, vector<16x16x4xf32>, vector<16x16x4xf32>, vector<16x16x4xf32>, vector<16x16x4xf32>, vector<16x16x4xf32> -> vector<16x16x36xf32>
    %18 = vector.shape_cast %17 : vector<16x16x36xf32> to vector<256x36xf32>
    %c0_15 = arith.constant 0 : index
    %c0_16 = arith.constant 0 : index
    %19 = vector.load %arg2[%c0_15, %c0_16] : memref<36x16xf32, #tpu.memory_space<vmem>>, vector<36x16xf32>
    %cst_17 = arith.constant dense<0.000000e+00> : vector<256x16xf32>
    %20 = tpu.matmul %18, %19, %cst_17 {dimension_numbers = #tpu.dot_dimension_numbers<[1], [0], [0], [1], [0, 0, 1, 1], [], []>} : vector<256x36xf32>, vector<36x16xf32>, vector<256x16xf32> -> vector<256x16xf32>
    %c0_18 = arith.constant 0 : index
    %c0_19 = arith.constant 0 : index
    %21 = vector.load %arg3[%c0_18, %c0_19] : memref<1x16xf32, #tpu.memory_space<vmem>>, vector<1x16xf32>
    %22 = vector.broadcast %21 : vector<1x16xf32> to vector<256x16xf32>
    %23 = arith.addf %20, %22 : vector<256x16xf32>
    %24 = math.tanh %23 : vector<256x16xf32>
    %25 = vector.shape_cast %24 : vector<256x16xf32> to vector<16x16x16xf32>
    %c1_20 = arith.constant 1 : index
    %c1_21 = arith.constant 1 : index
    %c0_22 = arith.constant 0 : index
    %26 = vector.load %arg12[%c1_20, %c1_21, %c0_22] : memref<18x18x16xf32, #tpu.memory_space<vmem>>, vector<16x16x16xf32>
    tpu.vector_store %arg12[%c1_20, %c1_21, %c0_22], %25 {strides = array<i32>} : memref<18x18x16xf32, #tpu.memory_space<vmem>>, vector<16x16x16xf32>,
    %c0_i32 = arith.constant 0 : i32
    %c0_23 = arith.constant 0 : index
    %c0_24 = arith.constant 0 : index
    %c0_25 = arith.constant 0 : index
    %27 = vector.load %arg12[%c0_23, %c0_24, %c0_25] : memref<18x18x16xf32, #tpu.memory_space<vmem>>, vector<18x18x16xf32>
    %28 = vector.extract_strided_slice %27 {offsets = [0, 0, 0], sizes = [16, 16, 16], strides = [1, 1, 1]} : vector<18x18x16xf32> to vector<16x16x16xf32>
    %29 = vector.extract_strided_slice %27 {offsets = [0, 1, 0], sizes = [16, 16, 16], strides = [1, 1, 1]} : vector<18x18x16xf32> to vector<16x16x16xf32>
    %30 = vector.extract_strided_slice %27 {offsets = [0, 2, 0], sizes = [16, 16, 16], strides = [1, 1, 1]} : vector<18x18x16xf32> to vector<16x16x16xf32>
    %31 = vector.extract_strided_slice %27 {offsets = [1, 0, 0], sizes = [16, 16, 16], strides = [1, 1, 1]} : vector<18x18x16xf32> to vector<16x16x16xf32>
    %32 = vector.extract_strided_slice %27 {offsets = [1, 1, 0], sizes = [16, 16, 16], strides = [1, 1, 1]} : vector<18x18x16xf32> to vector<16x16x16xf32>
    %33 = vector.extract_strided_slice %27 {offsets = [1, 2, 0], sizes = [16, 16, 16], strides = [1, 1, 1]} : vector<18x18x16xf32> to vector<16x16x16xf32>
    %34 = vector.extract_strided_slice %27 {offsets = [2, 0, 0], sizes = [16, 16, 16], strides = [1, 1, 1]} : vector<18x18x16xf32> to vector<16x16x16xf32>
    %35 = vector.extract_strided_slice %27 {offsets = [2, 1, 0], sizes = [16, 16, 16], strides = [1, 1, 1]} : vector<18x18x16xf32> to vector<16x16x16xf32>
    %36 = vector.extract_strided_slice %27 {offsets = [2, 2, 0], sizes = [16, 16, 16], strides = [1, 1, 1]} : vector<18x18x16xf32> to vector<16x16x16xf32>
    %37 = tpu.concatenate %28, %29, %30, %31, %32, %33, %34, %35, %36 in 2 : vector<16x16x16xf32>, vector<16x16x16xf32>, vector<16x16x16xf32>, vector<16x16x16xf32>, vector<16x16x16xf32>, vector<16x16x16xf32>, vector<16x16x16xf32>, vector<16x16x16xf32>, vector<16x16x16xf32> -> vector<16x16x144xf32>
    %38 = vector.shape_cast %37 : vector<16x16x144xf32> to vector<256x144xf32>
    %39 = arith.index_cast %c0_i32 : i32 to index
    %c0_26 = arith.constant 0 : index
    %c0_27 = arith.constant 0 : index
    %40 = vector.load %arg4[%39, %c0_26, %c0_27] : memref<2x144x16xf32, #tpu.memory_space<vmem>>, vector<1x144x16xf32>
    %41 = vector.shape_cast %40 : vector<1x144x16xf32> to vector<144x16xf32>
    %cst_28 = arith.constant dense<0.000000e+00> : vector<256x16xf32>
    %42 = tpu.matmul %38, %41, %cst_28 {dimension_numbers = #tpu.dot_dimension_numbers<[1], [0], [0], [1], [0, 0, 1, 1], [], []>} : vector<256x144xf32>, vector<144x16xf32>, vector<256x16xf32> -> vector<256x16xf32>
    %43 = arith.index_cast %c0_i32 : i32 to index
    %c0_29 = arith.constant 0 : index
    %c0_30 = arith.constant 0 : index
    %44 = vector.load %arg5[%43, %c0_29, %c0_30] : memref<2x1x16xf32, #tpu.memory_space<vmem>>, vector<1x1x16xf32>
    %45 = vector.shape_cast %44 : vector<1x1x16xf32> to vector<1x16xf32>
    %46 = vector.broadcast %45 : vector<1x16xf32> to vector<256x16xf32>
    %47 = arith.addf %42, %46 : vector<256x16xf32>
    %48 = math.tanh %47 : vector<256x16xf32>
    %49 = vector.shape_cast %48 : vector<256x16xf32> to vector<16x16x16xf32>
    %c1_31 = arith.constant 1 : index
    %c1_32 = arith.constant 1 : index
    %c0_33 = arith.constant 0 : index
    %50 = vector.load %arg12[%c1_31, %c1_32, %c0_33] : memref<18x18x16xf32, #tpu.memory_space<vmem>>, vector<16x16x16xf32>
    tpu.vector_store %arg12[%c1_31, %c1_32, %c0_33], %49 {strides = array<i32>} : memref<18x18x16xf32, #tpu.memory_space<vmem>>, vector<16x16x16xf32>,
    %c1_i32 = arith.constant 1 : i32
    %c0_34 = arith.constant 0 : index
    %c0_35 = arith.constant 0 : index
    %c0_36 = arith.constant 0 : index
    %51 = vector.load %arg12[%c0_34, %c0_35, %c0_36] : memref<18x18x16xf32, #tpu.memory_space<vmem>>, vector<18x18x16xf32>
    %52 = vector.extract_strided_slice %51 {offsets = [0, 0, 0], sizes = [16, 16, 16], strides = [1, 1, 1]} : vector<18x18x16xf32> to vector<16x16x16xf32>
    %53 = vector.extract_strided_slice %51 {offsets = [0, 1, 0], sizes = [16, 16, 16], strides = [1, 1, 1]} : vector<18x18x16xf32> to vector<16x16x16xf32>
    %54 = vector.extract_strided_slice %51 {offsets = [0, 2, 0], sizes = [16, 16, 16], strides = [1, 1, 1]} : vector<18x18x16xf32> to vector<16x16x16xf32>
    %55 = vector.extract_strided_slice %51 {offsets = [1, 0, 0], sizes = [16, 16, 16], strides = [1, 1, 1]} : vector<18x18x16xf32> to vector<16x16x16xf32>
    %56 = vector.extract_strided_slice %51 {offsets = [1, 1, 0], sizes = [16, 16, 16], strides = [1, 1, 1]} : vector<18x18x16xf32> to vector<16x16x16xf32>
    %57 = vector.extract_strided_slice %51 {offsets = [1, 2, 0], sizes = [16, 16, 16], strides = [1, 1, 1]} : vector<18x18x16xf32> to vector<16x16x16xf32>
    %58 = vector.extract_strided_slice %51 {offsets = [2, 0, 0], sizes = [16, 16, 16], strides = [1, 1, 1]} : vector<18x18x16xf32> to vector<16x16x16xf32>
    %59 = vector.extract_strided_slice %51 {offsets = [2, 1, 0], sizes = [16, 16, 16], strides = [1, 1, 1]} : vector<18x18x16xf32> to vector<16x16x16xf32>
    %60 = vector.extract_strided_slice %51 {offsets = [2, 2, 0], sizes = [16, 16, 16], strides = [1, 1, 1]} : vector<18x18x16xf32> to vector<16x16x16xf32>
    %61 = tpu.concatenate %52, %53, %54, %55, %56, %57, %58, %59, %60 in 2 : vector<16x16x16xf32>, vector<16x16x16xf32>, vector<16x16x16xf32>, vector<16x16x16xf32>, vector<16x16x16xf32>, vector<16x16x16xf32>, vector<16x16x16xf32>, vector<16x16x16xf32>, vector<16x16x16xf32> -> vector<16x16x144xf32>
    %62 = vector.shape_cast %61 : vector<16x16x144xf32> to vector<256x144xf32>
    %63 = arith.index_cast %c1_i32 : i32 to index
    %c0_37 = arith.constant 0 : index
    %c0_38 = arith.constant 0 : index
    %64 = vector.load %arg4[%63, %c0_37, %c0_38] : memref<2x144x16xf32, #tpu.memory_space<vmem>>, vector<1x144x16xf32>
    %65 = vector.shape_cast %64 : vector<1x144x16xf32> to vector<144x16xf32>
    %cst_39 = arith.constant dense<0.000000e+00> : vector<256x16xf32>
    %66 = tpu.matmul %62, %65, %cst_39 {dimension_numbers = #tpu.dot_dimension_numbers<[1], [0], [0], [1], [0, 0, 1, 1], [], []>} : vector<256x144xf32>, vector<144x16xf32>, vector<256x16xf32> -> vector<256x16xf32>
    %67 = arith.index_cast %c1_i32 : i32 to index
    %c0_40 = arith.constant 0 : index
    %c0_41 = arith.constant 0 : index
    %68 = vector.load %arg5[%67, %c0_40, %c0_41] : memref<2x1x16xf32, #tpu.memory_space<vmem>>, vector<1x1x16xf32>
    %69 = vector.shape_cast %68 : vector<1x1x16xf32> to vector<1x16xf32>
    %70 = vector.broadcast %69 : vector<1x16xf32> to vector<256x16xf32>
    %71 = arith.addf %66, %70 : vector<256x16xf32>
    %72 = math.tanh %71 : vector<256x16xf32>
    %73 = vector.shape_cast %72 : vector<256x16xf32> to vector<16x16x16xf32>
    %c1_42 = arith.constant 1 : index
    %c1_43 = arith.constant 1 : index
    %c0_44 = arith.constant 0 : index
    %74 = vector.load %arg12[%c1_42, %c1_43, %c0_44] : memref<18x18x16xf32, #tpu.memory_space<vmem>>, vector<16x16x16xf32>
    tpu.vector_store %arg12[%c1_42, %c1_43, %c0_44], %73 {strides = array<i32>} : memref<18x18x16xf32, #tpu.memory_space<vmem>>, vector<16x16x16xf32>,
    %c2_i32 = arith.constant 2 : i32
    %c1_45 = arith.constant 1 : index
    %c1_46 = arith.constant 1 : index
    %c0_47 = arith.constant 0 : index
    %75 = vector.load %arg12[%c1_45, %c1_46, %c0_47] : memref<18x18x16xf32, #tpu.memory_space<vmem>>, vector<16x16x16xf32>
    %76 = vector.shape_cast %75 : vector<16x16x16xf32> to vector<256x16xf32>
    %c0_48 = arith.constant 0 : index
    %c0_49 = arith.constant 0 : index
    %77 = vector.load %arg6[%c0_48, %c0_49] : memref<16x32xf32, #tpu.memory_space<vmem>>, vector<16x32xf32>
    %cst_50 = arith.constant dense<0.000000e+00> : vector<256x32xf32>
    %78 = tpu.matmul %76, %77, %cst_50 {dimension_numbers = #tpu.dot_dimension_numbers<[1], [0], [0], [1], [0, 0, 1, 1], [], []>} : vector<256x16xf32>, vector<16x32xf32>, vector<256x32xf32> -> vector<256x32xf32>
    %c0_51 = arith.constant 0 : index
    %c0_52 = arith.constant 0 : index
    %79 = vector.load %arg7[%c0_51, %c0_52] : memref<1x32xf32, #tpu.memory_space<vmem>>, vector<1x32xf32>
    %80 = vector.broadcast %79 : vector<1x32xf32> to vector<256x32xf32>
    %81 = arith.addf %78, %80 : vector<256x32xf32>
    %82 = math.tanh %81 : vector<256x32xf32>
    %c0_53 = arith.constant 0 : index
    %c0_54 = arith.constant 0 : index
    %83 = vector.load %arg8[%c0_53, %c0_54] : memref<32x3xf32, #tpu.memory_space<vmem>>, vector<32x3xf32>
    %cst_55 = arith.constant dense<0.000000e+00> : vector<256x3xf32>
    %84 = tpu.matmul %82, %83, %cst_55 {dimension_numbers = #tpu.dot_dimension_numbers<[1], [0], [0], [1], [0, 0, 1, 1], [], []>} : vector<256x32xf32>, vector<32x3xf32>, vector<256x3xf32> -> vector<256x3xf32>
    %c0_56 = arith.constant 0 : index
    %c0_57 = arith.constant 0 : index
    %85 = vector.load %arg9[%c0_56, %c0_57] : memref<1x3xf32, #tpu.memory_space<vmem>>, vector<1x3xf32>
    %86 = vector.broadcast %85 : vector<1x3xf32> to vector<256x3xf32>
    %87 = arith.addf %84, %86 : vector<256x3xf32>
    %c0_58 = arith.constant 0 : index
    %c0_59 = arith.constant 0 : index
    %c0_60 = arith.constant 0 : index
    %88 = vector.load %arg10[%c0_58, %c0_59, %c0_60] : memref<1x256x3xf32, #tpu.memory_space<vmem>>, vector<1x256x3xf32>
    %89 = vector.shape_cast %88 : vector<1x256x3xf32> to vector<256x3xf32>
    %90 = vector.shape_cast %87 : vector<256x3xf32> to vector<1x256x3xf32>
    tpu.vector_store %arg10[%c0_58, %c0_59, %c0_60], %90 {strides = array<i32>} : memref<1x256x3xf32, #tpu.memory_space<vmem>>, vector<1x256x3xf32>,
    return
  }
  func.func @transform_0(%arg0: i32) -> (i32, i32, i32, i32) {
    %c0_i32 = arith.constant 0 : i32
    %c0_i32_0 = arith.constant 0 : i32
    %c0_i32_1 = arith.constant 0 : i32
    %c0_i32_2 = arith.constant 0 : i32
    return %arg0, %c0_i32, %c0_i32_0, %c0_i32_1 : i32, i32, i32, i32
  }
  func.func @transform_1(%arg0: i32) -> (i32, i32) {
    %c0_i32 = arith.constant 0 : i32
    %c0_i32_0 = arith.constant 0 : i32
    %c0_i32_1 = arith.constant 0 : i32
    return %c0_i32, %c0_i32_0 : i32, i32
  }
  func.func @transform_2(%arg0: i32) -> (i32, i32) {
    %c0_i32 = arith.constant 0 : i32
    %c0_i32_0 = arith.constant 0 : i32
    %c0_i32_1 = arith.constant 0 : i32
    return %c0_i32, %c0_i32_0 : i32, i32
  }
  func.func @transform_3(%arg0: i32) -> (i32, i32, i32) {
    %c0_i32 = arith.constant 0 : i32
    %c0_i32_0 = arith.constant 0 : i32
    %c0_i32_1 = arith.constant 0 : i32
    %c0_i32_2 = arith.constant 0 : i32
    return %c0_i32, %c0_i32_0, %c0_i32_1 : i32, i32, i32
  }
  func.func @transform_4(%arg0: i32) -> (i32, i32, i32) {
    %c0_i32 = arith.constant 0 : i32
    %c0_i32_0 = arith.constant 0 : i32
    %c0_i32_1 = arith.constant 0 : i32
    %c0_i32_2 = arith.constant 0 : i32
    return %c0_i32, %c0_i32_0, %c0_i32_1 : i32, i32, i32
  }
  func.func @transform_5(%arg0: i32) -> (i32, i32) {
    %c0_i32 = arith.constant 0 : i32
    %c0_i32_0 = arith.constant 0 : i32
    %c0_i32_1 = arith.constant 0 : i32
    return %c0_i32, %c0_i32_0 : i32, i32
  }
  func.func @transform_6(%arg0: i32) -> (i32, i32) {
    %c0_i32 = arith.constant 0 : i32
    %c0_i32_0 = arith.constant 0 : i32
    %c0_i32_1 = arith.constant 0 : i32
    return %c0_i32, %c0_i32_0 : i32, i32
  }
  func.func @transform_7(%arg0: i32) -> (i32, i32) {
    %c0_i32 = arith.constant 0 : i32
    %c0_i32_0 = arith.constant 0 : i32
    %c0_i32_1 = arith.constant 0 : i32
    return %c0_i32, %c0_i32_0 : i32, i32
  }
  func.func @transform_8(%arg0: i32) -> (i32, i32) {
    %c0_i32 = arith.constant 0 : i32
    %c0_i32_0 = arith.constant 0 : i32
    %c0_i32_1 = arith.constant 0 : i32
    return %c0_i32, %c0_i32_0 : i32, i32
  }
  func.func @transform_9(%arg0: i32) -> (i32, i32, i32) {
    %c0_i32 = arith.constant 0 : i32
    %c0_i32_0 = arith.constant 0 : i32
    %c0_i32_1 = arith.constant 0 : i32
    return %arg0, %c0_i32, %c0_i32_0 : i32, i32, i32
  }
}

</mosaic_0001>

<bundles_post_ra>
// kernel: tpu_custom_call.1
= control target key start
LH: loop header
LB: loop body
LE: loop exit
PB: predicated region body
PF: predicated region fallthrough
CT: control target
= control target key end

     0   :  { %s7607_s30 = smov 0   ;;  %s12799_s0 = inlined_call_operand.vmem [shape: f32[2,16,16,4], index: 0, kind: input, shape index: {}]   ;;  %s12800_s1 = inlined_call_operand.vmem [shape: f32[36,16], index: 1, kind: input, shape index: {}]   ;;  %s12801_s2 = inlined_call_operand.vmem [shape: f32[1,16], index: 2, kind: input, shape index: {}]   ;;  %s12802_s3 = inlined_call_operand.vmem [shape: f32[2,144,16], index: 3, kind: input, shape index: {}]   ;;  %s12803_s4 = inlined_call_operand.vmem [shape: f32[2,1,16], index: 4, kind: input, shape index: {}]   ;;  %s12804_s5 = inlined_call_operand.vmem [shape: f32[16,32], index: 5, kind: input, shape index: {}]   ;;  %s12805_s6 = inlined_call_operand.vmem [shape: f32[1,32], index: 6, kind: input, shape index: {}]   ;;  %s12806_s7 = inlined_call_operand.vmem [shape: f32[32,3], index: 7, kind: input, shape index: {}]   ;;  %s12807_s8 = inlined_call_operand.vmem [shape: f32[1,3], index: 8, kind: input, shape index: {}]   ;;  %s12808_s9 = inlined_call_operand.vmem [shape: f32[2,256,3], index: 9, kind: output, shape index: {}]  }
   0x1 LB: > { %s5829_s10 = sadd.s32 4294967295, %s7541_s30   ;;  %p5833_p0 = scmp.ge.s32.totalorder %s7541_s30, 1  ;;  %s7541_s30 = sphi %s7607_s30, %s19_s30  }
   0x2   : > { %p287_p1 = scmp.lt.s32.totalorder %s7541_s30, 3 }
   0x4   : > { %p288_p2 = pnand %p5833_p0, %p287_p1 }
   0x6   : > { %291 = sbr.rel (%p288_p2) target bundleno = 2385 (0x951), region = 56 }
   0xb   : > { %vm333_vm0 = vcmask 31744   ;;  %v12809_v0 = vmov 0.0   ;;  %vm612_vm1 = vcmask 1046528   ;;  %s7544_s11 = smov 4   ;;  %p323_p3 = scmp.lt.s32.totalorder %s5829_s10, 1  ;;  %vm336_vm2 = vcmask 25600  }
   0xc   : > { %334 = vst.msk [vmem:[#allocation2] sm:$0xff] %vm333_vm0, %v12809_v0  ;;  %vm789_vm3 = vcmask 1045504   ;;  %s7545_s16 = smov 8   ;;  %s7546_s17 = smov 12   ;;  %vm389_vm4 = vcmask 130048   ;;  %vm1936_vm5 = vcmask 1043456  }
   0xd   : > { %335 = vst.msk [vmem:[#allocation2 + $0x8] sm:$0xff] %vm333_vm0, %v12809_v0  ;;  %s13611_s10 = smov (!%p323_p3, %s5829_s10), 1  ;;  %s7547_s18 = smov 16   ;;  %vm1600_vm6 = vcmask 64512   ;;  %vm1633_vm7 = vcmask 97280   ;;  %vm1698_vm8 = vcmask 162816  }
   0xe   : > { %338 = vst.msk [vmem:[#allocation2 + $0x18] sm:$0xff] %vm333_vm0, %v12809_v0  ;;  %s6020_s12 = sshll.u32 %s13611_s10, 8  ;;  %s7548_s19 = smov 20   ;;  %vm1731_vm9 = vcmask 195584   ;;  %vm1797_vm10 = vcmask 261120   ;;  %vm1764_vm11 = vcmask 228352  }
   0xf   : > { %339 = vst.msk [vmem:[#allocation2 + $0x20] sm:$0xff] %vm333_vm0, %v12809_v0  ;;  %s7699_s15 = scalar_lea.vmem %s12799_s0, %s6020_s12  ;;  %s7549_s20 = smov 24   ;;  %vm1839_vm12 = vcmask 293888   ;;  %vm392_vm13 = vcmask 123904   ;;  %vm3142_vm14 = vcmask 392192   ;;  %vm3208_vm15 = vcmask 654336  }
  0x10   : > { %341 = vst.msk [vmem:[#allocation2 + $0x30] sm:$0xff] %vm333_vm0, %v12809_v0  ;;  %v447_v6 = vld [vmem:[%s7699_s15 + $0x10] sm:$0xff]  ;;  %v448_v7 = vld [vmem:[%s7699_s15 + $0x18] sm:$0xff]  ;;  %v445_v18 = vld [vmem:[%s7699_s15] sm:$0xff]  ;;  %s7550_s21 = smov 28   ;;  %s7551_s22 = smov 32  }
  0x11   : > { %342 = vst.msk [vmem:[#allocation2 + $0x38] sm:$0xff] %vm333_vm0, %v12809_v0  ;;  %v446_v19 = vld [vmem:[%s7699_s15 + $0x8] sm:$0xff]  ;;  %v449_v21 = vld [vmem:[%s7699_s15 + $0x20] sm:$0xff]  ;;  %v451_v23 = vld [vmem:[%s7699_s15 + $0x30] sm:$0xff]  ;;  %s7552_s25 = smov 48   ;;  %s7553_s26 = smov 64  }
  0x12   : > { %344 = vst.msk [vmem:[#allocation2 + $0x48] sm:$0xff] %vm333_vm0, %v12809_v0  ;;  %v450_v22 = vld [vmem:[%s7699_s15 + $0x28] sm:$0xff]  ;;  %v452_v24 = vld [vmem:[%s7699_s15 + $0x38] sm:$0xff]  ;;  %v453_v25 = vld [vmem:[%s7699_s15 + $0x40] sm:$0xff]  ;;  %s7554_s27 = smov 80   ;;  %s7555_s28 = smov 96  }
  0x13   : > { %v7629_v1 = vld [vmem:[#allocation2] sm:$0xff]  ;;  %345 = vst.msk [vmem:[#allocation2 + $0x50] sm:$0xff] %vm333_vm0, %v12809_v0  ;;  %v454_v26 = vld [vmem:[%s7699_s15 + $0x48] sm:$0xff]  ;;  %v455_v27 = vld [vmem:[%s7699_s15 + $0x50] sm:$0xff]  ;;  %s7556_s29 = smov 112  }
  0x14   : > { %v7633_v2 = vld [vmem:[#allocation2 + $0x8] sm:$0xff]  ;;  %v613_v3 = vrot.slane %v7629_v1, 1  ;;  %347 = vst.msk [vmem:[#allocation2 + $0x60] sm:$0xff] %vm333_vm0, %v12809_v0  ;;  %v456_v28 = vld [vmem:[%s7699_s15 + $0x58] sm:$0xff]  ;;  %v457_v30 = vld [vmem:[%s7699_s15 + $0x60] sm:$0xff] }
  0x15   : > { %v614_v4 = vrot.slane %v7633_v2, 1  ;;  %348 = vst.msk [vmem:[#allocation2 + $0x68] sm:$0xff] %vm333_vm0, %v12809_v0  ;;  %v458_v33 = vld [vmem:[%s7699_s15 + $0x68] sm:$0xff]  ;;  %v459_v36 = vld [vmem:[%s7699_s15 + $0x70] sm:$0xff]  ;;  %v460_v40 = vld [vmem:[%s7699_s15 + $0x78] sm:$0xff] }
  0x16   : > { %350 = vst.msk [vmem:[#allocation2 + $0x78] sm:$0xff] %vm333_vm0, %v12809_v0  ;;  %v461_v44 = vld [vmem:[%s7699_s15 + $0x80] sm:$0xff]  ;;  %v462_v48 = vld [vmem:[%s7699_s15 + $0x88] sm:$0xff]  ;;  %v463_v56 = vld [vmem:[%s7699_s15 + $0x90] sm:$0xff] }
  0x17   : > { %v615_v5 = vsel %vm612_vm1, %v613_v3, %v614_v4  ;;  %351 = vst.msk [vmem:[#allocation2 + $0x80] sm:$0xff] %vm333_vm0, %v12809_v0  ;;  %v464_v60 = vld [vmem:[%s7699_s15 + $0x98] sm:$0xff] }
  0x18   : > { %693 = vrot.lane.b32.xlu0 %v615_v5, %s7544_s11  ;;  %353 = vst.msk [vmem:[#allocation2 + $0x90] sm:$0xff] %vm333_vm0, %v12809_v0 }
  0x19   : > { %354 = vst.msk [vmem:[#allocation2 + $0x98] sm:$0xff] %vm333_vm0, %v12809_v0 }
  0x1a   : > { %356 = vst.msk [vmem:[#allocation2 + $0xa8] sm:$0xff] %vm333_vm0, %v12809_v0 }
  0x1b   : > { %357 = vst.msk [vmem:[#allocation2 + $0xb0] sm:$0xff] %vm333_vm0, %v12809_v0 }
  0x1c   : > { %359 = vst.msk [vmem:[#allocation2 + $0xc0] sm:$0xff] %vm333_vm0, %v12809_v0 }
  0x1d   : > { %360 = vst.msk [vmem:[#allocation2 + $0xc8] sm:$0xff] %vm333_vm0, %v12809_v0 }
  0x1e   : > { %362 = vst.msk [vmem:[#allocation2 + $0xd8] sm:$0xff] %vm333_vm0, %v12809_v0 }
  0x1f   : > { %363 = vst.msk [vmem:[#allocation2 + $0xe0] sm:$0xff] %vm333_vm0, %v12809_v0 }
  0x20   : > { %365 = vst.msk [vmem:[#allocation2 + $0xf0] sm:$0xff] %vm333_vm0, %v12809_v0 }
  0x21   : > { %366 = vst.msk [vmem:[#allocation2 + $0xf8] sm:$0xff] %vm333_vm0, %v12809_v0 }
  0x22   : > { %368 = vst.msk [vmem:[#allocation2 + $0x108] sm:$0xff] %vm333_vm0, %v12809_v0 }
  0x23   : > { %369 = vst.msk [vmem:[#allocation2 + $0x110] sm:$0xff] %vm333_vm0, %v12809_v0 }
  0x24   : > { %371 = vst.msk [vmem:[#allocation2 + $0x120] sm:$0xff] %vm333_vm0, %v12809_v0 }
  0x25   : > { %372 = vst.msk [vmem:[#allocation2 + $0x128] sm:$0xff] %vm333_vm0, %v12809_v0 }
  0x26   : > { %374 = vst.msk [vmem:[#allocation2 + $0x138] sm:$0xff] %vm333_vm0, %v12809_v0 }
  0x27   : > { %375 = vst.msk [vmem:[#allocation2 + $0x140] sm:$0xff] %vm333_vm0, %v12809_v0 }
  0x28   : > { %377 = vst.msk [vmem:[#allocation2 + $0x150] sm:$0xff] %vm333_vm0, %v12809_v0 }
  0x29   : > { %378 = vst.msk [vmem:[#allocation2 + $0x158] sm:$0xff] %vm333_vm0, %v12809_v0 }
  0x2a   : > { %380 = vst.msk [vmem:[#allocation2 + $0x168] sm:$0xff] %vm333_vm0, %v12809_v0 }
  0x2b   : > { %381 = vst.msk [vmem:[#allocation2 + $0x170] sm:$0xff] %vm333_vm0, %v12809_v0 }
  0x2c   : > { %383 = vst.msk [vmem:[#allocation2 + $0x180] sm:$0xff] %vm333_vm0, %v12809_v0 }
  0x2d   : > { %384 = vst.msk [vmem:[#allocation2 + $0x188] sm:$0xff] %vm333_vm0, %v12809_v0 }
  0x2e   : > { %386 = vst.msk [vmem:[#allocation2 + $0x198] sm:$0xff] %vm333_vm0, %v12809_v0 }
  0x2f   : > { %387 = vst.msk [vmem:[#allocation2 + $0x1a0] sm:$0xff] %vm333_vm0, %v12809_v0 }
  0x30   : > { %343 = vst.msk [vmem:[#allocation2 + $0x40] sm:$0x3] %vm336_vm2, %v12809_v0 }
  0x31   : > { %480 = vst.msk [vmem:[#allocation2 + $0x31] sm:$0xff] %vm333_vm0, %v447_v6 }
  0x32   : > { %481 = vst.msk [vmem:[#allocation2 + $0x39] sm:$0xff] %vm333_vm0, %v448_v7 }
  0x33   : > { %337 = vst.msk [vmem:[#allocation2 + $0x10] sm:$0x3] %vm336_vm2, %v12809_v0 }
  0x34   : > { %340 = vst.msk [vmem:[#allocation2 + $0x28] sm:$0x3] %vm336_vm2, %v12809_v0 }
  0x35   : > { %346 = vst.msk [vmem:[#allocation2 + $0x58] sm:$0x3] %vm336_vm2, %v12809_v0 }
  0x36   : > { %349 = vst.msk [vmem:[#allocation2 + $0x70] sm:$0x3] %vm336_vm2, %v12809_v0 }
  0x37   : > { %352 = vst.msk [vmem:[#allocation2 + $0x88] sm:$0x3] %vm336_vm2, %v12809_v0 }
  0x38   : > { %v7725_v8 = vld [vmem:[#allocation2 + $0x30] sm:$0xff]  ;;  %355 = vst.msk [vmem:[#allocation2 + $0xa0] sm:$0x3] %vm336_vm2, %v12809_v0 }
  0x39   : > { %v7729_v9 = vld [vmem:[#allocation2 + $0x38] sm:$0xff]  ;;  %v623_v10 = vrot.slane %v7725_v8, 1  ;;  %358 = vst.msk [vmem:[#allocation2 + $0xb8] sm:$0x3] %vm336_vm2, %v12809_v0  ;;  %v7742_v14 = vld [vmem:[#allocation2 + $0x40] sm:$0x3] }
  0x3a   : > { %v624_v11 = vrot.slane %v7729_v9, 1  ;;  %361 = vst.msk [vmem:[#allocation2 + $0xd0] sm:$0x3] %vm336_vm2, %v12809_v0  ;;  %v7737_v12 = vld [vmem:[#allocation2 + $0x10] sm:$0x3]  ;;  %v626_v17 = vrot.slane %v7742_v14, 1 }
  0x3b   : > { %364 = vst.msk [vmem:[#allocation2 + $0xe8] sm:$0x3] %vm336_vm2, %v12809_v0  ;;  %v616_v13 = vrot.slane %v7737_v12, 1 }
  0x3c   : > { %v7745_v15 = vsel %vm612_vm1, %v623_v10, %v624_v11  ;;  %367 = vst.msk [vmem:[#allocation2 + $0x100] sm:$0x3] %vm336_vm2, %v12809_v0  ;;  %v7769_v20 = vsel %vm612_vm1, %v624_v11, %v626_v17 }
  0x3d   : > { %701 = vrot.lane.b32.xlu2 %v7745_v15, %s7544_s11  ;;  %370 = vst.msk [vmem:[#allocation2 + $0x118] sm:$0x3] %vm336_vm2, %v12809_v0  ;;  %v617_v16 = vsel %vm612_vm1, %v614_v4, %v616_v13  ;;  %v465_v13 = vld [vmem:[%s7699_s15 + $0xa0] sm:$0xff] }
  0x3e   : > { %373 = vst.msk [vmem:[#allocation2 + $0x130] sm:$0x3] %vm336_vm2, %v12809_v0  ;;  %695 = vrot.lane.b32.xlu0 %v617_v16, %s7544_s11  ;;  %v466_v16 = vld [vmem:[%s7699_s15 + $0xa8] sm:$0xff] }
  0x3f   : > { %376 = vst.msk [vmem:[#allocation2 + $0x148] sm:$0x3] %vm336_vm2, %v12809_v0 }
  0x40   : > { %379 = vst.msk [vmem:[#allocation2 + $0x160] sm:$0x3] %vm336_vm2, %v12809_v0 }
  0x41   : > { %382 = vst.msk [vmem:[#allocation2 + $0x178] sm:$0x3] %vm336_vm2, %v12809_v0 }
  0x42   : > { %385 = vst.msk [vmem:[#allocation2 + $0x190] sm:$0x3] %vm336_vm2, %v12809_v0 }
  0x43   : > { %388 = vst.msk [vmem:[#allocation2 + $0x1a8] sm:$0x3] %vm336_vm2, %v12809_v0  ;;  %vm3241_vm2 = vcmask 785408  }
  0x44   : > { %478 = vst.msk [vmem:[#allocation2 + $0x19] sm:$0xff] %vm333_vm0, %v445_v18 }
  0x45   : > { %479 = vst.msk [vmem:[#allocation2 + $0x21] sm:$0xff] %vm333_vm0, %v446_v19  ;;  %703 = vrot.lane.b32.xlu2 %v7769_v20, %s7544_s11 }
  0x46   : > { %482 = vst.msk [vmem:[#allocation2 + $0x49] sm:$0xff] %vm333_vm0, %v449_v21 }
  0x47   : > { %483 = vst.msk [vmem:[#allocation2 + $0x51] sm:$0xff] %vm333_vm0, %v450_v22  ;;  %v467_v22 = vld [vmem:[%s7699_s15 + $0xb0] sm:$0xff] }
  0x48   : > { %484 = vst.msk [vmem:[#allocation2 + $0x61] sm:$0xff] %vm333_vm0, %v451_v23  ;;  %v468_v23 = vld [vmem:[%s7699_s15 + $0xb8] sm:$0xff] }
  0x49   : > { %485 = vst.msk [vmem:[#allocation2 + $0x69] sm:$0xff] %vm333_vm0, %v452_v24 }
  0x4a   : > { %486 = vst.msk [vmem:[#allocation2 + $0x79] sm:$0xff] %vm333_vm0, %v453_v25 }
  0x4b   : > { %v7790_v29 = vld [vmem:[#allocation2 + $0x18] sm:$0xff]  ;;  %487 = vst.msk [vmem:[#allocation2 + $0x81] sm:$0xff] %vm333_vm0, %v454_v26 }
  0x4c   : > { %v7794_v31 = vld [vmem:[#allocation2 + $0x20] sm:$0xff]  ;;  %v618_v32 = vrot.slane %v7790_v29, 1  ;;  %488 = vst.msk [vmem:[#allocation2 + $0x91] sm:$0xff] %vm333_vm0, %v455_v27  ;;  %v7804_v37 = vld [vmem:[#allocation2 + $0x28] sm:$0x3] }
  0x4d   : > { %v619_v34 = vrot.slane %v7794_v31, 1  ;;  %v7800_v35 = vld [vmem:[#allocation2 + $0x48] sm:$0xff]  ;;  %489 = vst.msk [vmem:[#allocation2 + $0x99] sm:$0xff] %vm333_vm0, %v456_v28  ;;  %v621_v49 = vrot.slane %v7804_v37, 1 }
  0x4e   : > { %v7806_v38 = vld [vmem:[#allocation2 + $0x50] sm:$0xff]  ;;  %v628_v39 = vrot.slane %v7800_v35, 1  ;;  %490 = vst.msk [vmem:[#allocation2 + $0xa9] sm:$0xff] %vm333_vm0, %v457_v30  ;;  %v7856_v61 = vld [vmem:[#allocation2 + $0x58] sm:$0x3] }
  0x4f   : > { %v7812_v41 = vsel %vm612_vm1, %v618_v32, %v619_v34  ;;  %v629_v42 = vrot.slane %v7806_v38, 1  ;;  %v7815_v43 = vld [vmem:[#allocation2 + $0x60] sm:$0xff]  ;;  %491 = vst.msk [vmem:[#allocation2 + $0xb1] sm:$0xff] %vm333_vm0, %v458_v33  ;;  %v7850_v57 = vsel %vm612_vm1, %v619_v34, %v621_v49  ;;  %v631_v4 = vrot.slane %v7856_v61, 1  ;;  %v470_v34 = vld [vmem:[%s7699_s15 + $0xc8] sm:$0xff] }
  0x50   : > { %697 = vrot.lane.b32.xlu1 %v7812_v41, %s7544_s11  ;;  %v7821_v45 = vld [vmem:[#allocation2 + $0x68] sm:$0xff]  ;;  %v633_v46 = vrot.slane %v7815_v43, 1  ;;  %v7824_v47 = vld [vmem:[#allocation2 + $0x70] sm:$0x3]  ;;  %492 = vst.msk [vmem:[#allocation2 + $0xc1] sm:$0xff] %vm333_vm0, %v459_v36  ;;  %v469_v33 = vld [vmem:[%s7699_s15 + $0xc0] sm:$0xff] }
  0x51   : > { %v7830_v50 = vsel %vm612_vm1, %v628_v39, %v629_v42  ;;  %v634_v51 = vrot.slane %v7821_v45, 1  ;;  %493 = vst.msk [vmem:[#allocation2 + $0xc9] sm:$0xff] %vm333_vm0, %v460_v40  ;;  %v636_v55 = vrot.slane %v7824_v47, 1  ;;  %v7885_v17 = vsel %vm612_vm1, %v629_v42, %v631_v4  ;;  %v7890_v21 = vld [vmem:[#allocation2 + $0x78] sm:$0xff] }
  0x52   : > { %12984 = vst [vmem:[#allocation4_spill] sm:$0xff] %v7830_v50  ;;  %705 = vrot.lane.b32.xlu0 %v7830_v50, %s7544_s11  ;;  %v7836_v52 = vld [vmem:[#allocation2 + $0x80] sm:$0xff]  ;;  %v7838_v53 = vld [vmem:[#allocation2 + $0x88] sm:$0x3]  ;;  %v638_v26 = vrot.slane %v7890_v21, 1  ;;  %v472_v4 = vld [vmem:[%s7699_s15 + $0xd8] sm:$0xff] }
  0x53   : > { %494 = vst.msk [vmem:[#allocation2 + $0xd9] sm:$0xff] %vm333_vm0, %v461_v44  ;;  %v7842_v54 = vsel %vm612_vm1, %v633_v46, %v634_v51  ;;  %v639_v58 = vrot.slane %v7836_v52, 1  ;;  %v641_v59 = vrot.slane %v7838_v53, 1  ;;  %v7860_v62 = vsel %vm612_vm1, %v634_v51, %v636_v55  ;;  %v7864_v63 = vld [vmem:[#allocation2 + $0x90] sm:$0xff] }
  0x54   : > { %495 = vst.msk [vmem:[#allocation2 + $0xe1] sm:$0xff] %vm333_vm0, %v462_v48  ;;  %709 = vrot.lane.b32.xlu2 %v7842_v54, %s7544_s11  ;;  %v7866_v3 = vld [vmem:[#allocation2 + $0x98] sm:$0xff]  ;;  %v643_v10 = vrot.slane %v7864_v63, 1  ;;  %v7925_v42 = vld [vmem:[#allocation2 + $0xa0] sm:$0x3]  ;;  %v791_v50 = vrot.slane %v7633_v2, 2 }
  0x55   : > { %496 = vst.msk [vmem:[#allocation2 + $0xf1] sm:$0xff] %vm333_vm0, %v463_v56  ;;  %v7870_v5 = vsel %vm612_vm1, %v639_v58, %v641_v59  ;;  %v7874_v6 = vld [vmem:[#allocation2 + $0xa8] sm:$0xff]  ;;  %v644_v11 = vrot.slane %v7866_v3, 1  ;;  %v7920_v36 = vsel %vm612_vm1, %v638_v26, %v639_v58  ;;  %v646_v49 = vrot.slane %v7925_v42, 1 }
  0x56   : > { %497 = vst.msk [vmem:[#allocation2 + $0xf9] sm:$0xff] %vm333_vm0, %v464_v60  ;;  %v7876_v7 = vld [vmem:[#allocation2 + $0xb0] sm:$0xff]  ;;  %v648_v18 = vrot.slane %v7874_v6, 1  ;;  %v7901_v25 = vld [vmem:[#allocation2 + $0xb8] sm:$0x3] }
  0x57   : > { %12985 = vst [vmem:[#allocation5_spill] sm:$0xff] %v7860_v62  ;;  %v649_v19 = vrot.slane %v7876_v7, 1  ;;  %v7896_v24 = vsel %vm612_vm1, %v643_v10, %v644_v11  ;;  %v651_v32 = vrot.slane %v7901_v25, 1  ;;  %v471_v60 = vld [vmem:[%s7699_s15 + $0xd0] sm:$0xff]  ;;  %v7954_v10 = vsel %vm612_vm1, %v644_v11, %v646_v49 }
  0x58   : > { %699 = vrot.lane.b32.xlu1 %v7850_v57, %s7544_s11  ;;  %12986 = vst [vmem:[#allocation6_spill] sm:$0xff] %v7870_v5  ;;  %v7910_v28 = vld [vmem:[#allocation2 + $0xc8] sm:$0xff]  ;;  %v7912_v30 = vld [vmem:[#allocation2 + $0xd0] sm:$0x3] }
  0x59   : > { %498 = vst.msk [vmem:[#allocation2 + $0x109] sm:$0xff] %vm333_vm0, %v465_v13  ;;  %v7906_v27 = vsel %vm612_vm1, %v648_v18, %v649_v19  ;;  %v654_v39 = vrot.slane %v7910_v28, 1  ;;  %v656_v40 = vrot.slane %v7912_v30, 1  ;;  %v7929_v44 = vsel %vm612_vm1, %v649_v19, %v651_v32  ;;  %v7959_v18 = vld [vmem:[#allocation2 + $0xc0] sm:$0xff] }
  0x5a   : > { %711 = vrot.lane.b32.xlu0 %v7860_v62, %s7544_s11  ;;  %499 = vst.msk [vmem:[#allocation2 + $0x111] sm:$0xff] %vm333_vm0, %v466_v16  ;;  %v7933_v46 = vld [vmem:[#allocation2 + $0xd8] sm:$0xff]  ;;  %v473_v19 = vld [vmem:[%s7699_s15 + $0xe0] sm:$0xff]  ;;  %v653_v26 = vrot.slane %v7959_v18, 1 }
  0x5b   : > { %12987 = vst [vmem:[#allocation7_spill] sm:$0xff] %v7896_v24  ;;  %v7935_v48 = vld [vmem:[#allocation2 + $0xe0] sm:$0xff]  ;;  %v7939_v51 = vsel %vm612_vm1, %v654_v39, %v656_v40  ;;  %v658_v58 = vrot.slane %v7933_v46, 1 }
  0x5c   : > { %715 = vrot.lane.b32.xlu2 %v7870_v5, %s7544_s11  ;;  %500 = vst.msk [vmem:[#allocation2 + $0x121] sm:$0xff] %vm333_vm0, %v467_v22  ;;  %v7943_v55 = vld [vmem:[#allocation2 + $0xf0] sm:$0xff]  ;;  %v659_v59 = vrot.slane %v7935_v48, 1  ;;  %v474_v22 = vld [vmem:[%s7699_s15 + $0xe8] sm:$0xff]  ;;  %v7987_v49 = vsel %vm612_vm1, %v653_v26, %v654_v39 }
  0x5d   : > { %501 = vst.msk [vmem:[#allocation2 + $0x129] sm:$0xff] %vm333_vm0, %v468_v23  ;;  %v7945_v56 = vld [vmem:[#allocation2 + $0xf8] sm:$0xff]  ;;  %v663_v13 = vrot.slane %v7943_v55, 1  ;;  %v7970_v11 = vld [vmem:[#allocation2 + $0x100] sm:$0x3] }
  0x5e   : > { %12988 = vst [vmem:[#allocation8_spill] sm:$0xff] %v7906_v27  ;;  %v664_v16 = vrot.slane %v7945_v56, 1  ;;  %v7965_v23 = vsel %vm612_vm1, %v658_v58, %v659_v59  ;;  %v666_v40 = vrot.slane %v7970_v11, 1 }
  0x5f   : > { %12989 = vst [vmem:[#allocation9_spill] sm:$0xff] %v7920_v36 }
  0x60   : > { %707 = vrot.lane.b32.xlu1 %v7885_v17, %s7544_s11  ;;  %502 = vst.msk [vmem:[#allocation2 + $0x139] sm:$0xff] %vm333_vm0, %v469_v33  ;;  %v7975_v32 = vsel %vm612_vm1, %v663_v13, %v664_v16  ;;  %v7994_v13 = vsel %vm612_vm1, %v664_v16, %v666_v40 }
  0x61   : > { %503 = vst.msk [vmem:[#allocation2 + $0x141] sm:$0xff] %vm333_vm0, %v470_v34  ;;  %v7979_v33 = vld [vmem:[#allocation2 + $0x110] sm:$0xff]  ;;  %v7981_v34 = vld [vmem:[#allocation2 + $0x118] sm:$0x3] }
  0x62   : > { %717 = vrot.lane.b32.xlu0 %v7896_v24, %s7544_s11  ;;  %12990 = vst [vmem:[#allocation10_spill] sm:$0xff] %v7929_v44  ;;  %v669_v58 = vrot.slane %v7979_v33, 1 }
  0x63   : > { %12991 = vst [vmem:[#allocation11_spill] sm:$0xff] %v7939_v51 }
  0x64   : > { %721 = vrot.lane.b32.xlu2 %v7906_v27, %s7544_s11  ;;  %12992 = vst [vmem:[#allocation12_spill] sm:$0xff] %v7954_v10  ;;  %v8048_v62 = vld [vmem:[#allocation2 + $0x130] sm:$0x3] }
  0x65   : > { %504 = vst.msk [vmem:[#allocation2 + $0x151] sm:$0xff] %vm333_vm0, %v471_v60  ;;  %v671_v60 = vrot.slane %v7981_v34, 1 }
  0x66   : > { %505 = vst.msk [vmem:[#allocation2 + $0x159] sm:$0xff] %vm333_vm0, %v472_v4  ;;  %v7991_v4 = vld [vmem:[#allocation2 + $0xe8] sm:$0x3] }
  0x67   : > { %12993 = vst [vmem:[#allocation13_spill] sm:$0xff] %v7965_v23  ;;  %v661_v0 = vrot.slane %v7991_v4, 1  ;;  %v8004_v39 = vsel %vm612_vm1, %v669_v58, %v671_v60  ;;  %v8008_v26 = vld [vmem:[#allocation2 + $0x138] sm:$0xff] }
  0x68   : > { %713 = vrot.lane.b32.xlu1 %v7920_v36, %s7544_s11  ;;  %506 = vst.msk [vmem:[#allocation2 + $0x169] sm:$0xff] %vm333_vm0, %v473_v19  ;;  %v7998_v19 = vld [vmem:[#allocation2 + $0x120] sm:$0xff]  ;;  %v678_v60 = vrot.slane %v8008_v26, 1  ;;  %v8028_v24 = vld [vmem:[#allocation2 + $0x148] sm:$0x3] }
  0x69   : > { %507 = vst.msk [vmem:[#allocation2 + $0x171] sm:$0xff] %vm333_vm0, %v474_v22  ;;  %v8000_v22 = vld [vmem:[#allocation2 + $0x128] sm:$0xff]  ;;  %v673_v16 = vrot.slane %v7998_v19, 1 }
  0x6a   : > { %723 = vrot.lane.b32.xlu0 %v7929_v44, %s7544_s11  ;;  %12994 = vst [vmem:[#allocation14_spill] sm:$0xff] %v7975_v32  ;;  %v674_v40 = vrot.slane %v8000_v22, 1 }
  0x6b   : > { %12995 = vst [vmem:[#allocation15_spill] sm:$0xff] %v7987_v49 }
  0x6c   : > { %727 = vrot.lane.b32.xlu2 %v7939_v51, %s7544_s11  ;;  %12996 = vst [vmem:[#allocation16_spill] sm:$0xff] %v7994_v13  ;;  %v8021_v51 = vld [vmem:[#allocation2 + $0x108] sm:$0xff]  ;;  %v8074_v36 = vld [vmem:[#allocation2 + $0x150] sm:$0xff] }
  0x6d   : > { %12997 = vst [vmem:[#allocation17_spill] sm:$0xff] %v8004_v39 }
  0x70   : > { %719 = vrot.lane.b32.xlu1 %v7954_v10, %s7544_s11  ;;  %v8055_v10 = vld [vmem:[#allocation2 + $0x168] sm:$0xff]  ;;  %v8057_v5 = vld [vmem:[#allocation2 + $0x170] sm:$0xff] }
  0x72   : > { %729 = vrot.lane.b32.xlu0 %v7965_v23, %s7544_s11  ;;  %v8010_v23 = vld [vmem:[#allocation2 + $0x140] sm:$0xff] }
  0x73   : > { %v679_v44 = vrot.slane %v8010_v23, 1 }
  0x74   : > { %733 = vrot.lane.b32.xlu2 %v7975_v32, %s7544_s11  ;;  %v8017_v32 = vsel %vm612_vm1, %v659_v59, %v661_v0  ;;  %v8036_v0 = vld [vmem:[#allocation2 + $0x158] sm:$0xff]  ;;  %v8038_v59 = vld [vmem:[#allocation2 + $0x160] sm:$0x3] }
  0x75   : > { %12998 = vst [vmem:[#allocation18_spill] sm:$0xff] %v8017_v32  ;;  %v684_v27 = vrot.slane %v8036_v0, 1 }
  0x78   : > { %725 = vrot.lane.b32.xlu1 %v7987_v49, %s7544_s11  ;;  %v668_v49 = vrot.slane %v8021_v51, 1 }
  0x7a   : > { %735 = vrot.lane.b32.xlu0 %v7994_v13, %s7544_s11  ;;  %v8024_v13 = vsel %vm612_vm1, %v673_v16, %v674_v40  ;;  %v681_v16 = vrot.slane %v8028_v24, 1 }
  0x7b   : > { %12999 = vst [vmem:[#allocation19_spill] sm:$0xff] %v8024_v13 }
  0x7c   : > { %739 = vrot.lane.b32.xlu2 %v8004_v39, %s7544_s11  ;;  %v8032_v39 = vsel %vm612_vm1, %v678_v60, %v679_v44  ;;  %v686_v60 = vrot.slane %v8038_v59, 1 }
  0x7d   : > { %13000 = vst [vmem:[#allocation20_spill] sm:$0xff] %v8032_v39 }
  0x80   : > { %731 = vrot.lane.b32.xlu1 %v8017_v32, %s7544_s11  ;;  %v8044_v32 = vsel %vm612_vm1, %v668_v49, %v669_v58  ;;  %v8061_v49 = vsel %vm612_vm1, %v684_v27, %v686_v60  ;;  %v688_v58 = vrot.slane %v8055_v10, 1 }
  0x81   : > { %13001 = vst [vmem:[#allocation21_spill] sm:$0xff] %v8044_v32 }
  0x82   : > { %741 = vrot.lane.b32.xlu0 %v8024_v13, %s7544_s11  ;;  %v8051_v13 = vsel %vm612_vm1, %v679_v44, %v681_v16  ;;  %13003 = vst [vmem:[#allocation23_spill] sm:$0xff] %v8061_v49  ;;  %v689_v44 = vrot.slane %v8057_v5, 1 }
  0x83   : > { %13002 = vst [vmem:[#allocation22_spill] sm:$0xff] %v8051_v13 }
  0x84   : > { %745 = vrot.lane.b32.xlu2 %v8032_v39, %s7544_s11  ;;  %v676_v39 = vrot.slane %v8048_v62, 1  ;;  %v8077_v60 = vsel %vm612_vm1, %v688_v58, %v689_v44  ;;  %v8092_v58 = vld [vmem:[#allocation2 + $0x178] sm:$0x3] }
  0x85   : > { %13005 = vst [vmem:[#allocation25_spill] sm:$0xff] %v8077_v60 }
  0x86   : > { %v8070_v16 = vsel %vm612_vm1, %v674_v40, %v676_v39  ;;  %v796_v39 = vrot.slane %v7794_v31, 2  ;;  %v798_v40 = vrot.slane %v7804_v37, 2  ;;  %v801_v37 = vrot.slane %v7729_v9, 2 }
  0x87   : > { %13004 = vst [vmem:[#allocation24_spill] sm:$0xff] %v8070_v16 }
  0x88   : > { %737 = vrot.lane.b32.xlu1 %v8044_v32, %s7544_s11  ;;  %v790_v32 = vrot.slane %v7629_v1, 2  ;;  %v793_v1 = vrot.slane %v7737_v12, 2  ;;  %v8099_v12 = vsel %vm789_vm3, %v796_v39, %v798_v40 }
  0x89   : > { %13006 = vst [vmem:[#allocation26_spill] sm:$0xff] %v8099_v12 }
  0x8a   : > { %747 = vrot.lane.b32.xlu0 %v8051_v13, %s7544_s11  ;;  %v683_v13 = vrot.slane %v8074_v36, 1 }
  0x8c   : > { %751 = vrot.lane.b32.xlu2 %v8061_v49, %s7544_s11  ;;  %v792_v49 = vsel %vm789_vm3, %v790_v32, %v791_v50  ;;  %v8088_v2 = vsel %vm612_vm1, %v683_v13, %v684_v27  ;;  %v691_v32 = vrot.slane %v8092_v58, 1  ;;  %v800_v13 = vrot.slane %v7725_v8, 2 }
  0x8e   : > { %v8114_v40 = vsel %vm789_vm3, %v800_v13, %v801_v37 }
  0x8f   : > { %13009 = vst [vmem:[#allocation29_spill] sm:$0xff] %v8114_v40 }
  0x90   : > { %743 = vrot.lane.b32.xlu1 %v8070_v16, %s7544_s11  ;;  %v794_v16 = vsel %vm789_vm3, %v791_v50, %v793_v1  ;;  %v8109_v50 = vsel %vm612_vm1, %v689_v44, %v691_v32  ;;  %v806_v1 = vrot.slane %v7806_v38, 2  ;;  %v808_v44 = vrot.slane %v7856_v61, 2 }
  0x91   : > { %13008 = vst [vmem:[#allocation28_spill] sm:$0xff] %v8109_v50  ;;  %v803_v61 = vrot.slane %v7742_v14, 2  ;;  %v821_v14 = vrot.slane %v7866_v3, 2 }
  0x92   : > { %753 = vrot.lane.b32.xlu0 %v8077_v60, %s7544_s11  ;;  %v813_v60 = vrot.slane %v7824_v47, 2 }
  0x93   : > { %v8150_v47 = vsel %vm789_vm3, %v801_v37, %v803_v61  ;;  %v823_v37 = vrot.slane %v7925_v42, 2  ;;  %v818_v42 = vrot.slane %v7838_v53, 2  ;;  %v835_v53 = vrot.slane %v7933_v46, 2 }
  0x94   : > { %870 = vrot.lane.b32.xlu2 %v792_v49, %s7545_s16  ;;  %v805_v49 = vrot.slane %v7800_v35, 2 }
  0x97   : > { %v8102_v27 = vpop.permute.xlu2 %701 }
  0x98   : > { %749 = vrot.lane.b32.xlu1 %v8088_v2, %s7544_s11  ;;  %13007 = vst [vmem:[#allocation27_spill] sm:$0xff] %v8102_v27  ;;  %v8120_v27 = vsel %vm789_vm3, %v805_v49, %v806_v1  ;;  %v8135_v49 = vsel %vm789_vm3, %v806_v1, %v808_v44  ;;  %v820_v1 = vrot.slane %v7864_v63, 2 }
  0x99   : > { %13010 = vst [vmem:[#allocation30_spill] sm:$0xff] %v8120_v27 }
  0x9a   : > { %872 = vrot.lane.b32.xlu0 %v794_v16, %s7545_s16  ;;  %v795_v16 = vrot.slane %v7790_v29, 2  ;;  %13012 = vst [vmem:[#allocation32_spill] sm:$0xff] %v8135_v49 }
  0x9c   : > { %876 = vrot.lane.b32.xlu2 %v8099_v12, %s7545_s16  ;;  %v8130_v13 = vsel %vm789_vm3, %v795_v16, %v796_v39  ;;  %v811_v12 = vrot.slane %v7821_v45, 2  ;;  %v815_v39 = vrot.slane %v7890_v21, 2  ;;  %v816_v16 = vrot.slane %v7836_v52, 2 }
  0x9f   : > { %v8127_v32 = vpop.permute.xlu2 %703 }
  0xa0   : > { %755 = vrot.lane.b32.xlu1 %v8109_v50, %s7544_s11  ;;  %13011 = vst [vmem:[#allocation31_spill] sm:$0xff] %v8127_v32  ;;  %v8161_v32 = vpop.permute.xlu0 %693 }
  0xa1   : > { %13016 = vst [vmem:[#allocation36_spill] sm:$0xff] %v8161_v32 }
  0xa2   : > { %878 = vrot.lane.b32.xlu0 %v8114_v40, %s7545_s16  ;;  %v8141_v40 = vsel %vm789_vm3, %v811_v12, %v813_v60  ;;  %v8157_v60 = vsel %vm789_vm3, %v815_v39, %v816_v16  ;;  %v826_v39 = vrot.slane %v7876_v7, 2 }
  0xa3   : > { %13013 = vst [vmem:[#allocation33_spill] sm:$0xff] %v8141_v40 }
  0xa4   : > { %882 = vrot.lane.b32.xlu2 %v8120_v27, %s7545_s16  ;;  %13015 = vst [vmem:[#allocation35_spill] sm:$0xff] %v8157_v60 }
  0xa8   : > { %874 = vrot.lane.b32.xlu1 %v8130_v13, %s7545_s16 }
  0xaa   : > { %884 = vrot.lane.b32.xlu0 %v8135_v49, %s7545_s16  ;;  %v810_v49 = vrot.slane %v7815_v43, 2 }
  0xac   : > { %888 = vrot.lane.b32.xlu2 %v8141_v40, %s7545_s16  ;;  %v8165_v40 = vsel %vm789_vm3, %v820_v1, %v821_v14  ;;  %v8173_v61 = vsel %vm789_vm3, %v810_v49, %v811_v12  ;;  %v8180_v1 = vsel %vm789_vm3, %v821_v14, %v823_v37  ;;  %v831_v49 = vrot.slane %v7910_v28, 2 }
  0xad   : > { %13017 = vst [vmem:[#allocation37_spill] sm:$0xff] %v8165_v40  ;;  %v8197_v14 = vsel %vm789_vm3, %v816_v16, %v818_v42  ;;  %v838_v16 = vrot.slane %v7991_v4, 2  ;;  %v833_v4 = vrot.slane %v7912_v30, 2  ;;  %v850_v30 = vrot.slane %v7998_v19, 2 }
  0xae   : > { %v8154_v44 = vpop.permute.xlu2 %709  ;;  %13018 = vst [vmem:[#allocation38_spill] sm:$0xff] %v8173_v61 }
  0xaf   : > { %13014 = vst [vmem:[#allocation34_spill] sm:$0xff] %v8154_v44  ;;  %v828_v44 = vrot.slane %v7901_v25, 2  ;;  %v830_v25 = vrot.slane %v7959_v18, 2 }
  0xb0   : > { %880 = vrot.lane.b32.xlu1 %v8150_v47, %s7545_s16  ;;  %13020 = vst [vmem:[#allocation40_spill] sm:$0xff] %v8180_v1  ;;  %v8190_v12 = vpop.permute.xlu0 %695 }
  0xb1   : > { %13022 = vst [vmem:[#allocation42_spill] sm:$0xff] %v8190_v12  ;;  %v825_v12 = vrot.slane %v7874_v6, 2 }
  0xb2   : > { %890 = vrot.lane.b32.xlu0 %v8157_v60, %s7545_s16  ;;  %v8186_v60 = vsel %vm789_vm3, %v826_v39, %v828_v44  ;;  %13023 = vst [vmem:[#allocation43_spill] sm:$0xff] %v8197_v14  ;;  %v836_v44 = vrot.slane %v7935_v48, 2 }
  0xb3   : > { %13021 = vst [vmem:[#allocation41_spill] sm:$0xff] %v8186_v60 }
  0xb4   : > { %894 = vrot.lane.b32.xlu2 %v8165_v40, %s7545_s16 }
  0xb6   : > { %v8177_v32 = vpop.permute.xlu2 %715 }
  0xb7   : > { %13019 = vst [vmem:[#allocation39_spill] sm:$0xff] %v8177_v32  ;;  %v8204_v32 = vsel %vm789_vm3, %v830_v25, %v831_v49  ;;  %v8222_v25 = vsel %vm789_vm3, %v825_v12, %v826_v39  ;;  %v846_v39 = vrot.slane %v7979_v33, 2 }
  0xb8   : > { %886 = vrot.lane.b32.xlu1 %v8173_v61, %s7545_s16  ;;  %13025 = vst [vmem:[#allocation45_spill] sm:$0xff] %v8204_v32 }
  0xba   : > { %896 = vrot.lane.b32.xlu0 %v8180_v1, %s7545_s16  ;;  %v8210_v1 = vsel %vm789_vm3, %v835_v53, %v836_v44  ;;  %v843_v53 = vrot.slane %v7970_v11, 2  ;;  %v845_v11 = vrot.slane %v8021_v51, 2 }
  0xbb   : > { %13026 = vst [vmem:[#allocation46_spill] sm:$0xff] %v8210_v1 }
  0xbc   : > { %900 = vrot.lane.b32.xlu2 %v8186_v60, %s7545_s16 }
  0xbe   : > { %v8201_v37 = vpop.permute.xlu2 %721 }
  0xbf   : > { %13024 = vst [vmem:[#allocation44_spill] sm:$0xff] %v8201_v37  ;;  %v841_v37 = vrot.slane %v7945_v56, 2 }
  0xc0   : > { %892 = vrot.lane.b32.xlu1 %v8197_v14, %s7545_s16 }
  0xc2   : > { %v8212_v60 = vpop.permute.xlu1 %697  ;;  %902 = vrot.lane.b32.xlu0 %v8204_v32, %s7545_s16 }
  0xc3   : > { %13027 = vst [vmem:[#allocation47_spill] sm:$0xff] %v8212_v60  ;;  %v8229_v60 = vsel %vm789_vm3, %v836_v44, %v838_v16  ;;  %v8248_v44 = vsel %vm789_vm3, %v831_v49, %v833_v4  ;;  %v851_v16 = vrot.slane %v8000_v22, 2  ;;  %v853_v49 = vrot.slane %v8048_v62, 2 }
  0xc4   : > { %v8217_v42 = vpop.permute.xlu0 %705  ;;  %906 = vrot.lane.b32.xlu2 %v8210_v1, %s7545_s16  ;;  %13030 = vst [vmem:[#allocation50_spill] sm:$0xff] %v8229_v60  ;;  %v848_v62 = vrot.slane %v7981_v34, 2  ;;  %v865_v34 = vrot.slane %v8055_v10, 2 }
  0xc5   : > { %13028 = vst [vmem:[#allocation48_spill] sm:$0xff] %v8217_v42  ;;  %v8235_v42 = vsel %vm789_vm3, %v841_v37, %v843_v53 }
  0xc6   : > { %v8226_v40 = vpop.permute.xlu2 %727  ;;  %13031 = vst [vmem:[#allocation51_spill] sm:$0xff] %v8235_v42 }
  0xc7   : > { %13029 = vst [vmem:[#allocation49_spill] sm:$0xff] %v8226_v40  ;;  %v8255_v40 = vsel %vm789_vm3, %v845_v11, %v846_v39 }
  0xc8   : > { %898 = vrot.lane.b32.xlu1 %v8222_v25, %s7545_s16  ;;  %13034 = vst [vmem:[#allocation54_spill] sm:$0xff] %v8248_v44 }
  0xc9   : > { %13036 = vst [vmem:[#allocation56_spill] sm:$0xff] %v8255_v40 }
  0xca   : > { %v8237_v32 = vpop.permute.xlu1 %699  ;;  %908 = vrot.lane.b32.xlu0 %v8229_v60, %s7545_s16 }
  0xcb   : > { %13032 = vst [vmem:[#allocation52_spill] sm:$0xff] %v8237_v32  ;;  %v8261_v32 = vsel %vm789_vm3, %v850_v30, %v851_v16  ;;  %v858_v30 = vrot.slane %v8028_v24, 2  ;;  %v860_v24 = vrot.slane %v8074_v36, 2 }
  0xcc   : > { %v8243_v12 = vpop.permute.xlu0 %711  ;;  %912 = vrot.lane.b32.xlu2 %v8235_v42, %s7545_s16  ;;  %13037 = vst [vmem:[#allocation57_spill] sm:$0xff] %v8261_v32 }
  0xcd   : > { %13033 = vst [vmem:[#allocation53_spill] sm:$0xff] %v8243_v12  ;;  %v840_v12 = vrot.slane %v7943_v55, 2 }
  0xce   : > { %v8252_v53 = vpop.permute.xlu2 %733 }
  0xcf   : > { %13035 = vst [vmem:[#allocation55_spill] sm:$0xff] %v8252_v53  ;;  %v8273_v11 = vsel %vm789_vm3, %v840_v12, %v841_v37  ;;  %v856_v53 = vrot.slane %v8010_v23, 2  ;;  %v861_v37 = vrot.slane %v8036_v0, 2 }
  0xd0   : > { %904 = vrot.lane.b32.xlu1 %v8248_v44, %s7545_s16 }
  0xd2   : > { %v8263_v60 = vpop.permute.xlu1 %707  ;;  %914 = vrot.lane.b32.xlu0 %v8255_v40, %s7545_s16 }
  0xd3   : > { %13038 = vst [vmem:[#allocation58_spill] sm:$0xff] %v8263_v60  ;;  %v8280_v60 = vsel %vm789_vm3, %v851_v16, %v853_v49  ;;  %v8299_v16 = vsel %vm789_vm3, %v846_v39, %v848_v62  ;;  %v866_v49 = vrot.slane %v8057_v5, 2  ;;  %v868_v39 = vrot.slane %v8092_v58, 2 }
  0xd4   : > { %v8268_v4 = vpop.permute.xlu0 %717  ;;  %918 = vrot.lane.b32.xlu2 %v8261_v32, %s7545_s16  ;;  %13041 = vst [vmem:[#allocation61_spill] sm:$0xff] %v8280_v60 }
  0xd5   : > { %13039 = vst [vmem:[#allocation59_spill] sm:$0xff] %v8268_v4  ;;  %v8286_v4 = vsel %vm789_vm3, %v856_v53, %v858_v30 }
  0xd6   : > { %v8277_v42 = vpop.permute.xlu2 %739  ;;  %13042 = vst [vmem:[#allocation62_spill] sm:$0xff] %v8286_v4 }
  0xd7   : > { %13040 = vst [vmem:[#allocation60_spill] sm:$0xff] %v8277_v42  ;;  %v8306_v42 = vsel %vm789_vm3, %v860_v24, %v861_v37 }
  0xd8   : > { %910 = vrot.lane.b32.xlu1 %v8273_v11, %s7545_s16  ;;  %13046 = vst [vmem:[#allocation66_spill] sm:$0xff] %v8306_v42 }
  0xda   : > { %v8288_v40 = vpop.permute.xlu1 %713  ;;  %920 = vrot.lane.b32.xlu0 %v8280_v60, %s7545_s16 }
  0xdb   : > { %13043 = vst [vmem:[#allocation63_spill] sm:$0xff] %v8288_v40  ;;  %v8312_v40 = vsel %vm789_vm3, %v865_v34, %v866_v49  ;;  %v8329_v34 = vsel %vm789_vm3, %v866_v49, %v868_v39 }
  0xdc   : > { %v8294_v12 = vpop.permute.xlu0 %723  ;;  %924 = vrot.lane.b32.xlu2 %v8286_v4, %s7545_s16 }
  0xdd   : > { %13044 = vst [vmem:[#allocation64_spill] sm:$0xff] %v8294_v12  ;;  %v855_v12 = vrot.slane %v8008_v26, 2 }
  0xde   : > { %v8303_v30 = vpop.permute.xlu2 %745 }
  0xdf   : > { %13045 = vst [vmem:[#allocation65_spill] sm:$0xff] %v8303_v30  ;;  %v8324_v24 = vsel %vm789_vm3, %v855_v12, %v856_v53 }
  0xe0   : > { %916 = vrot.lane.b32.xlu1 %v8299_v16, %s7545_s16  ;;  %13049 = vst [vmem:[#allocation69_spill] sm:$0xff] %v8324_v24 }
  0xe2   : > { %v8314_v60 = vpop.permute.xlu1 %719  ;;  %926 = vrot.lane.b32.xlu0 %v8306_v42, %s7545_s16 }
  0xe3   : > { %13047 = vst [vmem:[#allocation67_spill] sm:$0xff] %v8314_v60  ;;  %v863_v60 = vrot.slane %v8038_v59, 2 }
  0xe4   : > { %v8319_v62 = vpop.permute.xlu0 %729  ;;  %930 = vrot.lane.b32.xlu2 %v8312_v40, %s7545_s16 }
  0xe5   : > { %13048 = vst [vmem:[#allocation68_spill] sm:$0xff] %v8319_v62  ;;  %v8343_v53 = vsel %vm789_vm3, %v861_v37, %v863_v60 }
  0xe6   : > { %v8326_v30 = vpop.permute.xlu2 %751  ;;  %13053 = vst [vmem:[#allocation73_spill] sm:$0xff] %v8343_v53 }
  0xe7   : > { %13050 = vst [vmem:[#allocation70_spill] sm:$0xff] %v8326_v30  ;;  %v13095_v30 = vld [vmem:[#allocation4_spill] sm:$0xff] }
  0xe8   : > { %922 = vrot.lane.b32.xlu1 %v8324_v24, %s7545_s16 }
  0xea   : > { %v8334_v42 = vpop.permute.xlu1 %725  ;;  %932 = vrot.lane.b32.xlu0 %v8329_v34, %s7545_s16 }
  0xeb   : > { %13051 = vst [vmem:[#allocation71_spill] sm:$0xff] %v8334_v42 }
  0xec   : > { %v8338_v58 = vpop.permute.xlu0 %735  ;;  %970 = vrot.lane.b32.xlu2 %v7794_v31, %s7546_s17 }
  0xed   : > { %13052 = vst [vmem:[#allocation72_spill] sm:$0xff] %v8338_v58 }
  0xee   : > { %v8345_v12 = vpop.permute.xlu2 %870 }
  0xef   : > { %13054 = vst [vmem:[#allocation74_spill] sm:$0xff] %v8345_v12 }
  0xf0   : > { %928 = vrot.lane.b32.xlu1 %v8343_v53, %s7545_s16 }
  0xf2   : > { %v8349_v59 = vpop.permute.xlu1 %731  ;;  %972 = vrot.lane.b32.xlu0 %v7725_v8, %s7546_s17 }
  0xf3   : > { %13055 = vst [vmem:[#allocation75_spill] sm:$0xff] %v8349_v59 }
  0xf4   : > { %v8353_v49 = vpop.permute.xlu0 %741  ;;  %976 = vrot.lane.b32.xlu2 %v7800_v35, %s7546_s17 }
  0xf5   : > { %13056 = vst [vmem:[#allocation76_spill] sm:$0xff] %v8353_v49  ;;  %v475_v49 = vld [vmem:[%s7699_s15 + $0xf0] sm:$0xff] }
  0xf6   : > { %v8357_v39 = vpop.permute.xlu2 %876  ;;  %508 = vst.msk [vmem:[#allocation2 + $0x181] sm:$0xff] %vm333_vm0, %v475_v49 }
  0xf7   : > { %13057 = vst [vmem:[#allocation77_spill] sm:$0xff] %v8357_v39 }
  0xf8   : > { %968 = vrot.lane.b32.xlu1 %v7790_v29, %s7546_s17 }
  0xfa   : > { %v8361_v31 = vpop.permute.xlu1 %737  ;;  %978 = vrot.lane.b32.xlu0 %v7806_v38, %s7546_s17 }
  0xfb   : > { %13058 = vst [vmem:[#allocation78_spill] sm:$0xff] %v8361_v31  ;;  %v476_v31 = vld [vmem:[%s7699_s15 + $0xf8] sm:$0xff]  ;;  %s12655_s15 = scalar_lea.vmem %s12808_s9, %s6020_s12 }
  0xfc   : > { %v8365_v60 = vpop.permute.xlu0 %747  ;;  %982 = vrot.lane.b32.xlu2 %v7821_v45, %s7546_s17  ;;  %509 = vst.msk [vmem:[#allocation2 + $0x189] sm:$0xff] %vm333_vm0, %v476_v31 }
  0xfd   : > { %13059 = vst [vmem:[#allocation79_spill] sm:$0xff] %v8365_v60  ;;  %v13103_v60 = vld [vmem:[#allocation8_spill] sm:$0xff] }
  0xfe   : > { %v8369_v8 = vpop.permute.xlu2 %882 }
  0xff   : > { %13060 = vst [vmem:[#allocation80_spill] sm:$0xff] %v8369_v8 }
 0x100   : > { %974 = vrot.lane.b32.xlu1 %v7729_v9, %s7546_s17 }
 0x102   : > { %v8373_v35 = vpop.permute.xlu1 %743  ;;  %984 = vrot.lane.b32.xlu0 %v7890_v21, %s7546_s17 }
 0x103   : > { %13061 = vst [vmem:[#allocation81_spill] sm:$0xff] %v8373_v35  ;;  %v8461_v62 = vld [vmem:[#allocation2 + $0x188] sm:$0xff] }
 0x104   : > { %v8377_v29 = vpop.permute.xlu0 %753  ;;  %988 = vrot.lane.b32.xlu2 %v7864_v63, %s7546_s17 }
 0x105   : > { %13062 = vst [vmem:[#allocation82_spill] sm:$0xff] %v8377_v29 }
 0x106   : > { %v8381_v38 = vpop.permute.xlu2 %888 }
 0x107   : > { %13063 = vst [vmem:[#allocation83_spill] sm:$0xff] %v8381_v38 }
 0x108   : > { %980 = vrot.lane.b32.xlu1 %v7815_v43, %s7546_s17 }
 0x10a   : > { %v8385_v45 = vpop.permute.xlu1 %749  ;;  %990 = vrot.lane.b32.xlu0 %v7866_v3, %s7546_s17 }
 0x10b   : > { %13064 = vst [vmem:[#allocation84_spill] sm:$0xff] %v8385_v45  ;;  %v13097_v45 = vld [vmem:[#allocation6_spill] sm:$0xff] }
 0x10c   : > { %v8389_v9 = vpop.permute.xlu0 %872  ;;  %994 = vrot.lane.b32.xlu2 %v7876_v7, %s7546_s17 }
 0x10d   : > { %13065 = vst [vmem:[#allocation85_spill] sm:$0xff] %v8389_v9 }
 0x10e   : > { %v8393_v21 = vpop.permute.xlu2 %894 }
 0x10f   : > { %13066 = vst [vmem:[#allocation86_spill] sm:$0xff] %v8393_v21 }
 0x110   : > { %986 = vrot.lane.b32.xlu1 %v7836_v52, %s7546_s17 }
 0x112   : > { %v8397_v63 = vpop.permute.xlu1 %755  ;;  %996 = vrot.lane.b32.xlu0 %v7959_v18, %s7546_s17 }
 0x113   : > { %13067 = vst [vmem:[#allocation87_spill] sm:$0xff] %v8397_v63 }
 0x114   : > { %v8401_v43 = vpop.permute.xlu0 %878  ;;  %1000 = vrot.lane.b32.xlu2 %v7933_v46, %s7546_s17 }
 0x115   : > { %13068 = vst [vmem:[#allocation88_spill] sm:$0xff] %v8401_v43 }
 0x116   : > { %v8405_v3 = vpop.permute.xlu2 %900 }
 0x117   : > { %13069 = vst [vmem:[#allocation89_spill] sm:$0xff] %v8405_v3 }
 0x118   : > { %992 = vrot.lane.b32.xlu1 %v7874_v6, %s7546_s17 }
 0x11a   : > { %v8409_v7 = vpop.permute.xlu1 %874  ;;  %1002 = vrot.lane.b32.xlu0 %v7935_v48, %s7546_s17 }
 0x11b   : > { %13070 = vst [vmem:[#allocation90_spill] sm:$0xff] %v8409_v7 }
 0x11c   : > { %v8413_v52 = vpop.permute.xlu0 %884  ;;  %1006 = vrot.lane.b32.xlu2 %v7945_v56, %s7546_s17 }
 0x11d   : > { %13071 = vst [vmem:[#allocation91_spill] sm:$0xff] %v8413_v52 }
 0x11e   : > { %v8417_v37 = vpop.permute.xlu2 %906 }
 0x11f   : > { %13072 = vst [vmem:[#allocation92_spill] sm:$0xff] %v8417_v37 }
 0x120   : > { %998 = vrot.lane.b32.xlu1 %v7910_v28, %s7546_s17 }
 0x122   : > { %v8425_v6 = vpop.permute.xlu1 %880  ;;  %1008 = vrot.lane.b32.xlu0 %v8021_v51, %s7546_s17 }
 0x123   : > { %13073 = vst [vmem:[#allocation93_spill] sm:$0xff] %v8425_v6  ;;  %v13117_v6 = vld [vmem:[#allocation21_spill] sm:$0xff] }
 0x124   : > { %v8429_v48 = vpop.permute.xlu0 %890  ;;  %1012 = vrot.lane.b32.xlu2 %v7998_v19, %s7546_s17 }
 0x125   : > { %13074 = vst [vmem:[#allocation94_spill] sm:$0xff] %v8429_v48 }
 0x126   : > { %v8433_v58 = vpop.permute.xlu2 %912 }
 0x127   : > { %13075 = vst [vmem:[#allocation95_spill] sm:$0xff] %v8433_v58 }
 0x128   : > { %1004 = vrot.lane.b32.xlu1 %v7943_v55, %s7546_s17 }
 0x12a   : > { %v8437_v28 = vpop.permute.xlu1 %886  ;;  %1014 = vrot.lane.b32.xlu0 %v8000_v22, %s7546_s17 }
 0x12b   : > { %13076 = vst [vmem:[#allocation96_spill] sm:$0xff] %v8437_v28 }
 0x12c   : > { %v8441_v49 = vpop.permute.xlu0 %896  ;;  %1018 = vrot.lane.b32.xlu2 %v8010_v23, %s7546_s17 }
 0x12d   : > { %13077 = vst [vmem:[#allocation97_spill] sm:$0xff] %v8441_v49 }
 0x12e   : > { %v8445_v31 = vpop.permute.xlu2 %918 }
 0x12f   : > { %13078 = vst [vmem:[#allocation98_spill] sm:$0xff] %v8445_v31 }
 0x130   : > { %1010 = vrot.lane.b32.xlu1 %v7979_v33, %s7546_s17 }
 0x132   : > { %v8449_v59 = vpop.permute.xlu1 %892  ;;  %1020 = vrot.lane.b32.xlu0 %v8074_v36, %s7546_s17 }
 0x133   : > { %13079 = vst [vmem:[#allocation99_spill] sm:$0xff] %v8449_v59 }
 0x134   : > { %v8453_v58 = vpop.permute.xlu0 %902  ;;  %1024 = vrot.lane.b32.xlu2 %v8055_v10, %s7546_s17 }
 0x135   : > { %13080 = vst [vmem:[#allocation100_spill] sm:$0xff] %v8453_v58 }
 0x136   : > { %v8457_v37 = vpop.permute.xlu2 %924 }
 0x137   : > { %13081 = vst [vmem:[#allocation101_spill] sm:$0xff] %v8457_v37 }
 0x138   : > { %1016 = vrot.lane.b32.xlu1 %v8008_v26, %s7546_s17 }
 0x13a   : > { %v8463_v31 = vpop.permute.xlu1 %898  ;;  %1026 = vrot.lane.b32.xlu0 %v8057_v5, %s7546_s17 }
 0x13b   : > { %13082 = vst [vmem:[#allocation102_spill] sm:$0xff] %v8463_v31 }
 0x13c   : > { %v8467_v42 = vpop.permute.xlu0 %908  ;;  %1030 = vrot.lane.b32.xlu2 %v8461_v62, %s7546_s17 }
 0x13d   : > { %13083 = vst [vmem:[#allocation103_spill] sm:$0xff] %v8467_v42  ;;  %v8483_v42 = vld [vmem:[#allocation2 + $0x180] sm:$0xff] }
 0x13e   : > { %v8471_v58 = vpop.permute.xlu2 %930 }
 0x13f   : > { %13084 = vst [vmem:[#allocation104_spill] sm:$0xff] %v8471_v58 }
 0x140   : > { %1022 = vrot.lane.b32.xlu1 %v8036_v0, %s7546_s17 }
 0x142   : > { %v8475_v3 = vpop.permute.xlu1 %904  ;;  %1070 = vrot.lane.b32.xlu0 %v7812_v41, %s7547_s18 }
 0x143   : > { %13085 = vst [vmem:[#allocation105_spill] sm:$0xff] %v8475_v3 }
 0x144   : > { %v8479_v63 = vpop.permute.xlu0 %914  ;;  %1074 = vrot.lane.b32.xlu2 %v7745_v15, %s7547_s18 }
 0x145   : > { %13086 = vst [vmem:[#allocation106_spill] sm:$0xff] %v8479_v63 }
 0x146   : > { %v8485_v31 = vpop.permute.xlu2 %970 }
 0x147   : > { %13087 = vst [vmem:[#allocation107_spill] sm:$0xff] %v8485_v31 }
 0x148   : > { %1028 = vrot.lane.b32.xlu1 %v8483_v42, %s7546_s17 }
 0x14a   : > { %v8489_v58 = vpop.permute.xlu1 %910  ;;  %1076 = vrot.lane.b32.xlu0 %v7769_v20, %s7547_s18 }
 0x14b   : > { %13088 = vst [vmem:[#allocation108_spill] sm:$0xff] %v8489_v58  ;;  %v13093_v58 = vld [vmem:[#allocation9_spill] sm:$0xff] }
 0x14c   : > { %v8493_v3 = vpop.permute.xlu0 %920  ;;  %1080 = vrot.lane.b32.xlu2 %v7885_v17, %s7547_s18 }
 0x14d   : > { %13089 = vst [vmem:[#allocation109_spill] sm:$0xff] %v8493_v3 }
 0x14e   : > { %v8497_v41 = vpop.permute.xlu2 %976 }
 0x14f   : > { %13090 = vst [vmem:[#allocation110_spill] sm:$0xff] %v8497_v41 }
 0x150   : > { %1072 = vrot.lane.b32.xlu1 %v7850_v57, %s7547_s18 }
 0x152   : > { %v8501_v63 = vpop.permute.xlu1 %916  ;;  %1082 = vrot.lane.b32.xlu0 %v7842_v54, %s7547_s18 }
 0x153   : > { %13091 = vst [vmem:[#allocation111_spill] sm:$0xff] %v8501_v63  ;;  %v13099_v63 = vld [vmem:[#allocation12_spill] sm:$0xff] }
 0x154   : > { %v8505_v29 = vpop.permute.xlu0 %926  ;;  %1086 = vrot.lane.b32.xlu2 %v13093_v58, %s7547_s18 }
 0x155   : > { %13092 = vst [vmem:[#allocation112_spill] sm:$0xff] %v8505_v29  ;;  %v13101_v29 = vld [vmem:[#allocation5_spill] sm:$0xff] }
 0x156   : > { %v8509_v49 = vpop.permute.xlu2 %982 }
 0x157   : > { %13094 = vst [vmem:[#allocation9_spill] sm:$0xff] %v8509_v49  ;;  %v13113_v49 = vld [vmem:[#allocation10_spill] sm:$0xff] }
 0x158   : > { %1078 = vrot.lane.b32.xlu1 %v13095_v30, %s7547_s18 }
 0x15a   : > { %v8513_v21 = vpop.permute.xlu1 %922  ;;  %1088 = vrot.lane.b32.xlu0 %v13097_v45, %s7547_s18 }
 0x15b   : > { %13096 = vst [vmem:[#allocation4_spill] sm:$0xff] %v8513_v21  ;;  %v13105_v21 = vld [vmem:[#allocation15_spill] sm:$0xff] }
 0x15c   : > { %v8517_v57 = vpop.permute.xlu0 %932  ;;  %1092 = vrot.lane.b32.xlu2 %v13099_v63, %s7547_s18 }
 0x15d   : > { %13098 = vst [vmem:[#allocation6_spill] sm:$0xff] %v8517_v57  ;;  %v13107_v57 = vld [vmem:[#allocation7_spill] sm:$0xff] }
 0x15e   : > { %v8521_v37 = vpop.permute.xlu2 %988 }
 0x15f   : > { %13100 = vst [vmem:[#allocation12_spill] sm:$0xff] %v8521_v37  ;;  %v13109_v37 = vld [vmem:[#allocation11_spill] sm:$0xff] }
 0x160   : > { %1084 = vrot.lane.b32.xlu1 %v13101_v29, %s7547_s18 }
 0x162   : > { %v8525_v59 = vpop.permute.xlu1 %928  ;;  %1094 = vrot.lane.b32.xlu0 %v13103_v60, %s7547_s18 }
 0x163   : > { %13102 = vst [vmem:[#allocation5_spill] sm:$0xff] %v8525_v59  ;;  %v13111_v59 = vld [vmem:[#allocation18_spill] sm:$0xff] }
 0x164   : > { %v8529_v48 = vpop.permute.xlu0 %972  ;;  %1098 = vrot.lane.b32.xlu2 %v13105_v21, %s7547_s18 }
 0x165   : > { %13104 = vst [vmem:[#allocation8_spill] sm:$0xff] %v8529_v48 }
 0x166   : > { %v8533_v38 = vpop.permute.xlu2 %994 }
 0x167   : > { %13106 = vst [vmem:[#allocation15_spill] sm:$0xff] %v8533_v38  ;;  %v13115_v38 = vld [vmem:[#allocation14_spill] sm:$0xff] }
 0x168   : > { %1090 = vrot.lane.b32.xlu1 %v13107_v57, %s7547_s18 }
 0x16a   : > { %v8537_v3 = vpop.permute.xlu1 %968  ;;  %1100 = vrot.lane.b32.xlu0 %v13109_v37, %s7547_s18 }
 0x16b   : > { %13108 = vst [vmem:[#allocation7_spill] sm:$0xff] %v8537_v3  ;;  %v1066_v3 = vrot.slane %v8461_v62, 1 }
 0x16c   : > { %v8541_v35 = vpop.permute.xlu0 %978  ;;  %1104 = vrot.lane.b32.xlu2 %v13111_v59, %s7547_s18 }
 0x16d   : > { %13110 = vst [vmem:[#allocation11_spill] sm:$0xff] %v8541_v35  ;;  %v13119_v35 = vld [vmem:[#allocation13_spill] sm:$0xff] }
 0x16e   : > { %v8545_v28 = vpop.permute.xlu2 %1000 }
 0x16f   : > { %13112 = vst [vmem:[#allocation18_spill] sm:$0xff] %v8545_v28  ;;  %v13121_v28 = vld [vmem:[#allocation17_spill] sm:$0xff] }
 0x170   : > { %1096 = vrot.lane.b32.xlu1 %v13113_v49, %s7547_s18 }
 0x172   : > { %v8549_v52 = vpop.permute.xlu1 %974  ;;  %1106 = vrot.lane.b32.xlu0 %v13115_v38, %s7547_s18 }
 0x173   : > { %13114 = vst [vmem:[#allocation10_spill] sm:$0xff] %v8549_v52  ;;  %v13123_v52 = vld [vmem:[#allocation24_spill] sm:$0xff] }
 0x174   : > { %v8553_v8 = vpop.permute.xlu0 %984  ;;  %1110 = vrot.lane.b32.xlu2 %v13117_v6, %s7547_s18 }
 0x175   : > { %13116 = vst [vmem:[#allocation14_spill] sm:$0xff] %v8553_v8  ;;  %v13125_v8 = vld [vmem:[#allocation16_spill] sm:$0xff] }
 0x176   : > { %v8557_v41 = vpop.permute.xlu2 %1006 }
 0x177   : > { %13118 = vst [vmem:[#allocation21_spill] sm:$0xff] %v8557_v41  ;;  %v13127_v41 = vld [vmem:[#allocation20_spill] sm:$0xff] }
 0x178   : > { %1102 = vrot.lane.b32.xlu1 %v13119_v35, %s7547_s18 }
 0x17a   : > { %v8561_v43 = vpop.permute.xlu1 %980  ;;  %1112 = vrot.lane.b32.xlu0 %v13121_v28, %s7547_s18 }
 0x17b   : > { %13120 = vst [vmem:[#allocation13_spill] sm:$0xff] %v8561_v43 }
 0x17c   : > { %v8565_v39 = vpop.permute.xlu0 %990  ;;  %1116 = vrot.lane.b32.xlu2 %v13123_v52, %s7547_s18 }
 0x17d   : > { %13122 = vst [vmem:[#allocation17_spill] sm:$0xff] %v8565_v39  ;;  %v13130_v39 = vld [vmem:[#allocation19_spill] sm:$0xff] }
 0x17e   : > { %v8569_v48 = vpop.permute.xlu2 %1012 }
 0x17f   : > { %13124 = vst [vmem:[#allocation24_spill] sm:$0xff] %v8569_v48  ;;  %v13131_v48 = vmov 0.0  }
 0x180   : > { %1108 = vrot.lane.b32.xlu1 %v13125_v8, %s7547_s18  ;;  %390 = vst.msk [vmem:[#allocation3] sm:$0xff] %vm389_vm4, %v13131_v48 }
 0x181   : > { %391 = vst.msk [vmem:[#allocation3 + $0x8] sm:$0xff] %vm389_vm4, %v13131_v48 }
 0x182   : > { %v8573_v7 = vpop.permute.xlu1 %986  ;;  %1118 = vrot.lane.b32.xlu0 %v13127_v41, %s7547_s18  ;;  %394 = vst.msk [vmem:[#allocation3 + $0x18] sm:$0xff] %vm389_vm4, %v13131_v48 }
 0x183   : > { %13126 = vst [vmem:[#allocation16_spill] sm:$0xff] %v8573_v7  ;;  %v13133_v7 = vld [vmem:[#allocation23_spill] sm:$0xff] }
 0x184   : > { %v8577_v31 = vpop.permute.xlu0 %996  ;;  %1122 = vrot.lane.b32.xlu2 %v8088_v2, %s7547_s18  ;;  %395 = vst.msk [vmem:[#allocation3 + $0x20] sm:$0xff] %vm389_vm4, %v13131_v48 }
 0x185   : > { %13128 = vst [vmem:[#allocation113_spill] sm:$0xff] %v8577_v31  ;;  %v1065_v31 = vrot.slane %v8483_v42, 1 }
 0x186   : > { %v8581_v43 = vpop.permute.xlu2 %1018  ;;  %397 = vst.msk [vmem:[#allocation3 + $0x30] sm:$0xff] %vm389_vm4, %v13131_v48 }
 0x187   : > { %13129 = vst [vmem:[#allocation114_spill] sm:$0xff] %v8581_v43  ;;  %v8610_v12 = vsel %vm612_vm1, %v1065_v31, %v1066_v3 }
 0x188   : > { %1114 = vrot.lane.b32.xlu1 %v13130_v39, %s7547_s18  ;;  %398 = vst.msk [vmem:[#allocation3 + $0x38] sm:$0xff] %vm389_vm4, %v13131_v48 }
 0x189   : > { %13136 = vst [vmem:[#allocation117_spill] sm:$0xff] %v8610_v12 }
 0x18a   : > { %v8587_v9 = vpop.permute.xlu1 %992  ;;  %1124 = vrot.lane.b32.xlu0 %v13133_v7, %s7547_s18  ;;  %400 = vst.msk [vmem:[#allocation3 + $0x48] sm:$0xff] %vm389_vm4, %v13131_v48 }
 0x18b   : > { %13132 = vst [vmem:[#allocation19_spill] sm:$0xff] %v8587_v9 }
 0x18c   : > { %v8597_v43 = vpop.permute.xlu0 %1002  ;;  %1128 = vrot.lane.b32.xlu2 %v8109_v50, %s7547_s18  ;;  %401 = vst.msk [vmem:[#allocation3 + $0x50] sm:$0xff] %vm389_vm4, %v13131_v48 }
 0x18d   : > { %13134 = vst [vmem:[#allocation115_spill] sm:$0xff] %v8597_v43  ;;  %v13137_v43 = vld [vmem:[#allocation22_spill] sm:$0xff] }
 0x18e   : > { %v8605_v9 = vpop.permute.xlu2 %1024  ;;  %403 = vst.msk [vmem:[#allocation3 + $0x60] sm:$0xff] %vm389_vm4, %v13131_v48 }
 0x18f   : > { %13135 = vst [vmem:[#allocation116_spill] sm:$0xff] %v8605_v9 }
 0x190   : > { %1120 = vrot.lane.b32.xlu1 %v13137_v43, %s7547_s18  ;;  %404 = vst.msk [vmem:[#allocation3 + $0x68] sm:$0xff] %vm389_vm4, %v13131_v48 }
 0x191   : > { %406 = vst.msk [vmem:[#allocation3 + $0x78] sm:$0xff] %vm389_vm4, %v13131_v48 }
 0x192   : > { %v8620_v7 = vpop.permute.xlu1 %998  ;;  %1130 = vrot.lane.b32.xlu0 %v8610_v12, %s7547_s18  ;;  %407 = vst.msk [vmem:[#allocation3 + $0x80] sm:$0xff] %vm389_vm4, %v13131_v48 }
 0x193   : > { %13138 = vst [vmem:[#allocation22_spill] sm:$0xff] %v8620_v7  ;;  %v8636_v7 = vld [vmem:[#allocation2 + $0x190] sm:$0x3] }
 0x194   : > { %v8628_v31 = vpop.permute.xlu0 %1008  ;;  %1171 = vrot.lane.b32.xlu2 %v8130_v13, %s7548_s19  ;;  %409 = vst.msk [vmem:[#allocation3 + $0x90] sm:$0xff] %vm389_vm4, %v13131_v48  ;;  %v1068_v13 = vrot.slane %v8636_v7, 1 }
 0x195   : > { %13139 = vst [vmem:[#allocation118_spill] sm:$0xff] %v8628_v31  ;;  %v13141_v31 = vld [vmem:[#allocation25_spill] sm:$0xff] }
 0x196   : > { %v8638_v9 = vpop.permute.xlu2 %1030  ;;  %410 = vst.msk [vmem:[#allocation3 + $0x98] sm:$0xff] %vm389_vm4, %v13131_v48  ;;  %v8666_v41 = vsel %vm612_vm1, %v1066_v3, %v1068_v13 }
 0x197   : > { %13140 = vst [vmem:[#allocation119_spill] sm:$0xff] %v8638_v9  ;;  %v13143_v9 = vld [vmem:[#allocation26_spill] sm:$0xff] }
 0x198   : > { %412 = vst.msk [vmem:[#allocation3 + $0xa8] sm:$0xff] %vm389_vm4, %v13131_v48  ;;  %1126 = vrot.lane.b32.xlu1 %v13141_v31, %s7547_s18 }
 0x199   : > { %413 = vst.msk [vmem:[#allocation3 + $0xb0] sm:$0xff] %vm389_vm4, %v13131_v48 }
 0x19a   : > { %415 = vst.msk [vmem:[#allocation3 + $0xc0] sm:$0xff] %vm389_vm4, %v13131_v48  ;;  %v8651_v12 = vpop.permute.xlu1 %1004  ;;  %1173 = vrot.lane.b32.xlu0 %v13143_v9, %s7548_s19 }
 0x19b   : > { %13142 = vst [vmem:[#allocation25_spill] sm:$0xff] %v8651_v12 }
 0x19c   : > { %416 = vst.msk [vmem:[#allocation3 + $0xc8] sm:$0xff] %vm389_vm4, %v13131_v48  ;;  %v8659_v50 = vpop.permute.xlu0 %1014  ;;  %1177 = vrot.lane.b32.xlu2 %v8150_v47, %s7548_s19 }
 0x19d   : > { %418 = vst.msk [vmem:[#allocation3 + $0xd8] sm:$0xff] %vm389_vm4, %v13131_v48 }
 0x19e   : > { %13144 = vst [vmem:[#allocation26_spill] sm:$0xff] %v8659_v50  ;;  %v8670_v9 = vpop.permute.xlu2 %1074 }
 0x19f   : > { %419 = vst.msk [vmem:[#allocation3 + $0xe0] sm:$0xff] %vm389_vm4, %v13131_v48 }
 0x1a0   : > { %421 = vst.msk [vmem:[#allocation3 + $0xf0] sm:$0xff] %vm389_vm4, %v13131_v48  ;;  %1132 = vrot.lane.b32.xlu1 %v8666_v41, %s7547_s18 }
 0x1a1   : > { %13145 = vst [vmem:[#allocation120_spill] sm:$0xff] %v8670_v9 }
 0x1a2   : > { %422 = vst.msk [vmem:[#allocation3 + $0xf8] sm:$0xff] %vm389_vm4, %v13131_v48  ;;  %v8682_v3 = vpop.permute.xlu1 %1010  ;;  %1179 = vrot.lane.b32.xlu0 %v8120_v27, %s7548_s19  ;;  %v13154_v27 = vld [vmem:[#allocation32_spill] sm:$0xff] }
 0x1a3   : > { %424 = vst.msk [vmem:[#allocation3 + $0x108] sm:$0xff] %vm389_vm4, %v13131_v48 }
 0x1a4   : > { %425 = vst.msk [vmem:[#allocation3 + $0x110] sm:$0xff] %vm389_vm4, %v13131_v48  ;;  %v8692_v13 = vpop.permute.xlu0 %1020  ;;  %1183 = vrot.lane.b32.xlu2 %v8173_v61, %s7548_s19 }
 0x1a5   : > { %427 = vst.msk [vmem:[#allocation3 + $0x120] sm:$0xff] %vm389_vm4, %v13131_v48 }
 0x1a6   : > { %13146 = vst [vmem:[#allocation121_spill] sm:$0xff] %v8682_v3  ;;  %v8700_v50 = vpop.permute.xlu2 %1080  ;;  %v13149_v3 = vld [vmem:[#allocation29_spill] sm:$0xff] }
 0x1a7   : > { %428 = vst.msk [vmem:[#allocation3 + $0x128] sm:$0xff] %vm389_vm4, %v13131_v48 }
 0x1a8   : > { %430 = vst.msk [vmem:[#allocation3 + $0x138] sm:$0xff] %vm389_vm4, %v13131_v48  ;;  %1175 = vrot.lane.b32.xlu1 %v13149_v3, %s7548_s19 }
 0x1a9   : > { %431 = vst.msk [vmem:[#allocation3 + $0x140] sm:$0xff] %vm389_vm4, %v13131_v48 }
 0x1aa   : > { %13147 = vst [vmem:[#allocation122_spill] sm:$0xff] %v8692_v13  ;;  %v8712_v12 = vpop.permute.xlu1 %1016  ;;  %v13151_v13 = vld [vmem:[#allocation33_spill] sm:$0xff] }
 0x1ab   : > { %433 = vst.msk [vmem:[#allocation3 + $0x150] sm:$0xff] %vm389_vm4, %v13131_v48  ;;  %1185 = vrot.lane.b32.xlu0 %v13151_v13, %s7548_s19  ;;  %v13156_v13 = vld [vmem:[#allocation37_spill] sm:$0xff] }
 0x1ac   : > { %434 = vst.msk [vmem:[#allocation3 + $0x158] sm:$0xff] %vm389_vm4, %v13131_v48  ;;  %1189 = vrot.lane.b32.xlu2 %v8197_v14, %s7548_s19 }
 0x1ad   : > { %13148 = vst [vmem:[#allocation123_spill] sm:$0xff] %v8700_v50  ;;  %v8720_v50 = vpop.permute.xlu0 %1026 }
 0x1ae   : > { %436 = vst.msk [vmem:[#allocation3 + $0x168] sm:$0xff] %vm389_vm4, %v13131_v48  ;;  %v8724_v9 = vpop.permute.xlu2 %1086 }
 0x1af   : > { %437 = vst.msk [vmem:[#allocation3 + $0x170] sm:$0xff] %vm389_vm4, %v13131_v48 }
 0x1b0   : > { %439 = vst.msk [vmem:[#allocation3 + $0x180] sm:$0xff] %vm389_vm4, %v13131_v48  ;;  %1181 = vrot.lane.b32.xlu1 %v13154_v27, %s7548_s19 }
 0x1b1   : > { %440 = vst.msk [vmem:[#allocation3 + $0x188] sm:$0xff] %vm389_vm4, %v13131_v48 }
 0x1b2   : > { %13150 = vst [vmem:[#allocation29_spill] sm:$0xff] %v8712_v12  ;;  %v8728_v12 = vpop.permute.xlu1 %1022 }
 0x1b3   : > { %442 = vst.msk [vmem:[#allocation3 + $0x198] sm:$0xff] %vm389_vm4, %v13131_v48  ;;  %1191 = vrot.lane.b32.xlu0 %v13156_v13, %s7548_s19 }
 0x1b4   : > { %443 = vst.msk [vmem:[#allocation3 + $0x1a0] sm:$0xff] %vm389_vm4, %v13131_v48  ;;  %1195 = vrot.lane.b32.xlu2 %v8222_v25, %s7548_s19 }
 0x1b5   : > { %13152 = vst [vmem:[#allocation124_spill] sm:$0xff] %v8720_v50  ;;  %v8732_v61 = vpop.permute.xlu0 %1070  ;;  %v13159_v50 = vld [vmem:[#allocation35_spill] sm:$0xff] }
 0x1b6   : > { %13153 = vst [vmem:[#allocation125_spill] sm:$0xff] %v8724_v9  ;;  %v8736_v48 = vpop.permute.xlu2 %1092  ;;  %v13161_v9 = vld [vmem:[#allocation41_spill] sm:$0xff] }
 0x1b7   : > { %13155 = vst [vmem:[#allocation126_spill] sm:$0xff] %v8728_v12 }
 0x1b8   : > { %13157 = vst [vmem:[#allocation127_spill] sm:$0xff] %v8732_v61  ;;  %1187 = vrot.lane.b32.xlu1 %v13159_v50, %s7548_s19  ;;  %v13164_v61 = vld [vmem:[#allocation40_spill] sm:$0xff] }
 0x1b9   : > { %13158 = vst [vmem:[#allocation128_spill] sm:$0xff] %v8736_v48 }
 0x1ba   : > { %v8740_v14 = vpop.permute.xlu1 %1028 }
 0x1bb   : > { %13160 = vst [vmem:[#allocation35_spill] sm:$0xff] %v8740_v14  ;;  %1197 = vrot.lane.b32.xlu0 %v13161_v9, %s7548_s19 }
 0x1bc   : > { %1201 = vrot.lane.b32.xlu2 %v8248_v44, %s7548_s19 }
 0x1bd   : > { %v8744_v27 = vpop.permute.xlu0 %1076 }
 0x1be   : > { %13162 = vst [vmem:[#allocation129_spill] sm:$0xff] %v8744_v27  ;;  %v8748_v12 = vpop.permute.xlu2 %1098  ;;  %v13168_v27 = vld [vmem:[#allocation45_spill] sm:$0xff] }
 0x1bf   : > { %13163 = vst [vmem:[#allocation130_spill] sm:$0xff] %v8748_v12  ;;  %v13170_v12 = vld [vmem:[#allocation51_spill] sm:$0xff] }
 0x1c0   : > { %1193 = vrot.lane.b32.xlu1 %v13164_v61, %s7548_s19 }
 0x1c2   : > { %v8752_v13 = vpop.permute.xlu1 %1072 }
 0x1c3   : > { %13165 = vst [vmem:[#allocation40_spill] sm:$0xff] %v8752_v13  ;;  %1203 = vrot.lane.b32.xlu0 %v8210_v1, %s7548_s19 }
 0x1c4   : > { %1207 = vrot.lane.b32.xlu2 %v8273_v11, %s7548_s19 }
 0x1c5   : > { %v8756_v48 = vpop.permute.xlu0 %1082 }
 0x1c6   : > { %13166 = vst [vmem:[#allocation131_spill] sm:$0xff] %v8756_v48  ;;  %v8760_v14 = vpop.permute.xlu2 %1104  ;;  %v13173_v48 = vld [vmem:[#allocation50_spill] sm:$0xff] }
 0x1c7   : > { %13167 = vst [vmem:[#allocation132_spill] sm:$0xff] %v8760_v14 }
 0x1c8   : > { %1199 = vrot.lane.b32.xlu1 %v13168_v27, %s7548_s19 }
 0x1ca   : > { %v8764_v9 = vpop.permute.xlu1 %1078 }
 0x1cb   : > { %13169 = vst [vmem:[#allocation45_spill] sm:$0xff] %v8764_v9  ;;  %1209 = vrot.lane.b32.xlu0 %v13170_v12, %s7548_s19 }
 0x1cc   : > { %1213 = vrot.lane.b32.xlu2 %v8299_v16, %s7548_s19 }
 0x1cd   : > { %v8768_v44 = vpop.permute.xlu0 %1088 }
 0x1ce   : > { %13171 = vst [vmem:[#allocation133_spill] sm:$0xff] %v8768_v44  ;;  %v8772_v13 = vpop.permute.xlu2 %1110  ;;  %v13177_v44 = vld [vmem:[#allocation56_spill] sm:$0xff] }
 0x1cf   : > { %13172 = vst [vmem:[#allocation134_spill] sm:$0xff] %v8772_v13 }
 0x1d0   : > { %1205 = vrot.lane.b32.xlu1 %v13173_v48, %s7548_s19 }
 0x1d2   : > { %v8776_v1 = vpop.permute.xlu1 %1084 }
 0x1d3   : > { %13174 = vst [vmem:[#allocation50_spill] sm:$0xff] %v8776_v1  ;;  %1215 = vrot.lane.b32.xlu0 %v8261_v32, %s7548_s19  ;;  %v1166_v1 = vrot.slane %v8483_v42, 2 }
 0x1d4   : > { %1219 = vrot.lane.b32.xlu2 %v8324_v24, %s7548_s19 }
 0x1d5   : > { %v8780_v14 = vpop.permute.xlu0 %1094 }
 0x1d6   : > { %13175 = vst [vmem:[#allocation135_spill] sm:$0xff] %v8780_v14  ;;  %v8784_v9 = vpop.permute.xlu2 %1116  ;;  %v1167_v14 = vrot.slane %v8461_v62, 2 }
 0x1d7   : > { %13176 = vst [vmem:[#allocation136_spill] sm:$0xff] %v8784_v9  ;;  %v13181_v9 = vld [vmem:[#allocation61_spill] sm:$0xff] }
 0x1d8   : > { %1211 = vrot.lane.b32.xlu1 %v13177_v44, %s7548_s19  ;;  %v8803_v24 = vsel %vm789_vm3, %v1166_v1, %v1167_v14  ;;  %v13186_v1 = vld [vmem:[#allocation66_spill] sm:$0xff] }
 0x1da   : > { %v8788_v12 = vpop.permute.xlu1 %1090 }
 0x1db   : > { %13178 = vst [vmem:[#allocation56_spill] sm:$0xff] %v8788_v12  ;;  %1221 = vrot.lane.b32.xlu0 %v8286_v4, %s7548_s19 }
 0x1dc   : > { %1225 = vrot.lane.b32.xlu2 %v8343_v53, %s7548_s19 }
 0x1dd   : > { %v8792_v13 = vpop.permute.xlu0 %1100 }
 0x1de   : > { %13179 = vst [vmem:[#allocation137_spill] sm:$0xff] %v8792_v13  ;;  %v8798_v32 = vpop.permute.xlu2 %1122  ;;  %v1169_v13 = vrot.slane %v8636_v7, 2  ;;  %v8827_v7 = vld [vmem:[#allocation2 + $0x38] sm:$0xff] }
 0x1df   : > { %13180 = vst [vmem:[#allocation138_spill] sm:$0xff] %v8798_v32 }
 0x1e0   : > { %1217 = vrot.lane.b32.xlu1 %v13181_v9, %s7548_s19  ;;  %v8817_v32 = vsel %vm789_vm3, %v1167_v14, %v1169_v13  ;;  %13189 = vst [vmem:[#allocation144_spill] sm:$0xff] %v8827_v7  ;;  %v8837_v13 = vld [vmem:[#allocation2 + $0x48] sm:$0xff] }
 0x1e1   : > { %13185 = vst [vmem:[#allocation142_spill] sm:$0xff] %v8817_v32 }
 0x1e2   : > { %v8805_v12 = vpop.permute.xlu1 %1096  ;;  %13191 = vst [vmem:[#allocation146_spill] sm:$0xff] %v8837_v13 }
 0x1e3   : > { %13182 = vst [vmem:[#allocation139_spill] sm:$0xff] %v8805_v12  ;;  %1227 = vrot.lane.b32.xlu0 %v8312_v40, %s7548_s19 }
 0x1e4   : > { %1231 = vrot.lane.b32.xlu2 %v8803_v24, %s7548_s19 }
 0x1e5   : > { %v8810_v4 = vpop.permute.xlu0 %1106 }
 0x1e6   : > { %13183 = vst [vmem:[#allocation140_spill] sm:$0xff] %v8810_v4  ;;  %v8814_v53 = vpop.permute.xlu2 %1128 }
 0x1e7   : > { %13184 = vst [vmem:[#allocation141_spill] sm:$0xff] %v8814_v53 }
 0x1e8   : > { %1223 = vrot.lane.b32.xlu1 %v13186_v1, %s7548_s19 }
 0x1ea   : > { %v8821_v9 = vpop.permute.xlu1 %1102 }
 0x1eb   : > { %13187 = vst [vmem:[#allocation66_spill] sm:$0xff] %v8821_v9  ;;  %1233 = vrot.lane.b32.xlu0 %v8817_v32, %s7548_s19  ;;  %v8855_v32 = vld [vmem:[#allocation2 + $0x68] sm:$0xff] }
 0x1ec   : > { %1271 = vrot.lane.b32.xlu2 %v8827_v7, %s7549_s20  ;;  %v8849_v7 = vld [vmem:[#allocation2 + $0x30] sm:$0xff]  ;;  %13197 = vst [vmem:[#allocation152_spill] sm:$0xff] %v8855_v32 }
 0x1ed   : > { %v8825_v12 = vpop.permute.xlu0 %1112  ;;  %13195 = vst [vmem:[#allocation150_spill] sm:$0xff] %v8849_v7 }
 0x1ee   : > { %13188 = vst [vmem:[#allocation143_spill] sm:$0xff] %v8825_v12  ;;  %v8831_v4 = vpop.permute.xlu2 %1171  ;;  %v8843_v12 = vld [vmem:[#allocation2 + $0x60] sm:$0xff] }
 0x1ef   : > { %13193 = vst [vmem:[#allocation148_spill] sm:$0xff] %v8843_v12 }
 0x1f0   : > { %1229 = vrot.lane.b32.xlu1 %v8329_v34, %s7548_s19 }
 0x1f2   : > { %v8835_v14 = vpop.permute.xlu1 %1108 }
 0x1f3   : > { %13190 = vst [vmem:[#allocation145_spill] sm:$0xff] %v8835_v14  ;;  %1273 = vrot.lane.b32.xlu0 %v8837_v13, %s7549_s20  ;;  %v8861_v13 = vld [vmem:[#allocation2 + $0x80] sm:$0xff] }
 0x1f4   : > { %1277 = vrot.lane.b32.xlu2 %v8843_v12, %s7549_s20  ;;  %13199 = vst [vmem:[#allocation154_spill] sm:$0xff] %v8861_v13 }
 0x1f5   : > { %v8841_v9 = vpop.permute.xlu0 %1118 }
 0x1f6   : > { %13192 = vst [vmem:[#allocation147_spill] sm:$0xff] %v8841_v9  ;;  %v8847_v53 = vpop.permute.xlu2 %1177 }
 0x1f7   : > { %13194 = vst [vmem:[#allocation149_spill] sm:$0xff] %v8847_v53  ;;  %v8867_v53 = vld [vmem:[#allocation2 + $0x50] sm:$0xff] }
 0x1f8   : > { %1269 = vrot.lane.b32.xlu1 %v8849_v7, %s7549_s20  ;;  %13201 = vst [vmem:[#allocation156_spill] sm:$0xff] %v8867_v53  ;;  %v8873_v7 = vld [vmem:[#allocation2 + $0x90] sm:$0xff] }
 0x1f9   : > { %13203 = vst [vmem:[#allocation158_spill] sm:$0xff] %v8873_v7 }
 0x1fa   : > { %v8853_v14 = vpop.permute.xlu1 %1114 }
 0x1fb   : > { %13196 = vst [vmem:[#allocation151_spill] sm:$0xff] %v8853_v14  ;;  %1279 = vrot.lane.b32.xlu0 %v8855_v32, %s7549_s20  ;;  %v8879_v32 = vld [vmem:[#allocation2 + $0xa8] sm:$0xff] }
 0x1fc   : > { %1283 = vrot.lane.b32.xlu2 %v8861_v13, %s7549_s20  ;;  %13205 = vst [vmem:[#allocation160_spill] sm:$0xff] %v8879_v32 }
 0x1fd   : > { %v8859_v9 = vpop.permute.xlu0 %1124 }
 0x1fe   : > { %13198 = vst [vmem:[#allocation153_spill] sm:$0xff] %v8859_v9  ;;  %v8865_v12 = vpop.permute.xlu2 %1183 }
 0x1ff   : > { %13200 = vst [vmem:[#allocation155_spill] sm:$0xff] %v8865_v12  ;;  %v8885_v12 = vld [vmem:[#allocation2 + $0x78] sm:$0xff] }
 0x200   : > { %1275 = vrot.lane.b32.xlu1 %v8867_v53, %s7549_s20  ;;  %13207 = vst [vmem:[#allocation162_spill] sm:$0xff] %v8885_v12  ;;  %v8891_v53 = vld [vmem:[#allocation2 + $0xb0] sm:$0xff] }
 0x201   : > { %13209 = vst [vmem:[#allocation164_spill] sm:$0xff] %v8891_v53 }
 0x202   : > { %v8871_v14 = vpop.permute.xlu1 %1120 }
 0x203   : > { %13202 = vst [vmem:[#allocation157_spill] sm:$0xff] %v8871_v14  ;;  %1285 = vrot.lane.b32.xlu0 %v8873_v7, %s7549_s20  ;;  %v8897_v7 = vld [vmem:[#allocation2 + $0xc8] sm:$0xff] }
 0x204   : > { %1289 = vrot.lane.b32.xlu2 %v8879_v32, %s7549_s20  ;;  %13210 = vst [vmem:[#allocation165_spill] sm:$0xff] %v8897_v7 }
 0x205   : > { %v8877_v9 = vpop.permute.xlu0 %1130 }
 0x206   : > { %13204 = vst [vmem:[#allocation159_spill] sm:$0xff] %v8877_v9  ;;  %v8883_v13 = vpop.permute.xlu2 %1189 }
 0x207   : > { %13206 = vst [vmem:[#allocation161_spill] sm:$0xff] %v8883_v13  ;;  %v8903_v13 = vld [vmem:[#allocation2 + $0x98] sm:$0xff] }
 0x208   : > { %1281 = vrot.lane.b32.xlu1 %v8885_v12, %s7549_s20  ;;  %13211 = vst [vmem:[#allocation166_spill] sm:$0xff] %v8903_v13 }
 0x20a   : > { %v8889_v14 = vpop.permute.xlu1 %1126 }
 0x20b   : > { %13208 = vst [vmem:[#allocation163_spill] sm:$0xff] %v8889_v14  ;;  %1291 = vrot.lane.b32.xlu0 %v8891_v53, %s7549_s20 }
 0x20c   : > { %1295 = vrot.lane.b32.xlu2 %v8897_v7, %s7549_s20 }
 0x20d   : > { %v8895_v9 = vpop.permute.xlu0 %1173 }
 0x20e   : > { %v8901_v32 = vpop.permute.xlu2 %1195 }
 0x210   : > { %1287 = vrot.lane.b32.xlu1 %v8903_v13, %s7549_s20 }
 0x212   : > { %v8907_v14 = vpop.permute.xlu1 %1132 }
 0x213   : > { %13212 = vst [vmem:[#allocation167_spill] sm:$0xff] %v8907_v14  ;;  %1297 = vrot.lane.b32.xlu0 %v7933_v46, %s7549_s20  ;;  %v8929_v14 = vld [vmem:[#allocation2 + $0xe0] sm:$0xff] }
 0x214   : > { %1301 = vrot.lane.b32.xlu2 %v7943_v55, %s7549_s20  ;;  %13215 = vst [vmem:[#allocation170_spill] sm:$0xff] %v8929_v14 }
 0x215   : > { %v8911_v53 = vpop.permute.xlu0 %1179 }
 0x216   : > { %v8915_v12 = vpop.permute.xlu2 %1201 }
 0x217   : > { %13213 = vst [vmem:[#allocation168_spill] sm:$0xff] %v8915_v12 }
 0x218   : > { %1293 = vrot.lane.b32.xlu1 %v7959_v18, %s7549_s20 }
 0x21a   : > { %v8919_v7 = vpop.permute.xlu1 %1175 }
 0x21b   : > { %1303 = vrot.lane.b32.xlu0 %v7945_v56, %s7549_s20 }
 0x21c   : > { %1307 = vrot.lane.b32.xlu2 %v7979_v33, %s7549_s20 }
 0x21d   : > { %v8923_v13 = vpop.permute.xlu0 %1185 }
 0x21e   : > { %v8927_v46 = vpop.permute.xlu2 %1207 }
 0x21f   : > { %13214 = vst [vmem:[#allocation169_spill] sm:$0xff] %v8927_v46 }
 0x220   : > { %1299 = vrot.lane.b32.xlu1 %v8929_v14, %s7549_s20 }
 0x222   : > { %v8933_v55 = vpop.permute.xlu1 %1181 }
 0x223   : > { %1309 = vrot.lane.b32.xlu0 %v7998_v19, %s7549_s20 }
 0x224   : > { %1313 = vrot.lane.b32.xlu2 %v8008_v26, %s7549_s20 }
 0x225   : > { %v8937_v18 = vpop.permute.xlu0 %1191 }
 0x226   : > { %v8941_v56 = vpop.permute.xlu2 %1213 }
 0x227   : > { %13216 = vst [vmem:[#allocation171_spill] sm:$0xff] %v8941_v56 }
 0x228   : > { %1305 = vrot.lane.b32.xlu1 %v8021_v51, %s7549_s20 }
 0x22a   : > { %v8945_v33 = vpop.permute.xlu1 %1187 }
 0x22b   : > { %1315 = vrot.lane.b32.xlu0 %v8010_v23, %s7549_s20 }
 0x22c   : > { %1319 = vrot.lane.b32.xlu2 %v8036_v0, %s7549_s20  ;;  %v8969_v0 = vld [vmem:[#allocation2 + $0x1a0] sm:$0xff] }
 0x22d   : > { %v8949_v14 = vpop.permute.xlu0 %1197 }
 0x22e   : > { %v8953_v19 = vpop.permute.xlu2 %1219 }
 0x22f   : > { %13217 = vst [vmem:[#allocation172_spill] sm:$0xff] %v8953_v19 }
 0x230   : > { %1311 = vrot.lane.b32.xlu1 %v8000_v22, %s7549_s20 }
 0x232   : > { %v8957_v26 = vpop.permute.xlu1 %1193 }
 0x233   : > { %1321 = vrot.lane.b32.xlu0 %v8055_v10, %s7549_s20 }
 0x234   : > { %1325 = vrot.lane.b32.xlu2 %v8483_v42, %s7549_s20 }
 0x235   : > { %v8961_v51 = vpop.permute.xlu0 %1203 }
 0x236   : > { %13218 = vst [vmem:[#allocation173_spill] sm:$0xff] %v8961_v51  ;;  %v8965_v23 = vpop.permute.xlu2 %1225 }
 0x238   : > { %1317 = vrot.lane.b32.xlu1 %v8074_v36, %s7549_s20 }
 0x23a   : > { %v8971_v19 = vpop.permute.xlu1 %1199 }
 0x23b   : > { %1327 = vrot.lane.b32.xlu0 %v8461_v62, %s7549_s20  ;;  %v8991_v62 = vld [vmem:[#allocation2 + $0x198] sm:$0xff] }
 0x23c   : > { %1331 = vrot.lane.b32.xlu2 %v8969_v0, %s7549_s20 }
 0x23d   : > { %v8975_v22 = vpop.permute.xlu0 %1209 }
 0x23e   : > { %13219 = vst [vmem:[#allocation174_spill] sm:$0xff] %v8975_v22  ;;  %v8979_v10 = vpop.permute.xlu2 %1231 }
 0x23f   : > { %13220 = vst [vmem:[#allocation175_spill] sm:$0xff] %v8979_v10  ;;  %v13265_v10 = vld [vmem:[#allocation74_spill] sm:$0xff] }
 0x240   : > { %1323 = vrot.lane.b32.xlu1 %v8057_v5, %s7549_s20 }
 0x242   : > { %v8983_v42 = vpop.permute.xlu1 %1205 }
 0x243   : > { %13221 = vst [vmem:[#allocation176_spill] sm:$0xff] %v8983_v42  ;;  %1371 = vrot.lane.b32.xlu0 %v7745_v15, %s7550_s21 }
 0x244   : > { %1375 = vrot.lane.b32.xlu2 %v13095_v30, %s7550_s21 }
 0x245   : > { %v8987_v36 = vpop.permute.xlu0 %1215 }
 0x246   : > { %13222 = vst [vmem:[#allocation177_spill] sm:$0xff] %v8987_v36  ;;  %v8993_v56 = vpop.permute.xlu2 %1271 }
 0x248   : > { %1329 = vrot.lane.b32.xlu1 %v8991_v62, %s7549_s20 }
 0x24a   : > { %v8997_v22 = vpop.permute.xlu1 %1211 }
 0x24b   : > { %13223 = vst [vmem:[#allocation178_spill] sm:$0xff] %v8997_v22  ;;  %1377 = vrot.lane.b32.xlu0 %v7885_v17, %s7550_s21 }
 0x24c   : > { %1381 = vrot.lane.b32.xlu2 %v13101_v29, %s7550_s21 }
 0x24d   : > { %v9001_v5 = vpop.permute.xlu0 %1221 }
 0x24e   : > { %v9005_v15 = vpop.permute.xlu2 %1277 }
 0x250   : > { %1373 = vrot.lane.b32.xlu1 %v7769_v20, %s7550_s21 }
 0x252   : > { %v9009_v30 = vpop.permute.xlu1 %1217 }
 0x253   : > { %13224 = vst [vmem:[#allocation179_spill] sm:$0xff] %v9009_v30  ;;  %1383 = vrot.lane.b32.xlu0 %v13093_v58, %s7550_s21  ;;  %v1366_v30 = vrot.slane %v8991_v62, 1 }
 0x254   : > { %1387 = vrot.lane.b32.xlu2 %v13107_v57, %s7550_s21 }
 0x255   : > { %v9013_v36 = vpop.permute.xlu0 %1227 }
 0x256   : > { %v9017_v17 = vpop.permute.xlu2 %1283 }
 0x258   : > { %1379 = vrot.lane.b32.xlu1 %v7842_v54, %s7550_s21 }
 0x25a   : > { %v9021_v29 = vpop.permute.xlu1 %1223 }
 0x25b   : > { %1389 = vrot.lane.b32.xlu0 %v13099_v63, %s7550_s21 }
 0x25c   : > { %1393 = vrot.lane.b32.xlu2 %v13113_v49, %s7550_s21 }
 0x25d   : > { %v9025_v20 = vpop.permute.xlu0 %1233 }
 0x25e   : > { %13225 = vst [vmem:[#allocation180_spill] sm:$0xff] %v9025_v20  ;;  %v9029_v58 = vpop.permute.xlu2 %1289  ;;  %v13253_v20 = vld [vmem:[#allocation46_spill] sm:$0xff] }
 0x260   : > { %1385 = vrot.lane.b32.xlu1 %v13097_v45, %s7550_s21 }
 0x262   : > { %v9033_v57 = vpop.permute.xlu1 %1229 }
 0x263   : > { %1395 = vrot.lane.b32.xlu0 %v13105_v21, %s7550_s21 }
 0x264   : > { %1399 = vrot.lane.b32.xlu2 %v13119_v35, %s7550_s21 }
 0x265   : > { %v9037_v54 = vpop.permute.xlu0 %1273 }
 0x266   : > { %v9041_v63 = vpop.permute.xlu2 %1295 }
 0x268   : > { %1391 = vrot.lane.b32.xlu1 %v13103_v60, %s7550_s21  ;;  %v1367_v60 = vrot.slane %v8969_v0, 1 }
 0x26a   : > { %v9045_v49 = vpop.permute.xlu1 %1269 }
 0x26b   : > { %1401 = vrot.lane.b32.xlu0 %v13111_v59, %s7550_s21 }
 0x26c   : > { %1405 = vrot.lane.b32.xlu2 %v13125_v8, %s7550_s21 }
 0x26d   : > { %v9049_v45 = vpop.permute.xlu0 %1279 }
 0x26e   : > { %v9053_v21 = vpop.permute.xlu2 %1301 }
 0x26f   : > { %13226 = vst [vmem:[#allocation181_spill] sm:$0xff] %v9053_v21 }
 0x270   : > { %1397 = vrot.lane.b32.xlu1 %v13109_v37, %s7550_s21  ;;  %v1368_v37 = vsel %vm612_vm1, %v1366_v30, %v1367_v60  ;;  %v13230_v30 = vld [vmem:[#allocation20_spill] sm:$0xff] }
 0x272   : > { %v9057_v35 = vpop.permute.xlu1 %1275 }
 0x273   : > { %1407 = vrot.lane.b32.xlu0 %v13117_v6, %s7550_s21 }
 0x274   : > { %1411 = vrot.lane.b32.xlu2 %v13130_v39, %s7550_s21 }
 0x275   : > { %v9063_v59 = vpop.permute.xlu0 %1285 }
 0x276   : > { %v9067_v8 = vpop.permute.xlu2 %1307 }
 0x277   : > { %13227 = vst [vmem:[#allocation182_spill] sm:$0xff] %v9067_v8  ;;  %v13233_v8 = vld [vmem:[#allocation23_spill] sm:$0xff] }
 0x278   : > { %1403 = vrot.lane.b32.xlu1 %v13115_v38, %s7550_s21 }
 0x27a   : > { %v9072_v22 = vpop.permute.xlu1 %1281 }
 0x27b   : > { %1413 = vrot.lane.b32.xlu0 %v13123_v52, %s7550_s21 }
 0x27c   : > { %1417 = vrot.lane.b32.xlu2 %v13137_v43, %s7550_s21 }
 0x27d   : > { %v9076_v6 = vpop.permute.xlu0 %1291 }
 0x27e   : > { %v9080_v46 = vpop.permute.xlu2 %1313 }
 0x27f   : > { %13228 = vst [vmem:[#allocation183_spill] sm:$0xff] %v9080_v46  ;;  %v13231_v46 = vld [vmem:[#allocation28_spill] sm:$0xff] }
 0x280   : > { %1409 = vrot.lane.b32.xlu1 %v13121_v28, %s7550_s21 }
 0x282   : > { %v9084_v39 = vpop.permute.xlu1 %1287 }
 0x283   : > { %1419 = vrot.lane.b32.xlu0 %v8088_v2, %s7550_s21 }
 0x284   : > { %1423 = vrot.lane.b32.xlu2 %v13141_v31, %s7550_s21 }
 0x285   : > { %v9088_v38 = vpop.permute.xlu0 %1297 }
 0x286   : > { %13229 = vst [vmem:[#allocation184_spill] sm:$0xff] %v9088_v38  ;;  %v9092_v52 = vpop.permute.xlu2 %1319  ;;  %v13264_v38 = vld [vmem:[#allocation36_spill] sm:$0xff] }
 0x288   : > { %1415 = vrot.lane.b32.xlu1 %v13230_v30, %s7550_s21 }
 0x28a   : > { %v9096_v43 = vpop.permute.xlu1 %1293 }
 0x28b   : > { %1425 = vrot.lane.b32.xlu0 %v13231_v46, %s7550_s21  ;;  %v9115_v46 = vld [vmem:[#allocation2 + $0x1a8] sm:$0x3] }
 0x28c   : > { %1429 = vrot.lane.b32.xlu2 %v8666_v41, %s7550_s21  ;;  %v13237_v41 = vld [vmem:[#allocation117_spill] sm:$0xff]  ;;  %v1369_v42 = vrot.slane %v9115_v46, 1 }
 0x28d   : > { %v9100_v28 = vpop.permute.xlu0 %1303 }
 0x28e   : > { %13232 = vst [vmem:[#allocation20_spill] sm:$0xff] %v9100_v28  ;;  %v9104_v2 = vpop.permute.xlu2 %1325 }
 0x290   : > { %1421 = vrot.lane.b32.xlu1 %v13233_v8, %s7550_s21 }
 0x292   : > { %v9108_v31 = vpop.permute.xlu1 %1299 }
 0x293   : > { %13234 = vst [vmem:[#allocation28_spill] sm:$0xff] %v9108_v31  ;;  %1431 = vrot.lane.b32.xlu0 %v1368_v37, %s7550_s21  ;;  %v1468_v31 = vrot.slane %v8969_v0, 2  ;;  %v13256_v0 = vld [vmem:[#allocation51_spill] sm:$0xff] }
 0x294   : > { %1472 = vrot.lane.b32.xlu2 %v13149_v3, %s7551_s22  ;;  %v1370_v3 = vsel %vm612_vm1, %v1367_v60, %v1369_v42  ;;  %v13245_v60 = vld [vmem:[#allocation43_spill] sm:$0xff] }
 0x295   : > { %v9111_v30 = vpop.permute.xlu0 %1309 }
 0x296   : > { %13235 = vst [vmem:[#allocation23_spill] sm:$0xff] %v9111_v30  ;;  %v9117_v28 = vpop.permute.xlu2 %1331  ;;  %v13240_v30 = vld [vmem:[#allocation32_spill] sm:$0xff] }
 0x297   : > { %13236 = vst [vmem:[#allocation185_spill] sm:$0xff] %v9117_v28  ;;  %v13251_v28 = vld [vmem:[#allocation41_spill] sm:$0xff] }
 0x298   : > { %1427 = vrot.lane.b32.xlu1 %v13237_v41, %s7550_s21  ;;  %v13242_v41 = vld [vmem:[#allocation38_spill] sm:$0xff] }
 0x29a   : > { %v9122_v8 = vpop.permute.xlu1 %1305 }
 0x29b   : > { %13238 = vst [vmem:[#allocation117_spill] sm:$0xff] %v9122_v8  ;;  %1474 = vrot.lane.b32.xlu0 %v8150_v47, %s7551_s22 }
 0x29c   : > { %1478 = vrot.lane.b32.xlu2 %v13240_v30, %s7551_s22  ;;  %v13243_v30 = vld [vmem:[#allocation30_spill] sm:$0xff] }
 0x29d   : > { %v9126_v37 = vpop.permute.xlu0 %1315 }
 0x29e   : > { %13239 = vst [vmem:[#allocation186_spill] sm:$0xff] %v9126_v37  ;;  %v9131_v21 = vpop.permute.xlu2 %1375  ;;  %v13246_v37 = vld [vmem:[#allocation33_spill] sm:$0xff] }
 0x2a0   : > { %1433 = vrot.lane.b32.xlu1 %v1370_v3, %s7550_s21 }
 0x2a2   : > { %v9134_v51 = vpop.permute.xlu1 %1311 }
 0x2a3   : > { %13241 = vst [vmem:[#allocation32_spill] sm:$0xff] %v9134_v51  ;;  %1480 = vrot.lane.b32.xlu0 %v13242_v41, %s7551_s22  ;;  %v13249_v51 = vld [vmem:[#allocation54_spill] sm:$0xff] }
 0x2a4   : > { %1484 = vrot.lane.b32.xlu2 %v13159_v50, %s7551_s22 }
 0x2a5   : > { %v9138_v8 = vpop.permute.xlu0 %1321 }
 0x2a6   : > { %v9142_v47 = vpop.permute.xlu2 %1381 }
 0x2a8   : > { %1476 = vrot.lane.b32.xlu1 %v13243_v30, %s7551_s22 }
 0x2aa   : > { %v9146_v42 = vpop.permute.xlu1 %1317 }
 0x2ab   : > { %13244 = vst [vmem:[#allocation38_spill] sm:$0xff] %v9146_v42  ;;  %1486 = vrot.lane.b32.xlu0 %v13245_v60, %s7551_s22  ;;  %v13247_v42 = vld [vmem:[#allocation37_spill] sm:$0xff] }
 0x2ac   : > { %1490 = vrot.lane.b32.xlu2 %v13164_v61, %s7551_s22 }
 0x2ad   : > { %v9150_v3 = vpop.permute.xlu0 %1327 }
 0x2ae   : > { %v9154_v41 = vpop.permute.xlu2 %1387 }
 0x2b0   : > { %1482 = vrot.lane.b32.xlu1 %v13246_v37, %s7551_s22 }
 0x2b2   : > { %v9158_v50 = vpop.permute.xlu1 %1323 }
 0x2b3   : > { %1492 = vrot.lane.b32.xlu0 %v8222_v25, %s7551_s22 }
 0x2b4   : > { %1496 = vrot.lane.b32.xlu2 %v13168_v27, %s7551_s22 }
 0x2b5   : > { %v9162_v30 = vpop.permute.xlu0 %1371 }
 0x2b6   : > { %v9166_v60 = vpop.permute.xlu2 %1393 }
 0x2b8   : > { %1488 = vrot.lane.b32.xlu1 %v13247_v42, %s7551_s22 }
 0x2ba   : > { %v9170_v61 = vpop.permute.xlu1 %1329 }
 0x2bb   : > { %13248 = vst [vmem:[#allocation30_spill] sm:$0xff] %v9170_v61  ;;  %1498 = vrot.lane.b32.xlu0 %v13249_v51, %s7551_s22 }
 0x2bc   : > { %1502 = vrot.lane.b32.xlu2 %v13173_v48, %s7551_s22  ;;  %v1467_v48 = vrot.slane %v8991_v62, 2 }
 0x2bd   : > { %v9174_v37 = vpop.permute.xlu0 %1377 }
 0x2be   : > { %v9178_v25 = vpop.permute.xlu2 %1399 }
 0x2bf   : > { %13250 = vst [vmem:[#allocation43_spill] sm:$0xff] %v9178_v25  ;;  %v13260_v25 = vld [vmem:[#allocation73_spill] sm:$0xff] }
 0x2c0   : > { %1494 = vrot.lane.b32.xlu1 %v13251_v28, %s7551_s22 }
 0x2c2   : > { %v9182_v27 = vpop.permute.xlu1 %1373 }
 0x2c3   : > { %1504 = vrot.lane.b32.xlu0 %v8273_v11, %s7551_s22  ;;  %v1469_v11 = vsel %vm789_vm3, %v1467_v48, %v1468_v31  ;;  %v1833_v48 = vld [vmem:[%s12800_s1 + $0x18] sm:$0xff] }
 0x2c4   : > { %1508 = vrot.lane.b32.xlu2 %v13177_v44, %s7551_s22  ;;  %v13254_v44 = vld [vmem:[#allocation61_spill] sm:$0xff] }
 0x2c5   : > { %v9186_v42 = vpop.permute.xlu0 %1383 }
 0x2c6   : > { %v9190_v51 = vpop.permute.xlu2 %1405 }
 0x2c7   : > { %13252 = vst [vmem:[#allocation33_spill] sm:$0xff] %v9190_v51 }
 0x2c8   : > { %1500 = vrot.lane.b32.xlu1 %v13253_v20, %s7551_s22  ;;  %v13257_v20 = vld [vmem:[#allocation69_spill] sm:$0xff] }
 0x2ca   : > { %v9196_v28 = vpop.permute.xlu1 %1379 }
 0x2cb   : > { %1510 = vrot.lane.b32.xlu0 %v8299_v16, %s7551_s22  ;;  %v1834_v16 = vld [vmem:[%s12800_s1 + $0x20] sm:$0xf] }
 0x2cc   : > { %1514 = vrot.lane.b32.xlu2 %v13254_v44, %s7551_s22  ;;  %5838 = vmatpush.msk.msra.mxu0 %vm1936_vm5, %v1834_v16 }
 0x2cd   : > { %v9201_v12 = vpop.permute.xlu0 %1389  ;;  %6022 = vmatpush.msk.msra.mxu3 %vm1936_vm5, %v1834_v16  ;;  %v13259_v16 = vld [vmem:[#allocation57_spill] sm:$0xff]  ;;  %vm3274_vm5 = vcmask 916480  }
 0x2ce   : > { %v9205_v51 = vpop.permute.xlu2 %1411  ;;  %1952 = vmatpush.msra.mxu0 %v1833_v48 }
 0x2cf   : > { %13255 = vst [vmem:[#allocation37_spill] sm:$0xff] %v9205_v51  ;;  %6023 = vmatpush.msra.mxu3 %v1833_v48  ;;  %v1831_v51 = vld [vmem:[%s12800_s1 + $0x8] sm:$0xff]  ;;  %v1830_v48 = vld [vmem:[%s12800_s1] sm:$0xff] }
 0x2d0   : > { %1506 = vrot.lane.b32.xlu1 %v13256_v0, %s7551_s22  ;;  %v1832_v0 = vld [vmem:[%s12800_s1 + $0x10] sm:$0xff] }
 0x2d1   : > { %1953 = vmatpush.msra.mxu0 %v1832_v0  ;;  %6024 = vmatpush.msra.mxu3 %v1832_v0 }
 0x2d2   : > { %v9209_v62 = vpop.permute.xlu1 %1385 }
 0x2d3   : > { %1516 = vrot.lane.b32.xlu0 %v13257_v20, %s7551_s22  ;;  %1954 = vmatpush.msra.mxu0 %v1831_v51 }
 0x2d4   : > { %1520 = vrot.lane.b32.xlu2 %v13186_v1, %s7551_s22  ;;  %6025 = vmatpush.msra.mxu3 %v1831_v51  ;;  %v13262_v51 = vld [vmem:[#allocation62_spill] sm:$0xff] }
 0x2d5   : > { %v9219_v44 = vpop.permute.xlu0 %1395  ;;  %1955 = vmatpush.msra.mxu0 %v1830_v48 }
 0x2d6   : > { %v9226_v20 = vpop.permute.xlu2 %1417  ;;  %6026 = vmatpush.msra.mxu3 %v1830_v48 }
 0x2d7   : > { %13258 = vst [vmem:[#allocation54_spill] sm:$0xff] %v9226_v20 }
 0x2d8   : > { %1512 = vrot.lane.b32.xlu1 %v13259_v16, %s7551_s22 }
 0x2da   : > { %v9233_v1 = vpop.permute.xlu1 %1391 }
 0x2db   : > { %1522 = vrot.lane.b32.xlu0 %v13260_v25, %s7551_s22  ;;  %v1470_v25 = vrot.slane %v9115_v46, 2  ;;  %v13266_v46 = vld [vmem:[#allocation7_spill] sm:$0xff] }
 0x2dc   : > { %1526 = vrot.lane.b32.xlu2 %v8329_v34, %s7551_s22 }
 0x2dd   : > { %v9240_v20 = vpop.permute.xlu0 %1401  ;;  %v1471_v34 = vsel %vm789_vm3, %v1468_v31, %v1470_v25  ;;  %v13268_v31 = vld [vmem:[#allocation127_spill] sm:$0xff] }
 0x2de   : > { %13261 = vst [vmem:[#allocation41_spill] sm:$0xff] %v9240_v20  ;;  %v9244_v0 = vpop.permute.xlu2 %1423  ;;  %v7447_v20 = vld [vmem:[#allocation2] sm:$0xff] }
 0x2e0   : > { %1518 = vrot.lane.b32.xlu1 %v13262_v51, %s7551_s22  ;;  %v1568_v51 = vsel %vm333_vm0, %v7447_v20, %v13264_v38 }
 0x2e2   : > { %v9248_v16 = vpop.permute.xlu1 %1397 }
 0x2e3   : > { %1528 = vrot.lane.b32.xlu0 %v8803_v24, %s7551_s22  ;;  %v1601_v24 = vsel %vm1600_vm6, %v1568_v51, %v13265_v10 }
 0x2e4   : > { %1532 = vrot.lane.b32.xlu2 %v1469_v11, %s7551_s22  ;;  %v1634_v11 = vsel %vm1633_vm7, %v1601_v24, %v13266_v46  ;;  %v13270_v24 = vld [vmem:[#allocation142_spill] sm:$0xff] }
 0x2e5   : > { %v9253_v61 = vpop.permute.xlu0 %1407  ;;  %v1666_v25 = vsel %vm389_vm4, %v1634_v11, %v13268_v31 }
 0x2e6   : > { %13263 = vst [vmem:[#allocation46_spill] sm:$0xff] %v9253_v61  ;;  %v9256_v48 = vpop.permute.xlu2 %1429  ;;  %v1699_v38 = vsel %vm1698_vm8, %v1666_v25, %v8831_v4 }
 0x2e7   : > { %v1732_v10 = vsel %vm1731_vm9, %v1699_v38, %v9045_v49  ;;  %v13275_v38 = vld [vmem:[#allocation42_spill] sm:$0xff] }
 0x2e8   : > { %1524 = vrot.lane.b32.xlu1 %v8312_v40, %s7551_s22  ;;  %v1765_v20 = vsel %vm1764_vm11, %v1732_v10, %v9162_v30  ;;  %v7448_v30 = vld [vmem:[#allocation2 + $0x8] sm:$0xff] }
 0x2e9   : > { %v1569_v10 = vsel %vm333_vm0, %v7448_v30, %v13275_v38 }
 0x2ea   : > { %v9267_v61 = vpop.permute.xlu1 %1403 }
 0x2eb   : > { %13267 = vst [vmem:[#allocation61_spill] sm:$0xff] %v9267_v61  ;;  %1534 = vrot.lane.b32.xlu0 %v1471_v34, %s7551_s22 }
 0x2ed   : > { %v9274_v40 = vpop.permute.xlu0 %1413 }
 0x2ee   : > { %13269 = vst [vmem:[#allocation51_spill] sm:$0xff] %v9274_v40  ;;  %v1473_v51 = vpop.permute.xlu2 %1472  ;;  %v13278_v40 = vld [vmem:[#allocation40_spill] sm:$0xff] }
 0x2ef   : > { %v1798_v34 = vsel %vm1797_vm10, %v1765_v20, %v1473_v51  ;;  %v13276_v20 = vld [vmem:[#allocation85_spill] sm:$0xff] }
 0x2f0   : > { %1530 = vrot.lane.b32.xlu1 %v13270_v24, %s7551_s22  ;;  %5839 = vmatmul.msk.f32.vlgmr.msra.gmra.mxu0 %vm1839_vm12, %v1798_v34  ;;  %v1602_v51 = vsel %vm1600_vm6, %v1569_v10, %v13276_v20  ;;  %v13277_v34 = vld [vmem:[#allocation107_spill] sm:$0xff] }
 0x2f1   : > { %v1635_v24 = vsel %vm1633_vm7, %v1602_v51, %v13277_v34  ;;  %v13280_v34 = vld [vmem:[#allocation47_spill] sm:$0xff] }
 0x2f2   : > { %v9284_v4 = vpop.permute.xlu1 %1409 }
 0x2f3   : > { %13271 = vst [vmem:[#allocation69_spill] sm:$0xff] %v9284_v4 }
 0x2f5   : > { %v9286_v46 = vpop.permute.xlu0 %1419 }
 0x2f6   : > { %13272 = vst [vmem:[#allocation57_spill] sm:$0xff] %v9286_v46  ;;  %v1667_v46 = vsel %vm389_vm4, %v1635_v24, %v13278_v40  ;;  %v1479_v20 = vpop.permute.xlu2 %1478  ;;  %v7449_v40 = vld [vmem:[#allocation2 + $0x18] sm:$0xff]  ;;  %v13281_v24 = vld [vmem:[#allocation90_spill] sm:$0xff] }
 0x2fa   : > { %v9288_v11 = vpop.permute.xlu1 %1415 }
 0x2fb   : > { %13273 = vst [vmem:[#allocation73_spill] sm:$0xff] %v9288_v11  ;;  %v1700_v11 = vsel %vm1698_vm8, %v1667_v46, %v8895_v9  ;;  %v1570_v9 = vsel %vm333_vm0, %v7449_v40, %v13280_v34 }
 0x2fc   : > { %v1733_v61 = vsel %vm1731_vm9, %v1700_v11, %v8993_v56  ;;  %v13282_v56 = vld [vmem:[#allocation8_spill] sm:$0xff] }
 0x2fd   : > { %v9290_v49 = vpop.permute.xlu0 %1425  ;;  %v1766_v30 = vsel %vm1764_vm11, %v1733_v61, %v9182_v27  ;;  %v13283_v61 = vld [vmem:[#allocation120_spill] sm:$0xff] }
 0x2fe   : > { %v1485_v40 = vpop.permute.xlu2 %1484 }
 0x302   : > { %v9292_v31 = vpop.permute.xlu1 %1421 }
 0x305   : > { %v9294_v25 = vpop.permute.xlu0 %1431 }
 0x306   : > { %13274 = vst [vmem:[#allocation62_spill] sm:$0xff] %v9294_v25  ;;  %v1603_v25 = vsel %vm1600_vm6, %v1570_v9, %v13281_v24  ;;  %v7450_v9 = vld [vmem:[#allocation2 + $0x20] sm:$0xff] }
 0x307   : > { %v1636_v11 = vsel %vm1633_vm7, %v1603_v25, %v13282_v56  ;;  %v13284_v24 = vld [vmem:[#allocation52_spill] sm:$0xff] }
 0x308   : > { %v1668_v27 = vsel %vm389_vm4, %v1636_v11, %v13283_v61  ;;  %v1571_v25 = vsel %vm333_vm0, %v7450_v9, %v13284_v24  ;;  %v13285_v11 = vld [vmem:[#allocation77_spill] sm:$0xff]  ;;  %v13286_v61 = vld [vmem:[#allocation10_spill] sm:$0xff]  ;;  %v13289_v24 = vld [vmem:[#allocation27_spill] sm:$0xff] }
 0x30a   : > { %v9306_v4 = vpop.permute.xlu1 %1427 }
 0x30d   : > { %v1475_v38 = vpop.permute.xlu0 %1474 }
 0x30e   : > { %v1799_v10 = vsel %vm1797_vm10, %v1766_v30, %v1475_v38  ;;  %v1701_v30 = vsel %vm1698_vm8, %v1668_v27, %v8919_v7  ;;  %v1604_v7 = vsel %vm1600_vm6, %v1571_v25, %v13285_v11  ;;  %v13287_v27 = vld [vmem:[#allocation129_spill] sm:$0xff]  ;;  %v13290_v25 = vld [vmem:[#allocation150_spill] sm:$0xff] }
 0x30f   : > { %5840 = vmatmul.msk.f32.gmra.mxu0 %vm1839_vm12, %v1799_v10  ;;  %v1734_v38 = vsel %vm1731_vm9, %v1701_v30, %v9037_v54  ;;  %v1637_v54 = vsel %vm1633_vm7, %v1604_v7, %v13286_v61  ;;  %v13288_v30 = vld [vmem:[#allocation149_spill] sm:$0xff]  ;;  %v1572_v11 = vsel %vm333_vm0, %v13290_v25, %v13289_v24  ;;  %v9350_v7 = vpop.permute.xlu2 %1490  ;;  %v13294_v24 = vld [vmem:[#allocation31_spill] sm:$0xff]  ;;  %v13295_v25 = vld [vmem:[#allocation144_spill] sm:$0xff] }
 0x310   : > { %v1767_v10 = vsel %vm1764_vm11, %v1734_v38, %v9131_v21  ;;  %v1669_v21 = vsel %vm389_vm4, %v1637_v54, %v13287_v27  ;;  %v13291_v54 = vld [vmem:[#allocation88_spill] sm:$0xff] }
 0x311   : > { %v1702_v38 = vsel %vm1698_vm8, %v1669_v21, %v13288_v30  ;;  %v1605_v27 = vsel %vm1600_vm6, %v1572_v11, %v13291_v54  ;;  %v1573_v11 = vsel %vm333_vm0, %v13295_v25, %v13294_v24  ;;  %v13300_v24 = vld [vmem:[#allocation146_spill] sm:$0xff] }
 0x312   : > { %v9314_v51 = vpop.permute.xlu1 %1433 }
 0x313   : > { %13279 = vst [vmem:[#allocation36_spill] sm:$0xff] %v9314_v51 }
 0x315   : > { %v1481_v46 = vpop.permute.xlu0 %1480 }
 0x31a   : > { %v1477_v34 = vpop.permute.xlu1 %1476 }
 0x31b   : > { %v1800_v51 = vsel %vm1797_vm10, %v1767_v10, %v1477_v34  ;;  %v1735_v10 = vsel %vm1731_vm9, %v1702_v38, %v9057_v35  ;;  %v13292_v35 = vld [vmem:[#allocation110_spill] sm:$0xff] }
 0x31c   : > { %5841 = vmatmul.msk.f32.gmra.mxu0 %vm1839_vm12, %v1800_v51  ;;  %v1768_v34 = vsel %vm1764_vm11, %v1735_v10, %v9174_v37  ;;  %v1638_v21 = vsel %vm1633_vm7, %v1605_v27, %v13292_v35  ;;  %v13293_v37 = vld [vmem:[#allocation45_spill] sm:$0xff]  ;;  %v13297_v35 = vld [vmem:[#allocation11_spill] sm:$0xff] }
 0x31d   : > { %v1487_v56 = vpop.permute.xlu0 %1486  ;;  %v1801_v9 = vsel %vm1797_vm10, %v1768_v34, %v1479_v20  ;;  %v1670_v30 = vsel %vm389_vm4, %v1638_v21, %v13293_v37  ;;  %v13296_v27 = vld [vmem:[#allocation93_spill] sm:$0xff]  ;;  %v9378_v21 = vpop.permute.xlu2 %1496 }
 0x31e   : > { %v1703_v20 = vsel %vm1698_vm8, %v1670_v30, %v8911_v53  ;;  %v1606_v53 = vsel %vm1600_vm6, %v1573_v11, %v13296_v27  ;;  %v13301_v27 = vld [vmem:[#allocation80_spill] sm:$0xff] }
 0x31f   : > { %v1736_v38 = vsel %vm1731_vm9, %v1703_v20, %v9005_v15  ;;  %v1639_v15 = vsel %vm1633_vm7, %v1606_v53, %v13297_v35  ;;  %v13302_v53 = vld [vmem:[#allocation13_spill] sm:$0xff]  ;;  %v13303_v35 = vld [vmem:[#allocation131_spill] sm:$0xff] }
 0x320   : > { %v1769_v10 = vsel %vm1764_vm11, %v1736_v38, %v9196_v28  ;;  %v13298_v28 = vld [vmem:[#allocation123_spill] sm:$0xff] }
 0x321   : > { %v1671_v37 = vsel %vm389_vm4, %v1639_v15, %v13298_v28  ;;  %v13304_v15 = vld [vmem:[#allocation155_spill] sm:$0xff] }
 0x322   : > { %v1483_v51 = vpop.permute.xlu1 %1482 }
 0x324   : > { %5842 = vmatmul.msk.f32.gmra.mxu0 %vm1839_vm12, %v1801_v9  ;;  %v1802_v9 = vsel %vm1797_vm10, %v1769_v10, %v1481_v46  ;;  %v1704_v46 = vsel %vm1698_vm8, %v1671_v37, %v8933_v55 }
 0x325   : > { %v9353_v61 = vpop.permute.xlu0 %1492  ;;  %v1737_v30 = vsel %vm1731_vm9, %v1704_v46, %v9049_v45  ;;  %v9405_v28 = vpop.permute.xlu2 %1502 }
 0x326   : > { %v1770_v20 = vsel %vm1764_vm11, %v1737_v30, %v9142_v47 }
 0x327   : > { %v1803_v10 = vsel %vm1797_vm10, %v1770_v20, %v1483_v51 }
 0x32a   : > { %v1489_v34 = vpop.permute.xlu1 %1488 }
 0x32c   : > { %5843 = vmatmul.msk.f32.gmra.mxu0 %vm1839_vm12, %v1802_v9  ;;  %v13299_v9 = vld [vmem:[#allocation48_spill] sm:$0xff] }
 0x32d   : > { %v9372_v54 = vpop.permute.xlu0 %1498  ;;  %v1574_v25 = vsel %vm333_vm0, %v13300_v24, %v13299_v9  ;;  %v13306_v9 = vld [vmem:[#allocation156_spill] sm:$0xff] }
 0x32e   : > { %v1607_v55 = vsel %vm1600_vm6, %v1574_v25, %v13301_v27  ;;  %v13307_v27 = vld [vmem:[#allocation91_spill] sm:$0xff] }
 0x32f   : > { %v1640_v45 = vsel %vm1633_vm7, %v1607_v55, %v13302_v53  ;;  %v13308_v53 = vld [vmem:[#allocation9_spill] sm:$0xff] }
 0x330   : > { %v1672_v47 = vsel %vm389_vm4, %v1640_v45, %v13303_v35  ;;  %v13309_v45 = vld [vmem:[#allocation50_spill] sm:$0xff] }
 0x331   : > { %v1705_v51 = vsel %vm1698_vm8, %v1672_v47, %v13304_v15  ;;  %v9432_v15 = vpop.permute.xlu2 %1508 }
 0x332   : > { %v9388_v38 = vpop.permute.xlu1 %1494  ;;  %v1738_v37 = vsel %vm1731_vm9, %v1705_v51, %v9072_v22 }
 0x333   : > { %v1771_v46 = vsel %vm1764_vm11, %v1738_v37, %v9186_v42 }
 0x334   : > { %5844 = vmatmul.msk.f32.gmra.mxu0 %vm1839_vm12, %v1803_v10  ;;  %v1804_v20 = vsel %vm1797_vm10, %v1771_v46, %v1485_v40  ;;  %v13305_v10 = vld [vmem:[#allocation58_spill] sm:$0xff] }
 0x335   : > { %v9395_v11 = vpop.permute.xlu0 %1504  ;;  %v1575_v24 = vsel %vm333_vm0, %v13306_v9, %v13305_v10  ;;  %v13310_v46 = vld [vmem:[#allocation34_spill] sm:$0xff] }
 0x336   : > { %v1608_v55 = vsel %vm1600_vm6, %v1575_v24, %v13307_v27  ;;  %v7451_v24 = vld [vmem:[#allocation2 + $0x128] sm:$0xff] }
 0x337   : > { %v1641_v22 = vsel %vm1633_vm7, %v1608_v55, %v13308_v53  ;;  %v13313_v27 = vld [vmem:[#allocation81_spill] sm:$0xff]  ;;  %v13314_v55 = vld [vmem:[#allocation14_spill] sm:$0xff] }
 0x338   : > { %v1673_v42 = vsel %vm389_vm4, %v1641_v22, %v13309_v45  ;;  %v13315_v22 = vld [vmem:[#allocation109_spill] sm:$0xff] }
 0x339   : > { %v1706_v40 = vsel %vm1698_vm8, %v1673_v42, %v8923_v13  ;;  %v13312_v13 = vld [vmem:[#allocation96_spill] sm:$0xff]  ;;  %v13316_v45 = vld [vmem:[#allocation125_spill] sm:$0xff] }
 0x33a   : > { %v9411_v30 = vpop.permute.xlu1 %1500  ;;  %v1739_v35 = vsel %vm1731_vm9, %v1706_v40, %v9017_v17  ;;  %v13317_v40 = vld [vmem:[#allocation114_spill] sm:$0xff] }
 0x33b   : > { %v1772_v47 = vsel %vm1764_vm11, %v1739_v35, %v9209_v62  ;;  %v1593_v62 = vsel %vm333_vm0, %v7451_v24, %v13313_v27 }
 0x33c   : > { %5845 = vmatmul.msk.f32.gmra.mxu0 %vm1839_vm12, %v1804_v20  ;;  %v1805_v37 = vsel %vm1797_vm10, %v1772_v47, %v1487_v56  ;;  %v13311_v20 = vld [vmem:[#allocation148_spill] sm:$0xff]  ;;  %v1626_v56 = vsel %vm1600_vm6, %v1593_v62, %v13315_v22 }
 0x33d   : > { %v9418_v25 = vpop.permute.xlu0 %1510  ;;  %v1576_v10 = vsel %vm333_vm0, %v13311_v20, %v13310_v46  ;;  %v1659_v35 = vsel %vm1633_vm7, %v1626_v56, %v13317_v40  ;;  %v13320_v62 = vld [vmem:[#allocation152_spill] sm:$0xff]  ;;  %v13324_v40 = vld [vmem:[#allocation161_spill] sm:$0xff] }
 0x33e   : > { %v1609_v17 = vsel %vm1600_vm6, %v1576_v10, %v13312_v13 }
 0x33f   : > { %v1642_v53 = vsel %vm1633_vm7, %v1609_v17, %v13314_v55 }
 0x340   : > { %v1674_v42 = vsel %vm389_vm4, %v1642_v53, %v13316_v45  ;;  %v9475_v53 = vpop.permute.xlu2 %1514  ;;  %v13323_v45 = vld [vmem:[#allocation133_spill] sm:$0xff] }
 0x341   : > { %v1707_v47 = vsel %vm1698_vm8, %v1674_v42, %v8945_v33  ;;  %v13319_v33 = vld [vmem:[#allocation53_spill] sm:$0xff] }
 0x342   : > { %v9434_v51 = vpop.permute.xlu1 %1506  ;;  %v1740_v20 = vsel %vm1731_vm9, %v1707_v47, %v9063_v59  ;;  %v1577_v55 = vsel %vm333_vm0, %v13320_v62, %v13319_v33  ;;  %v13328_v62 = vld [vmem:[#allocation94_spill] sm:$0xff] }
 0x343   : > { %v1773_v13 = vsel %vm1764_vm11, %v1740_v20, %v9154_v41  ;;  %v13321_v41 = vld [vmem:[#allocation83_spill] sm:$0xff] }
 0x344   : > { %5846 = vmatmul.msk.f32.gmra.mxu0 %vm1839_vm12, %v1805_v37  ;;  %v13318_v37 = vld [vmem:[#allocation157_spill] sm:$0xff]  ;;  %v1806_v27 = vsel %vm1797_vm10, %v1773_v13, %v1489_v34  ;;  %v1610_v22 = vsel %vm1600_vm6, %v1577_v55, %v13321_v41  ;;  %v13325_v20 = vld [vmem:[#allocation63_spill] sm:$0xff]  ;;  %v13329_v55 = vld [vmem:[#allocation4_spill] sm:$0xff] }
 0x345   : > { %v9441_v9 = vpop.permute.xlu0 %1516  ;;  %v1691_v46 = vsel %vm389_vm4, %v1659_v35, %v13318_v37 }
 0x346   : > { %v1724_v10 = vsel %vm1698_vm8, %v1691_v46, %v9001_v5 }
 0x347   : > { %v1757_v24 = vsel %vm1731_vm9, %v1724_v10, %v9092_v52  ;;  %v13322_v52 = vld [vmem:[#allocation16_spill] sm:$0xff]  ;;  %v13326_v10 = vld [vmem:[#allocation162_spill] sm:$0xff] }
 0x348   : > { %v1790_v59 = vsel %vm1764_vm11, %v1757_v24, %v9292_v31  ;;  %v1643_v34 = vsel %vm1633_vm7, %v1610_v22, %v13322_v52  ;;  %v1578_v13 = vsel %vm333_vm0, %v13326_v10, %v13325_v20  ;;  %v7452_v24 = vld [vmem:[#allocation2 + $0x138] sm:$0xff]  ;;  %v9510_v22 = vpop.permute.xlu2 %1520 }
 0x349   : > { %v1675_v42 = vsel %vm389_vm4, %v1643_v34, %v13323_v45  ;;  %v13333_v34 = vld [vmem:[#allocation138_spill] sm:$0xff] }
 0x34a   : > { %v9465_v17 = vpop.permute.xlu1 %1512  ;;  %v1708_v31 = vsel %vm1698_vm8, %v1675_v42, %v13324_v40 }
 0x34b   : > { %v1741_v35 = vsel %vm1731_vm9, %v1708_v31, %v9084_v39  ;;  %v1611_v39 = vsel %vm1600_vm6, %v1578_v13, %v13328_v62  ;;  %v13334_v13 = vld [vmem:[#allocation39_spill] sm:$0xff]  ;;  %v13339_v62 = vld [vmem:[#allocation17_spill] sm:$0xff] }
 0x34c   : > { %5847 = vmatmul.msk.f32.gmra.mxu0 %vm1839_vm12, %v1806_v27  ;;  %v1774_v47 = vsel %vm1764_vm11, %v1741_v35, %v9201_v12  ;;  %v13327_v27 = vld [vmem:[#allocation65_spill] sm:$0xff] }
 0x34d   : > { %v1523_v5 = vpop.permute.xlu0 %1522  ;;  %v1807_v46 = vsel %vm1797_vm10, %v1774_v47, %v9350_v7  ;;  %v1594_v33 = vsel %vm333_vm0, %v7452_v24, %v13327_v27  ;;  %v13331_v7 = vld [vmem:[#allocation122_spill] sm:$0xff]  ;;  %v13336_v27 = vld [vmem:[#allocation79_spill] sm:$0xff] }
 0x34e   : > { %v1823_v56 = vsel %vm1797_vm10, %v1790_v59, %v1523_v5  ;;  %v1627_v12 = vsel %vm1600_vm6, %v1594_v33, %v13329_v55  ;;  %v13330_v59 = vld [vmem:[#allocation12_spill] sm:$0xff]  ;;  %v13338_v33 = vld [vmem:[#allocation101_spill] sm:$0xff]  ;;  %v13340_v55 = vld [vmem:[#allocation126_spill] sm:$0xff] }
 0x34f   : > { %5864 = vmatmul.msk.f32.vlgmr.msra.gmra.mxu3 %vm1839_vm12, %v1823_v56  ;;  %v1644_v5 = vsel %vm1633_vm7, %v1611_v39, %v13330_v59  ;;  %v1660_v41 = vsel %vm1633_vm7, %v1627_v12, %v13331_v7  ;;  %v13332_v56 = vld [vmem:[#allocation56_spill] sm:$0xff]  ;;  %v13342_v7 = vld [vmem:[#allocation153_spill] sm:$0xff] }
 0x350   : > { %v1676_v52 = vsel %vm389_vm4, %v1644_v5, %v13332_v56  ;;  %v1692_v45 = vsel %vm389_vm4, %v1660_v41, %v13333_v34  ;;  %v13341_v59 = vld [vmem:[#allocation128_spill] sm:$0xff]  ;;  %v1527_v34 = vpop.permute.xlu2 %1526 }
 0x351   : > { %v1709_v42 = vsel %vm1698_vm8, %v1676_v52, %v8937_v18  ;;  %v1725_v40 = vsel %vm1698_vm8, %v1692_v45, %v9021_v29  ;;  %v13335_v29 = vld [vmem:[#allocation154_spill] sm:$0xff] }
 0x352   : > { %v9492_v37 = vpop.permute.xlu1 %1518  ;;  %v1742_v31 = vsel %vm1731_vm9, %v1709_v42, %v9029_v58  ;;  %v1758_v35 = vsel %vm1731_vm9, %v1725_v40, %v9138_v8  ;;  %v1579_v24 = vsel %vm333_vm0, %v13335_v29, %v13334_v13  ;;  %v7453_v58 = vld [vmem:[#allocation2 + $0x140] sm:$0xff] }
 0x353   : > { %v1775_v47 = vsel %vm1764_vm11, %v1742_v31, %v9233_v1  ;;  %v1595_v8 = vsel %vm333_vm0, %v7453_v58, %v13336_v27  ;;  %v13337_v1 = vld [vmem:[#allocation99_spill] sm:$0xff]  ;;  %v13349_v29 = vld [vmem:[#allocation116_spill] sm:$0xff] }
 0x354   : > { %5848 = vmatmul.msk.f32.gmra.mxu0 %vm1839_vm12, %v1807_v46  ;;  %v1791_v46 = vsel %vm1764_vm11, %v1758_v35, %v9244_v0  ;;  %v1808_v10 = vsel %vm1797_vm10, %v1775_v47, %v9353_v61  ;;  %v1612_v0 = vsel %vm1600_vm6, %v1579_v24, %v13337_v1  ;;  %v1628_v61 = vsel %vm1600_vm6, %v1595_v8, %v13338_v33  ;;  %v13343_v47 = vld [vmem:[#allocation59_spill] sm:$0xff] }
 0x355   : > { %v1645_v39 = vsel %vm1633_vm7, %v1612_v0, %v13339_v62  ;;  %v1661_v12 = vsel %vm1633_vm7, %v1628_v61, %v13340_v55  ;;  %v13350_v58 = vld [vmem:[#allocation135_spill] sm:$0xff]  ;;  %v1529_v61 = vpop.permute.xlu0 %1528 }
 0x356   : > { %v1677_v5 = vsel %vm389_vm4, %v1645_v39, %v13341_v59  ;;  %v1693_v41 = vsel %vm389_vm4, %v1661_v12, %v13342_v7  ;;  %v13351_v8 = vld [vmem:[#allocation163_spill] sm:$0xff] }
 0x357   : > { %v1710_v56 = vsel %vm1698_vm8, %v1677_v5, %v8957_v26  ;;  %v1726_v52 = vsel %vm1698_vm8, %v1693_v41, %v8965_v23  ;;  %v13344_v23 = vld [vmem:[#allocation158_spill] sm:$0xff]  ;;  %v7455_v7 = vld [vmem:[#allocation2 + $0x158] sm:$0xff] }
 0x358   : > { %v1743_v45 = vsel %vm1731_vm9, %v1710_v56, %v9076_v6  ;;  %v1759_v42 = vsel %vm1731_vm9, %v1726_v52, %v9158_v50  ;;  %v13345_v6 = vld [vmem:[#allocation84_spill] sm:$0xff]  ;;  %v13346_v50 = vld [vmem:[#allocation86_spill] sm:$0xff]  ;;  %v13356_v52 = vld [vmem:[#allocation5_spill] sm:$0xff] }
 0x359   : > { %v1776_v40 = vsel %vm1764_vm11, %v1743_v45, %v9166_v60  ;;  %v1792_v31 = vsel %vm1764_vm11, %v1759_v42, %v9290_v49  ;;  %v13347_v49 = vld [vmem:[#allocation112_spill] sm:$0xff]  ;;  %v13353_v5 = vld [vmem:[#allocation166_spill] sm:$0xff]  ;;  %v13357_v45 = vmov 0.0   ;;  %v13358_v42 = vld [vmem:[#allocation15_spill] sm:$0xff] }
 0x35a   : > { %v1525_v20 = vpop.permute.xlu1 %1524  ;;  %v1809_v35 = vsel %vm1797_vm10, %v1776_v40, %v9388_v38  ;;  %v1825_v26 = vsel %vm1797_vm10, %v1792_v31, %v1527_v34  ;;  %v13354_v41 = vld [vmem:[#allocation70_spill] sm:$0xff]  ;;  %396 = vst.msk [vmem:[#allocation3 + $0x28] sm:$0x3] %vm392_vm13, %v13357_v45  ;;  %v13359_v31 = vld [vmem:[#allocation124_spill] sm:$0xff] }
 0x35b   : > { %v1824_v18 = vsel %vm1797_vm10, %v1791_v46, %v1525_v20  ;;  %v1580_v46 = vsel %vm333_vm0, %v13344_v23, %v13343_v47  ;;  %v7454_v20 = vld [vmem:[#allocation2 + $0x150] sm:$0xff]  ;;  %393 = vst.msk [vmem:[#allocation3 + $0x10] sm:$0x3] %vm392_vm13, %v13357_v45  ;;  %v13360_v47 = vld [vmem:[#allocation139_spill] sm:$0xff] }
 0x35c   : > { %5849 = vmatmul.msk.f32.gmra.mxu0 %vm1839_vm12, %v1808_v10  ;;  %5865 = vmatmul.msk.f32.gmra.mxu3 %vm1839_vm12, %v1824_v18  ;;  %v1596_v10 = vsel %vm333_vm0, %v7454_v20, %v13345_v6  ;;  %v1613_v60 = vsel %vm1600_vm6, %v1580_v46, %v13346_v50  ;;  %v13348_v18 = vld [vmem:[#allocation19_spill] sm:$0xff]  ;;  %v13361_v46 = vld [vmem:[#allocation141_spill] sm:$0xff]  ;;  %399 = vst.msk [vmem:[#allocation3 + $0x40] sm:$0x3] %vm392_vm13, %v13357_v45 }
 0x35d   : > { %v1629_v38 = vsel %vm1600_vm6, %v1596_v10, %v13347_v49  ;;  %v1646_v13 = vsel %vm1633_vm7, %v1613_v60, %v13348_v18  ;;  %402 = vst.msk [vmem:[#allocation3 + $0x58] sm:$0x3] %vm392_vm13, %v13357_v45  ;;  %v13363_v18 = vld [vmem:[#allocation160_spill] sm:$0xff] }
 0x35e   : > { %v1662_v24 = vsel %vm1633_vm7, %v1629_v38, %v13349_v29  ;;  %v1678_v27 = vsel %vm389_vm4, %v1646_v13, %v13350_v58  ;;  %405 = vst.msk [vmem:[#allocation3 + $0x70] sm:$0x3] %vm392_vm13, %v13357_v45  ;;  %v7456_v29 = vld [vmem:[#allocation2 + $0x168] sm:$0xff]  ;;  %v13366_v58 = vld [vmem:[#allocation104_spill] sm:$0xff] }
 0x35f   : > { %v1694_v1 = vsel %vm389_vm4, %v1662_v24, %v13351_v8  ;;  %v1711_v0 = vsel %vm1698_vm8, %v1678_v27, %v8901_v32  ;;  %v9599_v32 = vld [vmem:[%s12801_s2] ss:$0 sm:$0xff]  ;;  %408 = vst.msk [vmem:[#allocation3 + $0x88] sm:$0x3] %vm392_vm13, %v13357_v45 }
 0x360   : > { %v1727_v33 = vsel %vm1698_vm8, %v1694_v1, %v9013_v36  ;;  %v1744_v62 = vsel %vm1731_vm9, %v1711_v0, %v9096_v43  ;;  %v13352_v43 = vld [vmem:[#allocation67_spill] sm:$0xff]  ;;  %411 = vst.msk [vmem:[#allocation3 + $0xa0] sm:$0x3] %vm392_vm13, %v13357_v45  ;;  %v13367_v1 = vld [vmem:[#allocation113_spill] sm:$0xff] }
 0x361   : > { %v1760_v39 = vsel %vm1731_vm9, %v1727_v33, %v9104_v2  ;;  %v1777_v55 = vsel %vm1764_vm11, %v1744_v62, %v9219_v44  ;;  %v1581_v2 = vsel %vm333_vm0, %v13353_v5, %v13352_v43  ;;  %v1597_v44 = vsel %vm333_vm0, %v7455_v7, %v13354_v41  ;;  %414 = vst.msk [vmem:[#allocation3 + $0xb8] sm:$0x3] %vm392_vm13, %v13357_v45  ;;  %v13368_v33 = vld [vmem:[#allocation35_spill] sm:$0xff]  ;;  %v13369_v62 = vld [vmem:[#allocation130_spill] sm:$0xff]  ;;  %v1533_v5 = vpop.permute.xlu2 %1532 }
 0x362   : > { %v1793_v12 = vsel %vm1764_vm11, %v1760_v39, %v9306_v4  ;;  %v1810_v36 = vsel %vm1797_vm10, %v1777_v55, %v9378_v21  ;;  %v13355_v4 = vld [vmem:[#allocation97_spill] sm:$0xff]  ;;  %v1630_v21 = vsel %vm1600_vm6, %v1597_v44, %v13356_v52  ;;  %v1531_v50 = vpop.permute.xlu1 %1530  ;;  %417 = vst.msk [vmem:[#allocation3 + $0xd0] sm:$0x3] %vm392_vm13, %v13357_v45  ;;  %v13370_v55 = vld [vmem:[#allocation159_spill] sm:$0xff]  ;;  %v13373_v41 = vld [vmem:[#allocation30_spill] sm:$0xff] }
 0x363   : > { %v1826_v59 = vsel %vm1797_vm10, %v1793_v12, %v1529_v61  ;;  %v1614_v56 = vsel %vm1600_vm6, %v1581_v2, %v13355_v4  ;;  %420 = vst.msk [vmem:[#allocation3 + $0xe8] sm:$0x3] %vm392_vm13, %v13357_v45  ;;  %v13372_v2 = vld [vmem:[#allocation184_spill] sm:$0xff]  ;;  %v13374_v4 = vld [vmem:[#allocation43_spill] sm:$0xff] }
 0x364   : > { %5850 = vmatmul.msk.f32.gmra.mxu0 %vm1839_vm12, %v1809_v35  ;;  %5866 = vmatmul.msk.f32.gmra.mxu3 %vm1839_vm12, %v1825_v26  ;;  %v1647_v40 = vsel %vm1633_vm7, %v1614_v56, %v13358_v42  ;;  %v1663_v35 = vsel %vm1633_vm7, %v1630_v21, %v13359_v31  ;;  %423 = vst.msk [vmem:[#allocation3 + $0x100] sm:$0x3] %vm392_vm13, %v13357_v45  ;;  %v13376_v42 = vld [vmem:[#allocation64_spill] sm:$0xff] }
 0x365   : > { %v1679_v23 = vsel %vm389_vm4, %v1647_v40, %v13360_v47  ;;  %v1695_v20 = vsel %vm389_vm4, %v1663_v35, %v13361_v46  ;;  %426 = vst.msk [vmem:[#allocation3 + $0x118] sm:$0x3] %vm392_vm13, %v13357_v45  ;;  %v13377_v40 = vld [vmem:[#allocation164_spill] sm:$0xff]  ;;  %v7457_v35 = vld [vmem:[#allocation2 + $0x170] sm:$0xff] }
 0x366   : > { %v1712_v6 = vsel %vm1698_vm8, %v1679_v23, %v8949_v14  ;;  %v1728_v10 = vsel %vm1698_vm8, %v1695_v20, %v9033_v57  ;;  %429 = vst.msk [vmem:[#allocation3 + $0x130] sm:$0x3] %vm392_vm13, %v13357_v45  ;;  %v1583_v31 = vsel %vm333_vm0, %v13377_v40, %v13376_v42  ;;  %v13380_v46 = vld [vmem:[#allocation6_spill] sm:$0xff]  ;;  %v13400_v42 = vld [vmem:[#allocation105_spill] sm:$0xff] }
 0x367   : > { %v1745_v60 = vsel %vm1731_vm9, %v1712_v6, %v9041_v63  ;;  %v1761_v49 = vsel %vm1731_vm9, %v1728_v10, %v9150_v3  ;;  %v13362_v3 = vld [vmem:[#allocation44_spill] sm:$0xff]  ;;  %432 = vst.msk [vmem:[#allocation3 + $0x148] sm:$0x3] %vm392_vm13, %v13357_v45  ;;  %v13381_v6 = vld [vmem:[#allocation22_spill] sm:$0xff] }
 0x368   : > { %v1778_v14 = vsel %vm1764_vm11, %v1745_v60, %v9248_v16  ;;  %v1794_v57 = vsel %vm1764_vm11, %v1761_v49, %v9256_v48  ;;  %v1582_v13 = vsel %vm333_vm0, %v13363_v18, %v13362_v3  ;;  %v13364_v16 = vld [vmem:[#allocation82_spill] sm:$0xff]  ;;  %435 = vst.msk [vmem:[#allocation3 + $0x160] sm:$0x3] %vm392_vm13, %v13357_v45  ;;  %v13383_v49 = vld [vmem:[#allocation137_spill] sm:$0xff]  ;;  %v13386_v18 = vld [vmem:[#allocation180_spill] sm:$0xff] }
 0x369   : > { %v1811_v38 = vsel %vm1797_vm10, %v1778_v14, %v9372_v54  ;;  %v1827_v63 = vsel %vm1797_vm10, %v1794_v57, %v1531_v50  ;;  %v1598_v24 = vsel %vm333_vm0, %v7456_v29, %v13364_v16  ;;  %v13365_v48 = vld [vmem:[#allocation102_spill] sm:$0xff]  ;;  %438 = vst.msk [vmem:[#allocation3 + $0x178] sm:$0x3] %vm392_vm13, %v13357_v45  ;;  %v13382_v50 = vld [vmem:[#allocation119_spill] sm:$0xff]  ;;  %v1535_v29 = vpop.permute.xlu0 %1534  ;;  %v13387_v16 = vld [vmem:[#allocation28_spill] sm:$0xff] }
 0x36a   : > { %v1615_v54 = vsel %vm1600_vm6, %v1582_v13, %v13365_v48  ;;  %v1631_v27 = vsel %vm1600_vm6, %v1598_v24, %v13366_v58  ;;  %441 = vst.msk [vmem:[#allocation3 + $0x190] sm:$0x3] %vm392_vm13, %v13357_v45  ;;  %v13384_v57 = vld [vmem:[#allocation167_spill] sm:$0xff]  ;;  %v13388_v48 = vld [vmem:[#allocation185_spill] sm:$0xff] }
 0x36b   : > { %v1648_v0 = vsel %vm1633_vm7, %v1615_v54, %v13367_v1  ;;  %v1664_v61 = vsel %vm1633_vm7, %v1631_v27, %v13368_v33  ;;  %444 = vst.msk [vmem:[#allocation3 + $0x1a8] sm:$0x3] %vm392_vm13, %v13357_v45  ;;  %v13389_v58 = vld [vmem:[#allocation41_spill] sm:$0xff]  ;;  %v7458_v33 = vld [vmem:[#allocation2 + $0xc0] sm:$0xff] }
 0x36c   : > { %5851 = vmatmul.msk.f32.gmra.mxu0 %vm1839_vm12, %v1810_v36  ;;  %5867 = vmatmul.msk.f32.gmra.mxu3 %vm1839_vm12, %v1826_v59  ;;  %v1680_v39 = vsel %vm389_vm4, %v1648_v0, %v13369_v62  ;;  %v1696_v12 = vsel %vm389_vm4, %v1664_v61, %v13370_v55  ;;  %v13371_v59 = vld [vmem:[#allocation175_spill] sm:$0xff] }
 0x36d   : > { %v1957_v34 = vpop.f32.mrf.mxu0  ;;  %v1713_v36 = vsel %vm1698_vm8, %v1680_v39, %v8971_v19  ;;  %v1729_v43 = vsel %vm1698_vm8, %v1696_v12, %v13371_v59  ;;  %v13375_v19 = vld [vmem:[#allocation62_spill] sm:$0xff]  ;;  %v13391_v61 = vld [vmem:[#allocation71_spill] sm:$0xff]  ;;  %v13392_v39 = vld [vmem:[#allocation100_spill] sm:$0xff] }
 0x36e   : > { %v1958_v26 = vadd.f32 %v9599_v32, %v1957_v34  ;;  %v1746_v7 = vsel %vm1731_vm9, %v1713_v36, %v13372_v2  ;;  %v1762_v44 = vsel %vm1731_vm9, %v1729_v43, %v13373_v41  ;;  %v1584_v62 = vsel %vm333_vm0, %v7458_v33, %v13391_v61  ;;  %v13393_v12 = vld [vmem:[#allocation18_spill] sm:$0xff]  ;;  %v13396_v2 = vld [vmem:[#allocation181_spill] sm:$0xff] }
 0x36f   : > { %v1779_v56 = vsel %vm1764_vm11, %v1746_v7, %v13374_v4  ;;  %v1795_v52 = vsel %vm1764_vm11, %v1762_v44, %v13375_v19  ;;  %v1617_v55 = vsel %vm1600_vm6, %v1584_v62, %v13392_v39  ;;  %v13394_v59 = vld [vmem:[#allocation66_spill] sm:$0xff]  ;;  %v13397_v41 = vld [vmem:[#allocation61_spill] sm:$0xff]  ;;  %v13415_v62 = vld [vmem:[#allocation103_spill] sm:$0xff] }
 0x370   : > { %7177 = vtanh.f32 %v1958_v26  ;;  %v1812_v21 = vsel %vm1797_vm10, %v1779_v56, %v9411_v30  ;;  %v1828_v34 = vsel %vm1797_vm10, %v1795_v52, %v1533_v5  ;;  %v13378_v26 = vld [vmem:[#allocation87_spill] sm:$0xff]  ;;  %v13379_v30 = vld [vmem:[#allocation89_spill] sm:$0xff]  ;;  %v1650_v36 = vsel %vm1633_vm7, %v1617_v55, %v13393_v12 }
 0x371   : > { %v1599_v47 = vsel %vm333_vm0, %v7457_v35, %v13378_v26  ;;  %v1616_v23 = vsel %vm1600_vm6, %v1583_v31, %v13379_v30  ;;  %v1682_v43 = vsel %vm389_vm4, %v1650_v36, %v13394_v59  ;;  %v13398_v19 = vld [vmem:[#allocation49_spill] sm:$0xff]  ;;  %v13401_v31 = vld [vmem:[#allocation115_spill] sm:$0xff]  ;;  %v13402_v26 = vld [vmem:[#allocation132_spill] sm:$0xff] }
 0x372   : > { %v1632_v20 = vsel %vm1600_vm6, %v1599_v47, %v13380_v46  ;;  %v1649_v10 = vsel %vm1633_vm7, %v1616_v23, %v13381_v6  ;;  %v13399_v52 = vld [vmem:[#allocation165_spill] sm:$0xff]  ;;  %v13404_v23 = vld [vmem:[#allocation20_spill] sm:$0xff] }
 0x373   : > { %v1665_v60 = vsel %vm1633_vm7, %v1632_v20, %v13382_v50  ;;  %v1681_v14 = vsel %vm389_vm4, %v1649_v10, %v13383_v49  ;;  %v13405_v20 = vld [vmem:[#allocation33_spill] sm:$0xff]  ;;  %v13406_v49 = vld [vmem:[#allocation68_spill] sm:$0xff] }
 0x374   : > { %5852 = vmatmul.msk.f32.gmra.mxu0 %vm1839_vm12, %v1811_v38  ;;  %5868 = vmatmul.msk.f32.gmra.mxu3 %vm1839_vm12, %v1827_v63  ;;  %v1697_v38 = vsel %vm389_vm4, %v1665_v60, %v13384_v57  ;;  %v13385_v63 = vld [vmem:[#allocation168_spill] sm:$0xff]  ;;  %v7459_v60 = vld [vmem:[#allocation2 + $0xd8] sm:$0xff]  ;;  %v3324_v57 = vld [vmem:[%s12802_s3 + $0x88] sm:$0xff] }
 0x375   : > { %v1714_v3 = vsel %vm1698_vm8, %v1681_v14, %v13385_v63  ;;  %v1730_v13 = vsel %vm1698_vm8, %v1697_v38, %v13386_v18  ;;  %v1586_v14 = vsel %vm333_vm0, %v7459_v60, %v13406_v49  ;;  %v13407_v38 = vld [vmem:[#allocation92_spill] sm:$0xff]  ;;  %3520 = vmatpush.msra.mxu2 %v3324_v57  ;;  %v13416_v12 = vld [vmem:[#allocation21_spill] sm:$0xff] }
 0x376   : > { %v7178_v8 = vpop.eup %7177  ;;  %v1747_v24 = vsel %vm1731_vm9, %v1714_v3, %v13387_v16  ;;  %v1763_v54 = vsel %vm1731_vm9, %v1730_v13, %v13388_v48  ;;  %v1619_v63 = vsel %vm1600_vm6, %v1586_v14, %v13407_v38  ;;  %v13408_v3 = vld [vmem:[#allocation25_spill] sm:$0xff]  ;;  %v3323_v18 = vld [vmem:[%s12802_s3 + $0x80] sm:$0xff] }
 0x377   : > { %2086 = vst.msk [vmem:[#allocation3 + $0x19] sm:$0xff] %vm389_vm4, %v7178_v8  ;;  %v1780_v27 = vsel %vm1764_vm11, %v1747_v24, %v13389_v58  ;;  %v13390_v8 = vld [vmem:[#allocation36_spill] sm:$0xff]  ;;  %3521 = vmatpush.msra.mxu2 %v3323_v18  ;;  %v13410_v16 = vld [vmem:[#allocation169_spill] sm:$0xff] }
 0x378   : > { %v1796_v1 = vsel %vm1764_vm11, %v1763_v54, %v13390_v8  ;;  %v1813_v45 = vsel %vm1797_vm10, %v1780_v27, %v9405_v28  ;;  %v13395_v28 = vld [vmem:[#allocation173_spill] sm:$0xff]  ;;  %v13409_v13 = vld [vmem:[#allocation140_spill] sm:$0xff]  ;;  %v13412_v8 = vld [vmem:[#allocation75_spill] sm:$0xff] }
 0x379   : > { %v1829_v0 = vsel %vm1797_vm10, %v1796_v1, %v1535_v29  ;;  %v1715_v5 = vsel %vm1698_vm8, %v1682_v43, %v13395_v28  ;;  %v13411_v48 = vld [vmem:[#allocation117_spill] sm:$0xff]  ;;  %v13413_v1 = vld [vmem:[#allocation170_spill] sm:$0xff] }
 0x37a   : > { %v1748_v7 = vsel %vm1731_vm9, %v1715_v5, %v13396_v2  ;;  %v9814_v5 = vld [vmem:[#allocation3] sm:$0xff]  ;;  %v13421_v49 = vld [vmem:[#allocation69_spill] sm:$0xff] }
 0x37b   : > { %v1781_v44 = vsel %vm1764_vm11, %v1748_v7, %v13397_v41  ;;  %v13417_v7 = vld [vmem:[#allocation145_spill] sm:$0xff] }
 0x37c   : > { %5853 = vmatmul.msk.f32.gmra.mxu0 %vm1839_vm12, %v1812_v21  ;;  %5869 = vmatmul.msk.f32.gmra.mxu3 %vm1839_vm12, %v1828_v34  ;;  %v1814_v4 = vsel %vm1797_vm10, %v1781_v44, %v9395_v11  ;;  %v1585_v21 = vsel %vm333_vm0, %v13399_v52, %v13398_v19  ;;  %v13403_v11 = vld [vmem:[#allocation176_spill] sm:$0xff]  ;;  %v2220_v19 = vrot.slane %v9814_v5, 1 }
 0x37d   : > { %v1618_v40 = vsel %vm1600_vm6, %v1585_v21, %v13400_v42 }
 0x37e   : > { %v1651_v35 = vsel %vm1633_vm7, %v1618_v40, %v13401_v31  ;;  %v2121_v27 = vld [vmem:[#allocation3 + $0x18] sm:$0xff]  ;;  %v13418_v40 = vld [vmem:[#allocation174_spill] sm:$0xff] }
 0x37f   : > { %v1683_v47 = vsel %vm389_vm4, %v1651_v35, %v13402_v26  ;;  %v2225_v28 = vrot.slane %v2121_v27, 1  ;;  %v2401_v2 = vrot.slane %v2121_v27, 2  ;;  %v13428_v27 = vld [vmem:[#allocation23_spill] sm:$0xff] }
 0x380   : > { %v1716_v30 = vsel %vm1698_vm8, %v1683_v47, %v13403_v11 }
 0x381   : > { %v1749_v46 = vsel %vm1731_vm9, %v1716_v30, %v13404_v23 }
 0x382   : > { %v1782_v6 = vsel %vm1764_vm11, %v1749_v46, %v13405_v20  ;;  %v13420_v46 = vld [vmem:[#allocation182_spill] sm:$0xff] }
 0x383   : > { %v1815_v10 = vsel %vm1797_vm10, %v1782_v6, %v9434_v51  ;;  %v1652_v51 = vsel %vm1633_vm7, %v1619_v63, %v13408_v3  ;;  %v7460_v3 = vld [vmem:[#allocation2 + $0xf0] sm:$0xff] }
 0x384   : > { %5854 = vmatmul.msk.f32.gmra.mxu0 %vm1839_vm12, %v1813_v45  ;;  %5870 = vmatmul.msk.f32.gmra.mxu3 %vm1839_vm12, %v1829_v0  ;;  %v1684_v29 = vsel %vm389_vm4, %v1652_v51, %v13409_v13  ;;  %v1587_v45 = vsel %vm333_vm0, %v13413_v1, %v13412_v8  ;;  %v13414_v0 = vld [vmem:[#allocation46_spill] sm:$0xff]  ;;  %v13423_v51 = vld [vmem:[#allocation55_spill] sm:$0xff]  ;;  %v13424_v13 = vld [vmem:[#allocation108_spill] sm:$0xff] }
 0x385   : > { %v1717_v24 = vsel %vm1698_vm8, %v1684_v29, %v13410_v16  ;;  %v1620_v39 = vsel %vm1600_vm6, %v1587_v45, %v13415_v62  ;;  %v1588_v18 = vsel %vm333_vm0, %v7460_v3, %v13423_v51  ;;  %v13425_v16 = vld [vmem:[#allocation118_spill] sm:$0xff]  ;;  %v7461_v62 = vld [vmem:[#allocation2 + $0xf8] sm:$0xff] }
 0x386   : > { %v1750_v54 = vsel %vm1731_vm9, %v1717_v24, %v13411_v48  ;;  %v1653_v36 = vsel %vm1633_vm7, %v1620_v39, %v13416_v12  ;;  %v1621_v29 = vsel %vm1600_vm6, %v1588_v18, %v13424_v13  ;;  %v13426_v48 = vld [vmem:[#allocation134_spill] sm:$0xff]  ;;  %v13430_v39 = vld [vmem:[#allocation72_spill] sm:$0xff] }
 0x387   : > { %v1783_v33 = vsel %vm1764_vm11, %v1750_v54, %v13414_v0  ;;  %v1685_v41 = vsel %vm389_vm4, %v1653_v36, %v13417_v7  ;;  %v1654_v24 = vsel %vm1633_vm7, %v1621_v29, %v13425_v16  ;;  %v13429_v0 = vld [vmem:[#allocation37_spill] sm:$0xff]  ;;  %v13431_v36 = vld [vmem:[#allocation95_spill] sm:$0xff] }
 0x388   : > { %v1816_v55 = vsel %vm1797_vm10, %v1783_v33, %v9432_v15  ;;  %v9820_v15 = vld [vmem:[#allocation3 + $0x10] sm:$0x3]  ;;  %v1718_v31 = vsel %vm1698_vm8, %v1685_v41, %v13418_v40  ;;  %v1686_v54 = vsel %vm389_vm4, %v1654_v24, %v13426_v48  ;;  %v13434_v41 = vld [vmem:[#allocation171_spill] sm:$0xff]  ;;  %v13442_v48 = vld [vmem:[#allocation177_spill] sm:$0xff] }
 0x389   : > { %v2223_v21 = vrot.slane %v9820_v15, 1  ;;  %v1751_v20 = vsel %vm1731_vm9, %v1718_v31, %v13420_v46  ;;  %v13438_v31 = vld [vmem:[#allocation51_spill] sm:$0xff] }
 0x38a   : > { %v1784_v14 = vsel %vm1764_vm11, %v1751_v20, %v13421_v49  ;;  %v13441_v16 = vld [vmem:[#allocation151_spill] sm:$0xff] }
 0x38b   : > { %v1817_v63 = vsel %vm1797_vm10, %v1784_v14, %v9418_v25 }
 0x38c   : > { %v1960_v56 = vpop.f32.mrf.mxu0  ;;  %5855 = vmatmul.msk.f32.gmra.mxu0 %vm1839_vm12, %v1814_v4 }
 0x38d   : > { %v1961_v34 = vadd.f32 %v9599_v32, %v1960_v56  ;;  %v9818_v56 = vld [vmem:[#allocation3 + $0x8] sm:$0xff] }
 0x38e   : > { %v2221_v52 = vrot.slane %v9818_v56, 1 }
 0x38f   : > { %7179 = vtanh.f32 %v1961_v34 }
 0x390   : > { %v2222_v11 = vsel %vm612_vm1, %v2220_v19, %v2221_v52  ;;  %v2224_v30 = vsel %vm612_vm1, %v2221_v52, %v2223_v21  ;;  %v7462_v19 = vld [vmem:[#allocation2 + $0x108] sm:$0xff]  ;;  %v13435_v52 = vld [vmem:[#allocation78_spill] sm:$0xff]  ;;  %v13436_v21 = vld [vmem:[#allocation32_spill] sm:$0xff] }
 0x394   : > { %5856 = vmatmul.msk.f32.gmra.mxu0 %vm1839_vm12, %v1815_v10  ;;  %v6067_v10 = vpack.i.bf16 %v2224_v30, %v2222_v11 }
 0x395   : > { %v7180_v50 = vpop.eup %7179 }
 0x396   : > { %2087 = vst.msk [vmem:[#allocation3 + $0x21] sm:$0xff] %vm389_vm4, %v7180_v50  ;;  %6068 = vrot.lane.b32.xlu1 %v6067_v10, %s7547_s18 }
 0x399   : > { %v1963_v58 = vpop.f32.mrf.mxu0 }
 0x39a   : > { %v1964_v61 = vadd.f32 %v9599_v32, %v1963_v58  ;;  %v13427_v58 = vld [vmem:[#allocation178_spill] sm:$0xff] }
 0x39b   : > { %v1719_v25 = vsel %vm1698_vm8, %v1686_v54, %v13427_v58  ;;  %v13443_v58 = vld [vmem:[#allocation183_spill] sm:$0xff] }
 0x39c   : > { %7181 = vtanh.f32 %v1964_v61  ;;  %5857 = vmatmul.msk.f32.gmra.mxu0 %vm1839_vm12, %v1816_v55  ;;  %v1752_v8 = vsel %vm1731_vm9, %v1719_v25, %v13428_v27  ;;  %v1589_v55 = vsel %vm333_vm0, %v7461_v62, %v13430_v39 }
 0x39d   : > { %v2122_v59 = vld [vmem:[#allocation3 + $0x20] sm:$0xff]  ;;  %v2123_v43 = vld [vmem:[#allocation3 + $0x28] sm:$0x3]  ;;  %v1785_v33 = vsel %vm1764_vm11, %v1752_v8, %v13429_v0 }
 0x39e   : > { %v2226_v44 = vrot.slane %v2122_v59, 1  ;;  %v2228_v4 = vrot.slane %v2123_v43, 1  ;;  %v2402_v34 = vrot.slane %v2122_v59, 2  ;;  %v2404_v42 = vrot.slane %v2123_v43, 2  ;;  %v13432_v43 = vld [vmem:[#allocation121_spill] sm:$0xff] }
 0x39f   : > { %v1818_v12 = vsel %vm1797_vm10, %v1785_v33, %v9465_v17  ;;  %v1622_v59 = vsel %vm1600_vm6, %v1589_v55, %v13431_v36  ;;  %v1590_v17 = vsel %vm333_vm0, %v7462_v19, %v13435_v52  ;;  %v7463_v33 = vld [vmem:[#allocation2 + $0x110] sm:$0xff]  ;;  %v13446_v55 = vld [vmem:[#allocation111_spill] sm:$0xff] }
 0x3a0   : > { %v2227_v35 = vsel %vm612_vm1, %v2225_v28, %v2226_v44  ;;  %v2229_v26 = vsel %vm612_vm1, %v2226_v44, %v2228_v4  ;;  %v2403_v23 = vsel %vm789_vm3, %v2401_v2, %v2402_v34  ;;  %v2405_v50 = vsel %vm789_vm3, %v2402_v34, %v2404_v42  ;;  %v13433_v2 = vld [vmem:[#allocation143_spill] sm:$0xff]  ;;  %v13437_v42 = vld [vmem:[#allocation106_spill] sm:$0xff] }
 0x3a1   : > { %v9829_v47 = vpack.i.bf16 %v2229_v26, %v2227_v35  ;;  %v1966_v6 = vpop.f32.mrf.mxu0  ;;  %v9842_v38 = vpack.i.bf16 %v2405_v50, %v2403_v23  ;;  %v1655_v28 = vsel %vm1633_vm7, %v1622_v59, %v13432_v43  ;;  %v1623_v40 = vsel %vm1600_vm6, %v1590_v17, %v13437_v42  ;;  %v13447_v36 = vld [vmem:[#allocation26_spill] sm:$0xff]  ;;  %v13448_v43 = vld [vmem:[#allocation136_spill] sm:$0xff] }
 0x3a2   : > { %v7182_v60 = vpop.eup %7181  ;;  %v1967_v57 = vadd.f32 %v9599_v32, %v1966_v6  ;;  %v1687_v7 = vsel %vm389_vm4, %v1655_v28, %v13433_v2  ;;  %v13449_v2 = vld [vmem:[#allocation179_spill] sm:$0xff]  ;;  %v13451_v52 = vld [vmem:[#allocation186_spill] sm:$0xff] }
 0x3a3   : > { %13419 = vst [vmem:[#allocation74_spill] sm:$0xff] %v9829_v47  ;;  %6073 = vrot.lane.b32.xlu2 %v9829_v47, %s7547_s18  ;;  %v1720_v44 = vsel %vm1698_vm8, %v1687_v7, %v13434_v41  ;;  %v13453_v42 = vld [vmem:[#allocation54_spill] sm:$0xff] }
 0x3a4   : > { %13422 = vst [vmem:[#allocation7_spill] sm:$0xff] %v9842_v38  ;;  %7183 = vtanh.f32 %v1967_v57  ;;  %5858 = vmatmul.msk.f32.gmra.mxu0 %vm1839_vm12, %v1817_v63  ;;  %v1753_v34 = vsel %vm1731_vm9, %v1720_v44, %v13436_v21  ;;  %v13439_v57 = vld [vmem:[#allocation24_spill] sm:$0xff]  ;;  %v13452_v21 = vld [vmem:[#allocation98_spill] sm:$0xff] }
 0x3a5   : > { %2088 = vst.msk [vmem:[#allocation3 + $0x31] sm:$0xff] %vm389_vm4, %v7182_v60  ;;  %v1786_v35 = vsel %vm1764_vm11, %v1753_v34, %v13438_v31  ;;  %v1656_v63 = vsel %vm1633_vm7, %v1623_v40, %v13439_v57  ;;  %v13450_v44 = vld [vmem:[#allocation76_spill] sm:$0xff] }
 0x3a6   : > { %v1819_v23 = vsel %vm1797_vm10, %v1786_v35, %v9475_v53  ;;  %v1688_v24 = vsel %vm389_vm4, %v1656_v63, %v13441_v16  ;;  %v13455_v16 = vld [vmem:[#allocation147_spill] sm:$0xff] }
 0x3a7   : > { %v1721_v54 = vsel %vm1698_vm8, %v1688_v24, %v13442_v48  ;;  %v13456_v48 = vld [vmem:[#allocation172_spill] sm:$0xff] }
 0x3a8   : > { %v1754_v25 = vsel %vm1731_vm9, %v1721_v54, %v13443_v58  ;;  %v13457_v58 = vld [vmem:[#allocation38_spill] sm:$0xff] }
 0x3a9   : > { %v1969_v1 = vpop.f32.mrf.mxu0 }
 0x3aa   : > { %v7184_v45 = vpop.eup %7183  ;;  %v1970_v61 = vadd.f32 %v9599_v32, %v1969_v1  ;;  %v13444_v1 = vld [vmem:[#allocation73_spill] sm:$0xff] }
 0x3ab   : > { %2089 = vst.msk [vmem:[#allocation3 + $0x39] sm:$0xff] %vm389_vm4, %v7184_v45  ;;  %v1787_v45 = vsel %vm1764_vm11, %v1754_v25, %v13444_v1  ;;  %v13458_v1 = vld [vmem:[#allocation57_spill] sm:$0xff] }
 0x3ac   : > { %7185 = vtanh.f32 %v1970_v61  ;;  %5859 = vmatmul.msk.f32.gmra.mxu0 %vm1839_vm12, %v1818_v12  ;;  %v9878_v4 = vld [vmem:[#allocation3 + $0x30] sm:$0xff]  ;;  %v1820_v39 = vsel %vm1797_vm10, %v1787_v45, %v9441_v9 }
 0x3ad   : > { %v2406_v20 = vrot.slane %v9878_v4, 2  ;;  %v2230_v10 = vrot.slane %v9878_v4, 1  ;;  %v13445_v61 = vld [vmem:[#allocation60_spill] sm:$0xff] }
 0x3ae   : > { %v1591_v62 = vsel %vm333_vm0, %v7463_v33, %v13445_v61  ;;  %v7464_v9 = vld [vmem:[#allocation2 + $0x120] sm:$0xff] }
 0x3af   : > { %v1624_v12 = vsel %vm1600_vm6, %v1591_v62, %v13446_v55  ;;  %v1592_v19 = vsel %vm333_vm0, %v7464_v9, %v13450_v44  ;;  %vm3175_vm0 = vcmask 523264  }
 0x3b0   : > { %v1657_v59 = vsel %vm1633_vm7, %v1624_v12, %v13447_v36  ;;  %v1625_v34 = vsel %vm1600_vm6, %v1592_v19, %v13452_v21 }
 0x3b1   : > { %v1972_v26 = vpop.f32.mrf.mxu0  ;;  %v1689_v28 = vsel %vm389_vm4, %v1657_v59, %v13448_v43 }
 0x3b2   : > { %v7186_v11 = vpop.eup %7185  ;;  %v1973_v30 = vadd.f32 %v9599_v32, %v1972_v26  ;;  %v9891_v46 = vld [vmem:[#allocation3 + $0x38] sm:$0xff]  ;;  %v2126_v6 = vld [vmem:[#allocation3 + $0x40] sm:$0x3]  ;;  %v1722_v7 = vsel %vm1698_vm8, %v1689_v28, %v13449_v2 }
 0x3b3   : > { %2090 = vst.msk [vmem:[#allocation3 + $0x49] sm:$0xff] %vm389_vm4, %v7186_v11  ;;  %v2407_v50 = vrot.slane %v9891_v46, 2  ;;  %v2231_v60 = vrot.slane %v9891_v46, 1  ;;  %v2233_v49 = vrot.slane %v2126_v6, 1  ;;  %v2409_v14 = vrot.slane %v2126_v6, 2 }
 0x3b4   : > { %7187 = vtanh.f32 %v1973_v30  ;;  %5860 = vmatmul.msk.f32.gmra.mxu0 %vm1839_vm12, %v1819_v23  ;;  %v1755_v17 = vsel %vm1731_vm9, %v1722_v7, %v13451_v52 }
 0x3b5   : > { %v2408_v53 = vsel %vm789_vm3, %v2406_v20, %v2407_v50  ;;  %v2232_v3 = vsel %vm612_vm1, %v2230_v10, %v2231_v60  ;;  %v2234_v51 = vsel %vm612_vm1, %v2231_v60, %v2233_v49  ;;  %v2410_v18 = vsel %vm789_vm3, %v2407_v50, %v2409_v14  ;;  %v13454_v14 = vld [vmem:[#allocation29_spill] sm:$0xff] }
 0x3b6   : > { %5871 = vmatmul.msk.f32.vlgmr.msra.gmra.mxu2 %vm389_vm4, %v2408_v53  ;;  %v9906_v13 = vpack.i.bf16 %v2234_v51, %v2232_v3  ;;  %v9908_v29 = vpack.i.bf16 %v2410_v18, %v2408_v53  ;;  %v1788_v40 = vsel %vm1764_vm11, %v1755_v17, %v13453_v42  ;;  %v1658_v57 = vsel %vm1633_vm7, %v1625_v34, %v13454_v14 }
 0x3b7   : > { %v1821_v11 = vsel %vm1797_vm10, %v1788_v40, %v9492_v37  ;;  %v1690_v24 = vsel %vm389_vm4, %v1658_v57, %v13455_v16 }
 0x3b8   : > { %13440 = vst [vmem:[#allocation127_spill] sm:$0xff] %v9906_v13  ;;  %6078 = vrot.lane.b32.xlu0 %v9906_v13, %s7547_s18  ;;  %v1723_v54 = vsel %vm1698_vm8, %v1690_v24, %v13456_v48  ;;  %v2399_v13 = vrot.slane %v9820_v15, 2 }
 0x3b9   : > { %v1975_v27 = vpop.f32.mrf.mxu0  ;;  %v1756_v25 = vsel %vm1731_vm9, %v1723_v54, %v13457_v58 }
 0x3ba   : > { %v7188_v8 = vpop.eup %7187  ;;  %v1976_v0 = vadd.f32 %v9599_v32, %v1975_v27  ;;  %v9936_v41 = vld [vmem:[#allocation3 + $0x48] sm:$0xff]  ;;  %v1789_v45 = vsel %vm1764_vm11, %v1756_v25, %v13458_v1 }
 0x3bb   : > { %2091 = vst.msk [vmem:[#allocation3 + $0x51] sm:$0xff] %vm389_vm4, %v7188_v8  ;;  %v2411_v23 = vrot.slane %v9936_v41, 2  ;;  %v2235_v6 = vrot.slane %v9936_v41, 1  ;;  %v1822_v33 = vsel %vm1797_vm10, %v1789_v45, %v9510_v22 }
 0x3bc   : > { %7189 = vtanh.f32 %v1976_v0  ;;  %5861 = vmatmul.msk.f32.gmra.mxu0 %vm1839_vm12, %v1820_v39 }
 0x3be   : > { %5872 = vmatmul.msk.f32.gmra.mxu2 %vm389_vm4, %v2410_v18 }
 0x3c1   : > { %v1978_v31 = vpop.f32.mrf.mxu0 }
 0x3c2   : > { %v7190_v35 = vpop.eup %7189  ;;  %v1979_v26 = vadd.f32 %v9599_v32, %v1978_v31  ;;  %v9949_v30 = vld [vmem:[#allocation3 + $0x50] sm:$0xff]  ;;  %v2129_v20 = vld [vmem:[#allocation3 + $0x58] sm:$0x3] }
 0x3c3   : > { %2092 = vst.msk [vmem:[#allocation3 + $0x61] sm:$0xff] %vm389_vm4, %v7190_v35  ;;  %v2412_v10 = vrot.slane %v9949_v30, 2  ;;  %v2236_v50 = vrot.slane %v9949_v30, 1  ;;  %v2238_v60 = vrot.slane %v2129_v20, 1  ;;  %v2414_v49 = vrot.slane %v2129_v20, 2 }
 0x3c4   : > { %7191 = vtanh.f32 %v1979_v26  ;;  %5862 = vmatmul.msk.f32.gmra.mxu0 %vm1839_vm12, %v1821_v11 }
 0x3c5   : > { %v2413_v37 = vsel %vm789_vm3, %v2411_v23, %v2412_v10  ;;  %v2237_v63 = vsel %vm612_vm1, %v2235_v6, %v2236_v50  ;;  %v2239_v53 = vsel %vm612_vm1, %v2236_v50, %v2238_v60  ;;  %v2415_v3 = vsel %vm789_vm3, %v2412_v10, %v2414_v49 }
 0x3c6   : > { %5873 = vmatmul.msk.f32.gmra.mxu2 %vm389_vm4, %v2413_v37  ;;  %v9964_v51 = vpack.i.bf16 %v2239_v53, %v2237_v63  ;;  %v9966_v18 = vpack.i.bf16 %v2415_v3, %v2413_v37 }
 0x3c8   : > { %6083 = vrot.lane.b32.xlu1 %v9964_v51, %s7547_s18 }
 0x3c9   : > { %v1981_v27 = vpop.f32.mrf.mxu0 }
 0x3ca   : > { %v7192_v8 = vpop.eup %7191  ;;  %v1982_v0 = vadd.f32 %v9599_v32, %v1981_v27  ;;  %v9984_v61 = vld [vmem:[#allocation3 + $0x60] sm:$0xff] }
 0x3cb   : > { %2093 = vst.msk [vmem:[#allocation3 + $0x69] sm:$0xff] %vm389_vm4, %v7192_v8  ;;  %v2416_v59 = vrot.slane %v9984_v61, 2  ;;  %v2240_v28 = vrot.slane %v9984_v61, 1 }
 0x3cc   : > { %7193 = vtanh.f32 %v1982_v0  ;;  %5863 = vmatmul.msk.f32.gmra.mxu0 %vm1839_vm12, %v1822_v33 }
 0x3ce   : > { %5874 = vmatmul.msk.f32.gmra.mxu2 %vm389_vm4, %v2415_v3 }
 0x3d1   : > { %v1984_v62 = vpop.f32.mrf.mxu0 }
 0x3d2   : > { %v2032_v39 = vpop.f32.mrf.mxu3  ;;  %v7194_v55 = vpop.eup %7193  ;;  %v1985_v12 = vadd.f32 %v9599_v32, %v1984_v62  ;;  %v9987_v36 = vld [vmem:[#allocation3 + $0x68] sm:$0xff]  ;;  %v2132_v43 = vld [vmem:[#allocation3 + $0x70] sm:$0x3] }
 0x3d3   : > { %v2033_v22 = vadd.f32 %v9599_v32, %v2032_v39  ;;  %2094 = vst.msk [vmem:[#allocation3 + $0x79] sm:$0xff] %vm389_vm4, %v7194_v55  ;;  %v2417_v2 = vrot.slane %v9987_v36, 2  ;;  %v2241_v7 = vrot.slane %v9987_v36, 1  ;;  %v2243_v9 = vrot.slane %v2132_v43, 1 }
 0x3d4   : > { %v2419_v44 = vrot.slane %v2132_v43, 2  ;;  %7195 = vtanh.f32 %v1985_v12 }
 0x3d5   : > { %v2418_v19 = vsel %vm789_vm3, %v2416_v59, %v2417_v2  ;;  %7197 = vtanh.f32 %v2033_v22  ;;  %v2242_v52 = vsel %vm612_vm1, %v2240_v28, %v2241_v7  ;;  %v2244_v17 = vsel %vm612_vm1, %v2241_v7, %v2243_v9 }
 0x3d6   : > { %5875 = vmatmul.msk.f32.gmra.mxu2 %vm389_vm4, %v2418_v19  ;;  %v9999_v21 = vpack.i.bf16 %v2244_v17, %v2242_v52  ;;  %v2420_v34 = vsel %vm789_vm3, %v2417_v2, %v2419_v44 }
 0x3d7   : > { %v10002_v42 = vpack.i.bf16 %v2420_v34, %v2418_v19 }
 0x3d8   : > { %13459 = vst [vmem:[#allocation142_spill] sm:$0xff] %v9999_v21  ;;  %6088 = vrot.lane.b32.xlu2 %v9999_v21, %s7547_s18 }
 0x3d9   : > { %v1987_v40 = vpop.f32.mrf.mxu0 }
 0x3da   : > { %v7196_v31 = vpop.eup %7195  ;;  %v1988_v35 = vadd.f32 %v9599_v32, %v1987_v40  ;;  %v10010_v23 = vld [vmem:[#allocation3 + $0x78] sm:$0xff] }
 0x3db   : > { %v7198_v26 = vpop.eup %7197  ;;  %2095 = vst.msk [vmem:[#allocation3 + $0x81] sm:$0xff] %vm389_vm4, %v7196_v31  ;;  %v2421_v49 = vrot.slane %v10010_v23, 2  ;;  %v2245_v57 = vrot.slane %v10010_v23, 1 }
 0x3dc   : > { %2111 = vst.msk [vmem:[#allocation3 + $0x141] sm:$0xff] %vm389_vm4, %v7198_v26  ;;  %7199 = vtanh.f32 %v1988_v35 }
 0x3de   : > { %5876 = vmatmul.msk.f32.gmra.mxu2 %vm389_vm4, %v2420_v34 }
 0x3df   : > { %v2035_v11 = vpop.f32.mrf.mxu3 }
 0x3e0   : > { %v2036_v20 = vadd.f32 %v9599_v32, %v2035_v11 }
 0x3e1   : > { %v1990_v6 = vpop.f32.mrf.mxu0 }
 0x3e2   : > { %v7200_v10 = vpop.eup %7199  ;;  %7201 = vtanh.f32 %v2036_v20  ;;  %v1991_v50 = vadd.f32 %v9599_v32, %v1990_v6  ;;  %v10014_v60 = vld [vmem:[#allocation3 + $0x80] sm:$0xff]  ;;  %v2135_v14 = vld [vmem:[#allocation3 + $0x88] sm:$0x3] }
 0x3e3   : > { %2096 = vst.msk [vmem:[#allocation3 + $0x91] sm:$0xff] %vm389_vm4, %v7200_v10  ;;  %v2422_v37 = vrot.slane %v10014_v60, 2  ;;  %v2246_v63 = vrot.slane %v10014_v60, 1  ;;  %v2248_v53 = vrot.slane %v2135_v14, 1  ;;  %v2424_v3 = vrot.slane %v2135_v14, 2 }
 0x3e4   : > { %7203 = vtanh.f32 %v1991_v50 }
 0x3e5   : > { %v2423_v16 = vsel %vm789_vm3, %v2421_v49, %v2422_v37  ;;  %v2247_v24 = vsel %vm612_vm1, %v2245_v57, %v2246_v63  ;;  %v2249_v48 = vsel %vm612_vm1, %v2246_v63, %v2248_v53  ;;  %v2425_v54 = vsel %vm789_vm3, %v2422_v37, %v2424_v3 }
 0x3e6   : > { %5877 = vmatmul.msk.f32.gmra.mxu2 %vm389_vm4, %v2423_v16  ;;  %v10026_v58 = vpack.i.bf16 %v2249_v48, %v2247_v24  ;;  %v10028_v25 = vpack.i.bf16 %v2425_v54, %v2423_v16 }
 0x3e7   : > { %v2038_v27 = vpop.f32.mrf.mxu3 }
 0x3e8   : > { %13460 = vst [vmem:[#allocation42_spill] sm:$0xff] %v10026_v58  ;;  %v7202_v8 = vpop.eup %7201  ;;  %v2039_v1 = vadd.f32 %v9599_v32, %v2038_v27  ;;  %6093 = vrot.lane.b32.xlu0 %v10026_v58, %s7547_s18 }
 0x3e9   : > { %2112 = vst.msk [vmem:[#allocation3 + $0x151] sm:$0xff] %vm389_vm4, %v7202_v8  ;;  %v1993_v45 = vpop.f32.mrf.mxu0 }
 0x3ea   : > { %v7204_v0 = vpop.eup %7203  ;;  %7205 = vtanh.f32 %v2039_v1  ;;  %v1994_v33 = vadd.f32 %v9599_v32, %v1993_v45  ;;  %v10037_v39 = vld [vmem:[#allocation3 + $0x90] sm:$0xff] }
 0x3eb   : > { %2097 = vst.msk [vmem:[#allocation3 + $0x99] sm:$0xff] %vm389_vm4, %v7204_v0  ;;  %v2426_v2 = vrot.slane %v10037_v39, 2  ;;  %v2250_v9 = vrot.slane %v10037_v39, 1 }
 0x3ec   : > { %7207 = vtanh.f32 %v1994_v33 }
 0x3ee   : > { %5878 = vmatmul.msk.f32.gmra.mxu2 %vm389_vm4, %v2425_v54 }
 0x3ef   : > { %v2041_v62 = vpop.f32.mrf.mxu3 }
 0x3f0   : > { %v7206_v55 = vpop.eup %7205  ;;  %v2042_v12 = vadd.f32 %v9599_v32, %v2041_v62  ;;  %v10058_v20 = vld [vmem:[#allocation3 + $0x150] sm:$0xff] }
 0x3f1   : > { %2113 = vst.msk [vmem:[#allocation3 + $0x159] sm:$0xff] %vm389_vm4, %v7206_v55  ;;  %v1996_v59 = vpop.f32.mrf.mxu0  ;;  %v2290_v37 = vrot.slane %v10058_v20, 1 }
 0x3f2   : > { %v7208_v22 = vpop.eup %7207  ;;  %7209 = vtanh.f32 %v2042_v12  ;;  %v1997_v43 = vadd.f32 %v9599_v32, %v1996_v59  ;;  %v10042_v28 = vld [vmem:[#allocation3 + $0x98] sm:$0xff]  ;;  %v2138_v7 = vld [vmem:[#allocation3 + $0xa0] sm:$0x3] }
 0x3f3   : > { %2098 = vst.msk [vmem:[#allocation3 + $0xa9] sm:$0xff] %vm389_vm4, %v7208_v22  ;;  %v2427_v44 = vrot.slane %v10042_v28, 2  ;;  %v2251_v19 = vrot.slane %v10042_v28, 1  ;;  %v2253_v52 = vrot.slane %v2138_v7, 1  ;;  %v2429_v17 = vrot.slane %v2138_v7, 2 }
 0x3f4   : > { %7211 = vtanh.f32 %v1997_v43 }
 0x3f5   : > { %v2428_v34 = vsel %vm789_vm3, %v2426_v2, %v2427_v44  ;;  %v2252_v40 = vsel %vm612_vm1, %v2250_v9, %v2251_v19  ;;  %v2254_v31 = vsel %vm612_vm1, %v2251_v19, %v2253_v52  ;;  %v2430_v35 = vsel %vm789_vm3, %v2427_v44, %v2429_v17 }
 0x3f6   : > { %5879 = vmatmul.msk.f32.gmra.mxu2 %vm389_vm4, %v2428_v34  ;;  %v10054_v26 = vpack.i.bf16 %v2254_v31, %v2252_v40  ;;  %v10056_v11 = vpack.i.bf16 %v2430_v35, %v2428_v34 }
 0x3f7   : > { %v2044_v6 = vpop.f32.mrf.mxu3 }
 0x3f8   : > { %v7210_v10 = vpop.eup %7209  ;;  %v2045_v50 = vadd.f32 %v9599_v32, %v2044_v6  ;;  %6098 = vrot.lane.b32.xlu1 %v10054_v26, %s7547_s18  ;;  %v10063_v49 = vld [vmem:[#allocation3 + $0x158] sm:$0xff]  ;;  %v10065_v14 = vld [vmem:[#allocation3 + $0x160] sm:$0x3] }
 0x3f9   : > { %2114 = vst.msk [vmem:[#allocation3 + $0x169] sm:$0xff] %vm389_vm4, %v7210_v10  ;;  %v1999_v57 = vpop.f32.mrf.mxu0  ;;  %v2291_v63 = vrot.slane %v10063_v49, 1  ;;  %v2293_v53 = vrot.slane %v10065_v14, 1 }
 0x3fa   : > { %v7212_v3 = vpop.eup %7211  ;;  %7213 = vtanh.f32 %v2045_v50  ;;  %v2000_v16 = vadd.f32 %v9599_v32, %v1999_v57  ;;  %v10084_v8 = vld [vmem:[#allocation3 + $0xa8] sm:$0xff] }
 0x3fb   : > { %2099 = vst.msk [vmem:[#allocation3 + $0xb1] sm:$0xff] %vm389_vm4, %v7212_v3  ;;  %v10074_v24 = vsel %vm612_vm1, %v2290_v37, %v2291_v63  ;;  %v10077_v48 = vsel %vm612_vm1, %v2291_v63, %v2293_v53  ;;  %v2431_v12 = vrot.slane %v10084_v8, 2  ;;  %v2255_v22 = vrot.slane %v10084_v8, 1 }
 0x3fc   : > { %13461 = vst [vmem:[#allocation85_spill] sm:$0xff] %v10074_v24  ;;  %7215 = vtanh.f32 %v2000_v16  ;;  %v10082_v54 = vpack.i.bf16 %v10077_v48, %v10074_v24 }
 0x3fd   : > { %13462 = vst [vmem:[#allocation107_spill] sm:$0xff] %v10077_v48 }
 0x3fe   : > { %5880 = vmatmul.msk.f32.gmra.mxu2 %vm389_vm4, %v2430_v35  ;;  %13463 = vst [vmem:[#allocation40_spill] sm:$0xff] %v10082_v54 }
 0x3ff   : > { %v2047_v27 = vpop.f32.mrf.mxu3 }
 0x400   : > { %v7214_v1 = vpop.eup %7213  ;;  %v2048_v45 = vadd.f32 %v9599_v32, %v2047_v27  ;;  %v10111_v31 = vld [vmem:[#allocation3 + $0x168] sm:$0xff] }
 0x401   : > { %2115 = vst.msk [vmem:[#allocation3 + $0x171] sm:$0xff] %vm389_vm4, %v7214_v1  ;;  %v2002_v0 = vpop.f32.mrf.mxu0  ;;  %v2295_v63 = vrot.slane %v10111_v31, 1 }
 0x402   : > { %v7216_v33 = vpop.eup %7215  ;;  %7217 = vtanh.f32 %v2048_v45  ;;  %v2003_v62 = vadd.f32 %v9599_v32, %v2002_v0  ;;  %v10089_v55 = vld [vmem:[#allocation3 + $0xb0] sm:$0xff]  ;;  %v2141_v59 = vld [vmem:[#allocation3 + $0xb8] sm:$0x3] }
 0x403   : > { %2100 = vst.msk [vmem:[#allocation3 + $0xc1] sm:$0xff] %vm389_vm4, %v7216_v33  ;;  %v2432_v43 = vrot.slane %v10089_v55, 2  ;;  %v2256_v2 = vrot.slane %v10089_v55, 1  ;;  %v2258_v7 = vrot.slane %v2141_v59, 1  ;;  %v2434_v9 = vrot.slane %v2141_v59, 2 }
 0x404   : > { %7219 = vtanh.f32 %v2003_v62 }
 0x405   : > { %v2433_v44 = vsel %vm789_vm3, %v2431_v12, %v2432_v43  ;;  %v10098_v19 = vsel %vm612_vm1, %v2255_v22, %v2256_v2  ;;  %v10101_v52 = vsel %vm612_vm1, %v2256_v2, %v2258_v7  ;;  %v2435_v17 = vsel %vm789_vm3, %v2432_v43, %v2434_v9 }
 0x406   : > { %13464 = vst [vmem:[#allocation47_spill] sm:$0xff] %v10098_v19  ;;  %5881 = vmatmul.msk.f32.gmra.mxu2 %vm389_vm4, %v2433_v44  ;;  %v10107_v34 = vpack.i.bf16 %v10101_v52, %v10098_v19  ;;  %v10109_v40 = vpack.i.bf16 %v2435_v17, %v2433_v44 }
 0x407   : > { %13465 = vst [vmem:[#allocation90_spill] sm:$0xff] %v10101_v52  ;;  %v2050_v35 = vpop.f32.mrf.mxu3 }
 0x408   : > { %13466 = vst [vmem:[#allocation8_spill] sm:$0xff] %v10107_v34  ;;  %v7218_v6 = vpop.eup %7217  ;;  %v2051_v10 = vadd.f32 %v9599_v32, %v2050_v35  ;;  %6103 = vrot.lane.b32.xlu2 %v10107_v34, %s7547_s18  ;;  %v10116_v50 = vld [vmem:[#allocation3 + $0x170] sm:$0xff]  ;;  %v10118_v57 = vld [vmem:[#allocation3 + $0x178] sm:$0x3] }
 0x409   : > { %2116 = vst.msk [vmem:[#allocation3 + $0x181] sm:$0xff] %vm389_vm4, %v7218_v6  ;;  %v2005_v37 = vpop.f32.mrf.mxu0  ;;  %v2296_v53 = vrot.slane %v10116_v50, 1  ;;  %v2298_v3 = vrot.slane %v10118_v57, 1 }
 0x40a   : > { %v7220_v16 = vpop.eup %7219  ;;  %7221 = vtanh.f32 %v2051_v10  ;;  %v2006_v27 = vadd.f32 %v9599_v32, %v2005_v37  ;;  %v10137_v33 = vld [vmem:[#allocation3 + $0xc0] sm:$0xff] }
 0x40b   : > { %2101 = vst.msk [vmem:[#allocation3 + $0xc9] sm:$0xff] %vm389_vm4, %v7220_v16  ;;  %v10127_v1 = vsel %vm612_vm1, %v2295_v63, %v2296_v53  ;;  %v10130_v45 = vsel %vm612_vm1, %v2296_v53, %v2298_v3  ;;  %v2436_v2 = vrot.slane %v10137_v33, 2  ;;  %v2260_v9 = vrot.slane %v10137_v33, 1 }
 0x40c   : > { %13467 = vst [vmem:[#allocation120_spill] sm:$0xff] %v10127_v1  ;;  %7223 = vtanh.f32 %v2006_v27  ;;  %v10134_v0 = vpack.i.bf16 %v10130_v45, %v10127_v1 }
 0x40d   : > { %13468 = vst [vmem:[#allocation52_spill] sm:$0xff] %v10130_v45 }
 0x40e   : > { %5882 = vmatmul.msk.f32.gmra.mxu2 %vm389_vm4, %v2435_v17 }
 0x410   : > { %v7222_v62 = vpop.eup %7221 }
 0x411   : > { %2117 = vst.msk [vmem:[#allocation3 + $0x189] sm:$0xff] %vm389_vm4, %v7222_v62  ;;  %v2008_v12 = vpop.f32.mrf.mxu0 }
 0x412   : > { %v7224_v59 = vpop.eup %7223  ;;  %v2009_v22 = vadd.f32 %v9599_v32, %v2008_v12  ;;  %v10141_v43 = vld [vmem:[#allocation3 + $0xc8] sm:$0xff]  ;;  %v2144_v7 = vld [vmem:[#allocation3 + $0xd0] sm:$0x3] }
 0x413   : > { %2102 = vst.msk [vmem:[#allocation3 + $0xd9] sm:$0xff] %vm389_vm4, %v7224_v59  ;;  %v2437_v44 = vrot.slane %v10141_v43, 2  ;;  %v2261_v17 = vrot.slane %v10141_v43, 1  ;;  %v2263_v35 = vrot.slane %v2144_v7, 1  ;;  %v2439_v6 = vrot.slane %v2144_v7, 2 }
 0x414   : > { %7225 = vtanh.f32 %v2009_v22 }
 0x415   : > { %v2438_v10 = vsel %vm789_vm3, %v2436_v2, %v2437_v44  ;;  %v10150_v37 = vsel %vm612_vm1, %v2260_v9, %v2261_v17  ;;  %v10153_v63 = vsel %vm612_vm1, %v2261_v17, %v2263_v35  ;;  %v2440_v53 = vsel %vm789_vm3, %v2437_v44, %v2439_v6 }
 0x416   : > { %13469 = vst [vmem:[#allocation77_spill] sm:$0xff] %v10150_v37  ;;  %5883 = vmatmul.msk.f32.gmra.mxu2 %vm389_vm4, %v2438_v10  ;;  %v10159_v3 = vpack.i.bf16 %v10153_v63, %v10150_v37  ;;  %v10161_v16 = vpack.i.bf16 %v2440_v53, %v2438_v10 }
 0x417   : > { %13470 = vst [vmem:[#allocation10_spill] sm:$0xff] %v10153_v63 }
 0x418   : > { %13471 = vst [vmem:[#allocation129_spill] sm:$0xff] %v10159_v3  ;;  %6108 = vrot.lane.b32.xlu0 %v10159_v3, %s7547_s18 }
 0x419   : > { %v2011_v12 = vpop.f32.mrf.mxu0 }
 0x41a   : > { %v7226_v59 = vpop.eup %7225  ;;  %v2012_v22 = vadd.f32 %v9599_v32, %v2011_v12  ;;  %v10172_v2 = vld [vmem:[#allocation3 + $0xd8] sm:$0xff] }
 0x41b   : > { %2103 = vst.msk [vmem:[#allocation3 + $0xe1] sm:$0xff] %vm389_vm4, %v7226_v59  ;;  %v2441_v35 = vrot.slane %v10172_v2, 2  ;;  %v2265_v10 = vrot.slane %v10172_v2, 1 }
 0x41c   : > { %7227 = vtanh.f32 %v2012_v22 }
 0x41e   : > { %5884 = vmatmul.msk.f32.gmra.mxu2 %vm389_vm4, %v2440_v53 }
 0x421   : > { %v2014_v7 = vpop.f32.mrf.mxu0 }
 0x422   : > { %v7228_v9 = vpop.eup %7227  ;;  %v2015_v44 = vadd.f32 %v9599_v32, %v2014_v7  ;;  %v10175_v17 = vld [vmem:[#allocation3 + $0xe0] sm:$0xff]  ;;  %v2147_v6 = vld [vmem:[#allocation3 + $0xe8] sm:$0x3] }
 0x423   : > { %2104 = vst.msk [vmem:[#allocation3 + $0xf1] sm:$0xff] %vm389_vm4, %v7228_v9  ;;  %v2442_v12 = vrot.slane %v10175_v17, 2  ;;  %v2266_v59 = vrot.slane %v10175_v17, 1  ;;  %v2268_v53 = vrot.slane %v2147_v6, 1  ;;  %v2444_v22 = vrot.slane %v2147_v6, 2 }
 0x424   : > { %7229 = vtanh.f32 %v2015_v44 }
 0x425   : > { %v2443_v62 = vsel %vm789_vm3, %v2441_v35, %v2442_v12  ;;  %v10184_v32 = vsel %vm612_vm1, %v2265_v10, %v2266_v59  ;;  %v10187_v7 = vsel %vm612_vm1, %v2266_v59, %v2268_v53  ;;  %v2445_v27 = vsel %vm789_vm3, %v2442_v12, %v2444_v22  ;;  %v10206_v12 = vld [vmem:[%s12801_s2] ss:$0 sm:$0xff]  ;;  %v10213_v53 = vld [vmem:[#allocation3 + $0x180] sm:$0xff] }
 0x426   : > { %13472 = vst [vmem:[#allocation149_spill] sm:$0xff] %v10184_v32  ;;  %5885 = vmatmul.msk.f32.gmra.mxu2 %vm389_vm4, %v2443_v62  ;;  %v10193_v9 = vpack.i.bf16 %v10187_v7, %v10184_v32  ;;  %v10195_v63 = vpack.i.bf16 %v2445_v27, %v2443_v62  ;;  %v10211_v62 = vld [vmem:[#allocation3 + $0x188] sm:$0xff]  ;;  %v10215_v22 = vld [vmem:[#allocation3 + $0x190] sm:$0x3] }
 0x427   : > { %13473 = vst [vmem:[#allocation27_spill] sm:$0xff] %v10187_v7  ;;  %v2672_v7 = vrot.slane %v10211_v62, 1 }
 0x428   : > { %13474 = vst [vmem:[#allocation150_spill] sm:$0xff] %v10193_v9  ;;  %6113 = vrot.lane.b32.xlu1 %v10193_v9, %s7547_s18 }
 0x429   : > { %v2017_v6 = vpop.f32.mrf.mxu0  ;;  %13475 = vst [vmem:[#allocation88_spill] sm:$0xff] %v10215_v22 }
 0x42a   : > { %v7230_v10 = vpop.eup %7229  ;;  %v2018_v59 = vadd.f32 %v10206_v12, %v2017_v6  ;;  %v10217_v35 = vld [vmem:[#allocation3 + $0xf0] sm:$0xff] }
 0x42b   : > { %2105 = vst.msk [vmem:[#allocation3 + $0xf9] sm:$0xff] %vm389_vm4, %v7230_v10  ;;  %v2446_v1 = vrot.slane %v10217_v35, 2  ;;  %v2270_v37 = vrot.slane %v10217_v35, 1 }
 0x42c   : > { %7231 = vtanh.f32 %v2018_v59  ;;  %v2671_v59 = vrot.slane %v10213_v53, 1 }
 0x42e   : > { %5886 = vmatmul.msk.f32.gmra.mxu2 %vm389_vm4, %v2445_v27  ;;  %v2674_v27 = vrot.slane %v10215_v22, 1  ;;  %v10235_v22 = vsel %vm612_vm1, %v2671_v59, %v2672_v7 }
 0x42f   : > { %13477 = vst [vmem:[#allocation45_spill] sm:$0xff] %v10235_v22 }
 0x431   : > { %v2020_v44 = vpop.f32.mrf.mxu0 }
 0x432   : > { %v7232_v45 = vpop.eup %7231  ;;  %v2021_v32 = vadd.f32 %v10206_v12, %v2020_v44  ;;  %v10221_v6 = vld [vmem:[#allocation3 + $0xf8] sm:$0xff]  ;;  %v2150_v10 = vld [vmem:[#allocation3 + $0x100] sm:$0x3] }
 0x433   : > { %2106 = vst.msk [vmem:[#allocation3 + $0x109] sm:$0xff] %vm389_vm4, %v7232_v45  ;;  %v2447_v48 = vrot.slane %v10221_v6, 2  ;;  %v2271_v24 = vrot.slane %v10221_v6, 1  ;;  %v2273_v52 = vrot.slane %v2150_v10, 1  ;;  %v2449_v44 = vrot.slane %v2150_v10, 2 }
 0x434   : > { %7233 = vtanh.f32 %v2021_v32 }
 0x435   : > { %v2448_v19 = vsel %vm789_vm3, %v2446_v1, %v2447_v48  ;;  %v10232_v3 = vsel %vm612_vm1, %v2270_v37, %v2271_v24  ;;  %v10239_v45 = vsel %vm612_vm1, %v2271_v24, %v2273_v52  ;;  %v2450_v34 = vsel %vm789_vm3, %v2447_v48, %v2449_v44 }
 0x436   : > { %13476 = vst [vmem:[#allocation110_spill] sm:$0xff] %v10232_v3  ;;  %5887 = vmatmul.msk.f32.gmra.mxu2 %vm389_vm4, %v2448_v19  ;;  %v10246_v10 = vpack.i.bf16 %v10239_v45, %v10232_v3  ;;  %v10248_v1 = vpack.i.bf16 %v2450_v34, %v2448_v19  ;;  %v10251_v37 = vsel %vm612_vm1, %v2672_v7, %v2674_v27 }
 0x437   : > { %13478 = vst [vmem:[#allocation31_spill] sm:$0xff] %v10239_v45 }
 0x438   : > { %13479 = vst [vmem:[#allocation144_spill] sm:$0xff] %v10246_v10  ;;  %6118 = vrot.lane.b32.xlu2 %v10246_v10, %s7547_s18 }
 0x439   : > { %13480 = vst [vmem:[#allocation93_spill] sm:$0xff] %v10251_v37  ;;  %v2023_v24 = vpop.f32.mrf.mxu0 }
 0x43a   : > { %v7234_v48 = vpop.eup %7233  ;;  %v2024_v52 = vadd.f32 %v10206_v12, %v2023_v24  ;;  %v10260_v19 = vld [vmem:[#allocation3 + $0x108] sm:$0xff] }
 0x43b   : > { %2107 = vst.msk [vmem:[#allocation3 + $0x111] sm:$0xff] %vm389_vm4, %v7234_v48  ;;  %v2451_v59 = vrot.slane %v10260_v19, 2  ;;  %v2275_v3 = vrot.slane %v10260_v19, 1 }
 0x43c   : > { %7235 = vtanh.f32 %v2024_v52 }
 0x43e   : > { %5888 = vmatmul.msk.f32.gmra.mxu2 %vm389_vm4, %v2450_v34 }
 0x441   : > { %v2026_v44 = vpop.f32.mrf.mxu0 }
 0x442   : > { %v7236_v7 = vpop.eup %7235  ;;  %v2027_v27 = vadd.f32 %v10206_v12, %v2026_v44  ;;  %v10263_v32 = vld [vmem:[#allocation3 + $0x110] sm:$0xff]  ;;  %v2153_v45 = vld [vmem:[#allocation3 + $0x118] sm:$0x3] }
 0x443   : > { %2108 = vst.msk [vmem:[#allocation3 + $0x121] sm:$0xff] %vm389_vm4, %v7236_v7  ;;  %v2452_v24 = vrot.slane %v10263_v32, 2  ;;  %v2276_v48 = vrot.slane %v10263_v32, 1  ;;  %v2278_v34 = vrot.slane %v2153_v45, 1  ;;  %v2454_v52 = vrot.slane %v2153_v45, 2 }
 0x444   : > { %7237 = vtanh.f32 %v2027_v27 }
 0x445   : > { %v2453_v37 = vsel %vm789_vm3, %v2451_v59, %v2452_v24  ;;  %v10272_v44 = vsel %vm612_vm1, %v2275_v3, %v2276_v48  ;;  %v10275_v22 = vsel %vm612_vm1, %v2276_v48, %v2278_v34  ;;  %v2455_v10 = vsel %vm789_vm3, %v2452_v24, %v2454_v52 }
 0x446   : > { %13481 = vst [vmem:[#allocation11_spill] sm:$0xff] %v10272_v44  ;;  %5889 = vmatmul.msk.f32.gmra.mxu2 %vm389_vm4, %v2453_v37  ;;  %v10281_v7 = vpack.i.bf16 %v10275_v22, %v10272_v44  ;;  %v10283_v58 = vpack.i.bf16 %v2455_v10, %v2453_v37 }
 0x447   : > { %13482 = vst [vmem:[#allocation123_spill] sm:$0xff] %v10275_v22 }
 0x448   : > { %13483 = vst [vmem:[#allocation48_spill] sm:$0xff] %v10281_v7  ;;  %6123 = vrot.lane.b32.xlu0 %v10281_v7, %s7547_s18 }
 0x449   : > { %v2029_v45 = vpop.f32.mrf.mxu0 }
 0x44a   : > { %v7238_v59 = vpop.eup %7237  ;;  %v2030_v3 = vadd.f32 %v10206_v12, %v2029_v45  ;;  %v10290_v27 = vld [vmem:[#allocation3 + $0x120] sm:$0xff] }
 0x44b   : > { %2109 = vst.msk [vmem:[#allocation3 + $0x129] sm:$0xff] %vm389_vm4, %v7238_v59  ;;  %v2456_v48 = vrot.slane %v10290_v27, 2  ;;  %v2280_v52 = vrot.slane %v10290_v27, 1 }
 0x44c   : > { %7239 = vtanh.f32 %v2030_v3 }
 0x44e   : > { %5890 = vmatmul.msk.f32.gmra.mxu2 %vm389_vm4, %v2455_v10 }
 0x450   : > { %6138 = vrot.lane.b32.xlu0 %v10082_v54, %s7547_s18 }
 0x452   : > { %v7240_v24 = vpop.eup %7239  ;;  %v10294_v37 = vld [vmem:[#allocation3 + $0x128] sm:$0xff]  ;;  %v2156_v34 = vld [vmem:[#allocation3 + $0x130] sm:$0x3] }
 0x453   : > { %2110 = vst.msk [vmem:[#allocation3 + $0x139] sm:$0xff] %vm389_vm4, %v7240_v24  ;;  %v2457_v12 = vrot.slane %v10294_v37, 2  ;;  %v2281_v45 = vrot.slane %v10294_v37, 1  ;;  %v2283_v10 = vrot.slane %v2156_v34, 1  ;;  %v2459_v59 = vrot.slane %v2156_v34, 2 }
 0x454   : > { %v2159_v24 = vld [vmem:[#allocation3 + $0x148] sm:$0x3] }
 0x455   : > { %v2458_v3 = vsel %vm789_vm3, %v2456_v48, %v2457_v12  ;;  %v2282_v22 = vsel %vm612_vm1, %v2280_v52, %v2281_v45  ;;  %v2284_v44 = vsel %vm612_vm1, %v2281_v45, %v2283_v10  ;;  %v2460_v54 = vsel %vm789_vm3, %v2457_v12, %v2459_v59 }
 0x456   : > { %5891 = vmatmul.msk.f32.gmra.mxu2 %vm389_vm4, %v2458_v3  ;;  %v10306_v7 = vpack.i.bf16 %v2284_v44, %v2282_v22  ;;  %v10308_v21 = vpack.i.bf16 %v2460_v54, %v2458_v3  ;;  %v2288_v45 = vrot.slane %v2159_v24, 1  ;;  %v2396_v10 = vrot.slane %v9814_v5, 2 }
 0x457   : > { %v2464_v59 = vrot.slane %v2159_v24, 2 }
 0x458   : > { %13484 = vst [vmem:[#allocation146_spill] sm:$0xff] %v10306_v7  ;;  %6128 = vrot.lane.b32.xlu1 %v10306_v7, %s7547_s18  ;;  %6153 = vrot.lane.b32.xlu0 %v9842_v38, %s7551_s22  ;;  %v2397_v7 = vrot.slane %v9818_v56, 2 }
 0x45a   : > { %v10314_v48 = vld [vmem:[#allocation3 + $0x138] sm:$0xff]  ;;  %v10316_v34 = vld [vmem:[#allocation3 + $0x140] sm:$0xff]  ;;  %v2398_v56 = vsel %vm789_vm3, %v2396_v10, %v2397_v7  ;;  %v2400_v15 = vsel %vm789_vm3, %v2397_v7, %v2399_v13  ;;  %v2466_v13 = vrot.slane %v10058_v20, 2  ;;  %v10363_v7 = vpop.f32.mrf.mxu2 }
 0x45b   : > { %v2285_v52 = vrot.slane %v10314_v48, 1  ;;  %v2286_v12 = vrot.slane %v10316_v34, 1  ;;  %v2461_v22 = vrot.slane %v10314_v48, 2  ;;  %v2462_v44 = vrot.slane %v10316_v34, 2  ;;  %13485 = vst [vmem:[#allocation80_spill] sm:$0xff] %v10363_v7  ;;  %v10380_v10 = vld [vmem:[#allocation3 + $0x20] sm:$0xff] }
 0x45c   : > { %v13503_v7 = vld [vmem:[#allocation42_spill] sm:$0xff] }
 0x45d   : > { %v10324_v3 = vsel %vm612_vm1, %v2285_v52, %v2286_v12  ;;  %v10327_v38 = vsel %vm612_vm1, %v2286_v12, %v2288_v45  ;;  %v2463_v47 = vsel %vm789_vm3, %v2461_v22, %v2462_v44  ;;  %v2465_v5 = vsel %vm789_vm3, %v2462_v44, %v2464_v59  ;;  %v10378_v44 = vld [vmem:[#allocation3 + $0x18] sm:$0xff] }
 0x45e   : > { %5892 = vmatmul.msk.f32.gmra.mxu2 %vm389_vm4, %v2460_v54  ;;  %v10334_v9 = vpack.i.bf16 %v10327_v38, %v10324_v3  ;;  %v10338_v24 = vpack.i.bf16 %v2465_v5, %v2463_v47  ;;  %v6147_v54 = vpack.i.bf16 %v2400_v15, %v2398_v56  ;;  %v2469_v12 = vrot.slane %v10065_v14, 2 }
 0x45f   : > { %v6227_v59 = vpack.i.bf16 %v10380_v10, %v10378_v44  ;;  %v10391_v14 = vpack.i.bf16 %v9987_v36, %v9984_v61  ;;  %v2472_v56 = vrot.slane %v10116_v50, 2  ;;  %v2474_v15 = vrot.slane %v10118_v57, 2 }
 0x460   : > { %6133 = vrot.lane.b32.xlu2 %v10334_v9, %s7547_s18  ;;  %6168 = vrot.lane.b32.xlu0 %v10002_v42, %s7551_s22  ;;  %v6257_v57 = vpack.i.bf16 %v10089_v55, %v10084_v8 }
 0x461   : > { %6143 = vrot.lane.b32.xlu1 %v10134_v0, %s7547_s18  ;;  %v10408_v36 = vsel %vm789_vm3, %v2472_v56, %v2474_v15 }
 0x462   : > { %v10375_v22 = vpop.f32.mrf.mxu2  ;;  %13488 = vst [vmem:[#allocation155_spill] sm:$0xff] %v10408_v36 }
 0x463   : > { %13486 = vst [vmem:[#allocation13_spill] sm:$0xff] %v10375_v22 }
 0x466   : > { %5893 = vmatmul.msk.f32.gmra.mxu2 %vm389_vm4, %v2463_v47  ;;  %v2467_v47 = vrot.slane %v10063_v49, 2 }
 0x468   : > { %6148 = vrot.lane.b32.xlu2 %v6147_v54, %s7551_s22  ;;  %6183 = vrot.lane.b32.xlu0 %v10109_v40, %s7551_s22  ;;  %v2468_v52 = vsel %vm789_vm3, %v2466_v13, %v2467_v47  ;;  %v2470_v45 = vsel %vm789_vm3, %v2467_v47, %v2469_v12  ;;  %v2471_v54 = vrot.slane %v10111_v31, 2  ;;  %v6232_v13 = vpack.i.bf16 %v9891_v46, %v9878_v4  ;;  %v10434_v4 = vpop.permute.xlu2 %6073 }
 0x469   : > { %6158 = vrot.lane.b32.xlu1 %v9908_v29, %s7551_s22  ;;  %v6237_v12 = vpack.i.bf16 %v9949_v30, %v9936_v41  ;;  %v6287_v46 = vpack.i.bf16 %v10316_v34, %v10314_v48  ;;  %v6262_v41 = vpack.i.bf16 %v10141_v43, %v10137_v33  ;;  %v10448_v30 = vpop.permute.xlu0 %6078 }
 0x46a   : > { %v10405_v61 = vsel %vm789_vm3, %v2471_v54, %v2472_v56  ;;  %v10460_v56 = vpop.permute.xlu1 %6068 }
 0x46b   : > { %13487 = vst [vmem:[#allocation131_spill] sm:$0xff] %v10405_v61  ;;  %v10414_v47 = vpack.i.bf16 %v10408_v36, %v10405_v61  ;;  %v13502_v36 = vld [vmem:[#allocation146_spill] sm:$0xff] }
 0x46e   : > { %5894 = vmatmul.msk.f32.gmra.mxu2 %vm389_vm4, %v2465_v5  ;;  %v10393_v5 = vpack.i.bf16 %v2470_v45, %v2468_v52 }
 0x470   : > { %6163 = vrot.lane.b32.xlu2 %v9966_v18, %s7551_s22  ;;  %6198 = vrot.lane.b32.xlu0 %v10248_v1, %s7551_s22 }
 0x471   : > { %6173 = vrot.lane.b32.xlu1 %v10028_v25, %s7551_s22  ;;  %v10463_v15 = vpop.permute.xlu0 %6093 }
 0x472   : > { %13490 = vst [vmem:[#allocation156_spill] sm:$0xff] %v10463_v15 }
 0x476   : > { %5895 = vmatmul.msk.f32.gmra.mxu2 %vm389_vm4, %v2468_v52  ;;  %v6272_v52 = vpack.i.bf16 %v10221_v6, %v10217_v35 }
 0x478   : > { %6178 = vrot.lane.b32.xlu2 %v10056_v11, %s7551_s22  ;;  %6213 = vrot.lane.b32.xlu0 %v10338_v24, %s7551_s22 }
 0x479   : > { %6188 = vrot.lane.b32.xlu1 %v10161_v16, %s7551_s22 }
 0x47e   : > { %5896 = vmatmul.msk.f32.gmra.mxu2 %vm389_vm4, %v2470_v45  ;;  %v10428_v45 = vpack.i.bf16 %v10014_v60, %v10010_v23  ;;  %v10450_v23 = vpop.permute.xlu2 %6088  ;;  %v6302_v60 = vpack.i.bf16 %v10211_v62, %v10213_v53 }
 0x47f   : > { %13489 = vst [vmem:[#allocation58_spill] sm:$0xff] %v10450_v23 }
 0x480   : > { %6193 = vrot.lane.b32.xlu2 %v10195_v63, %s7551_s22  ;;  %6228 = vrot.lane.b32.xlu0 %v6227_v59, %s7552_s25  ;;  %v10440_v59 = vpack.i.bf16 %v10042_v28, %v10037_v39  ;;  %v6267_v39 = vpack.i.bf16 %v10175_v17, %v10172_v2  ;;  %v6277_v28 = vpack.i.bf16 %v10263_v32, %v10260_v19 }
 0x481   : > { %6203 = vrot.lane.b32.xlu1 %v10283_v58, %s7551_s22 }
 0x486   : > { %v10465_v54 = vpop.permute.xlu2 %6103 }
 0x487   : > { %13491 = vst [vmem:[#allocation91_spill] sm:$0xff] %v10465_v54 }
 0x488   : > { %6208 = vrot.lane.b32.xlu2 %v10308_v21, %s7551_s22  ;;  %6243 = vrot.lane.b32.xlu0 %v10391_v14, %s7552_s25 }
 0x489   : > { %6218 = vrot.lane.b32.xlu1 %v10393_v5, %s7551_s22 }
 0x490   : > { %6258 = vrot.lane.b32.xlu0 %v6257_v57, %s7552_s25  ;;  %6223 = vrot.lane.b32.xlu2 %v10414_v47, %s7551_s22  ;;  %v10469_v57 = vpack.i.bf16 %v10294_v37, %v10290_v27  ;;  %v6297_v27 = vpack.i.bf16 %v10116_v50, %v10111_v31  ;;  %v13494_v37 = vld [vmem:[#allocation74_spill] sm:$0xff] }
 0x491   : > { %6233 = vrot.lane.b32.xlu1 %v6232_v13, %s7552_s25  ;;  %v6292_v13 = vpack.i.bf16 %v10063_v49, %v10058_v20 }
 0x498   : > { %6273 = vrot.lane.b32.xlu0 %v6272_v52, %s7552_s25  ;;  %6238 = vrot.lane.b32.xlu2 %v6237_v12, %s7552_s25  ;;  %v10478_v52 = vpop.permute.xlu0 %6108  ;;  %v10480_v12 = vpop.permute.xlu2 %6118 }
 0x499   : > { %6248 = vrot.lane.b32.xlu1 %v10428_v45, %s7552_s25  ;;  %13492 = vst [vmem:[#allocation9_spill] sm:$0xff] %v10478_v52 }
 0x49a   : > { %13493 = vst [vmem:[#allocation50_spill] sm:$0xff] %v10480_v12  ;;  %v13499_v12 = vld [vmem:[#allocation142_spill] sm:$0xff] }
 0x4a0   : > { %6288 = vrot.lane.b32.xlu0 %v6287_v46, %s7552_s25  ;;  %6253 = vrot.lane.b32.xlu2 %v10440_v59, %s7552_s25  ;;  %v10482_v46 = vpop.permute.xlu1 %6083 }
 0x4a1   : > { %6263 = vrot.lane.b32.xlu1 %v6262_v41, %s7552_s25 }
 0x4a8   : > { %6303 = vrot.lane.b32.xlu0 %v6302_v60, %s7552_s25  ;;  %6268 = vrot.lane.b32.xlu2 %v6267_v39, %s7552_s25  ;;  %v10495_v39 = vpop.permute.xlu1 %6098 }
 0x4a9   : > { %6278 = vrot.lane.b32.xlu1 %v6277_v28, %s7552_s25  ;;  %13496 = vst [vmem:[#allocation148_spill] sm:$0xff] %v10495_v39  ;;  %v13497_v28 = vld [vmem:[#allocation150_spill] sm:$0xff]  ;;  %v13505_v39 = vld [vmem:[#allocation129_spill] sm:$0xff] }
 0x4b0   : > { %6318 = vrot.lane.b32.xlu0 %v9964_v51, %s7553_s26  ;;  %6283 = vrot.lane.b32.xlu2 %v10469_v57, %s7552_s25 }
 0x4b1   : > { %6293 = vrot.lane.b32.xlu1 %v6292_v13, %s7552_s25  ;;  %v13498_v13 = vld [vmem:[#allocation127_spill] sm:$0xff] }
 0x4b8   : > { %6333 = vrot.lane.b32.xlu0 %v10054_v26, %s7553_s26  ;;  %6298 = vrot.lane.b32.xlu2 %v6297_v27, %s7552_s25 }
 0x4b9   : > { %6308 = vrot.lane.b32.xlu1 %v13494_v37, %s7553_s26  ;;  %v10507_v37 = vpop.permute.xlu1 %6113 }
 0x4ba   : > { %v10491_v41 = vpop.permute.xlu0 %6123  ;;  %v10493_v60 = vpop.permute.xlu2 %6133  ;;  %13501 = vst [vmem:[#allocation81_spill] sm:$0xff] %v10507_v37  ;;  %v13506_v37 = vld [vmem:[#allocation144_spill] sm:$0xff] }
 0x4bb   : > { %13495 = vst [vmem:[#allocation34_spill] sm:$0xff] %v10493_v60  ;;  %v13510_v60 = vld [vmem:[#allocation48_spill] sm:$0xff] }
 0x4c0   : > { %6348 = vrot.lane.b32.xlu0 %v13497_v28, %s7553_s26  ;;  %6313 = vrot.lane.b32.xlu2 %v13498_v13, %s7553_s26  ;;  %v13504_v28 = vld [vmem:[#allocation8_spill] sm:$0xff] }
 0x4c1   : > { %6323 = vrot.lane.b32.xlu1 %v13499_v12, %s7553_s26 }
 0x4c2   : > { %v10503_v22 = vpop.permute.xlu2 %6148  ;;  %v10505_v27 = vpop.permute.xlu0 %6138 }
 0x4c3   : > { %13500 = vst [vmem:[#allocation96_spill] sm:$0xff] %v10505_v27 }
 0x4c8   : > { %6363 = vrot.lane.b32.xlu0 %v13502_v36, %s7553_s26  ;;  %6328 = vrot.lane.b32.xlu2 %v13503_v7, %s7553_s26 }
 0x4c9   : > { %6338 = vrot.lane.b32.xlu1 %v13504_v28, %s7553_s26 }
 0x4ca   : > { %v10515_v61 = vpop.permute.xlu2 %6163  ;;  %v10517_v52 = vpop.permute.xlu0 %6153 }
 0x4cb   : > { %v10519_v54 = vpop.permute.xlu1 %6128 }
 0x4d0   : > { %6343 = vrot.lane.b32.xlu2 %v13505_v39, %s7553_s26  ;;  %6378 = vrot.lane.b32.xlu0 %v10134_v0, %s7553_s26 }
 0x4d1   : > { %6353 = vrot.lane.b32.xlu1 %v13506_v37, %s7553_s26 }
 0x4d2   : > { %v10527_v27 = vpop.permute.xlu2 %6178  ;;  %v10529_v15 = vpop.permute.xlu0 %6168 }
 0x4d3   : > { %13507 = vst [vmem:[#allocation14_spill] sm:$0xff] %v10527_v27  ;;  %v10531_v28 = vpop.permute.xlu1 %6143  ;;  %v13513_v27 = vld [vmem:[#allocation45_spill] sm:$0xff] }
 0x4d4   : > { %13508 = vst [vmem:[#allocation109_spill] sm:$0xff] %v10529_v15  ;;  %v13514_v15 = vld [vmem:[#allocation93_spill] sm:$0xff] }
 0x4d5   : > { %13509 = vst [vmem:[#allocation125_spill] sm:$0xff] %v10531_v28  ;;  %v6382_v23 = vpack.i.bf16 %v13514_v15, %v13513_v27  ;;  %v13515_v28 = vld [vmem:[#allocation40_spill] sm:$0xff] }
 0x4d8   : > { %6358 = vrot.lane.b32.xlu2 %v13510_v60, %s7553_s26  ;;  %6393 = vrot.lane.b32.xlu0 %v9908_v29, %s7554_s27 }
 0x4d9   : > { %6368 = vrot.lane.b32.xlu1 %v10334_v9, %s7553_s26 }
 0x4da   : > { %v10539_v0 = vpop.permute.xlu2 %6193  ;;  %v10541_v39 = vpop.permute.xlu0 %6183 }
 0x4db   : > { %13511 = vst [vmem:[#allocation114_spill] sm:$0xff] %v10539_v0  ;;  %v10543_v37 = vpop.permute.xlu1 %6158  ;;  %v13518_v0 = vld [vmem:[#allocation7_spill] sm:$0xff] }
 0x4dc   : > { %13512 = vst [vmem:[#allocation157_spill] sm:$0xff] %v10541_v39  ;;  %v10584_v39 = vld [vmem:[#allocation3 + $0x38] sm:$0xff] }
 0x4e0   : > { %6373 = vrot.lane.b32.xlu2 %v13515_v28, %s7553_s26  ;;  %6408 = vrot.lane.b32.xlu0 %v10028_v25, %s7554_s27 }
 0x4e1   : > { %6383 = vrot.lane.b32.xlu1 %v6382_v23, %s7553_s26 }
 0x4e2   : > { %v10552_v29 = vpop.permute.xlu2 %6208  ;;  %v10554_v9 = vpop.permute.xlu0 %6198 }
 0x4e3   : > { %13516 = vst [vmem:[#allocation53_spill] sm:$0xff] %v10554_v9  ;;  %v10556_v60 = vpop.permute.xlu1 %6173  ;;  %v10582_v9 = vld [vmem:[#allocation3 + $0x30] sm:$0xff] }
 0x4e4   : > { %13517 = vst [vmem:[#allocation152_spill] sm:$0xff] %v10556_v60  ;;  %v10601_v60 = vld [vmem:[#allocation3 + $0x50] sm:$0xff] }
 0x4e8   : > { %6388 = vrot.lane.b32.xlu2 %v13518_v0, %s7554_s27  ;;  %6423 = vrot.lane.b32.xlu0 %v10161_v16, %s7554_s27 }
 0x4e9   : > { %6398 = vrot.lane.b32.xlu1 %v9966_v18, %s7554_s27 }
 0x4ea   : > { %v10564_v28 = vpop.permute.xlu0 %6213  ;;  %v10566_v25 = vpop.permute.xlu2 %6223 }
 0x4eb   : > { %13519 = vst [vmem:[#allocation83_spill] sm:$0xff] %v10564_v28  ;;  %v10568_v23 = vpop.permute.xlu1 %6188 }
 0x4ec   : > { %13520 = vst [vmem:[#allocation16_spill] sm:$0xff] %v10566_v25  ;;  %v10599_v25 = vld [vmem:[#allocation3 + $0x48] sm:$0xff] }
 0x4ed   : > { %13521 = vst [vmem:[#allocation133_spill] sm:$0xff] %v10568_v23  ;;  %v6427_v23 = vpack.i.bf16 %v10584_v39, %v10582_v9  ;;  %v6442_v28 = vpack.i.bf16 %v10601_v60, %v10599_v25 }
 0x4f0   : > { %6403 = vrot.lane.b32.xlu2 %v10002_v42, %s7554_s27  ;;  %6438 = vrot.lane.b32.xlu0 %v10195_v63, %s7554_s27 }
 0x4f1   : > { %6413 = vrot.lane.b32.xlu1 %v10056_v11, %s7554_s27 }
 0x4f2   : > { %v10576_v0 = vpop.permute.xlu0 %6228  ;;  %v10578_v16 = vpop.permute.xlu2 %6238 }
 0x4f3   : > { %v10580_v18 = vpop.permute.xlu1 %6203 }
 0x4f8   : > { %6418 = vrot.lane.b32.xlu2 %v10109_v40, %s7554_s27  ;;  %6453 = vrot.lane.b32.xlu0 %v10391_v14, %s7555_s28 }
 0x4f9   : > { %6428 = vrot.lane.b32.xlu1 %v6427_v23, %s7555_s28 }
 0x4fa   : > { %v10593_v42 = vpop.permute.xlu0 %6243  ;;  %v10595_v11 = vpop.permute.xlu2 %6253 }
 0x4fb   : > { %v10597_v63 = vpop.permute.xlu1 %6218 }
 0x4fc   : > { %13522 = vst [vmem:[#allocation161_spill] sm:$0xff] %v10597_v63 }
 0x500   : > { %6433 = vrot.lane.b32.xlu2 %v13498_v13, %s7556_s29  ;;  %6468 = vrot.lane.b32.xlu0 %v10428_v45, %s7555_s28 }
 0x501   : > { %6443 = vrot.lane.b32.xlu1 %v6442_v28, %s7555_s28 }
 0x502   : > { %v10610_v40 = vpop.permute.xlu0 %6258  ;;  %v10612_v14 = vpop.permute.xlu2 %6268 }
 0x503   : > { %13523 = vst [vmem:[#allocation63_spill] sm:$0xff] %v10610_v40  ;;  %v10614_v23 = vpop.permute.xlu1 %6233  ;;  %v13526_v40 = vld [vmem:[#allocation47_spill] sm:$0xff] }
 0x504   : > { %13524 = vst [vmem:[#allocation162_spill] sm:$0xff] %v10612_v14  ;;  %v6497_v14 = vpack.i.bf16 %v10324_v3, %v13526_v40  ;;  %v6492_v40 = vpack.i.bf16 %v10314_v48, %v10084_v8  ;;  %v6542_v8 = vpack.i.bf16 %v10111_v31, %v10172_v2  ;;  %v6517_v48 = vpack.i.bf16 %v10058_v20, %v10137_v33  ;;  %v13532_v33 = vld [vmem:[#allocation85_spill] sm:$0xff] }
 0x505   : > { %v6557_v20 = vpack.i.bf16 %v10116_v50, %v10175_v17  ;;  %v6532_v31 = vpack.i.bf16 %v10063_v49, %v10141_v43  ;;  %v13533_v2 = vld [vmem:[#allocation77_spill] sm:$0xff]  ;;  %v3319_v43 = vld [vmem:[%s12802_s3 + $0x60] sm:$0xff]  ;;  %v3318_v17 = vld [vmem:[%s12802_s3 + $0x58] sm:$0xff] }
 0x506   : > { %v3320_v50 = vld [vmem:[%s12802_s3 + $0x68] sm:$0xff] }
 0x508   : > { %6448 = vrot.lane.b32.xlu2 %v9964_v51, %s7556_s29  ;;  %6483 = vrot.lane.b32.xlu0 %v10440_v59, %s7555_s28 }
 0x509   : > { %6458 = vrot.lane.b32.xlu1 %v13499_v12, %s7556_s29 }
 0x50a   : > { %v10622_v13 = vpop.permute.xlu0 %6273  ;;  %v10624_v45 = vpop.permute.xlu2 %6283 }
 0x50b   : > { %13525 = vst [vmem:[#allocation65_spill] sm:$0xff] %v10622_v13  ;;  %v10626_v28 = vpop.permute.xlu1 %6248  ;;  %v13528_v13 = vld [vmem:[#allocation90_spill] sm:$0xff] }
 0x50c   : > { %v6512_v63 = vpack.i.bf16 %v10327_v38, %v13528_v13  ;;  %v3321_v13 = vld [vmem:[%s12802_s3 + $0x70] sm:$0xff] }
 0x510   : > { %6463 = vrot.lane.b32.xlu2 %v10248_v1, %s7554_s27  ;;  %6498 = vrot.lane.b32.xlu0 %v6497_v14, %s7556_s29 }
 0x511   : > { %6473 = vrot.lane.b32.xlu1 %v13503_v7, %s7556_s29 }
 0x512   : > { %v10635_v51 = vpop.permute.xlu0 %6288  ;;  %v10637_v59 = vpop.permute.xlu2 %6298 }
 0x513   : > { %v10639_v12 = vpop.permute.xlu1 %6263 }
 0x514   : > { %13527 = vst [vmem:[#allocation94_spill] sm:$0xff] %v10639_v12 }
 0x518   : > { %6478 = vrot.lane.b32.xlu2 %v10283_v58, %s7554_s27  ;;  %6513 = vrot.lane.b32.xlu0 %v6512_v63, %s7556_s29  ;;  %v6507_v63 = vpack.i.bf16 %v10316_v34, %v10089_v55  ;;  %v3322_v55 = vld [vmem:[%s12802_s3 + $0x78] sm:$0xff]  ;;  %v13534_v34 = vpack.i.bf16 %v13532_v33, %v13533_v2  ;;  %v13542_v33 = vld [vmem:[#allocation120_spill] sm:$0xff]  ;;  %v13543_v2 = vld [vmem:[#allocation149_spill] sm:$0xff] }
 0x519   : > { %6488 = vrot.lane.b32.xlu1 %v10054_v26, %s7556_s29  ;;  %3393 = vmatpush.msra.mxu1 %v3322_v55 }
 0x51a   : > { %v10648_v1 = vpop.permute.xlu0 %6303  ;;  %v10650_v3 = vpop.permute.xlu2 %6313  ;;  %6027 = vmatpush.msrb.mxu3 %v3322_v55 }
 0x51b   : > { %13529 = vst [vmem:[#allocation4_spill] sm:$0xff] %v10648_v1  ;;  %v10652_v7 = vpop.permute.xlu1 %6278  ;;  %3394 = vmatpush.msra.mxu1 %v3321_v13 }
 0x51c   : > { %13530 = vst [vmem:[#allocation12_spill] sm:$0xff] %v10652_v7  ;;  %6028 = vmatpush.msrb.mxu3 %v3321_v13  ;;  %v3317_v13 = vld [vmem:[%s12802_s3 + $0x50] sm:$0xff] }
 0x51d   : > { %3395 = vmatpush.msra.mxu1 %v3320_v50 }
 0x51e   : > { %6029 = vmatpush.msrb.mxu3 %v3320_v50 }
 0x51f   : > { %3396 = vmatpush.msra.mxu1 %v3319_v43 }
 0x520   : > { %6493 = vrot.lane.b32.xlu2 %v6492_v40, %s7555_s28  ;;  %6528 = vrot.lane.b32.xlu0 %v10338_v24, %s7554_s27 }
 0x521   : > { %6503 = vrot.lane.b32.xlu1 %v10308_v21, %s7554_s27  ;;  %6030 = vmatpush.msrb.mxu3 %v3319_v43 }
 0x522   : > { %v10661_v38 = vpop.permute.xlu0 %6318  ;;  %v10663_v58 = vpop.permute.xlu2 %6328  ;;  %3397 = vmatpush.msra.mxu1 %v3318_v17 }
 0x523   : > { %v10665_v26 = vpop.permute.xlu1 %6293  ;;  %6031 = vmatpush.msrb.mxu3 %v3318_v17  ;;  %v2773_v17 = vrot.slane %v10211_v62, 2 }
 0x524   : > { %3398 = vmatpush.msra.mxu1 %v3317_v13 }
 0x525   : > { %6032 = vmatpush.msrb.mxu3 %v3317_v13  ;;  %v13550_v13 = vld [vmem:[#allocation27_spill] sm:$0xff] }
 0x528   : > { %6508 = vrot.lane.b32.xlu2 %v6507_v63, %s7555_s28  ;;  %6543 = vrot.lane.b32.xlu0 %v6542_v8, %s7555_s28  ;;  %v13537_v8 = vld [vmem:[#allocation107_spill] sm:$0xff] }
 0x529   : > { %6518 = vrot.lane.b32.xlu1 %v6517_v48, %s7555_s28  ;;  %v13538_v48 = vld [vmem:[#allocation10_spill] sm:$0xff] }
 0x52a   : > { %v10676_v21 = vpop.permute.xlu0 %6333  ;;  %v10678_v24 = vpop.permute.xlu2 %6343  ;;  %v13539_v55 = vpack.i.bf16 %v13537_v8, %v13538_v48  ;;  %v3315_v48 = vld [vmem:[%s12802_s3 + $0x40] sm:$0xff] }
 0x52b   : > { %13531 = vst [vmem:[#allocation122_spill] sm:$0xff] %v10678_v24  ;;  %v10680_v14 = vpop.permute.xlu1 %6308 }
 0x530   : > { %6523 = vrot.lane.b32.xlu2 %v13534_v34, %s7556_s29  ;;  %6558 = vrot.lane.b32.xlu0 %v6557_v20, %s7555_s28  ;;  %v13540_v20 = vld [vmem:[#allocation110_spill] sm:$0xff]  ;;  %v13544_v34 = vpack.i.bf16 %v13542_v33, %v13543_v2  ;;  %v13547_v33 = vld [vmem:[#allocation31_spill] sm:$0xff] }
 0x531   : > { %6533 = vrot.lane.b32.xlu1 %v6532_v31, %s7555_s28  ;;  %v13541_v31 = vpack.i.bf16 %v13513_v27, %v13540_v20  ;;  %v3316_v27 = vld [vmem:[%s12802_s3 + $0x48] sm:$0xff]  ;;  %v13546_v20 = vld [vmem:[#allocation88_spill] sm:$0xff]  ;;  %v13548_v2 = vpack.i.bf16 %v13514_v15, %v13547_v33 }
 0x532   : > { %v10698_v40 = vpop.permute.xlu0 %6348  ;;  %v10700_v63 = vpop.permute.xlu2 %6358  ;;  %3399 = vmatpush.msra.mxu1 %v3316_v27  ;;  %6033 = vmatpush.msrb.mxu3 %v3316_v27  ;;  %v2772_v27 = vrot.slane %v10213_v53, 2 }
 0x533   : > { %13535 = vst [vmem:[#allocation56_spill] sm:$0xff] %v10698_v40  ;;  %v10702_v49 = vpop.permute.xlu1 %6323 }
 0x534   : > { %13536 = vst [vmem:[#allocation138_spill] sm:$0xff] %v10700_v63  ;;  %3400 = vmatpush.msra.mxu1 %v3315_v48  ;;  %6034 = vmatpush.msrb.mxu3 %v3315_v48  ;;  %v10766_v15 = vsel %vm789_vm3, %v2772_v27, %v2773_v17  ;;  %v6567_v48 = vpack.i.bf16 %v10213_v53, %v10217_v35  ;;  %v2170_v27 = vld [vmem:[#allocation3 + $0x1a0] sm:$0xff] }
 0x535   : > { %13554 = vst [vmem:[#allocation99_spill] sm:$0xff] %v10766_v15 }
 0x538   : > { %6538 = vrot.lane.b32.xlu2 %v13539_v55, %s7556_s29  ;;  %6573 = vrot.lane.b32.xlu0 %v13541_v31, %s7556_s29  ;;  %v3314_v55 = vld [vmem:[%s12802_s3 + $0x38] sm:$0xff]  ;;  %v2775_v31 = vrot.slane %v13546_v20, 2  ;;  %v3313_v20 = vld [vmem:[%s12802_s3 + $0x30] sm:$0xff] }
 0x539   : > { %6548 = vrot.lane.b32.xlu1 %v13544_v34, %s7556_s29  ;;  %v13549_v34 = vld [vmem:[#allocation52_spill] sm:$0xff]  ;;  %3401 = vmatpush.msra.mxu1 %v3314_v55 }
 0x53a   : > { %v10728_v50 = vpop.permute.xlu0 %6363  ;;  %v10730_v43 = vpop.permute.xlu2 %6373  ;;  %v13551_v63 = vpack.i.bf16 %v13549_v34, %v13550_v13  ;;  %v10769_v33 = vsel %vm789_vm3, %v2773_v17, %v2775_v31  ;;  %6035 = vmatpush.msrb.mxu3 %v3314_v55  ;;  %v3310_v17 = vld [vmem:[%s12802_s3 + $0x18] sm:$0xff]  ;;  %v3309_v55 = vld [vmem:[%s12802_s3 + $0x10] sm:$0xff]  ;;  %v2169_v13 = vld [vmem:[#allocation3 + $0x198] sm:$0xff] }
 0x53b   : > { %v10732_v8 = vpop.permute.xlu1 %6338  ;;  %13555 = vst [vmem:[#allocation101_spill] sm:$0xff] %v10769_v33  ;;  %3402 = vmatpush.msra.mxu1 %v3313_v20  ;;  %v6602_v34 = vpack.i.bf16 %v10769_v33, %v10766_v15  ;;  %v2973_v33 = vrot.slane %v2170_v27, 1  ;;  %v10806_v15 = vpop.f32.mrf.mxu2 }
 0x53c   : > { %13545 = vst [vmem:[#allocation39_spill] sm:$0xff] %v10732_v8  ;;  %6036 = vmatpush.msrb.mxu3 %v3313_v20  ;;  %v3308_v20 = vld [vmem:[%s12802_s3 + $0x8] sm:$0xff] }
 0x53d   : > { %13556 = vst [vmem:[#allocation17_spill] sm:$0xff] %v10806_v15 }
 0x540   : > { %6553 = vrot.lane.b32.xlu2 %v10393_v5, %s7554_s27  ;;  %6588 = vrot.lane.b32.xlu0 %v13548_v2, %s7556_s29  ;;  %v3311_v2 = vld [vmem:[%s12802_s3 + $0x20] sm:$0xff] }
 0x541   : > { %6563 = vrot.lane.b32.xlu1 %v13551_v63, %s7556_s29  ;;  %v3312_v63 = vld [vmem:[%s12802_s3 + $0x28] sm:$0xff] }
 0x542   : > { %v10759_v7 = vpop.permute.xlu2 %6388  ;;  %v10761_v5 = vpop.permute.xlu0 %6378  ;;  %3403 = vmatpush.msra.mxu1 %v3312_v63  ;;  %6037 = vmatpush.msrb.mxu3 %v3312_v63  ;;  %v2972_v63 = vrot.slane %v2169_v13, 1 }
 0x543   : > { %13552 = vst [vmem:[#allocation154_spill] sm:$0xff] %v10761_v5  ;;  %v10763_v40 = vpop.permute.xlu1 %6353 }
 0x544   : > { %13553 = vst [vmem:[#allocation79_spill] sm:$0xff] %v10763_v40  ;;  %3404 = vmatpush.msra.mxu1 %v3311_v2  ;;  %6038 = vmatpush.msrb.mxu3 %v3311_v2 }
 0x546   : > { %3405 = vmatpush.msra.mxu1 %v3310_v17  ;;  %6039 = vmatpush.msrb.mxu3 %v3310_v17  ;;  %v2171_v17 = vld [vmem:[#allocation3 + $0x1a8] sm:$0x3] }
 0x548   : > { %6568 = vrot.lane.b32.xlu2 %v6567_v48, %s7555_s28  ;;  %6603 = vrot.lane.b32.xlu0 %v6602_v34, %s7554_s27  ;;  %v3307_v48 = vld [vmem:[%s12802_s3] sm:$0xff]  ;;  %v6592_v34 = vpack.i.bf16 %v2169_v13, %v10260_v19  ;;  %v13559_v13 = vld [vmem:[#allocation11_spill] sm:$0xff] }
 0x549   : > { %6578 = vrot.lane.b32.xlu1 %v10414_v47, %s7554_s27  ;;  %3406 = vmatpush.msra.mxu1 %v3309_v55  ;;  %v6582_v47 = vpack.i.bf16 %v10211_v62, %v10221_v6  ;;  %v2974_v6 = vsel %vm612_vm1, %v2972_v63, %v2973_v33 }
 0x54a   : > { %v10791_v35 = vpop.permute.xlu2 %6403  ;;  %v10793_v53 = vpop.permute.xlu0 %6393  ;;  %6040 = vmatpush.msrb.mxu3 %v3309_v55  ;;  %v6597_v15 = vpack.i.bf16 %v2974_v6, %v13559_v13  ;;  %v6607_v55 = vpack.i.bf16 %v2170_v27, %v10263_v32  ;;  %v13562_v27 = vld [vmem:[#allocation123_spill] sm:$0xff] }
 0x54b   : > { %v10795_v31 = vpop.permute.xlu1 %6368  ;;  %3407 = vmatpush.msra.mxu1 %v3308_v20 }
 0x54c   : > { %6041 = vmatpush.msrb.mxu3 %v3308_v20  ;;  %v10829_v20 = vpop.f32.mrf.mxu2 }
 0x54d   : > { %3408 = vmatpush.msra.mxu1 %v3307_v48  ;;  %13560 = vst [vmem:[#allocation153_spill] sm:$0xff] %v10829_v20  ;;  %v6150_v20 = vunpack.i.l.bf16 %v10503_v22 }
 0x54e   : > { %6042 = vmatpush.msrb.mxu3 %v3307_v48 }
 0x550   : > { %6583 = vrot.lane.b32.xlu2 %v6582_v47, %s7555_s28  ;;  %6618 = vrot.lane.b32.xlu0 %v10469_v57, %s7555_s28  ;;  %v7472_v57 = vld [vmem:[%s12802_s3 + $0x88] sm:$0xff]  ;;  %v2975_v47 = vrot.slane %v2171_v17, 1 }
 0x551   : > { %6593 = vrot.lane.b32.xlu1 %v6592_v34, %s7555_s28  ;;  %6043 = vmatpush.msra.mxu3 %v7472_v57  ;;  %v7473_v34 = vld [vmem:[%s12802_s3 + $0x80] sm:$0xff] }
 0x552   : > { %v10812_v2 = vpop.permute.xlu0 %6408  ;;  %v10814_v40 = vpop.permute.xlu2 %6418  ;;  %v2976_v6 = vsel %vm612_vm1, %v2973_v33, %v2975_v47  ;;  %v6230_v33 = vunpack.i.l.bf16 %v10576_v0 }
 0x553   : > { %13557 = vst [vmem:[#allocation126_spill] sm:$0xff] %v10814_v40  ;;  %v10816_v62 = vpop.permute.xlu1 %6383  ;;  %6044 = vmatpush.msra.mxu3 %v7473_v34  ;;  %v6612_v17 = vpack.i.bf16 %v2976_v6, %v13562_v27  ;;  %v6070_v34 = vunpack.i.l.bf16 %v10460_v56  ;;  %v6310_v6 = vunpack.i.l.bf16 %v10680_v14  ;;  %v7474_v27 = vld [vmem:[#allocation3] sm:$0xff] }
 0x554   : > { %13558 = vst [vmem:[#allocation128_spill] sm:$0xff] %v10816_v62  ;;  %v6151_v62 = vunpack.i.h.bf16 %v10503_v22  ;;  %v6391_v22 = vunpack.i.h.bf16 %v10759_v7 }
 0x558   : > { %6598 = vrot.lane.b32.xlu2 %v6597_v15, %s7556_s29 }
 0x559   : > { %6608 = vrot.lane.b32.xlu1 %v6607_v55, %s7555_s28  ;;  %v10844_v55 = vpop.f32.mrf.mxu2 }
 0x55a   : > { %v10831_v48 = vpop.permute.xlu0 %6423  ;;  %v6434_v13 = vpop.permute.xlu2 %6433  ;;  %13564 = vst [vmem:[#allocation84_spill] sm:$0xff] %v10844_v55  ;;  %v6071_v55 = vunpack.i.h.bf16 %v10460_v56  ;;  %v6311_v56 = vunpack.i.h.bf16 %v10680_v14  ;;  %v6075_v14 = vunpack.i.l.bf16 %v10434_v4 }
 0x55b   : > { %13561 = vst [vmem:[#allocation59_spill] sm:$0xff] %v10831_v48  ;;  %v10833_v63 = vpop.permute.xlu1 %6398 }
 0x560   : > { %6613 = vrot.lane.b32.xlu2 %v6612_v17, %s7556_s29  ;;  %v6390_v17 = vunpack.i.l.bf16 %v10759_v7  ;;  %v6155_v7 = vunpack.i.l.bf16 %v10517_v52 }
 0x561   : > { %6623 = vrot.lane.b32.xlu1 %v13502_v36, %s7556_s29  ;;  %v3078_v36 = vsel %vm389_vm4, %v7474_v27, %v6070_v34  ;;  %v6231_v34 = vunpack.i.h.bf16 %v10576_v0  ;;  %v6435_v27 = vunpack.i.l.bf16 %v6434_v13 }
 0x562   : > { %v10840_v15 = vpop.permute.xlu0 %6438  ;;  %v10849_v47 = vpop.permute.xlu2 %6448 }
 0x563   : > { %13563 = vst [vmem:[#allocation158_spill] sm:$0xff] %v10840_v15  ;;  %v10842_v57 = vpop.permute.xlu1 %6413  ;;  %v3110_v15 = vsel %vm1797_vm10, %v3078_v36, %v6150_v20  ;;  %v10863_v36 = vpop.f32.mrf.mxu2 }
 0x564   : > { %v3143_v24 = vsel %vm3142_vm14, %v3110_v15, %v6230_v33  ;;  %v7475_v33 = vld [vmem:[#allocation3 + $0x8] sm:$0xff] }
 0x565   : > { %v3176_v40 = vsel %vm3175_vm0, %v3143_v24, %v6310_v6  ;;  %v3079_v8 = vsel %vm389_vm4, %v7475_v33, %v6071_v55 }
 0x566   : > { %v3209_v20 = vsel %vm3208_vm15, %v3176_v40, %v6390_v17  ;;  %v3111_v24 = vsel %vm1797_vm10, %v3079_v8, %v6151_v62  ;;  %v6436_v8 = vunpack.i.h.bf16 %v6434_v13  ;;  %v3080_v62 = vsel %vm389_vm4, %v10378_v44, %v6075_v14 }
 0x567   : > { %v3144_v0 = vsel %vm3142_vm14, %v3111_v24, %v6231_v34  ;;  %v6395_v34 = vunpack.i.l.bf16 %v10793_v53  ;;  %v3112_v33 = vsel %vm1797_vm10, %v3080_v62, %v6155_v7  ;;  %v6076_v13 = vunpack.i.h.bf16 %v10434_v4 }
 0x568   : > { %v3177_v17 = vsel %vm3175_vm0, %v3144_v0, %v6311_v56  ;;  %v6156_v14 = vunpack.i.h.bf16 %v10517_v52  ;;  %v6236_v7 = vunpack.i.h.bf16 %v10614_v23 }
 0x569   : > { %v3210_v55 = vsel %vm3208_vm15, %v3177_v17, %v6391_v22  ;;  %v3081_v4 = vsel %vm389_vm4, %v10380_v10, %v6076_v13  ;;  %v6240_v13 = vunpack.i.l.bf16 %v10578_v16 }
 0x56a   : > { %v10855_v48 = vpop.permute.xlu0 %6453  ;;  %v10872_v40 = vpop.permute.xlu2 %6463 }
 0x56b   : > { %v6429_v12 = vpop.permute.xlu1 %6428 }
 0x56c   : > { %v6430_v1 = vunpack.i.l.bf16 %v6429_v12  ;;  %v6431_v6 = vunpack.i.h.bf16 %v6429_v12  ;;  %v6235_v12 = vunpack.i.l.bf16 %v10614_v23 }
 0x56e   : > { %v3242_v15 = vsel %vm3241_vm2, %v3209_v20, %v6430_v1  ;;  %v3145_v24 = vsel %vm3142_vm14, %v3112_v33, %v6235_v12  ;;  %v6316_v12 = vunpack.i.h.bf16 %v10650_v3 }
 0x56f   : > { %v3275_v5 = vsel %vm3274_vm5, %v3242_v15, %v6435_v27  ;;  %v3243_v27 = vsel %vm3241_vm2, %v3210_v55, %v6431_v6  ;;  %v10887_v15 = vpop.f32.mrf.mxu2 }
 0x570   : > { %3409 = vmatmul.f32.vlgmr.msra.gmra.mxu1 %v3275_v5  ;;  %v6315_v5 = vunpack.i.l.bf16 %v10650_v3  ;;  %v3276_v56 = vsel %vm3274_vm5, %v3243_v27, %v6436_v8  ;;  %v6450_v27 = vunpack.i.l.bf16 %v10849_v47 }
 0x572   : > { %v10876_v1 = vpop.permute.xlu0 %6468  ;;  %v3178_v6 = vsel %vm3175_vm0, %v3145_v24, %v6315_v5  ;;  %v10893_v0 = vpop.permute.xlu2 %6478  ;;  %v6396_v5 = vunpack.i.h.bf16 %v10793_v53  ;;  %v6080_v53 = vunpack.i.l.bf16 %v10448_v30  ;;  %v6451_v24 = vunpack.i.h.bf16 %v10849_v47 }
 0x573   : > { %v6444_v20 = vpop.permute.xlu1 %6443  ;;  %v3211_v44 = vsel %vm3208_vm15, %v3178_v6, %v6395_v34  ;;  %v3113_v34 = vsel %vm1797_vm10, %v3081_v4, %v6156_v14 }
 0x574   : > { %v6445_v22 = vunpack.i.l.bf16 %v6444_v20  ;;  %v6446_v52 = vunpack.i.h.bf16 %v6444_v20  ;;  %v6160_v20 = vunpack.i.l.bf16 %v10543_v37 }
 0x576   : > { %v3244_v55 = vsel %vm3241_vm2, %v3211_v44, %v6445_v22 }
 0x577   : > { %v3277_v62 = vsel %vm3274_vm5, %v3244_v55, %v6450_v27  ;;  %v10911_v23 = vpop.f32.mrf.mxu2  ;;  %v6320_v55 = vunpack.i.l.bf16 %v10661_v38  ;;  %v6400_v27 = vunpack.i.l.bf16 %v10833_v63 }
 0x578   : > { %3412 = vmatmul.f32.gmra.mxu1 %v3276_v56  ;;  %v3146_v56 = vsel %vm3142_vm14, %v3113_v34, %v6236_v7  ;;  %v3082_v7 = vsel %vm389_vm4, %v10582_v9, %v6080_v53  ;;  %v6081_v34 = vunpack.i.h.bf16 %v10448_v30  ;;  %v6126_v9 = vunpack.i.h.bf16 %v10491_v41 }
 0x579   : > { %v3179_v33 = vsel %vm3175_vm0, %v3146_v56, %v6316_v12  ;;  %v3114_v47 = vsel %vm1797_vm10, %v3082_v7, %v6160_v20  ;;  %v6455_v12 = vunpack.i.l.bf16 %v10855_v48  ;;  %v6205_v20 = vunpack.i.l.bf16 %v10580_v18 }
 0x57a   : > { %v10902_v8 = vpop.permute.xlu0 %6483  ;;  %v3212_v3 = vsel %vm3208_vm15, %v3179_v33, %v6396_v5  ;;  %v10920_v6 = vpop.permute.xlu2 %6493  ;;  %v3147_v4 = vsel %vm3142_vm14, %v3114_v47, %v6240_v13  ;;  %v6321_v7 = vunpack.i.h.bf16 %v10661_v38  ;;  %v6456_v38 = vunpack.i.h.bf16 %v10855_v48 }
 0x57b   : > { %v10895_v17 = vpop.permute.xlu1 %6458  ;;  %v3245_v10 = vsel %vm3241_vm2, %v3212_v3, %v6446_v52  ;;  %v3180_v56 = vsel %vm3175_vm0, %v3147_v4, %v6320_v55  ;;  %v6125_v3 = vunpack.i.l.bf16 %v10491_v41  ;;  %v6285_v55 = vunpack.i.l.bf16 %v10624_v45 }
 0x57c   : > { %v3278_v14 = vsel %vm3274_vm5, %v3245_v10, %v6451_v24  ;;  %v6460_v5 = vunpack.i.l.bf16 %v10895_v17  ;;  %v3213_v33 = vsel %vm3208_vm15, %v3180_v56, %v6400_v27  ;;  %v6161_v10 = vunpack.i.h.bf16 %v10543_v37 }
 0x57d   : > { %v3246_v53 = vsel %vm3241_vm2, %v3213_v33, %v6455_v12  ;;  %v6241_v24 = vunpack.i.h.bf16 %v10578_v16  ;;  %v6085_v41 = vunpack.i.l.bf16 %v10482_v46  ;;  %v3101_v37 = vsel %vm389_vm4, %v10263_v32, %v6126_v9 }
 0x57e   : > { %v3279_v30 = vsel %vm3274_vm5, %v3246_v53, %v6460_v5  ;;  %v6365_v16 = vunpack.i.l.bf16 %v10728_v50  ;;  %v6401_v27 = vunpack.i.h.bf16 %v10833_v63  ;;  %v3100_v12 = vsel %vm389_vm4, %v10260_v19, %v6125_v3 }
 0x57f   : > { %v10938_v52 = vpop.f32.mrf.mxu2  ;;  %v3132_v32 = vsel %vm1797_vm10, %v3100_v12, %v6205_v20  ;;  %v6461_v56 = vunpack.i.h.bf16 %v10895_v17  ;;  %v6286_v9 = vunpack.i.h.bf16 %v10624_v45  ;;  %v6496_v53 = vunpack.i.h.bf16 %v10920_v6 }
 0x580   : > { %3415 = vmatmul.f32.gmra.mxu1 %v3277_v62  ;;  %v3165_v33 = vsel %vm3142_vm14, %v3132_v32, %v6285_v55  ;;  %v6245_v55 = vunpack.i.l.bf16 %v10593_v42  ;;  %v6470_v32 = vunpack.i.l.bf16 %v10876_v1 }
 0x581   : > { %v3198_v48 = vsel %vm3175_vm0, %v3165_v33, %v6365_v16 }
 0x582   : > { %v10924_v44 = vpop.permute.xlu0 %6498  ;;  %v10948_v13 = vpop.permute.xlu2 %6508 }
 0x583   : > { %v10914_v22 = vpop.permute.xlu1 %6473  ;;  %v6501_v17 = vunpack.i.h.bf16 %v10924_v44 }
 0x584   : > { %v6475_v33 = vunpack.i.l.bf16 %v10914_v22 }
 0x588   : > { %3418 = vmatmul.f32.gmra.mxu1 %v3278_v14  ;;  %v3083_v14 = vsel %vm389_vm4, %v10584_v39, %v6081_v34  ;;  %v6165_v39 = vunpack.i.l.bf16 %v10515_v61  ;;  %v6206_v34 = vunpack.i.h.bf16 %v10580_v18 }
 0x589   : > { %v3115_v4 = vsel %vm1797_vm10, %v3083_v14, %v6161_v10  ;;  %v6366_v10 = vunpack.i.h.bf16 %v10728_v50 }
 0x58a   : > { %v10960_v47 = vpop.permute.xlu0 %6513  ;;  %v3148_v5 = vsel %vm3142_vm14, %v3115_v4, %v6241_v24  ;;  %v10978_v24 = vpop.f32.mrf.mxu2  ;;  %v3133_v14 = vsel %vm1797_vm10, %v3101_v37, %v6206_v34  ;;  %v3084_v4 = vsel %vm389_vm4, %v10599_v25, %v6085_v41 }
 0x58b   : > { %v10935_v62 = vpop.permute.xlu1 %6488  ;;  %v3181_v3 = vsel %vm3175_vm0, %v3148_v5, %v6321_v7  ;;  %v3166_v16 = vsel %vm3142_vm14, %v3133_v14, %v6286_v9  ;;  %v10993_v5 = vpop.permute.xlu2 %6523  ;;  %v3116_v34 = vsel %vm1797_vm10, %v3084_v4, %v6165_v39  ;;  %v6511_v9 = vunpack.i.h.bf16 %v10948_v13 }
 0x58c   : > { %v3214_v18 = vsel %vm3208_vm15, %v3181_v3, %v6401_v27  ;;  %v6325_v27 = vunpack.i.l.bf16 %v10702_v49  ;;  %v3199_v37 = vsel %vm3175_vm0, %v3166_v16, %v6366_v10  ;;  %v6086_v39 = vunpack.i.h.bf16 %v10482_v46 }
 0x58d   : > { %v3247_v45 = vsel %vm3241_vm2, %v3214_v18, %v6456_v38  ;;  %v6405_v38 = vunpack.i.l.bf16 %v10791_v35  ;;  %v6210_v10 = vunpack.i.l.bf16 %v10552_v29  ;;  %v6166_v18 = vunpack.i.h.bf16 %v10515_v61 }
 0x58e   : > { %v3280_v50 = vsel %vm3274_vm5, %v3247_v45, %v6461_v56  ;;  %v6370_v14 = vunpack.i.l.bf16 %v10795_v31  ;;  %v6326_v16 = vunpack.i.h.bf16 %v10702_v49  ;;  %v6406_v4 = vunpack.i.h.bf16 %v10791_v35 }
 0x58f   : > { %v6471_v49 = vunpack.i.h.bf16 %v10876_v1  ;;  %v6131_v35 = vunpack.i.h.bf16 %v10519_v54  ;;  %v6211_v1 = vunpack.i.h.bf16 %v10552_v29 }
 0x590   : > { %3421 = vmatmul.f32.gmra.mxu1 %v3279_v30 }
 0x592   : > { %v11002_v25 = vpop.permute.xlu0 %6528 }
 0x593   : > { %v6504_v63 = vpop.permute.xlu1 %6503  ;;  %v6530_v61 = vunpack.i.l.bf16 %v11002_v25 }
 0x594   : > { %v6505_v19 = vunpack.i.l.bf16 %v6504_v63  ;;  %v6506_v20 = vunpack.i.h.bf16 %v6504_v63  ;;  %v3149_v63 = vsel %vm3142_vm14, %v3116_v34, %v6245_v55  ;;  %v11019_v55 = vpop.f32.mrf.mxu2 }
 0x595   : > { %v3182_v3 = vsel %vm3175_vm0, %v3149_v63, %v6325_v27  ;;  %v11035_v63 = vpop.permute.xlu2 %6538 }
 0x596   : > { %v3231_v30 = vsel %vm3208_vm15, %v3198_v48, %v6505_v19  ;;  %v3232_v56 = vsel %vm3208_vm15, %v3199_v37, %v6506_v20  ;;  %v6130_v19 = vunpack.i.l.bf16 %v10519_v54  ;;  %v3215_v48 = vsel %vm3208_vm15, %v3182_v3, %v6405_v38  ;;  %v13565_v3 = vld [vmem:[#allocation58_spill] sm:$0xff] }
 0x597   : > { %v3264_v7 = vsel %vm3241_vm2, %v3231_v30, %v6496_v53  ;;  %v3265_v53 = vsel %vm3241_vm2, %v3232_v56, %v6511_v9  ;;  %v6516_v20 = vunpack.i.h.bf16 %v10960_v47  ;;  %v3248_v45 = vsel %vm3241_vm2, %v3215_v48, %v6470_v32 }
 0x598   : > { %3424 = vmatmul.f32.gmra.mxu1 %v3280_v50  ;;  %v3297_v12 = vsel %vm3274_vm5, %v3264_v7, %v6501_v17  ;;  %v6290_v17 = vunpack.i.l.bf16 %v10635_v51  ;;  %v6246_v30 = vunpack.i.h.bf16 %v10593_v42  ;;  %v3281_v46 = vsel %vm3274_vm5, %v3248_v45, %v6475_v33  ;;  %v7476_v50 = vld [vmem:[#allocation3 + $0x120] sm:$0xff] }
 0x599   : > { %3475 = vmatmul.f32.vlgmr.msrb.gmra.mxu3 %v3297_v12  ;;  %v3102_v7 = vsel %vm389_vm4, %v7476_v50, %v6130_v19  ;;  %v3298_v27 = vsel %vm3274_vm5, %v3265_v53, %v6516_v20  ;;  %v3085_v12 = vsel %vm389_vm4, %v10601_v60, %v6086_v39  ;;  %v6476_v56 = vunpack.i.h.bf16 %v10914_v22  ;;  %v13566_v53 = vld [vmem:[#allocation109_spill] sm:$0xff] }
 0x59a   : > { %v3134_v42 = vsel %vm1797_vm10, %v3102_v7, %v6210_v10  ;;  %v3117_v37 = vsel %vm1797_vm10, %v3085_v12, %v6166_v18  ;;  %v6090_v39 = vunpack.i.l.bf16 %v13565_v3  ;;  %v11045_v10 = vpop.permute.xlu0 %6543  ;;  %v6170_v18 = vunpack.i.l.bf16 %v13566_v53 }
 0x59b   : > { %v11004_v41 = vpop.permute.xlu1 %6518  ;;  %v3167_v34 = vsel %vm3142_vm14, %v3134_v42, %v6290_v17  ;;  %v3150_v32 = vsel %vm3142_vm14, %v3117_v37, %v6246_v30  ;;  %v6291_v17 = vunpack.i.h.bf16 %v10635_v51  ;;  %v6526_v54 = vunpack.i.h.bf16 %v10993_v5 }
 0x59c   : > { %v6521_v38 = vunpack.i.h.bf16 %v11004_v41  ;;  %v3200_v9 = vsel %vm3175_vm0, %v3167_v34, %v6370_v14  ;;  %v3183_v33 = vsel %vm3175_vm0, %v3150_v32, %v6326_v16  ;;  %v6250_v45 = vunpack.i.l.bf16 %v10626_v28  ;;  %v7477_v14 = vld [vmem:[#allocation3 + $0x128] sm:$0xff]  ;;  %v7478_v16 = vld [vmem:[#allocation3 + $0x60] sm:$0xff]  ;;  %v11064_v42 = vpop.f32.mrf.mxu2 }
 0x59d   : > { %v3233_v19 = vsel %vm3208_vm15, %v3200_v9, %v6530_v61  ;;  %v3216_v22 = vsel %vm3208_vm15, %v3183_v33, %v6406_v4  ;;  %v6371_v30 = vunpack.i.h.bf16 %v10795_v31  ;;  %v6330_v50 = vunpack.i.l.bf16 %v10663_v58 }
 0x59e   : > { %v3266_v48 = vsel %vm3241_vm2, %v3233_v19, %v6521_v38  ;;  %v3249_v20 = vsel %vm3241_vm2, %v3216_v22, %v6471_v49  ;;  %v6531_v7 = vunpack.i.h.bf16 %v11002_v25  ;;  %v3086_v61 = vsel %vm389_vm4, %v7478_v16, %v6090_v39  ;;  %v13568_v39 = vld [vmem:[#allocation83_spill] sm:$0xff]  ;;  %v11079_v22 = vpop.permute.xlu2 %6553 }
 0x59f   : > { %v3282_v29 = vsel %vm3274_vm5, %v3249_v20, %v6476_v56  ;;  %v3299_v51 = vsel %vm3274_vm5, %v3266_v48, %v6526_v54  ;;  %v6410_v12 = vunpack.i.l.bf16 %v10812_v2  ;;  %v3118_v4 = vsel %vm1797_vm10, %v3086_v61, %v6170_v18  ;;  %v13567_v56 = vld [vmem:[#allocation34_spill] sm:$0xff]  ;;  %v7480_v16 = vld [vmem:[#allocation3 + $0x68] sm:$0xff] }
 0x5a0   : > { %3427 = vmatmul.f32.gmra.mxu1 %v3281_v46  ;;  %v3103_v46 = vsel %vm389_vm4, %v7477_v14, %v6131_v35  ;;  %v6485_v25 = vunpack.i.l.bf16 %v10902_v8  ;;  %v3151_v37 = vsel %vm3142_vm14, %v3118_v4, %v6250_v45  ;;  %v6490_v34 = vunpack.i.l.bf16 %v10935_v62 }
 0x5a1   : > { %3478 = vmatmul.f32.gmra.mxu3 %v3298_v27  ;;  %v3135_v27 = vsel %vm1797_vm10, %v3103_v46, %v6211_v1  ;;  %v6135_v9 = vunpack.i.l.bf16 %v13567_v56  ;;  %v3184_v35 = vsel %vm3175_vm0, %v3151_v37, %v6330_v50  ;;  %v6091_v19 = vunpack.i.h.bf16 %v13565_v3  ;;  %v7479_v46 = vld [vmem:[#allocation3 + $0x138] sm:$0xff] }
 0x5a2   : > { %v3168_v38 = vsel %vm3142_vm14, %v3135_v27, %v6291_v17  ;;  %v6215_v1 = vunpack.i.l.bf16 %v13568_v39  ;;  %v3217_v48 = vsel %vm3208_vm15, %v3184_v35, %v6410_v12  ;;  %v6171_v17 = vunpack.i.h.bf16 %v13566_v53 }
 0x5a3   : > { %v11037_v60 = vpop.permute.xlu1 %6533  ;;  %v3201_v32 = vsel %vm3175_vm0, %v3168_v38, %v6371_v30  ;;  %v6295_v54 = vunpack.i.l.bf16 %v10665_v26  ;;  %v6541_v20 = vunpack.i.h.bf16 %v11035_v63  ;;  %v3250_v45 = vsel %vm3241_vm2, %v3217_v48, %v6485_v25 }
 0x5a4   : > { %v6536_v31 = vunpack.i.h.bf16 %v11037_v60  ;;  %v3234_v33 = vsel %vm3208_vm15, %v3201_v32, %v6531_v7  ;;  %v6251_v30 = vunpack.i.h.bf16 %v10626_v28  ;;  %v6375_v3 = vunpack.i.l.bf16 %v10730_v43  ;;  %v13569_v32 = vld [vmem:[#allocation156_spill] sm:$0xff] }
 0x5a5   : > { %v3283_v14 = vsel %vm3274_vm5, %v3250_v45, %v6490_v34  ;;  %v3104_v50 = vsel %vm389_vm4, %v7479_v46, %v6135_v9  ;;  %v6331_v7 = vunpack.i.h.bf16 %v10663_v58  ;;  %v6555_v53 = vunpack.i.l.bf16 %v11079_v22 }
 0x5a6   : > { %v3267_v18 = vsel %vm3241_vm2, %v3234_v33, %v6536_v31  ;;  %v3087_v61 = vsel %vm389_vm4, %v7480_v16, %v6091_v19  ;;  %v3136_v28 = vsel %vm1797_vm10, %v3104_v50, %v6215_v1  ;;  %v6411_v27 = vunpack.i.h.bf16 %v10812_v2  ;;  %v11109_v2 = vpop.f32.mrf.mxu2  ;;  %v13570_v1 = vld [vmem:[#allocation152_spill] sm:$0xff]  ;;  %v7482_v50 = vld [vmem:[#allocation3 + $0x140] sm:$0xff] }
 0x5a7   : > { %v3119_v12 = vsel %vm1797_vm10, %v3087_v61, %v6171_v17  ;;  %v3169_v31 = vsel %vm3142_vm14, %v3136_v28, %v6295_v54  ;;  %v6486_v4 = vunpack.i.h.bf16 %v10902_v8  ;;  %v6491_v38 = vunpack.i.h.bf16 %v10935_v62 }
 0x5a8   : > { %3430 = vmatmul.f32.gmra.mxu1 %v3282_v29  ;;  %v11089_v29 = vpop.permute.xlu0 %6558  ;;  %v3152_v58 = vsel %vm3142_vm14, %v3119_v12, %v6251_v30  ;;  %v6546_v25 = vunpack.i.h.bf16 %v11045_v10  ;;  %v3202_v34 = vsel %vm3175_vm0, %v3169_v31, %v6375_v3  ;;  %v6095_v9 = vunpack.i.l.bf16 %v13569_v32  ;;  %v7481_v3 = vld [vmem:[#allocation3 + $0x78] sm:$0xff] }
 0x5a9   : > { %3481 = vmatmul.f32.gmra.mxu3 %v3299_v51  ;;  %v3300_v51 = vsel %vm3274_vm5, %v3267_v18, %v6541_v20  ;;  %v3185_v33 = vsel %vm3175_vm0, %v3152_v58, %v6331_v7  ;;  %v3235_v8 = vsel %vm3208_vm15, %v3202_v34, %v6555_v53  ;;  %v6136_v19 = vunpack.i.h.bf16 %v13567_v56  ;;  %v13571_v53 = vld [vmem:[#allocation96_spill] sm:$0xff]  ;;  %v13572_v58 = vld [vmem:[#allocation161_spill] sm:$0xff] }
 0x5aa   : > { %v3218_v62 = vsel %vm3208_vm15, %v3185_v33, %v6411_v27  ;;  %v6175_v48 = vunpack.i.l.bf16 %v13570_v1  ;;  %v6216_v18 = vunpack.i.h.bf16 %v13568_v39  ;;  %v6096_v54 = vunpack.i.h.bf16 %v13569_v32  ;;  %v7483_v33 = vld [vmem:[#allocation3 + $0x150] sm:$0xff] }
 0x5ab   : > { %v11071_v49 = vpop.permute.xlu1 %6548  ;;  %v3251_v17 = vsel %vm3241_vm2, %v3218_v62, %v6486_v4  ;;  %v6255_v20 = vunpack.i.l.bf16 %v10595_v11  ;;  %v3268_v30 = vsel %vm3241_vm2, %v3235_v8, %v6546_v25  ;;  %v6296_v56 = vunpack.i.h.bf16 %v10665_v26  ;;  %v13573_v8 = vld [vmem:[#allocation154_spill] sm:$0xff]  ;;  %v11149_v62 = vpop.permute.xlu2 %6568 }
 0x5ac   : > { %v6551_v35 = vunpack.i.h.bf16 %v11071_v49  ;;  %v3284_v45 = vsel %vm3274_vm5, %v3251_v17, %v6491_v38  ;;  %v6335_v46 = vunpack.i.l.bf16 %v10676_v21  ;;  %v3105_v7 = vsel %vm389_vm4, %v7482_v50, %v6136_v19 }
 0x5ad   : > { %v6376_v16 = vunpack.i.h.bf16 %v10730_v43  ;;  %v6415_v61 = vunpack.i.l.bf16 %v10842_v57  ;;  %v3137_v26 = vsel %vm1797_vm10, %v3105_v7, %v6216_v18  ;;  %v6495_v12 = vunpack.i.l.bf16 %v10920_v6 }
 0x5ae   : > { %v3301_v39 = vsel %vm3274_vm5, %v3268_v30, %v6551_v35  ;;  %v6556_v31 = vunpack.i.h.bf16 %v11079_v22  ;;  %v6220_v38 = vunpack.i.l.bf16 %v13572_v58  ;;  %v6500_v25 = vunpack.i.l.bf16 %v10924_v44  ;;  %v11153_v18 = vpop.f32.mrf.mxu2 }
 0x5af   : > { %v6561_v43 = vunpack.i.h.bf16 %v11089_v29  ;;  %v6300_v32 = vunpack.i.l.bf16 %v10637_v59  ;;  %v6380_v19 = vunpack.i.l.bf16 %v13573_v8  ;;  %v6176_v17 = vunpack.i.h.bf16 %v13570_v1 }
 0x5b0   : > { %3433 = vmatmul.f32.gmra.mxu1 %v3283_v14  ;;  %v3088_v14 = vsel %vm389_vm4, %v7481_v3, %v6095_v9  ;;  %v11131_v28 = vpop.permute.xlu0 %6573  ;;  %v3170_v9 = vsel %vm3142_vm14, %v3137_v26, %v6296_v56  ;;  %v6256_v3 = vunpack.i.h.bf16 %v10595_v11  ;;  %v6336_v1 = vunpack.i.h.bf16 %v10676_v21 }
 0x5b1   : > { %3484 = vmatmul.f32.gmra.mxu3 %v3300_v51  ;;  %v6140_v51 = vunpack.i.l.bf16 %v13571_v53  ;;  %v3120_v27 = vsel %vm1797_vm10, %v3088_v14, %v6175_v48  ;;  %v3203_v48 = vsel %vm3175_vm0, %v3170_v9, %v6376_v16  ;;  %v6416_v11 = vunpack.i.h.bf16 %v10842_v57 }
 0x5b2   : > { %v3153_v4 = vsel %vm3142_vm14, %v3120_v27, %v6255_v20  ;;  %v3236_v30 = vsel %vm3208_vm15, %v3203_v48, %v6556_v31  ;;  %v13574_v27 = vld [vmem:[#allocation148_spill] sm:$0xff]  ;;  %v6576_v48 = vunpack.i.h.bf16 %v11131_v28 }
 0x5b3   : > { %v11105_v37 = vpop.permute.xlu1 %6563  ;;  %v3186_v6 = vsel %vm3175_vm0, %v3153_v4, %v6335_v46  ;;  %v3106_v22 = vsel %vm389_vm4, %v7483_v33, %v6140_v51  ;;  %v3269_v46 = vsel %vm3241_vm2, %v3236_v30, %v6561_v43  ;;  %v7484_v51 = vld [vmem:[#allocation3 + $0x80] sm:$0xff]  ;;  %v6100_v26 = vunpack.i.l.bf16 %v13574_v27 }
 0x5b4   : > { %v6566_v35 = vunpack.i.h.bf16 %v11105_v37  ;;  %v3219_v44 = vsel %vm3208_vm15, %v3186_v6, %v6415_v61  ;;  %v3138_v14 = vsel %vm1797_vm10, %v3106_v22, %v6220_v38  ;;  %v3089_v16 = vsel %vm389_vm4, %v7484_v51, %v6096_v54  ;;  %v13576_v6 = vld [vmem:[#allocation63_spill] sm:$0xff] }
 0x5b5   : > { %v3171_v50 = vsel %vm3142_vm14, %v3138_v14, %v6300_v32  ;;  %v6221_v4 = vunpack.i.h.bf16 %v13572_v58  ;;  %v6515_v38 = vunpack.i.l.bf16 %v10960_v47  ;;  %v6571_v54 = vunpack.i.h.bf16 %v11149_v62  ;;  %v13575_v32 = vld [vmem:[#allocation14_spill] sm:$0xff] }
 0x5b6   : > { %v3302_v7 = vsel %vm3274_vm5, %v3269_v46, %v6566_v35  ;;  %v3204_v61 = vsel %vm3175_vm0, %v3171_v50, %v6380_v19  ;;  %v6180_v9 = vunpack.i.l.bf16 %v13575_v32  ;;  %v6301_v35 = vunpack.i.h.bf16 %v10637_v59  ;;  %v13577_v19 = vld [vmem:[#allocation39_spill] sm:$0xff]  ;;  %v11198_v46 = vpop.f32.mrf.mxu2 }
 0x5b7   : > { %v6260_v33 = vunpack.i.l.bf16 %v13576_v6  ;;  %v6381_v22 = vunpack.i.h.bf16 %v13573_v8  ;;  %v11195_v8 = vpop.permute.xlu2 %6583 }
 0x5b8   : > { %3436 = vmatmul.f32.gmra.mxu1 %v3284_v45  ;;  %v3252_v45 = vsel %vm3241_vm2, %v3219_v44, %v6495_v12  ;;  %v3121_v12 = vsel %vm1797_vm10, %v3089_v16, %v6176_v17  ;;  %v11178_v57 = vpop.permute.xlu0 %6588  ;;  %v6340_v44 = vunpack.i.l.bf16 %v13577_v19  ;;  %v5920_v16 = vld [vmem:[%s12802_s3 + $0x118] sm:$0xff] }
 0x5b9   : > { %3487 = vmatmul.f32.gmra.mxu3 %v3301_v39  ;;  %v3285_v56 = vsel %vm3274_vm5, %v3252_v45, %v6500_v25  ;;  %v6141_v39 = vunpack.i.h.bf16 %v13571_v53  ;;  %v6510_v53 = vunpack.i.l.bf16 %v10948_v13  ;;  %v3154_v21 = vsel %vm3142_vm14, %v3121_v12, %v6256_v3  ;;  %v7485_v25 = vld [vmem:[#allocation3 + $0x158] sm:$0xff]  ;;  %v7486_v45 = vld [vmem:[#allocation3 + $0x90] sm:$0xff]  ;;  %v13578_v3 = vld [vmem:[#allocation126_spill] sm:$0xff]  ;;  %5082 = vmatpush.msrb.mxu2 %v5920_v16 }
 0x5ba   : > { %v3187_v13 = vsel %vm3175_vm0, %v3154_v21, %v6336_v1  ;;  %v3090_v59 = vsel %vm389_vm4, %v7486_v45, %v6100_v26  ;;  %v6420_v14 = vunpack.i.l.bf16 %v13578_v3  ;;  %v6586_v12 = vunpack.i.h.bf16 %v11195_v8 }
 0x5bb   : > { %v11141_v34 = vpop.permute.xlu1 %6578  ;;  %v3107_v43 = vsel %vm389_vm4, %v7485_v25, %v6141_v39  ;;  %v3220_v58 = vsel %vm3208_vm15, %v3187_v13, %v6416_v11  ;;  %v3122_v39 = vsel %vm1797_vm10, %v3090_v59, %v6180_v9  ;;  %v6101_v11 = vunpack.i.h.bf16 %v13574_v27 }
 0x5bc   : > { %v6580_v20 = vunpack.i.l.bf16 %v11141_v34  ;;  %v6581_v17 = vunpack.i.h.bf16 %v11141_v34  ;;  %v3139_v30 = vsel %vm1797_vm10, %v3107_v43, %v6221_v4  ;;  %v6520_v34 = vunpack.i.l.bf16 %v11004_v41 }
 0x5bd   : > { %v3172_v50 = vsel %vm3142_vm14, %v3139_v30, %v6301_v35  ;;  %v6181_v41 = vunpack.i.h.bf16 %v13575_v32  ;;  %v6261_v27 = vunpack.i.h.bf16 %v13576_v6  ;;  %v6525_v43 = vunpack.i.l.bf16 %v10993_v5  ;;  %v7487_v35 = vld [vmem:[#allocation3 + $0x98] sm:$0xff]  ;;  %v13582_v6 = vld [vmem:[#allocation128_spill] sm:$0xff] }
 0x5be   : > { %v3237_v31 = vsel %vm3208_vm15, %v3204_v61, %v6580_v20  ;;  %v3253_v20 = vsel %vm3241_vm2, %v3220_v58, %v6510_v53  ;;  %v3205_v51 = vsel %vm3175_vm0, %v3172_v50, %v6381_v22  ;;  %v3091_v13 = vsel %vm389_vm4, %v7487_v35, %v6101_v11  ;;  %v11242_v50 = vpop.f32.mrf.mxu2 }
 0x5bf   : > { %v3270_v47 = vsel %vm3241_vm2, %v3237_v31, %v6571_v54  ;;  %v3238_v26 = vsel %vm3208_vm15, %v3205_v51, %v6581_v17  ;;  %v13579_v31 = vld [vmem:[#allocation125_spill] sm:$0xff]  ;;  %v13580_v54 = vld [vmem:[#allocation16_spill] sm:$0xff]  ;;  %v6341_v58 = vunpack.i.h.bf16 %v13577_v19  ;;  %v6385_v17 = vunpack.i.l.bf16 %v13582_v6 }
 0x5c0   : > { %3439 = vmatmul.f32.gmra.mxu1 %v3285_v56  ;;  %v3286_v56 = vsel %vm3274_vm5, %v3253_v20, %v6515_v38  ;;  %v3303_v1 = vsel %vm3274_vm5, %v3270_v47, %v6576_v48  ;;  %v6145_v21 = vunpack.i.l.bf16 %v13579_v31  ;;  %v6225_v25 = vunpack.i.l.bf16 %v13580_v54  ;;  %v11222_v9 = vpop.permute.xlu0 %6603  ;;  %v7488_v20 = vld [vmem:[#allocation3 + $0x168] sm:$0xff] }
 0x5c1   : > { %3490 = vmatmul.f32.gmra.mxu3 %v3302_v7  ;;  %v3155_v7 = vsel %vm3142_vm14, %v3122_v39, %v6260_v33  ;;  %v3271_v32 = vsel %vm3241_vm2, %v3238_v26, %v6586_v12  ;;  %v13581_v33 = vld [vmem:[#allocation4_spill] sm:$0xff]  ;;  %v6591_v47 = vunpack.i.h.bf16 %v11178_v57  ;;  %v6421_v48 = vunpack.i.h.bf16 %v13578_v3  ;;  %v11239_v39 = vpop.permute.xlu2 %6598 }
 0x5c2   : > { %v3188_v61 = vsel %vm3175_vm0, %v3155_v7, %v6340_v44  ;;  %v6305_v22 = vunpack.i.l.bf16 %v13581_v33  ;;  %v3123_v44 = vsel %vm1797_vm10, %v3091_v13, %v6181_v41  ;;  %v3108_v45 = vsel %vm389_vm4, %v7488_v20, %v6145_v21  ;;  %v13584_v21 = vld [vmem:[#allocation157_spill] sm:$0xff] }
 0x5c3   : > { %v3221_v53 = vsel %vm3208_vm15, %v3188_v61, %v6420_v14  ;;  %v11216_v4 = vpop.permute.xlu1 %6593  ;;  %v6535_v59 = vunpack.i.l.bf16 %v11037_v60  ;;  %v6605_v30 = vunpack.i.l.bf16 %v11222_v9  ;;  %v3304_v19 = vsel %vm3274_vm5, %v3271_v32, %v6591_v47  ;;  %v13583_v61 = vld [vmem:[#allocation91_spill] sm:$0xff] }
 0x5c4   : > { %v3254_v38 = vsel %vm3241_vm2, %v3221_v53, %v6520_v34  ;;  %v3140_v14 = vsel %vm1797_vm10, %v3108_v45, %v6225_v25  ;;  %v6596_v3 = vunpack.i.h.bf16 %v11216_v4  ;;  %v6146_v51 = vunpack.i.h.bf16 %v13579_v31  ;;  %v13585_v31 = vld [vmem:[#allocation94_spill] sm:$0xff] }
 0x5c5   : > { %v3287_v5 = vsel %vm3274_vm5, %v3254_v38, %v6525_v43  ;;  %v3173_v34 = vsel %vm3142_vm14, %v3140_v14, %v6305_v22  ;;  %v6105_v26 = vunpack.i.l.bf16 %v13583_v61  ;;  %v6226_v41 = vunpack.i.h.bf16 %v13580_v54  ;;  %v7489_v22 = vld [vmem:[#allocation3 + $0x170] sm:$0xff] }
 0x5c6   : > { %v3206_v7 = vsel %vm3175_vm0, %v3173_v34, %v6385_v17  ;;  %v6540_v12 = vunpack.i.l.bf16 %v11035_v63  ;;  %v6185_v38 = vunpack.i.l.bf16 %v13584_v21  ;;  %v6306_v25 = vunpack.i.h.bf16 %v13581_v33  ;;  %v13586_v63 = vld [vmem:[#allocation122_spill] sm:$0xff]  ;;  %v11280_v34 = vpop.f32.mrf.mxu2 }
 0x5c7   : > { %v3239_v11 = vsel %vm3208_vm15, %v3206_v7, %v6605_v30  ;;  %v6265_v32 = vunpack.i.l.bf16 %v13585_v31  ;;  %v6386_v35 = vunpack.i.h.bf16 %v13582_v6  ;;  %v3109_v54 = vsel %vm389_vm4, %v7489_v22, %v6146_v51 }
 0x5c8   : > { %3442 = vmatmul.f32.gmra.mxu1 %v3286_v56  ;;  %v3156_v56 = vsel %vm3142_vm14, %v3123_v44, %v6261_v27  ;;  %v3272_v53 = vsel %vm3241_vm2, %v3239_v11, %v6596_v3  ;;  %v6601_v27 = vunpack.i.h.bf16 %v11239_v39  ;;  %v6606_v47 = vunpack.i.h.bf16 %v11222_v9  ;;  %v7490_v44 = vld [vmem:[#allocation3 + $0xa8] sm:$0xff] }
 0x5c9   : > { %3493 = vmatmul.f32.gmra.mxu3 %v3303_v1  ;;  %v3189_v60 = vsel %vm3175_vm0, %v3156_v56, %v6341_v58  ;;  %v6345_v58 = vunpack.i.l.bf16 %v13586_v63  ;;  %v3141_v17 = vsel %vm1797_vm10, %v3109_v54, %v6226_v41  ;;  %v6545_v30 = vunpack.i.l.bf16 %v11045_v10  ;;  %v11276_v14 = vpop.permute.xlu2 %6613  ;;  %v7491_v41 = vld [vmem:[#allocation3 + $0xb0] sm:$0xff]  ;;  %v3683_v54 = vld [vmem:[#allocation3] sm:$0xff] }
 0x5ca   : > { %v3222_v1 = vsel %vm3208_vm15, %v3189_v60, %v6421_v48  ;;  %v3305_v33 = vsel %vm3274_vm5, %v3272_v53, %v6601_v27  ;;  %v3092_v48 = vsel %vm389_vm4, %v7490_v44, %v6105_v26  ;;  %v6106_v3 = vunpack.i.h.bf16 %v13583_v61 }
 0x5cb   : > { %v3255_v16 = vsel %vm3241_vm2, %v3222_v1, %v6535_v59  ;;  %v11258_v43 = vpop.permute.xlu1 %6608  ;;  %v3124_v45 = vsel %vm1797_vm10, %v3092_v48, %v6185_v38  ;;  %v3174_v59 = vsel %vm3142_vm14, %v3141_v17, %v6306_v25  ;;  %v6186_v7 = vunpack.i.h.bf16 %v13584_v21 }
 0x5cc   : > { %v3288_v13 = vsel %vm3274_vm5, %v3255_v16, %v6540_v12  ;;  %v6611_v6 = vunpack.i.h.bf16 %v11258_v43  ;;  %v3157_v9 = vsel %vm3142_vm14, %v3124_v45, %v6265_v32  ;;  %v3207_v56 = vsel %vm3175_vm0, %v3174_v59, %v6386_v35  ;;  %v13588_v35 = vld [vmem:[#allocation9_spill] sm:$0xff]  ;;  %v13590_v45 = vld [vmem:[#allocation162_spill] sm:$0xff] }
 0x5cd   : > { %v3190_v60 = vsel %vm3175_vm0, %v3157_v9, %v6345_v58  ;;  %v3240_v1 = vsel %vm3208_vm15, %v3207_v56, %v6606_v47  ;;  %v6616_v16 = vunpack.i.h.bf16 %v11276_v14  ;;  %v6346_v61 = vunpack.i.h.bf16 %v13586_v63  ;;  %v3684_v63 = vld [vmem:[#allocation3 + $0x8] sm:$0xff]  ;;  %v3685_v58 = vld [vmem:[#allocation3 + $0x10] sm:$0x3] }
 0x5ce   : > { %v3273_v51 = vsel %vm3241_vm2, %v3240_v1, %v6611_v6  ;;  %v3093_v12 = vsel %vm389_vm4, %v7491_v41, %v6106_v3  ;;  %v6560_v27 = vunpack.i.l.bf16 %v11089_v29  ;;  %v3785_v47 = vrot.slane %v3683_v54, 1  ;;  %v11302_v17 = vpop.f32.mrf.mxu2  ;;  %v13591_v56 = vld [vmem:[#allocation56_spill] sm:$0xff] }
 0x5cf   : > { %v3306_v21 = vsel %vm3274_vm5, %v3273_v51, %v6616_v16  ;;  %v3125_v38 = vsel %vm1797_vm10, %v3093_v12, %v6186_v7  ;;  %v3788_v44 = vrot.slane %v3685_v58, 1  ;;  %v3961_v48 = vrot.slane %v3683_v54, 2  ;;  %v11322_v12 = vld [vmem:[%s12803_s4] ss:$0 sm:$0xff] }
 0x5d0   : > { %3445 = vmatmul.f32.gmra.mxu1 %v3287_v5  ;;  %v13587_v5 = vld [vmem:[#allocation59_spill] sm:$0xff]  ;;  %v3964_v6 = vrot.slane %v3685_v58, 2  ;;  %v6270_v59 = vunpack.i.l.bf16 %v13590_v45  ;;  %v6350_v3 = vunpack.i.l.bf16 %v13591_v56  ;;  %v6570_v41 = vunpack.i.l.bf16 %v11149_v62  ;;  %v13594_v58 = vld [vmem:[#allocation80_spill] sm:$0xff] }
 0x5d1   : > { %3496 = vmatmul.f32.gmra.mxu3 %v3304_v19  ;;  %v6425_v20 = vunpack.i.l.bf16 %v13587_v5  ;;  %v6550_v19 = vunpack.i.l.bf16 %v11071_v49  ;;  %v6266_v49 = vunpack.i.h.bf16 %v13585_v31  ;;  %v6426_v53 = vunpack.i.h.bf16 %v13587_v5  ;;  %v13589_v5 = vld [vmem:[#allocation133_spill] sm:$0xff] }
 0x5d2   : > { %v6565_v31 = vunpack.i.l.bf16 %v11105_v37  ;;  %v3962_v37 = vrot.slane %v3684_v63, 2 }
 0x5d3   : > { %v3223_v10 = vsel %vm3208_vm15, %v3190_v60, %v6425_v20  ;;  %v3158_v25 = vsel %vm3142_vm14, %v3125_v38, %v6266_v49  ;;  %v6190_v20 = vunpack.i.l.bf16 %v13589_v5  ;;  %v13592_v49 = vld [vmem:[#allocation158_spill] sm:$0xff] }
 0x5d4   : > { %v3256_v11 = vsel %vm3241_vm2, %v3223_v10, %v6545_v30  ;;  %v3191_v32 = vsel %vm3175_vm0, %v3158_v25, %v6346_v61  ;;  %v3963_v1 = vsel %vm789_vm3, %v3961_v48, %v3962_v37  ;;  %v3965_v7 = vsel %vm789_vm3, %v3962_v37, %v3964_v6  ;;  %v7492_v10 = vld [vmem:[#allocation3 + $0xc0] sm:$0xff]  ;;  %v13595_v48 = vld [vmem:[#allocation155_spill] sm:$0xff] }
 0x5d5   : > { %v3289_v26 = vsel %vm3274_vm5, %v3256_v11, %v6550_v19  ;;  %v3224_v22 = vsel %vm3208_vm15, %v3191_v32, %v6426_v53  ;;  %v6440_v16 = vunpack.i.l.bf16 %v13592_v49  ;;  %v13593_v11 = vld [vmem:[#allocation131_spill] sm:$0xff]  ;;  %v6632_v61 = vpack.i.bf16 %v3965_v7, %v3963_v1 }
 0x5d6   : > { %v3257_v29 = vsel %vm3241_vm2, %v3224_v22, %v6560_v27  ;;  %v6111_v25 = vunpack.i.h.bf16 %v13588_v35  ;;  %v6271_v22 = vunpack.i.h.bf16 %v13590_v45  ;;  %v6590_v45 = vunpack.i.l.bf16 %v11178_v57  ;;  %v13599_v1 = vld [vmem:[#allocation79_spill] sm:$0xff] }
 0x5d7   : > { %v3290_v30 = vsel %vm3274_vm5, %v3257_v29, %v6565_v31  ;;  %6633 = vrot.lane.b32.xlu0 %v6632_v61, %s7551_s22  ;;  %v6191_v31 = vunpack.i.h.bf16 %v13589_v5  ;;  %v13596_v29 = vld [vmem:[#allocation81_spill] sm:$0xff]  ;;  %v6355_v7 = vunpack.i.l.bf16 %v13599_v1  ;;  %v6465_v57 = vunpack.i.l.bf16 %v10872_v40 }
 0x5d8   : > { %3448 = vmatmul.f32.gmra.mxu1 %v3288_v13  ;;  %v6110_v13 = vunpack.i.l.bf16 %v13588_v35  ;;  %v7493_v35 = vld [vmem:[#allocation3 + $0xc8] sm:$0xff]  ;;  %v6115_v37 = vunpack.i.l.bf16 %v13596_v29 }
 0x5d9   : > { %3499 = vmatmul.f32.gmra.mxu3 %v3305_v33  ;;  %v3786_v33 = vrot.slane %v3684_v63, 1  ;;  %v6351_v63 = vunpack.i.h.bf16 %v13591_v56 }
 0x5da   : > { %v3094_v51 = vsel %vm389_vm4, %v7492_v10, %v6110_v13 }
 0x5db   : > { %v3787_v9 = vsel %vm612_vm1, %v3785_v47, %v3786_v33  ;;  %v3789_v19 = vsel %vm612_vm1, %v3786_v33, %v3788_v44  ;;  %v3095_v33 = vsel %vm389_vm4, %v7493_v35, %v6111_v25  ;;  %v6441_v44 = vunpack.i.h.bf16 %v13592_v49  ;;  %v7495_v35 = vld [vmem:[#allocation3 + $0xe0] sm:$0xff] }
 0x5dc   : > { %v6627_v60 = vpack.i.bf16 %v3789_v19, %v3787_v9  ;;  %v3127_v5 = vsel %vm1797_vm10, %v3095_v33, %v6191_v31  ;;  %v13598_v19 = vld [vmem:[#allocation65_spill] sm:$0xff] }
 0x5dd   : > { %v3160_v6 = vsel %vm3142_vm14, %v3127_v5, %v6271_v22  ;;  %v6275_v56 = vunpack.i.l.bf16 %v13598_v19  ;;  %v6600_v22 = vunpack.i.l.bf16 %v11239_v39 }
 0x5de   : > { %6628 = vrot.lane.b32.xlu2 %v6627_v60, %s7547_s18  ;;  %v3193_v9 = vsel %vm3175_vm0, %v3160_v6, %v6351_v63  ;;  %v6356_v63 = vunpack.i.h.bf16 %v13599_v1  ;;  %v13603_v6 = vld [vmem:[#allocation50_spill] sm:$0xff]  ;;  %v13606_v1 = vld [vmem:[#allocation12_spill] sm:$0xff] }
 0x5df   : > { %v3226_v60 = vsel %vm3208_vm15, %v3193_v9, %v6441_v44  ;;  %v6466_v44 = vunpack.i.h.bf16 %v10872_v40  ;;  %v13605_v40 = vld [vmem:[#allocation101_spill] sm:$0xff] }
 0x5e0   : > { %3451 = vmatmul.f32.gmra.mxu1 %v3289_v26  ;;  %v3126_v26 = vsel %vm1797_vm10, %v3094_v51, %v6190_v20  ;;  %v6585_v20 = vunpack.i.l.bf16 %v11195_v8  ;;  %v7494_v51 = vld [vmem:[#allocation3 + $0xd8] sm:$0xff] }
 0x5e1   : > { %3502 = vmatmul.f32.gmra.mxu3 %v3306_v21  ;;  %v3159_v53 = vsel %vm3142_vm14, %v3126_v26, %v6270_v59  ;;  %v6575_v21 = vunpack.i.l.bf16 %v11131_v28  ;;  %v11336_v28 = vpop.f32.mrf.mxu2  ;;  %v13597_v59 = vld [vmem:[#allocation114_spill] sm:$0xff]  ;;  %v3096_v49 = vsel %vm389_vm4, %v7494_v51, %v6115_v37  ;;  %v6595_v26 = vunpack.i.l.bf16 %v11216_v4 }
 0x5e2   : > { %v3192_v38 = vsel %vm3175_vm0, %v3159_v53, %v6350_v3  ;;  %v3259_v10 = vsel %vm3241_vm2, %v3226_v60, %v6585_v20  ;;  %v6196_v4 = vunpack.i.h.bf16 %v13597_v59  ;;  %v6610_v20 = vunpack.i.l.bf16 %v11258_v43  ;;  %v7497_v43 = vld [vmem:[#allocation3 + $0x1a0] sm:$0xff] }
 0x5e3   : > { %v3225_v62 = vsel %vm3208_vm15, %v3192_v38, %v6440_v16  ;;  %v3292_v16 = vsel %vm3274_vm5, %v3259_v10, %v6590_v45  ;;  %v13601_v38 = vld [vmem:[#allocation99_spill] sm:$0xff]  ;;  %v6120_v45 = vunpack.i.l.bf16 %v13603_v6  ;;  %v3074_v60 = vrot.slane %v7497_v43, 2 }
 0x5e4   : > { %v3258_v13 = vsel %vm3241_vm2, %v3225_v62, %v6570_v41  ;;  %v13600_v41 = vld [vmem:[#allocation13_spill] sm:$0xff]  ;;  %v6116_v62 = vunpack.i.h.bf16 %v13596_v29 }
 0x5e5   : > { %v3291_v54 = vsel %vm3274_vm5, %v3258_v13, %v6575_v21  ;;  %v6276_v13 = vunpack.i.h.bf16 %v13598_v19  ;;  %v13602_v29 = vld [vmem:[#allocation17_spill] sm:$0xff] }
 0x5e6   : > { %v3097_v33 = vsel %vm389_vm4, %v7495_v35, %v6116_v62  ;;  %v11405_v62 = vpop.permute.xlu0 %6618 }
 0x5e7   : > { %v3129_v39 = vsel %vm1797_vm10, %v3097_v33, %v6196_v4 }
 0x5e8   : > { %3454 = vmatmul.f32.gmra.mxu1 %v3290_v30  ;;  %v6195_v30 = vunpack.i.l.bf16 %v13597_v59  ;;  %v13604_v59 = vld [vmem:[#allocation53_spill] sm:$0xff]  ;;  %v3162_v9 = vsel %vm3142_vm14, %v3129_v39, %v6276_v13 }
 0x5e9   : > { %5897 = vmatmul.msk.f32.vlgmr.msra.gmra.mxu3 %vm389_vm4, %v13593_v11  ;;  %v11366_v25 = vpop.f32.mrf.mxu2  ;;  %v3195_v19 = vsel %vm3175_vm0, %v3162_v9, %v6356_v63  ;;  %v13608_v13 = vld [vmem:[#allocation153_spill] sm:$0xff] }
 0x5ea   : > { %v3128_v61 = vsel %vm1797_vm10, %v3096_v49, %v6195_v30  ;;  %v6200_v30 = vunpack.i.l.bf16 %v13604_v59  ;;  %v7498_v49 = vld [vmem:[#allocation3 + $0xf0] sm:$0xff] }
 0x5eb   : > { %v3161_v21 = vsel %vm3142_vm14, %v3128_v61, %v6275_v56  ;;  %v7496_v56 = vld [vmem:[#allocation3 + $0x198] sm:$0xff] }
 0x5ed   : > { %v3410_v27 = vpop.f32.mrf.mxu1 }
 0x5ee   : > { %v3411_v32 = vadd.f32 %v11322_v12, %v3410_v27  ;;  %v3194_v27 = vsel %vm3175_vm0, %v3161_v21, %v6355_v7  ;;  %v6280_v7 = vunpack.i.l.bf16 %v13606_v1 }
 0x5ef   : > { %v3227_v31 = vsel %vm3208_vm15, %v3194_v27, %v6465_v57  ;;  %v3098_v57 = vsel %vm389_vm4, %v7498_v49, %v6120_v45  ;;  %v6201_v49 = vunpack.i.h.bf16 %v13604_v59 }
 0x5f0   : > { %v3524_v47 = vadd.f32 %v13594_v58, %v3411_v32  ;;  %3457 = vmatmul.f32.gmra.mxu1 %v3291_v54  ;;  %v3260_v32 = vsel %vm3241_vm2, %v3227_v31, %v6595_v26  ;;  %v3130_v26 = vsel %vm1797_vm10, %v3098_v57, %v6200_v30 }
 0x5f1   : > { %5898 = vmatmul.msk.f32.gmra.mxu3 %vm389_vm4, %v13595_v48  ;;  %v3293_v48 = vsel %vm3274_vm5, %v3260_v32, %v6600_v22  ;;  %v11395_v10 = vpop.f32.mrf.mxu2  ;;  %v3163_v21 = vsel %vm3142_vm14, %v3130_v26, %v6280_v7  ;;  %v6480_v32 = vunpack.i.l.bf16 %v10893_v0 }
 0x5f2   : > { %7241 = vtanh.f32 %v3524_v47  ;;  %v5919_v47 = vld [vmem:[%s12802_s3 + $0x110] sm:$0xff] }
 0x5f3   : > { %5083 = vmatpush.msrb.mxu2 %v5919_v47 }
 0x5f5   : > { %v3413_v3 = vpop.f32.mrf.mxu1 }
 0x5f6   : > { %v3414_v8 = vadd.f32 %v11322_v12, %v3413_v3  ;;  %v3073_v3 = vrot.slane %v7496_v56, 2 }
 0x5f8   : > { %v7242_v11 = vpop.eup %7241  ;;  %v3527_v53 = vadd.f32 %v13600_v41, %v3414_v8  ;;  %3460 = vmatmul.f32.gmra.mxu1 %v3292_v16  ;;  %v3228_v8 = vsel %vm3208_vm15, %v3195_v19, %v6466_v44  ;;  %v6615_v16 = vunpack.i.l.bf16 %v11276_v14  ;;  %v6624_v14 = vpop.permute.xlu1 %6623 }
 0x5f9   : > { %3651 = vst.msk [vmem:[#allocation3 + $0x19] sm:$0xff] %vm389_vm4, %v7242_v11  ;;  %5899 = vmatmul.msk.f32.gmra.mxu3 %vm389_vm4, %v13601_v38  ;;  %v3261_v51 = vsel %vm3241_vm2, %v3228_v8, %v6610_v20  ;;  %v13607_v38 = vld [vmem:[#allocation138_spill] sm:$0xff]  ;;  %v7499_v20 = vld [vmem:[#allocation3 + $0x1a8] sm:$0x3] }
 0x5fa   : > { %7243 = vtanh.f32 %v3527_v53  ;;  %v3075_v53 = vsel %vm789_vm3, %v3073_v3, %v3074_v60  ;;  %v6360_v27 = vunpack.i.l.bf16 %v13607_v38  ;;  %v3294_v31 = vsel %vm3274_vm5, %v3261_v51, %v6615_v16  ;;  %v11423_v51 = vpop.f32.mrf.mxu2 }
 0x5fb   : > { %v6121_v3 = vunpack.i.h.bf16 %v13603_v6 }
 0x5fc   : > { %v3196_v56 = vsel %vm3175_vm0, %v3163_v21, %v6360_v27  ;;  %v7500_v21 = vld [vmem:[#allocation3 + $0xf8] sm:$0xff] }
 0x5fd   : > { %v3416_v54 = vpop.f32.mrf.mxu1  ;;  %v3229_v8 = vsel %vm3208_vm15, %v3196_v56, %v6480_v32  ;;  %v3099_v27 = vsel %vm389_vm4, %v7500_v21, %v6121_v3 }
 0x5fe   : > { %v3417_v58 = vadd.f32 %v11322_v12, %v3416_v54 }
 0x600   : > { %v7244_v5 = vpop.eup %7243  ;;  %v3530_v37 = vadd.f32 %v13602_v29, %v3417_v58  ;;  %3463 = vmatmul.f32.gmra.mxu1 %v3293_v48  ;;  %v3686_v61 = vld [vmem:[#allocation3 + $0x18] sm:$0xff]  ;;  %v3076_v29 = vrot.slane %v7499_v20, 2 }
 0x601   : > { %3652 = vst.msk [vmem:[#allocation3 + $0x21] sm:$0xff] %vm389_vm4, %v7244_v5  ;;  %5900 = vmatmul.msk.f32.gmra.mxu3 %vm389_vm4, %v13605_v40  ;;  %v3966_v58 = vrot.slane %v3686_v61, 2  ;;  %v3790_v47 = vrot.slane %v3686_v61, 1  ;;  %v6620_v5 = vunpack.i.l.bf16 %v11405_v62 }
 0x602   : > { %7245 = vtanh.f32 %v3530_v37  ;;  %v6625_v37 = vunpack.i.l.bf16 %v6624_v14 }
 0x603   : > { %v3262_v16 = vsel %vm3241_vm2, %v3229_v8, %v6620_v5 }
 0x604   : > { %v3295_v6 = vsel %vm3274_vm5, %v3262_v16, %v6625_v37 }
 0x605   : > { %v3419_v11 = vpop.f32.mrf.mxu1 }
 0x606   : > { %v3420_v41 = vadd.f32 %v11322_v12, %v3419_v11  ;;  %v3077_v11 = vsel %vm789_vm3, %v3074_v60, %v3076_v29  ;;  %v3131_v60 = vsel %vm1797_vm10, %v3099_v27, %v6201_v49 }
 0x608   : > { %v7246_v4 = vpop.eup %7245  ;;  %v3533_v22 = vadd.f32 %v13608_v13, %v3420_v41  ;;  %3466 = vmatmul.f32.gmra.mxu1 %v3294_v31  ;;  %v3687_v54 = vld [vmem:[#allocation3 + $0x20] sm:$0xff]  ;;  %v3688_v63 = vld [vmem:[#allocation3 + $0x28] sm:$0x3]  ;;  %v6361_v41 = vunpack.i.h.bf16 %v13607_v38  ;;  %v6481_v31 = vunpack.i.h.bf16 %v10893_v0  ;;  %v6626_v38 = vunpack.i.h.bf16 %v6624_v14 }
 0x609   : > { %3653 = vst.msk [vmem:[#allocation3 + $0x31] sm:$0xff] %vm389_vm4, %v7246_v4  ;;  %5901 = vmatmul.msk.f32.gmra.mxu3 %vm389_vm4, %v3075_v53  ;;  %v6637_v35 = vpack.i.bf16 %v3687_v54, %v3686_v61  ;;  %v3967_v33 = vrot.slane %v3687_v54, 2  ;;  %v3969_v44 = vrot.slane %v3688_v63, 2  ;;  %v3791_v48 = vrot.slane %v3687_v54, 1  ;;  %v13609_v53 = vld [vmem:[#allocation84_spill] sm:$0xff] }
 0x60a   : > { %7247 = vtanh.f32 %v3533_v22  ;;  %v3793_v39 = vrot.slane %v3688_v63, 1  ;;  %v6281_v61 = vunpack.i.h.bf16 %v13606_v1  ;;  %v6621_v1 = vunpack.i.h.bf16 %v11405_v62  ;;  %v3589_v62 = vpop.f32.mrf.mxu2 }
 0x60b   : > { %6638 = vrot.lane.b32.xlu1 %v6637_v35, %s7552_s25  ;;  %v3968_v45 = vsel %vm789_vm3, %v3966_v58, %v3967_v33  ;;  %v3970_v30 = vsel %vm789_vm3, %v3967_v33, %v3969_v44  ;;  %v3792_v9 = vsel %vm612_vm1, %v3790_v47, %v3791_v48 }
 0x60c   : > { %v11417_v40 = vpack.i.bf16 %v3970_v30, %v3968_v45  ;;  %v3794_v19 = vsel %vm612_vm1, %v3791_v48, %v3793_v39  ;;  %v3164_v4 = vsel %vm3142_vm14, %v3131_v60, %v6281_v61 }
 0x60d   : > { %v3422_v43 = vpop.f32.mrf.mxu1  ;;  %v6642_v7 = vpack.i.bf16 %v3794_v19, %v3792_v9  ;;  %v3197_v32 = vsel %vm3175_vm0, %v3164_v4, %v6361_v41 }
 0x60e   : > { %v3423_v57 = vadd.f32 %v11322_v12, %v3422_v43  ;;  %6648 = vrot.lane.b32.xlu0 %v11417_v40, %s7554_s27  ;;  %v3230_v22 = vsel %vm3208_vm15, %v3197_v32, %v6481_v31 }
 0x60f   : > { %6643 = vrot.lane.b32.xlu2 %v6642_v7, %s7553_s26  ;;  %v3263_v63 = vsel %vm3241_vm2, %v3230_v22, %v6621_v1 }
 0x610   : > { %v7248_v26 = vpop.eup %7247  ;;  %v3536_v59 = vadd.f32 %v13609_v53, %v3423_v57  ;;  %3469 = vmatmul.f32.gmra.mxu1 %v3295_v6  ;;  %v3689_v54 = vld [vmem:[#allocation3 + $0x30] sm:$0xff]  ;;  %v3296_v58 = vsel %vm3274_vm5, %v3263_v63, %v6626_v38 }
 0x611   : > { %3654 = vst.msk [vmem:[#allocation3 + $0x39] sm:$0xff] %vm389_vm4, %v7248_v26  ;;  %5902 = vmatmul.msk.f32.gmra.mxu3 %vm389_vm4, %v3077_v11  ;;  %v3971_v33 = vrot.slane %v3689_v54, 2  ;;  %v3795_v48 = vrot.slane %v3689_v54, 1 }
 0x612   : > { %7249 = vtanh.f32 %v3536_v59  ;;  %v3592_v57 = vpop.f32.mrf.mxu2 }
 0x615   : > { %v3425_v13 = vpop.f32.mrf.mxu1 }
 0x616   : > { %v3426_v0 = vadd.f32 %v11322_v12, %v3425_v13  ;;  %6663 = vrot.lane.b32.xlu0 %v6642_v7, %s7547_s18 }
 0x618   : > { %v7250_v47 = vpop.eup %7249  ;;  %v3539_v35 = vadd.f32 %v10863_v36, %v3426_v0  ;;  %3472 = vmatmul.f32.gmra.mxu1 %v3296_v58  ;;  %v3690_v14 = vld [vmem:[#allocation3 + $0x38] sm:$0xff]  ;;  %v3691_v44 = vld [vmem:[#allocation3 + $0x40] sm:$0x3] }
 0x619   : > { %3655 = vst.msk [vmem:[#allocation3 + $0x49] sm:$0xff] %vm389_vm4, %v7250_v47  ;;  %v6652_v5 = vpack.i.bf16 %v3690_v14, %v3689_v54  ;;  %v3972_v39 = vrot.slane %v3690_v14, 2  ;;  %v3796_v20 = vrot.slane %v3690_v14, 1  ;;  %v3798_v29 = vrot.slane %v3691_v44, 1 }
 0x61a   : > { %7251 = vtanh.f32 %v3539_v35  ;;  %v3974_v7 = vrot.slane %v3691_v44, 2 }
 0x61b   : > { %6653 = vrot.lane.b32.xlu1 %v6652_v5, %s7555_s28  ;;  %v3973_v37 = vsel %vm789_vm3, %v3971_v33, %v3972_v39  ;;  %v3797_v45 = vsel %vm612_vm1, %v3795_v48, %v3796_v20  ;;  %v3799_v36 = vsel %vm612_vm1, %v3796_v20, %v3798_v29 }
 0x61c   : > { %v3476_v30 = vpop.f32.mrf.mxu3  ;;  %5922 = vmatmul.msk.f32.vlgmr.msrb.gmra.mxu2 %vm389_vm4, %v3973_v37  ;;  %v6677_v9 = vpack.i.bf16 %v3799_v36, %v3797_v45  ;;  %v3975_v16 = vsel %vm789_vm3, %v3972_v39, %v3974_v7 }
 0x61d   : > { %v3477_v19 = vadd.f32 %v11322_v12, %v3476_v30  ;;  %v3428_v56 = vpop.f32.mrf.mxu1  ;;  %v6682_v21 = vpack.i.bf16 %v3975_v16, %v3973_v37 }
 0x61e   : > { %v3429_v3 = vadd.f32 %v11322_v12, %v3428_v56  ;;  %6678 = vrot.lane.b32.xlu0 %v6677_v9, %s7553_s26  ;;  %6658 = vrot.lane.b32.xlu2 %v6677_v9, %s7556_s29 }
 0x61f   : > { %v3590_v43 = vadd.f32 %v3589_v62, %v3477_v19 }
 0x620   : > { %v7252_v8 = vpop.eup %7251  ;;  %v3542_v49 = vadd.f32 %v10887_v15, %v3429_v3  ;;  %v3692_v26 = vld [vmem:[#allocation3 + $0x48] sm:$0xff] }
 0x621   : > { %3656 = vst.msk [vmem:[#allocation3 + $0x51] sm:$0xff] %vm389_vm4, %v7252_v8  ;;  %7253 = vtanh.f32 %v3590_v43  ;;  %v3976_v31 = vrot.slane %v3692_v26, 2  ;;  %v3800_v1 = vrot.slane %v3692_v26, 1 }
 0x622   : > { %7255 = vtanh.f32 %v3542_v49 }
 0x623   : > { %6668 = vrot.lane.b32.xlu1 %v11417_v40, %s7551_s22 }
 0x624   : > { %v3479_v11 = vpop.f32.mrf.mxu3  ;;  %5923 = vmatmul.msk.f32.gmra.mxu2 %vm389_vm4, %v3975_v16 }
 0x625   : > { %v3480_v61 = vadd.f32 %v11322_v12, %v3479_v11  ;;  %v3431_v6 = vpop.f32.mrf.mxu1 }
 0x626   : > { %v3432_v41 = vadd.f32 %v11322_v12, %v3431_v6  ;;  %6673 = vrot.lane.b32.xlu2 %v6652_v5, %s7552_s25 }
 0x627   : > { %v7254_v15 = vpop.eup %7253  ;;  %v3593_v53 = vadd.f32 %v3592_v57, %v3480_v61 }
 0x628   : > { %v7256_v59 = vpop.eup %7255  ;;  %3673 = vst.msk [vmem:[#allocation3 + $0x121] sm:$0xff] %vm389_vm4, %v7254_v15  ;;  %v3545_v40 = vadd.f32 %v10911_v23, %v3432_v41  ;;  %v3693_v27 = vld [vmem:[#allocation3 + $0x50] sm:$0xff]  ;;  %v3694_v60 = vld [vmem:[#allocation3 + $0x58] sm:$0x3]  ;;  %v3595_v23 = vpop.f32.mrf.mxu2 }
 0x629   : > { %3657 = vst.msk [vmem:[#allocation3 + $0x61] sm:$0xff] %vm389_vm4, %v7256_v59  ;;  %7257 = vtanh.f32 %v3593_v53  ;;  %v3977_v4 = vrot.slane %v3693_v27, 2  ;;  %v3801_v38 = vrot.slane %v3693_v27, 1  ;;  %v3803_v32 = vrot.slane %v3694_v60, 1 }
 0x62a   : > { %7259 = vtanh.f32 %v3545_v40  ;;  %v6687_v58 = vpack.i.bf16 %v3693_v27, %v3692_v26  ;;  %v3979_v44 = vrot.slane %v3694_v60, 2 }
 0x62b   : > { %6683 = vrot.lane.b32.xlu1 %v6682_v21, %s7554_s27  ;;  %v3978_v13 = vsel %vm789_vm3, %v3976_v31, %v3977_v4  ;;  %v3802_v22 = vsel %vm612_vm1, %v3800_v1, %v3801_v38  ;;  %v3804_v54 = vsel %vm612_vm1, %v3801_v38, %v3803_v32 }
 0x62c   : > { %v3482_v0 = vpop.f32.mrf.mxu3  ;;  %5924 = vmatmul.msk.f32.gmra.mxu2 %vm389_vm4, %v3978_v13  ;;  %v11477_v63 = vpack.i.bf16 %v3804_v54, %v3802_v22  ;;  %v3980_v39 = vsel %vm789_vm3, %v3977_v4, %v3979_v44 }
 0x62d   : > { %v3483_v47 = vadd.f32 %v11322_v12, %v3482_v0  ;;  %v3434_v62 = vpop.f32.mrf.mxu1  ;;  %v6717_v11 = vpack.i.bf16 %v3980_v39, %v3978_v13 }
 0x62e   : > { %v3435_v35 = vadd.f32 %v11322_v12, %v3434_v62  ;;  %6693 = vrot.lane.b32.xlu0 %v11477_v63, %s7556_s29  ;;  %6688 = vrot.lane.b32.xlu2 %v6687_v58, %s7555_s28 }
 0x62f   : > { %v7258_v14 = vpop.eup %7257  ;;  %v3596_v33 = vadd.f32 %v3595_v23, %v3483_v47 }
 0x630   : > { %v7260_v48 = vpop.eup %7259  ;;  %3674 = vst.msk [vmem:[#allocation3 + $0x129] sm:$0xff] %vm389_vm4, %v7258_v14  ;;  %v3548_v5 = vadd.f32 %v10938_v52, %v3435_v35  ;;  %v3598_v45 = vpop.f32.mrf.mxu2  ;;  %v3695_v52 = vld [vmem:[#allocation3 + $0x60] sm:$0xff] }
 0x631   : > { %3658 = vst.msk [vmem:[#allocation3 + $0x69] sm:$0xff] %vm389_vm4, %v7260_v48  ;;  %7261 = vtanh.f32 %v3596_v33  ;;  %v3981_v7 = vrot.slane %v3695_v52, 2  ;;  %v3805_v6 = vrot.slane %v3695_v52, 1 }
 0x632   : > { %7263 = vtanh.f32 %v3548_v5 }
 0x633   : > { %6698 = vrot.lane.b32.xlu1 %v6677_v9, %s7547_s18 }
 0x634   : > { %v3485_v20 = vpop.f32.mrf.mxu3  ;;  %5925 = vmatmul.msk.f32.gmra.mxu2 %vm389_vm4, %v3980_v39 }
 0x635   : > { %v3486_v29 = vadd.f32 %v11322_v12, %v3485_v20  ;;  %v3437_v37 = vpop.f32.mrf.mxu1 }
 0x636   : > { %v3438_v36 = vadd.f32 %v11322_v12, %v3437_v37  ;;  %6708 = vrot.lane.b32.xlu0 %v6687_v58, %s7552_s25  ;;  %6703 = vrot.lane.b32.xlu2 %v6682_v21, %s7551_s22 }
 0x637   : > { %v7262_v30 = vpop.eup %7261  ;;  %v3599_v19 = vadd.f32 %v3598_v45, %v3486_v29 }
 0x638   : > { %v7264_v56 = vpop.eup %7263  ;;  %3675 = vst.msk [vmem:[#allocation3 + $0x139] sm:$0xff] %vm389_vm4, %v7262_v30  ;;  %v3551_v9 = vadd.f32 %v10978_v24, %v3438_v36  ;;  %v3696_v3 = vld [vmem:[#allocation3 + $0x68] sm:$0xff]  ;;  %v3697_v43 = vld [vmem:[#allocation3 + $0x70] sm:$0x3] }
 0x639   : > { %3659 = vst.msk [vmem:[#allocation3 + $0x79] sm:$0xff] %vm389_vm4, %v7264_v56  ;;  %7265 = vtanh.f32 %v3599_v19  ;;  %v3982_v8 = vrot.slane %v3696_v3, 2  ;;  %v3806_v49 = vrot.slane %v3696_v3, 1  ;;  %v3808_v57 = vrot.slane %v3697_v43, 1  ;;  %v5918_v19 = vld [vmem:[%s12802_s3 + $0x108] sm:$0xff] }
 0x63a   : > { %7267 = vtanh.f32 %v3551_v9  ;;  %v6722_v24 = vpack.i.bf16 %v3696_v3, %v3695_v52  ;;  %v3984_v21 = vrot.slane %v3697_v43, 2  ;;  %4955 = vmatpush.msrb.mxu3 %v5918_v19  ;;  %v5917_v43 = vld [vmem:[%s12802_s3 + $0x100] sm:$0xff] }
 0x63b   : > { %6713 = vrot.lane.b32.xlu1 %v11477_v63, %s7553_s26  ;;  %v3983_v16 = vsel %vm789_vm3, %v3981_v7, %v3982_v8  ;;  %v3807_v15 = vsel %vm612_vm1, %v3805_v6, %v3806_v49  ;;  %v3809_v53 = vsel %vm612_vm1, %v3806_v49, %v3808_v57  ;;  %v5916_v57 = vld [vmem:[%s12802_s3 + $0xf8] sm:$0xff] }
 0x63c   : > { %v11500_v61 = vpop.f32.mrf.mxu3  ;;  %5926 = vmatmul.msk.f32.gmra.mxu2 %vm389_vm4, %v3983_v16  ;;  %v6727_v31 = vpack.i.bf16 %v3809_v53, %v3807_v15  ;;  %v3985_v60 = vsel %vm789_vm3, %v3982_v8, %v3984_v21  ;;  %4956 = vmatpush.msrb.mxu3 %v5917_v43  ;;  %v5914_v15 = vld [vmem:[%s12802_s3 + $0xe8] sm:$0xff] }
 0x63d   : > { %v3440_v26 = vpop.f32.mrf.mxu1  ;;  %v6752_v47 = vpack.i.bf16 %v3985_v60, %v3983_v16 }
 0x63e   : > { %v3441_v41 = vadd.f32 %v11322_v12, %v3440_v26  ;;  %6723 = vrot.lane.b32.xlu0 %v6722_v24, %s7555_s28  ;;  %6718 = vrot.lane.b32.xlu2 %v6717_v11, %s7554_s27 }
 0x63f   : > { %v7266_v59 = vpop.eup %7265  ;;  %4957 = vmatpush.msrb.mxu3 %v5916_v57 }
 0x640   : > { %v7268_v40 = vpop.eup %7267  ;;  %3676 = vst.msk [vmem:[#allocation3 + $0x141] sm:$0xff] %vm389_vm4, %v7266_v59  ;;  %v3554_v27 = vadd.f32 %v11019_v55, %v3441_v41  ;;  %v3698_v55 = vld [vmem:[#allocation3 + $0x78] sm:$0xff] }
 0x641   : > { %3660 = vst.msk [vmem:[#allocation3 + $0x81] sm:$0xff] %vm389_vm4, %v7268_v40  ;;  %v3986_v54 = vrot.slane %v3698_v55, 2  ;;  %v3810_v44 = vrot.slane %v3698_v55, 1 }
 0x642   : > { %7269 = vtanh.f32 %v3554_v27  ;;  %v5913_v27 = vld [vmem:[%s12802_s3 + $0xe0] sm:$0xff] }
 0x643   : > { %6728 = vrot.lane.b32.xlu1 %v6727_v31, %s7556_s29 }
 0x644   : > { %v11513_v1 = vpop.f32.mrf.mxu3  ;;  %5927 = vmatmul.msk.f32.gmra.mxu2 %vm389_vm4, %v3985_v60 }
 0x645   : > { %v3443_v4 = vpop.f32.mrf.mxu1 }
 0x646   : > { %v3444_v38 = vadd.f32 %v11322_v12, %v3443_v4  ;;  %6738 = vrot.lane.b32.xlu0 %v6717_v11, %s7551_s22  ;;  %6733 = vrot.lane.b32.xlu2 %v11477_v63, %s7547_s18  ;;  %v5915_v11 = vld [vmem:[%s12802_s3 + $0xf0] sm:$0xff] }
 0x647   : > { %4958 = vmatpush.msrb.mxu3 %v5915_v11 }
 0x648   : > { %v7270_v32 = vpop.eup %7269  ;;  %v3557_v13 = vadd.f32 %v11064_v42, %v3444_v38  ;;  %v3699_v22 = vld [vmem:[#allocation3 + $0x80] sm:$0xff]  ;;  %v3700_v0 = vld [vmem:[#allocation3 + $0x88] sm:$0x3] }
 0x649   : > { %3661 = vst.msk [vmem:[#allocation3 + $0x91] sm:$0xff] %vm389_vm4, %v7270_v32  ;;  %v3987_v23 = vrot.slane %v3699_v22, 2  ;;  %v3813_v35 = vrot.slane %v3700_v0, 1  ;;  %v3811_v14 = vrot.slane %v3699_v22, 1  ;;  %v3989_v33 = vrot.slane %v3700_v0, 2  ;;  %4959 = vmatpush.msrb.mxu3 %v5914_v15  ;;  %v5912_v38 = vld [vmem:[%s12802_s3 + $0xd8] sm:$0xff] }
 0x64a   : > { %7271 = vtanh.f32 %v3557_v13  ;;  %v6757_v39 = vpack.i.bf16 %v3699_v22, %v3698_v55  ;;  %v5911_v22 = vld [vmem:[%s12802_s3 + $0xd0] sm:$0xff] }
 0x64b   : > { %6743 = vrot.lane.b32.xlu1 %v6722_v24, %s7552_s25  ;;  %v3988_v58 = vsel %vm789_vm3, %v3986_v54, %v3987_v23  ;;  %v3812_v20 = vsel %vm612_vm1, %v3810_v44, %v3811_v14  ;;  %v3814_v29 = vsel %vm612_vm1, %v3811_v14, %v3813_v35  ;;  %v3990_v37 = vsel %vm789_vm3, %v3987_v23, %v3989_v33  ;;  %v11594_v23 = vpop.permute.xlu2 %6628 }
 0x64c   : > { %v11524_v62 = vpop.f32.mrf.mxu3  ;;  %5928 = vmatmul.msk.f32.gmra.mxu2 %vm389_vm4, %v3988_v58  ;;  %v11539_v36 = vpack.i.bf16 %v3814_v29, %v3812_v20  ;;  %4960 = vmatpush.msrb.mxu3 %v5913_v27  ;;  %v5907_v29 = vld [vmem:[%s12802_s3 + $0xb0] sm:$0xff] }
 0x64d   : > { %v3446_v63 = vpop.f32.mrf.mxu1 }
 0x64e   : > { %v3447_v42 = vadd.f32 %v11322_v12, %v3446_v63  ;;  %6753 = vrot.lane.b32.xlu0 %v6752_v47, %s7554_s27  ;;  %6748 = vrot.lane.b32.xlu2 %v6727_v31, %s7553_s26 }
 0x64f   : > { %4961 = vmatpush.msrb.mxu3 %v5912_v38 }
 0x650   : > { %v7272_v48 = vpop.eup %7271  ;;  %v3560_v5 = vadd.f32 %v11109_v2, %v3447_v42  ;;  %v3701_v30 = vld [vmem:[#allocation3 + $0x90] sm:$0xff] }
 0x651   : > { %3662 = vst.msk [vmem:[#allocation3 + $0x99] sm:$0xff] %vm389_vm4, %v7272_v48  ;;  %v3991_v7 = vrot.slane %v3701_v30, 2  ;;  %v3815_v59 = vrot.slane %v3701_v30, 1  ;;  %4962 = vmatpush.msrb.mxu3 %v5911_v22  ;;  %v5909_v42 = vld [vmem:[%s12802_s3 + $0xc0] sm:$0xff]  ;;  %v5908_v48 = vld [vmem:[%s12802_s3 + $0xb8] sm:$0xff]  ;;  %v3495_v22 = vadd.f32 %v11322_v12, %v11524_v62  ;;  %v6630_v62 = vunpack.i.l.bf16 %v11594_v23 }
 0x652   : > { %7273 = vtanh.f32 %v3560_v5  ;;  %v3489_v5 = vadd.f32 %v11322_v12, %v11500_v61 }
 0x653   : > { %6758 = vrot.lane.b32.xlu1 %v6757_v39, %s7555_s28 }
 0x654   : > { %v11536_v45 = vpop.f32.mrf.mxu3  ;;  %5929 = vmatmul.msk.f32.gmra.mxu2 %vm389_vm4, %v3990_v37 }
 0x655   : > { %v3449_v52 = vpop.f32.mrf.mxu1 }
 0x656   : > { %v3450_v2 = vadd.f32 %v11322_v12, %v3449_v52  ;;  %6768 = vrot.lane.b32.xlu0 %v6727_v31, %s7547_s18  ;;  %6763 = vrot.lane.b32.xlu2 %v11539_v36, %s7556_s29  ;;  %v6787_v31 = vpack.i.bf16 %v3990_v37, %v3988_v58 }
 0x658   : > { %v7274_v56 = vpop.eup %7273  ;;  %v3563_v9 = vadd.f32 %v11153_v18, %v3450_v2  ;;  %v3702_v3 = vld [vmem:[#allocation3 + $0x98] sm:$0xff]  ;;  %v3703_v49 = vld [vmem:[#allocation3 + $0xa0] sm:$0x3] }
 0x659   : > { %3663 = vst.msk [vmem:[#allocation3 + $0xa9] sm:$0xff] %vm389_vm4, %v7274_v56  ;;  %v3992_v8 = vrot.slane %v3702_v3, 2  ;;  %v3818_v6 = vrot.slane %v3703_v49, 1  ;;  %v3816_v26 = vrot.slane %v3702_v3, 1  ;;  %v3994_v53 = vrot.slane %v3703_v49, 2 }
 0x65a   : > { %7275 = vtanh.f32 %v3563_v9  ;;  %v6792_v13 = vpack.i.bf16 %v3702_v3, %v3701_v30  ;;  %v5905_v9 = vld [vmem:[%s12802_s3 + $0xa0] sm:$0xff]  ;;  %v5278_v3 = vld [vmem:[%s12804_s5 + $0x8] sm:$0xff] }
 0x65b   : > { %6773 = vrot.lane.b32.xlu1 %v6752_v47, %s7551_s22  ;;  %v11558_v18 = vsel %vm789_vm3, %v3991_v7, %v3992_v8  ;;  %v3817_v60 = vsel %vm612_vm1, %v3815_v59, %v3816_v26  ;;  %v3819_v4 = vsel %vm612_vm1, %v3816_v26, %v3818_v6  ;;  %v5910_v47 = vld [vmem:[%s12802_s3 + $0xc8] sm:$0xff]  ;;  %5393 = vmatpush.msrb.mxu0 %v5278_v3  ;;  %v5903_v26 = vld [vmem:[%s12802_s3 + $0x90] sm:$0xff] }
 0x65c   : > { %v11560_v16 = vpop.f32.mrf.mxu3  ;;  %5930 = vmatmul.msk.f32.gmra.mxu2 %vm389_vm4, %v11558_v18  ;;  %v11589_v32 = vpack.i.bf16 %v3819_v4, %v3817_v60  ;;  %4963 = vmatpush.msrb.mxu3 %v5910_v47 }
 0x65d   : > { %v3452_v24 = vpop.f32.mrf.mxu1 }
 0x65e   : > { %v3453_v41 = vadd.f32 %v11322_v12, %v3452_v24  ;;  %6783 = vrot.lane.b32.xlu0 %v11539_v36, %s7553_s26  ;;  %6778 = vrot.lane.b32.xlu2 %v6757_v39, %s7552_s25 }
 0x65f   : > { %4964 = vmatpush.msrb.mxu3 %v5909_v42 }
 0x660   : > { %v7276_v21 = vpop.eup %7275  ;;  %v3566_v40 = vadd.f32 %v11198_v46, %v3453_v41  ;;  %v3995_v46 = vsel %vm789_vm3, %v3992_v8, %v3994_v53  ;;  %v11600_v58 = vld [vmem:[#allocation3 + $0xa8] sm:$0xff] }
 0x661   : > { %3664 = vst.msk [vmem:[#allocation3 + $0xb1] sm:$0xff] %vm389_vm4, %v7276_v21  ;;  %v3996_v33 = vrot.slane %v11600_v58, 2  ;;  %4965 = vmatpush.msrb.mxu3 %v5908_v48  ;;  %v5904_v8 = vld [vmem:[%s12802_s3 + $0x98] sm:$0xff]  ;;  %v6822_v57 = vpack.i.bf16 %v3995_v46, %v11558_v18  ;;  %v3820_v6 = vrot.slane %v11600_v58, 1 }
 0x662   : > { %7277 = vtanh.f32 %v3566_v40 }
 0x663   : > { %6788 = vrot.lane.b32.xlu1 %v6787_v31, %s7554_s27  ;;  %4966 = vmatpush.msrb.mxu3 %v5907_v29 }
 0x664   : > { %v11586_v55 = vpop.f32.mrf.mxu3  ;;  %5931 = vmatmul.msk.f32.gmra.mxu2 %vm389_vm4, %v3995_v46 }
 0x665   : > { %v3455_v54 = vpop.f32.mrf.mxu1 }
 0x666   : > { %v3456_v0 = vadd.f32 %v11322_v12, %v3455_v54  ;;  %6798 = vrot.lane.b32.xlu0 %v11589_v32, %s7556_s29  ;;  %6793 = vrot.lane.b32.xlu2 %v6792_v13, %s7555_s28 }
 0x668   : > { %v7278_v63 = vpop.eup %7277  ;;  %v3569_v35 = vadd.f32 %v11242_v50, %v3456_v0  ;;  %v3705_v14 = vld [vmem:[#allocation3 + $0xb0] sm:$0xff]  ;;  %v3706_v20 = vld [vmem:[#allocation3 + $0xb8] sm:$0x3] }
 0x669   : > { %3665 = vst.msk [vmem:[#allocation3 + $0xc1] sm:$0xff] %vm389_vm4, %v7278_v63  ;;  %v3997_v44 = vrot.slane %v3705_v14, 2  ;;  %v3999_v2 = vrot.slane %v3706_v20, 2  ;;  %v11632_v19 = vpop.permute.xlu2 %6643  ;;  %v3823_v43 = vrot.slane %v3706_v20, 1  ;;  %v3821_v7 = vrot.slane %v3705_v14, 1 }
 0x66a   : > { %7279 = vtanh.f32 %v3569_v35  ;;  %v6827_v24 = vpack.i.bf16 %v3705_v14, %v11600_v58 }
 0x66b   : > { %6803 = vrot.lane.b32.xlu1 %v11539_v36, %s7547_s18  ;;  %v11619_v50 = vsel %vm789_vm3, %v3996_v33, %v3997_v44  ;;  %v5906_v36 = vld [vmem:[%s12802_s3 + $0xa8] sm:$0xff]  ;;  %v4000_v49 = vsel %vm789_vm3, %v3997_v44, %v3999_v2  ;;  %v3822_v18 = vsel %vm612_vm1, %v3820_v6, %v3821_v7  ;;  %v3824_v59 = vsel %vm612_vm1, %v3821_v7, %v3823_v43 }
 0x66c   : > { %v3601_v39 = vpop.f32.mrf.mxu3  ;;  %5932 = vmatmul.msk.f32.gmra.mxu2 %vm389_vm4, %v11619_v50  ;;  %4967 = vmatpush.msrb.mxu3 %v5906_v36  ;;  %v11671_v4 = vpack.i.bf16 %v3824_v59, %v3822_v18 }
 0x66d   : > { %v3602_v37 = vadd.f32 %v3601_v39, %v3489_v5  ;;  %v3458_v52 = vpop.f32.mrf.mxu1  ;;  %v3498_v39 = vadd.f32 %v11322_v12, %v11536_v45 }
 0x66e   : > { %v3459_v61 = vadd.f32 %v11322_v12, %v3458_v52  ;;  %6813 = vrot.lane.b32.xlu0 %v6792_v13, %s7552_s25  ;;  %6808 = vrot.lane.b32.xlu2 %v6787_v31, %s7551_s22  ;;  %v11675_v13 = vpop.permute.xlu0 %6633 }
 0x66f   : > { %7281 = vtanh.f32 %v3602_v37  ;;  %4968 = vmatpush.msrb.mxu3 %v5905_v9  ;;  %v6635_v48 = vunpack.i.l.bf16 %v11675_v13  ;;  %v11708_v37 = vpack.i.bf16 %v4000_v49, %v11619_v50  ;;  %v6636_v3 = vunpack.i.h.bf16 %v11675_v13 }
 0x670   : > { %v7280_v30 = vpop.eup %7279  ;;  %v3572_v56 = vadd.f32 %v11280_v34, %v3459_v61  ;;  %v3492_v34 = vadd.f32 %v11322_v12, %v11513_v1  ;;  %v11663_v21 = vld [vmem:[#allocation3 + $0xc0] sm:$0xff] }
 0x671   : > { %3666 = vst.msk [vmem:[#allocation3 + $0xc9] sm:$0xff] %vm389_vm4, %v7280_v30  ;;  %4969 = vmatpush.msrb.mxu3 %v5904_v8  ;;  %v4001_v38 = vrot.slane %v11663_v21, 2  ;;  %v3825_v7 = vrot.slane %v11663_v21, 1 }
 0x672   : > { %7283 = vtanh.f32 %v3572_v56 }
 0x673   : > { %6818 = vrot.lane.b32.xlu1 %v11589_v32, %s7553_s26  ;;  %4970 = vmatpush.msrb.mxu3 %v5903_v26 }
 0x674   : > { %v3604_v11 = vpop.f32.mrf.mxu3  ;;  %5933 = vmatmul.msk.f32.gmra.mxu2 %vm389_vm4, %v4000_v49 }
 0x675   : > { %v7282_v1 = vpop.eup %7281  ;;  %v3605_v41 = vadd.f32 %v3604_v11, %v3492_v34  ;;  %v3461_v15 = vpop.f32.mrf.mxu1  ;;  %v7503_v34 = vld [vmem:[#allocation3 + $0x8] sm:$0xff] }
 0x676   : > { %3677 = vst.msk [vmem:[#allocation3 + $0x151] sm:$0xff] %vm389_vm4, %v7282_v1  ;;  %v3462_v53 = vadd.f32 %v11322_v12, %v3461_v15  ;;  %6828 = vrot.lane.b32.xlu0 %v6827_v24, %s7555_s28  ;;  %6823 = vrot.lane.b32.xlu2 %v6822_v57, %s7554_s27  ;;  %v6645_v15 = vunpack.i.l.bf16 %v11632_v19 }
 0x677   : > { %7285 = vtanh.f32 %v3605_v41 }
 0x678   : > { %v7284_v40 = vpop.eup %7283  ;;  %v3575_v27 = vadd.f32 %v11302_v17, %v3462_v53  ;;  %v11666_v31 = vpop.permute.xlu2 %6658  ;;  %v11668_v60 = vld [vmem:[#allocation3 + $0xc8] sm:$0xff]  ;;  %v3709_v0 = vld [vmem:[#allocation3 + $0xd0] sm:$0x3] }
 0x679   : > { %3667 = vst.msk [vmem:[#allocation3 + $0xd9] sm:$0xff] %vm389_vm4, %v7284_v40  ;;  %v4002_v46 = vrot.slane %v11668_v60, 2  ;;  %v4004_v14 = vrot.slane %v3709_v0, 2  ;;  %v3828_v2 = vrot.slane %v3709_v0, 1  ;;  %v3826_v56 = vrot.slane %v11668_v60, 1 }
 0x67a   : > { %7287 = vtanh.f32 %v3575_v27  ;;  %v6862_v26 = vpack.i.bf16 %v11668_v60, %v11663_v21 }
 0x67b   : > { %6833 = vrot.lane.b32.xlu1 %v11671_v4, %s7556_s29  ;;  %v11682_v17 = vsel %vm789_vm3, %v4001_v38, %v4002_v46  ;;  %v11704_v29 = vsel %vm789_vm3, %v4002_v46, %v4004_v14  ;;  %v3827_v1 = vsel %vm612_vm1, %v3825_v7, %v3826_v56  ;;  %v3829_v41 = vsel %vm612_vm1, %v3826_v56, %v3828_v2 }
 0x67c   : > { %v3607_v54 = vpop.f32.mrf.mxu3  ;;  %5934 = vmatmul.msk.f32.gmra.mxu2 %vm389_vm4, %v11682_v17  ;;  %v11757_v46 = vpack.i.bf16 %v3829_v41, %v3827_v1  ;;  %v6661_v7 = vunpack.i.h.bf16 %v11666_v31  ;;  %v7504_v1 = vld [vmem:[#allocation3 + $0x18] sm:$0xff] }
 0x67d   : > { %v7286_v58 = vpop.eup %7285  ;;  %v3608_v47 = vadd.f32 %v3607_v54, %v3495_v22  ;;  %v3464_v63 = vpop.f32.mrf.mxu1 }
 0x67e   : > { %3678 = vst.msk [vmem:[#allocation3 + $0x159] sm:$0xff] %vm389_vm4, %v7286_v58  ;;  %v3465_v35 = vadd.f32 %v11322_v12, %v3464_v63  ;;  %6843 = vrot.lane.b32.xlu0 %v6822_v57, %s7551_s22  ;;  %6838 = vrot.lane.b32.xlu2 %v11589_v32, %s7547_s18  ;;  %v11697_v5 = vpop.permute.xlu1 %6638  ;;  %v7501_v32 = vld [vmem:[#allocation3] sm:$0xff] }
 0x67f   : > { %7289 = vtanh.f32 %v3608_v47  ;;  %v4643_v20 = vsel %vm389_vm4, %v7501_v32, %v6630_v62  ;;  %v6640_v45 = vunpack.i.l.bf16 %v11697_v5  ;;  %v6641_v40 = vunpack.i.h.bf16 %v11697_v5 }
 0x680   : > { %v7288_v42 = vpop.eup %7287  ;;  %v3578_v33 = vadd.f32 %v11336_v28, %v3465_v35  ;;  %v11693_v44 = vpop.permute.xlu2 %6673  ;;  %v6631_v28 = vunpack.i.h.bf16 %v11594_v23  ;;  %v4675_v9 = vsel %vm1797_vm10, %v4643_v20, %v6635_v48  ;;  %v11721_v23 = vld [vmem:[%s12803_s4] ss:$0 sm:$0xff]  ;;  %v11729_v43 = vld [vmem:[#allocation3 + $0xd8] sm:$0xff]  ;;  %v6646_v35 = vunpack.i.h.bf16 %v11632_v19 }
 0x681   : > { %3668 = vst.msk [vmem:[#allocation3 + $0xe1] sm:$0xff] %vm389_vm4, %v7288_v42  ;;  %v11710_v52 = vpop.permute.xlu0 %6648  ;;  %v4707_v6 = vsel %vm3142_vm14, %v4675_v9, %v6640_v45  ;;  %v3501_v18 = vadd.f32 %v11721_v23, %v11560_v16 }
 0x682   : > { %7291 = vtanh.f32 %v3578_v33  ;;  %v4644_v49 = vsel %vm389_vm4, %v7503_v34, %v6631_v28  ;;  %v6650_v21 = vunpack.i.l.bf16 %v11710_v52  ;;  %v4739_v27 = vsel %vm3175_vm0, %v4707_v6, %v6645_v15 }
 0x683   : > { %6848 = vrot.lane.b32.xlu1 %v6827_v24, %s7552_s25  ;;  %v4676_v59 = vsel %vm1797_vm10, %v4644_v49, %v6636_v3  ;;  %v6660_v33 = vunpack.i.l.bf16 %v11666_v31  ;;  %v6651_v32 = vunpack.i.h.bf16 %v11710_v52  ;;  %v3830_v49 = vrot.slane %v11729_v43, 1 }
 0x684   : > { %v3610_v61 = vpop.f32.mrf.mxu3  ;;  %5935 = vmatmul.msk.f32.gmra.mxu2 %vm389_vm4, %v11704_v29  ;;  %v4708_v62 = vsel %vm3142_vm14, %v4676_v59, %v6641_v40  ;;  %v4771_v14 = vsel %vm3208_vm15, %v4739_v27, %v6650_v21 }
 0x685   : > { %v7290_v12 = vpop.eup %7289  ;;  %v3611_v36 = vadd.f32 %v3610_v61, %v3498_v39  ;;  %v3467_v30 = vpop.f32.mrf.mxu1  ;;  %v4740_v28 = vsel %vm3175_vm0, %v4708_v62, %v6646_v35  ;;  %v3504_v61 = vadd.f32 %v11721_v23, %v11586_v55 }
 0x686   : > { %3679 = vst.msk [vmem:[#allocation3 + $0x169] sm:$0xff] %vm389_vm4, %v7290_v12  ;;  %v3468_v50 = vadd.f32 %v11721_v23, %v3467_v30  ;;  %6858 = vrot.lane.b32.xlu0 %v11708_v37, %s7554_s27  ;;  %6853 = vrot.lane.b32.xlu2 %v11671_v4, %s7553_s26  ;;  %v4772_v55 = vsel %vm3208_vm15, %v4740_v28, %v6651_v32 }
 0x687   : > { %7293 = vtanh.f32 %v3611_v36 }
 0x688   : > { %v7292_v8 = vpop.eup %7291  ;;  %v3581_v57 = vadd.f32 %v11366_v25, %v3468_v50  ;;  %v11734_v11 = vpop.permute.xlu2 %6688  ;;  %v11736_v24 = vld [vmem:[#allocation3 + $0xe0] sm:$0xff]  ;;  %v4006_v25 = vrot.slane %v11729_v43, 2  ;;  %v11761_v0 = vld [vmem:[#allocation3 + $0xe8] sm:$0x3] }
 0x689   : > { %3669 = vst.msk [vmem:[#allocation3 + $0xf1] sm:$0xff] %vm389_vm4, %v7292_v8  ;;  %v4007_v53 = vrot.slane %v11736_v24, 2  ;;  %v11764_v58 = vpop.permute.xlu0 %6663  ;;  %v3833_v2 = vrot.slane %v11761_v0, 1  ;;  %v3831_v9 = vrot.slane %v11736_v24, 1  ;;  %v11806_v8 = vpack.i.bf16 %v11704_v29, %v11682_v17 }
 0x68a   : > { %7295 = vtanh.f32 %v3581_v57  ;;  %v6675_v57 = vunpack.i.l.bf16 %v11693_v44  ;;  %v6666_v6 = vunpack.i.h.bf16 %v11764_v58 }
 0x68b   : > { %6863 = vrot.lane.b32.xlu1 %v6862_v26, %s7555_s28  ;;  %v11755_v38 = vsel %vm789_vm3, %v4006_v25, %v4007_v53 }
 0x68c   : > { %v3613_v60 = vpop.f32.mrf.mxu3  ;;  %5936 = vmatmul.msk.f32.gmra.mxu2 %vm389_vm4, %v11755_v38 }
 0x68d   : > { %v7294_v13 = vpop.eup %7293  ;;  %v3614_v22 = vadd.f32 %v3613_v60, %v3501_v18  ;;  %v3470_v16 = vpop.f32.mrf.mxu1  ;;  %v3834_v18 = vsel %vm612_vm1, %v3831_v9, %v3833_v2 }
 0x68e   : > { %v6654_v54 = vpop.permute.xlu1 %6653  ;;  %3680 = vst.msk [vmem:[#allocation3 + $0x171] sm:$0xff] %vm389_vm4, %v7294_v13  ;;  %v3471_v47 = vadd.f32 %v11721_v23, %v3470_v16  ;;  %6873 = vrot.lane.b32.xlu0 %v11671_v4, %s7547_s18  ;;  %6868 = vrot.lane.b32.xlu2 %v11757_v46, %s7556_s29  ;;  %v4009_v4 = vrot.slane %v11761_v0, 2  ;;  %v6897_v13 = vpack.i.bf16 %v11736_v24, %v11729_v43  ;;  %v7505_v16 = vld [vmem:[#allocation3 + $0x20] sm:$0xff]  ;;  %v6676_v43 = vunpack.i.h.bf16 %v11693_v44 }
 0x68f   : > { %v6655_v63 = vunpack.i.l.bf16 %v6654_v54  ;;  %7297 = vtanh.f32 %v3614_v22  ;;  %v6656_v19 = vunpack.i.h.bf16 %v6654_v54  ;;  %v4646_v54 = vsel %vm389_vm4, %v7505_v16, %v6666_v6  ;;  %v7507_v16 = vld [vmem:[#allocation3 + $0x38] sm:$0xff] }
 0x690   : > { %v7296_v42 = vpop.eup %7295  ;;  %v3584_v48 = vadd.f32 %v11395_v10, %v3471_v47  ;;  %v11776_v5 = vpop.permute.xlu2 %6703  ;;  %v6665_v10 = vunpack.i.l.bf16 %v11764_v58  ;;  %v11790_v52 = vsel %vm789_vm3, %v4007_v53, %v4009_v4  ;;  %v11808_v34 = vld [vmem:[#allocation3 + $0xf0] sm:$0xff]  ;;  %v3832_v53 = vsel %vm612_vm1, %v3830_v49, %v3831_v9 }
 0x691   : > { %v4803_v39 = vsel %vm3241_vm2, %v4771_v14, %v6655_v63  ;;  %3670 = vst.msk [vmem:[#allocation3 + $0xf9] sm:$0xff] %vm389_vm4, %v7296_v42  ;;  %v4804_v3 = vsel %vm3241_vm2, %v4772_v55, %v6656_v19  ;;  %v6679_v41 = vpop.permute.xlu0 %6678  ;;  %v4011_v40 = vrot.slane %v11808_v34, 2  ;;  %v11832_v60 = vpack.i.bf16 %v3834_v18, %v3832_v53 }
 0x692   : > { %7299 = vtanh.f32 %v3584_v48  ;;  %v4835_v20 = vsel %vm3274_vm5, %v4803_v39, %v6660_v33  ;;  %v4836_v25 = vsel %vm3274_vm5, %v4804_v3, %v6661_v7  ;;  %v6680_v0 = vunpack.i.l.bf16 %v6679_v41  ;;  %v7506_v3 = vld [vmem:[#allocation3 + $0x30] sm:$0xff] }
 0x693   : > { %4971 = vmatmul.f32.vlgmr.msrb.gmra.mxu3 %v4835_v20  ;;  %6878 = vrot.lane.b32.xlu1 %v11708_v37, %s7551_s22  ;;  %v6690_v14 = vunpack.i.l.bf16 %v11734_v11  ;;  %v6681_v20 = vunpack.i.h.bf16 %v6679_v41 }
 0x694   : > { %v3616_v12 = vpop.f32.mrf.mxu3  ;;  %5937 = vmatmul.msk.f32.gmra.mxu2 %vm389_vm4, %v11790_v52 }
 0x695   : > { %v7298_v45 = vpop.eup %7297  ;;  %v3617_v36 = vadd.f32 %v3616_v12, %v3504_v61  ;;  %v3473_v30 = vpop.f32.mrf.mxu1 }
 0x696   : > { %v6669_v56 = vpop.permute.xlu1 %6668  ;;  %3681 = vst.msk [vmem:[#allocation3 + $0x181] sm:$0xff] %vm389_vm4, %v7298_v45  ;;  %v3474_v37 = vadd.f32 %v11721_v23, %v3473_v30  ;;  %6888 = vrot.lane.b32.xlu0 %v11757_v46, %s7553_s26  ;;  %6883 = vrot.lane.b32.xlu2 %v6862_v26, %s7552_s25  ;;  %v4645_v26 = vsel %vm389_vm4, %v7504_v1, %v6665_v10 }
 0x697   : > { %v6670_v50 = vunpack.i.l.bf16 %v6669_v56  ;;  %7301 = vtanh.f32 %v3617_v36  ;;  %v6671_v59 = vunpack.i.h.bf16 %v6669_v56  ;;  %v6691_v36 = vunpack.i.h.bf16 %v11734_v11 }
 0x698   : > { %v7300_v23 = vpop.eup %7299  ;;  %v3587_v31 = vadd.f32 %v11423_v51, %v3474_v37  ;;  %v11815_v15 = vpop.permute.xlu2 %6718  ;;  %v11817_v17 = vld [vmem:[#allocation3 + $0xf8] sm:$0xff]  ;;  %v11839_v47 = vld [vmem:[#allocation3 + $0x100] sm:$0x3] }
 0x699   : > { %3671 = vst.msk [vmem:[#allocation3 + $0x109] sm:$0xff] %vm389_vm4, %v7300_v23  ;;  %v4677_v29 = vsel %vm1797_vm10, %v4645_v26, %v6670_v50  ;;  %v4012_v51 = vrot.slane %v11817_v17, 2  ;;  %v4678_v63 = vsel %vm1797_vm10, %v4646_v54, %v6671_v59  ;;  %v4014_v39 = vrot.slane %v11839_v47, 2 }
 0x69a   : > { %7303 = vtanh.f32 %v3587_v31  ;;  %v4709_v21 = vsel %vm3142_vm14, %v4677_v29, %v6675_v57  ;;  %v4710_v4 = vsel %vm3142_vm14, %v4678_v63, %v6676_v43  ;;  %v3838_v50 = vrot.slane %v11839_v47, 1  ;;  %v11919_v43 = vld [vmem:[#allocation3 + $0x128] sm:$0xff] }
 0x69b   : > { %4974 = vmatmul.f32.gmra.mxu3 %v4836_v25  ;;  %6893 = vrot.lane.b32.xlu1 %v11806_v8, %s7554_s27  ;;  %v11830_v27 = vsel %vm789_vm3, %v4011_v40, %v4012_v51  ;;  %v4741_v24 = vsel %vm3175_vm0, %v4709_v21, %v6680_v0  ;;  %v11860_v61 = vsel %vm789_vm3, %v4012_v51, %v4014_v39  ;;  %v6705_v23 = vunpack.i.l.bf16 %v11776_v5 }
 0x69c   : > { %5938 = vmatmul.msk.f32.gmra.mxu2 %vm389_vm4, %v11830_v27  ;;  %v4742_v10 = vsel %vm3175_vm0, %v4710_v4, %v6681_v20  ;;  %v6927_v57 = vpack.i.bf16 %v11790_v52, %v11755_v38  ;;  %v6932_v41 = vpack.i.bf16 %v11817_v17, %v11808_v34  ;;  %v3835_v31 = vrot.slane %v11808_v34, 1 }
 0x69d   : > { %v7302_v22 = vpop.eup %7301  ;;  %v6706_v0 = vunpack.i.h.bf16 %v11776_v5  ;;  %v4022_v39 = vrot.slane %v11919_v43, 2 }
 0x69e   : > { %v6684_v58 = vpop.permute.xlu1 %6683  ;;  %3682 = vst.msk [vmem:[#allocation3 + $0x189] sm:$0xff] %vm389_vm4, %v7302_v22  ;;  %6903 = vrot.lane.b32.xlu0 %v11832_v60, %s7556_s29  ;;  %6898 = vrot.lane.b32.xlu2 %v6897_v13, %s7555_s28  ;;  %v6720_v22 = vunpack.i.l.bf16 %v11815_v15 }
 0x69f   : > { %v6685_v35 = vunpack.i.l.bf16 %v6684_v58  ;;  %v6686_v32 = vunpack.i.h.bf16 %v6684_v58 }
 0x6a0   : > { %v7304_v62 = vpop.eup %7303  ;;  %v6694_v42 = vpop.permute.xlu0 %6693  ;;  %v11870_v30 = vld [vmem:[#allocation3 + $0x108] sm:$0xff] }
 0x6a1   : > { %v11849_v33 = vpop.permute.xlu2 %6733  ;;  %v4773_v48 = vsel %vm3208_vm15, %v4741_v24, %v6685_v35  ;;  %3672 = vst.msk [vmem:[#allocation3 + $0x111] sm:$0xff] %vm389_vm4, %v7304_v62  ;;  %v6695_v19 = vunpack.i.l.bf16 %v6694_v42  ;;  %v4774_v45 = vsel %vm3208_vm15, %v4742_v10, %v6686_v32  ;;  %v4016_v7 = vrot.slane %v11870_v30, 2 }
 0x6a2   : > { %v4805_v44 = vsel %vm3241_vm2, %v4773_v48, %v6690_v14  ;;  %v4806_v9 = vsel %vm3241_vm2, %v4774_v45, %v6691_v36  ;;  %v6735_v10 = vunpack.i.l.bf16 %v11849_v33 }
 0x6a3   : > { %6908 = vrot.lane.b32.xlu1 %v11757_v46, %s7547_s18  ;;  %v4837_v28 = vsel %vm3274_vm5, %v4805_v44, %v6695_v19  ;;  %v6696_v46 = vunpack.i.h.bf16 %v6694_v42  ;;  %v11927_v42 = vld [vmem:[#allocation3 + $0x120] sm:$0xff] }
 0x6a4   : > { %4977 = vmatmul.f32.gmra.mxu3 %v4837_v28  ;;  %5939 = vmatmul.msk.f32.gmra.mxu2 %vm389_vm4, %v11860_v61  ;;  %v4021_v28 = vrot.slane %v11927_v42, 2 }
 0x6a5   : > { %v4838_v6 = vsel %vm3274_vm5, %v4806_v9, %v6696_v46  ;;  %v11946_v9 = vld [vmem:[#allocation3 + $0x130] sm:$0x3] }
 0x6a6   : > { %v6699_v12 = vpop.permute.xlu1 %6698  ;;  %6918 = vrot.lane.b32.xlu0 %v6897_v13, %s7552_s25  ;;  %6913 = vrot.lane.b32.xlu2 %v11806_v8, %s7551_s22  ;;  %v3836_v8 = vrot.slane %v11817_v17, 1  ;;  %v11943_v36 = vsel %vm789_vm3, %v4021_v28, %v4022_v39 }
 0x6a7   : > { %v6700_v2 = vunpack.i.l.bf16 %v6699_v12  ;;  %v6701_v25 = vunpack.i.h.bf16 %v6699_v12  ;;  %v6962_v12 = vpack.i.bf16 %v11860_v61, %v11830_v27 }
 0x6a8   : > { %v6709_v56 = vpop.permute.xlu0 %6708  ;;  %v11875_v37 = vld [vmem:[#allocation3 + $0x110] sm:$0xff]  ;;  %v11897_v52 = vld [vmem:[#allocation3 + $0x118] sm:$0x3]  ;;  %v3837_v18 = vsel %vm612_vm1, %v3835_v31, %v3836_v8  ;;  %v3839_v17 = vsel %vm612_vm1, %v3836_v8, %v3838_v50  ;;  %v3840_v8 = vrot.slane %v11870_v30, 1 }
 0x6a9   : > { %v11872_v55 = vpop.permute.xlu2 %6748  ;;  %v4647_v11 = vsel %vm389_vm4, %v7506_v3, %v6700_v2  ;;  %v4017_v49 = vrot.slane %v11875_v37, 2  ;;  %v6710_v1 = vunpack.i.l.bf16 %v6709_v56  ;;  %v4019_v51 = vrot.slane %v11897_v52, 2  ;;  %v7508_v3 = vld [vmem:[#allocation3 + $0x48] sm:$0xff] }
 0x6aa   : > { %v4679_v29 = vsel %vm1797_vm10, %v4647_v11, %v6705_v23  ;;  %v11908_v13 = vpack.i.bf16 %v3839_v17, %v3837_v18  ;;  %v4648_v54 = vsel %vm389_vm4, %v7507_v16, %v6701_v25  ;;  %v6711_v47 = vunpack.i.h.bf16 %v6709_v56 }
 0x6ab   : > { %6923 = vrot.lane.b32.xlu1 %v11832_v60, %s7553_s26  ;;  %v11889_v26 = vsel %vm789_vm3, %v4016_v7, %v4017_v49  ;;  %v4711_v34 = vsel %vm3142_vm14, %v4679_v29, %v6710_v1  ;;  %v11916_v63 = vsel %vm789_vm3, %v4017_v49, %v4019_v51  ;;  %v4680_v24 = vsel %vm1797_vm10, %v4648_v54, %v6706_v0  ;;  %v11979_v51 = vld [vmem:[#allocation3 + $0x140] sm:$0xff]  ;;  %v11988_v0 = vld [vmem:[#allocation3 + $0x138] sm:$0xff] }
 0x6ac   : > { %4980 = vmatmul.f32.gmra.mxu3 %v4838_v6  ;;  %5940 = vmatmul.msk.f32.gmra.mxu2 %vm389_vm4, %v11889_v26  ;;  %v4712_v4 = vsel %vm3142_vm14, %v4680_v24, %v6711_v47  ;;  %v3843_v50 = vrot.slane %v11897_v52, 1  ;;  %v3841_v27 = vrot.slane %v11875_v37, 1  ;;  %v4649_v11 = vsel %vm389_vm4, %v7508_v3, %v6735_v10  ;;  %v12008_v10 = vld [vmem:[#allocation3 + $0x148] sm:$0x3] }
 0x6ad   : > { %v4024_v49 = vrot.slane %v11946_v9, 2  ;;  %v6967_v31 = vpack.i.bf16 %v11875_v37, %v11870_v30  ;;  %v6736_v52 = vunpack.i.h.bf16 %v11849_v33  ;;  %v6750_v25 = vunpack.i.l.bf16 %v11872_v55  ;;  %v7509_v33 = vld [vmem:[#allocation3 + $0x50] sm:$0xff] }
 0x6ae   : > { %v6714_v38 = vpop.permute.xlu1 %6713  ;;  %6933 = vrot.lane.b32.xlu0 %v6932_v41, %s7555_s28  ;;  %6928 = vrot.lane.b32.xlu2 %v6927_v57, %s7554_s27  ;;  %v3842_v29 = vsel %vm612_vm1, %v3840_v8, %v3841_v27  ;;  %v4029_v3 = vrot.slane %v12008_v10, 2 }
 0x6af   : > { %v6715_v53 = vunpack.i.l.bf16 %v6714_v38  ;;  %v6716_v62 = vunpack.i.h.bf16 %v6714_v38  ;;  %v3844_v38 = vsel %vm612_vm1, %v3841_v27, %v3843_v50  ;;  %v11972_v17 = vsel %vm789_vm3, %v4022_v39, %v4024_v49  ;;  %v7510_v50 = vld [vmem:[#allocation3 + $0x60] sm:$0xff] }
 0x6b0   : > { %v6724_v59 = vpop.permute.xlu0 %6723  ;;  %v4026_v39 = vrot.slane %v11988_v0, 2 }
 0x6b1   : > { %v11904_v40 = vpop.permute.xlu2 %6763  ;;  %v4743_v21 = vsel %vm3175_vm0, %v4711_v34, %v6715_v53  ;;  %v6725_v58 = vunpack.i.l.bf16 %v6724_v59  ;;  %v4744_v44 = vsel %vm3175_vm0, %v4712_v4, %v6716_v62  ;;  %v6726_v45 = vunpack.i.h.bf16 %v6724_v59 }
 0x6b2   : > { %v4775_v35 = vsel %vm3208_vm15, %v4743_v21, %v6720_v22  ;;  %v11974_v59 = vpack.i.bf16 %v3844_v38, %v3842_v29  ;;  %v4650_v21 = vsel %vm389_vm4, %v7509_v33, %v6736_v52  ;;  %v7002_v38 = vpack.i.bf16 %v11919_v43, %v11927_v42  ;;  %v7511_v52 = vld [vmem:[#allocation3 + $0x68] sm:$0xff] }
 0x6b3   : > { %6938 = vrot.lane.b32.xlu1 %v11908_v13, %s7556_s29  ;;  %v4807_v48 = vsel %vm3241_vm2, %v4775_v35, %v6725_v58  ;;  %v6765_v58 = vunpack.i.l.bf16 %v11904_v40 }
 0x6b4   : > { %5941 = vmatmul.msk.f32.gmra.mxu2 %vm389_vm4, %v11916_v63 }
 0x6b6   : > { %v6729_v14 = vpop.permute.xlu1 %6728  ;;  %6948 = vrot.lane.b32.xlu0 %v6927_v57, %s7551_s22  ;;  %6943 = vrot.lane.b32.xlu2 %v11832_v60, %s7547_s18  ;;  %v6721_v60 = vunpack.i.h.bf16 %v11815_v15 }
 0x6b7   : > { %v6730_v5 = vunpack.i.l.bf16 %v6729_v14  ;;  %v6731_v2 = vunpack.i.h.bf16 %v6729_v14  ;;  %v6751_v14 = vunpack.i.h.bf16 %v11872_v55 }
 0x6b8   : > { %v6739_v32 = vpop.permute.xlu0 %6738  ;;  %v4776_v56 = vsel %vm3208_vm15, %v4744_v44, %v6721_v60  ;;  %v3848_v60 = vrot.slane %v11946_v9, 1  ;;  %v6766_v9 = vunpack.i.h.bf16 %v11904_v40 }
 0x6b9   : > { %v11932_v19 = vpop.permute.xlu2 %6778  ;;  %v4839_v20 = vsel %vm3274_vm5, %v4807_v48, %v6730_v5  ;;  %v6740_v46 = vunpack.i.l.bf16 %v6739_v32  ;;  %v4808_v7 = vsel %vm3241_vm2, %v4776_v56, %v6726_v45  ;;  %v6741_v53 = vunpack.i.h.bf16 %v6739_v32 }
 0x6ba   : > { %4983 = vmatmul.f32.gmra.mxu3 %v4839_v20  ;;  %v4840_v1 = vsel %vm3274_vm5, %v4808_v7, %v6731_v2  ;;  %v3846_v20 = vrot.slane %v11919_v43, 1  ;;  %v6997_v7 = vpack.i.bf16 %v11916_v63, %v11889_v26  ;;  %v6780_v40 = vunpack.i.l.bf16 %v11932_v19 }
 0x6bb   : > { %6953 = vrot.lane.b32.xlu1 %v6932_v41, %s7552_s25  ;;  %v4681_v23 = vsel %vm1797_vm10, %v4649_v11, %v6740_v46  ;;  %v4682_v16 = vsel %vm1797_vm10, %v4650_v21, %v6741_v53  ;;  %v3845_v46 = vrot.slane %v11927_v42, 1  ;;  %v12053_v42 = vld [vmem:[#allocation3 + $0x150] sm:$0xff] }
 0x6bc   : > { %5942 = vmatmul.msk.f32.gmra.mxu2 %vm389_vm4, %v11943_v36 }
 0x6bd   : > { %v3847_v11 = vsel %vm612_vm1, %v3845_v46, %v3846_v20  ;;  %v3853_v46 = vrot.slane %v12008_v10, 1  ;;  %v7037_v10 = vpack.i.bf16 %v11979_v51, %v11988_v0 }
 0x6be   : > { %v6744_v15 = vpop.permute.xlu1 %6743  ;;  %6963 = vrot.lane.b32.xlu0 %v6962_v12, %s7554_s27  ;;  %6958 = vrot.lane.b32.xlu2 %v11908_v13, %s7553_s26 }
 0x6bf   : > { %v6745_v61 = vunpack.i.l.bf16 %v6744_v15  ;;  %v6746_v34 = vunpack.i.h.bf16 %v6744_v15 }
 0x6c0   : > { %v6754_v57 = vpop.permute.xlu0 %6753 }
 0x6c1   : > { %v11960_v6 = vpop.permute.xlu2 %6793  ;;  %v4713_v41 = vsel %vm3142_vm14, %v4681_v23, %v6745_v61  ;;  %v6755_v18 = vunpack.i.l.bf16 %v6754_v57  ;;  %v4714_v47 = vsel %vm3142_vm14, %v4682_v16, %v6746_v34  ;;  %v6756_v5 = vunpack.i.h.bf16 %v6754_v57 }
 0x6c2   : > { %4986 = vmatmul.f32.gmra.mxu3 %v4840_v1  ;;  %v4745_v30 = vsel %vm3175_vm0, %v4713_v41, %v6750_v25  ;;  %v4746_v32 = vsel %vm3175_vm0, %v4714_v47, %v6751_v14  ;;  %v3849_v23 = vsel %vm612_vm1, %v3846_v20, %v3848_v60  ;;  %v12031_v41 = vpop.f32.mrf.mxu2  ;;  %v6795_v33 = vunpack.i.l.bf16 %v11960_v6  ;;  %v12075_v20 = vld [vmem:[#allocation3 + $0x160] sm:$0x3] }
 0x6c3   : > { %6968 = vrot.lane.b32.xlu1 %v6967_v31, %s7555_s28  ;;  %v4777_v54 = vsel %vm3208_vm15, %v4745_v30, %v6755_v18  ;;  %v4778_v2 = vsel %vm3208_vm15, %v4746_v32, %v6756_v5  ;;  %v12038_v63 = vpack.i.bf16 %v3849_v23, %v3847_v11  ;;  %v12045_v18 = vld [vmem:[#allocation3 + $0x158] sm:$0xff] }
 0x6c4   : > { %5943 = vmatmul.msk.f32.gmra.mxu2 %vm389_vm4, %v11972_v17 }
 0x6c6   : > { %v6759_v37 = vpop.permute.xlu1 %6758  ;;  %6978 = vrot.lane.b32.xlu0 %v11908_v13, %s7547_s18  ;;  %6973 = vrot.lane.b32.xlu2 %v11974_v59, %s7556_s29  ;;  %v4027_v13 = vrot.slane %v11979_v51, 2 }
 0x6c7   : > { %v6760_v22 = vunpack.i.l.bf16 %v6759_v37  ;;  %v6761_v4 = vunpack.i.h.bf16 %v6759_v37  ;;  %v6781_v37 = vunpack.i.h.bf16 %v11932_v19 }
 0x6c8   : > { %v6769_v35 = vpop.permute.xlu0 %6768  ;;  %v12003_v28 = vsel %vm789_vm3, %v4026_v39, %v4027_v13  ;;  %v12036_v26 = vsel %vm789_vm3, %v4027_v13, %v4029_v3  ;;  %v4031_v13 = vrot.slane %v12053_v42, 2 }
 0x6c9   : > { %v11992_v24 = vpop.permute.xlu2 %6808  ;;  %v4809_v62 = vsel %vm3241_vm2, %v4777_v54, %v6760_v22  ;;  %v6770_v44 = vunpack.i.l.bf16 %v6769_v35  ;;  %v4810_v56 = vsel %vm3241_vm2, %v4778_v2, %v6761_v4  ;;  %v6771_v49 = vunpack.i.h.bf16 %v6769_v35 }
 0x6ca   : > { %v4841_v48 = vsel %vm3274_vm5, %v4809_v62, %v6765_v58  ;;  %v4842_v1 = vsel %vm3274_vm5, %v4810_v56, %v6766_v9  ;;  %v4032_v58 = vrot.slane %v12045_v18, 2  ;;  %v12070_v39 = vpop.f32.mrf.mxu2  ;;  %v4034_v2 = vrot.slane %v12075_v20, 2  ;;  %v7512_v56 = vld [vmem:[#allocation3 + $0x78] sm:$0xff] }
 0x6cb   : > { %4989 = vmatmul.f32.gmra.mxu3 %v4841_v48  ;;  %6983 = vrot.lane.b32.xlu1 %v6962_v12, %s7551_s22  ;;  %v5277_v12 = vld [vmem:[%s12804_s5] sm:$0xff]  ;;  %v4651_v15 = vsel %vm389_vm4, %v7510_v50, %v6770_v44  ;;  %v4652_v25 = vsel %vm389_vm4, %v7511_v52, %v6771_v49  ;;  %v7032_v50 = vpack.i.bf16 %v11972_v17, %v11943_v36 }
 0x6cc   : > { %5944 = vmatmul.msk.f32.gmra.mxu2 %vm389_vm4, %v12003_v28  ;;  %5394 = vmatpush.msrb.mxu0 %v5277_v12  ;;  %v12068_v48 = vsel %vm789_vm3, %v4031_v13, %v4032_v58  ;;  %v12094_v11 = vsel %vm789_vm3, %v4032_v58, %v4034_v2  ;;  %v12102_v17 = vld [vmem:[#allocation3 + $0x170] sm:$0xff] }
 0x6ce   : > { %v6774_v55 = vpop.permute.xlu1 %6773  ;;  %6993 = vrot.lane.b32.xlu0 %v11974_v59, %s7553_s26  ;;  %6988 = vrot.lane.b32.xlu2 %v6967_v31, %s7552_s25 }
 0x6cf   : > { %v6775_v45 = vunpack.i.l.bf16 %v6774_v55  ;;  %v6776_v57 = vunpack.i.h.bf16 %v6774_v55 }
 0x6d0   : > { %v6784_v27 = vpop.permute.xlu0 %6783 }
 0x6d1   : > { %v12021_v61 = vpop.permute.xlu2 %6823  ;;  %v4683_v8 = vsel %vm1797_vm10, %v4651_v15, %v6775_v45  ;;  %v6785_v31 = vunpack.i.l.bf16 %v6784_v27  ;;  %v4684_v34 = vsel %vm1797_vm10, %v4652_v25, %v6776_v57  ;;  %v6786_v21 = vunpack.i.h.bf16 %v6784_v27 }
 0x6d2   : > { %v4715_v29 = vsel %vm3142_vm14, %v4683_v8, %v6780_v40  ;;  %v4716_v47 = vsel %vm3142_vm14, %v4684_v34, %v6781_v37  ;;  %v6810_v15 = vunpack.i.l.bf16 %v11992_v24  ;;  %v12108_v57 = vpop.f32.mrf.mxu2  ;;  %v7513_v34 = vld [vmem:[#allocation3 + $0x80] sm:$0xff] }
 0x6d3   : > { %4992 = vmatmul.f32.gmra.mxu3 %v4842_v1  ;;  %6998 = vrot.lane.b32.xlu1 %v6997_v7, %s7554_s27  ;;  %v4747_v43 = vsel %vm3175_vm0, %v4715_v29, %v6785_v31  ;;  %v4748_v5 = vsel %vm3175_vm0, %v4716_v47, %v6786_v21 }
 0x6d4   : > { %5945 = vmatmul.msk.f32.gmra.mxu2 %vm389_vm4, %v12036_v26 }
 0x6d6   : > { %v6789_v53 = vpop.permute.xlu1 %6788  ;;  %7008 = vrot.lane.b32.xlu0 %v12038_v63, %s7556_s29  ;;  %7003 = vrot.lane.b32.xlu2 %v7002_v38, %s7555_s28 }
 0x6d7   : > { %v6790_v30 = vunpack.i.l.bf16 %v6789_v53  ;;  %v6791_v35 = vunpack.i.h.bf16 %v6789_v53  ;;  %v6825_v53 = vunpack.i.l.bf16 %v12021_v61 }
 0x6d8   : > { %v6799_v22 = vpop.permute.xlu0 %6798 }
 0x6d9   : > { %v12056_v16 = vpop.permute.xlu2 %6838  ;;  %v4779_v54 = vsel %vm3208_vm15, %v4747_v43, %v6790_v30  ;;  %v6800_v62 = vunpack.i.l.bf16 %v6799_v22  ;;  %v4780_v32 = vsel %vm3208_vm15, %v4748_v5, %v6791_v35  ;;  %v6801_v60 = vunpack.i.h.bf16 %v6799_v22 }
 0x6da   : > { %v4811_v19 = vsel %vm3241_vm2, %v4779_v54, %v6795_v33  ;;  %v6811_v43 = vunpack.i.h.bf16 %v11992_v24 }
 0x6db   : > { %7013 = vrot.lane.b32.xlu1 %v11974_v59, %s7547_s18  ;;  %v4843_v14 = vsel %vm3274_vm5, %v4811_v19, %v6800_v62  ;;  %v6796_v59 = vunpack.i.h.bf16 %v11960_v6  ;;  %v3851_v6 = vrot.slane %v11979_v51, 1  ;;  %v12132_v62 = vld [vmem:[#allocation3 + $0x178] sm:$0x3] }
 0x6dc   : > { %4995 = vmatmul.f32.gmra.mxu3 %v4843_v14  ;;  %5946 = vmatmul.msk.f32.gmra.mxu2 %vm389_vm4, %v12068_v48 }
 0x6dd   : > { %v4812_v45 = vsel %vm3241_vm2, %v4780_v32, %v6796_v59  ;;  %v3854_v51 = vsel %vm612_vm1, %v3851_v6, %v3853_v46  ;;  %v4039_v32 = vrot.slane %v12132_v62, 2  ;;  %v12143_v59 = vpop.f32.mrf.mxu2 }
 0x6de   : > { %v6804_v4 = vpop.permute.xlu1 %6803  ;;  %7023 = vrot.lane.b32.xlu0 %v7002_v38, %s7552_s25  ;;  %7018 = vrot.lane.b32.xlu2 %v6997_v7, %s7551_s22  ;;  %v4844_v27 = vsel %vm3274_vm5, %v4812_v45, %v6801_v60  ;;  %v3850_v7 = vrot.slane %v11988_v0, 1  ;;  %v12110_v0 = vld [vmem:[#allocation3 + $0x168] sm:$0xff]  ;;  %v4037_v38 = vrot.slane %v12102_v17, 2  ;;  %v6826_v60 = vunpack.i.h.bf16 %v12021_v61 }
 0x6df   : > { %v6805_v44 = vunpack.i.l.bf16 %v6804_v4  ;;  %v6806_v8 = vunpack.i.h.bf16 %v6804_v4  ;;  %v4036_v37 = vrot.slane %v12110_v0, 2 }
 0x6e0   : > { %v6814_v55 = vpop.permute.xlu0 %6813  ;;  %v3852_v40 = vsel %vm612_vm1, %v3850_v7, %v3851_v6  ;;  %v3858_v6 = vrot.slane %v12075_v20, 1  ;;  %v12166_v20 = vld [vmem:[#allocation3 + $0x180] sm:$0xff] }
 0x6e1   : > { %v12080_v12 = vpop.permute.xlu2 %6853  ;;  %v4653_v9 = vsel %vm389_vm4, %v7512_v56, %v6805_v44  ;;  %v6815_v3 = vunpack.i.l.bf16 %v6814_v55  ;;  %v12117_v25 = vpack.i.bf16 %v3854_v51, %v3852_v40  ;;  %v4654_v30 = vsel %vm389_vm4, %v7513_v34, %v6806_v8 }
 0x6e2   : > { %v4685_v49 = vsel %vm1797_vm10, %v4653_v9, %v6810_v15  ;;  %v6816_v21 = vunpack.i.h.bf16 %v6814_v55  ;;  %v12126_v22 = vsel %vm789_vm3, %v4036_v37, %v4037_v38  ;;  %v4686_v58 = vsel %vm1797_vm10, %v4654_v30, %v6811_v43  ;;  %v7514_v15 = vld [vmem:[#allocation3 + $0x90] sm:$0xff] }
 0x6e3   : > { %7028 = vrot.lane.b32.xlu1 %v12038_v63, %s7553_s26  ;;  %v4717_v1 = vsel %vm3142_vm14, %v4685_v49, %v6815_v3  ;;  %v6840_v55 = vunpack.i.l.bf16 %v12056_v16  ;;  %v12152_v56 = vsel %vm789_vm3, %v4037_v38, %v4039_v32  ;;  %v7072_v51 = vpack.i.bf16 %v12045_v18, %v12053_v42 }
 0x6e4   : > { %4998 = vmatmul.f32.gmra.mxu3 %v4844_v27  ;;  %5947 = vmatmul.msk.f32.gmra.mxu2 %vm389_vm4, %v12094_v11  ;;  %v4718_v13 = vsel %vm3142_vm14, %v4686_v58, %v6816_v21  ;;  %v6841_v38 = vunpack.i.h.bf16 %v12056_v16  ;;  %v12193_v21 = vld [vmem:[#allocation3 + $0x190] sm:$0x3] }
 0x6e5   : > { %v4655_v27 = vsel %vm389_vm4, %v7514_v15, %v6840_v55  ;;  %v12182_v34 = vpop.f32.mrf.mxu2 }
 0x6e6   : > { %v6819_v36 = vpop.permute.xlu1 %6818  ;;  %7038 = vrot.lane.b32.xlu0 %v7037_v10, %s7555_s28  ;;  %7033 = vrot.lane.b32.xlu2 %v7032_v50, %s7554_s27 }
 0x6e7   : > { %v6820_v23 = vunpack.i.l.bf16 %v6819_v36  ;;  %v6821_v47 = vunpack.i.h.bf16 %v6819_v36 }
 0x6e8   : > { %v6829_v31 = vpop.permute.xlu0 %6828 }
 0x6e9   : > { %v12113_v29 = vpop.permute.xlu2 %6868  ;;  %v4749_v52 = vsel %vm3175_vm0, %v4717_v1, %v6820_v23  ;;  %v6830_v33 = vunpack.i.l.bf16 %v6829_v31  ;;  %v4750_v44 = vsel %vm3175_vm0, %v4718_v13, %v6821_v47  ;;  %v6831_v45 = vunpack.i.h.bf16 %v6829_v31 }
 0x6ea   : > { %v4781_v54 = vsel %vm3208_vm15, %v4749_v52, %v6825_v53  ;;  %v4782_v9 = vsel %vm3208_vm15, %v4750_v44, %v6826_v60  ;;  %v6855_v52 = vunpack.i.l.bf16 %v12080_v12  ;;  %v4337_v53 = vrot.slane %v12166_v20, 2 }
 0x6eb   : > { %7043 = vrot.lane.b32.xlu1 %v12117_v25, %s7556_s29  ;;  %v4813_v19 = vsel %vm3241_vm2, %v4781_v54, %v6830_v33  ;;  %v4814_v3 = vsel %vm3241_vm2, %v4782_v9, %v6831_v45  ;;  %v7515_v54 = vld [vmem:[#allocation3 + $0x98] sm:$0xff]  ;;  %v4340_v44 = vrot.slane %v12193_v21, 2 }
 0x6ec   : > { %5948 = vmatmul.msk.f32.gmra.mxu2 %vm389_vm4, %v12126_v22  ;;  %v4656_v58 = vsel %vm389_vm4, %v7515_v54, %v6841_v38 }
 0x6ee   : > { %v6834_v35 = vpop.permute.xlu1 %6833  ;;  %7053 = vrot.lane.b32.xlu0 %v7032_v50, %s7551_s22  ;;  %7048 = vrot.lane.b32.xlu2 %v12038_v63, %s7547_s18  ;;  %v7067_v63 = vpack.i.bf16 %v12036_v26, %v12003_v28  ;;  %v12158_v50 = vld [vmem:[#allocation3 + $0x188] sm:$0xff]  ;;  %v3856_v28 = vrot.slane %v12045_v18, 1 }
 0x6ef   : > { %v6835_v24 = vunpack.i.l.bf16 %v6834_v35  ;;  %v6836_v2 = vunpack.i.h.bf16 %v6834_v35  ;;  %v4338_v23 = vrot.slane %v12158_v50, 2 }
 0x6f0   : > { %v6844_v14 = vpop.permute.xlu0 %6843  ;;  %v3859_v31 = vsel %vm612_vm1, %v3856_v28, %v3858_v6  ;;  %v12215_v6 = vpop.f32.mrf.mxu2 }
 0x6f1   : > { %v12139_v5 = vpop.permute.xlu2 %6883  ;;  %v4845_v4 = vsel %vm3274_vm5, %v4813_v19, %v6835_v24  ;;  %v6845_v46 = vunpack.i.l.bf16 %v6844_v14  ;;  %v4846_v8 = vsel %vm3274_vm5, %v4814_v3, %v6836_v2  ;;  %v6846_v30 = vunpack.i.h.bf16 %v6844_v14 }
 0x6f2   : > { %5001 = vmatmul.f32.gmra.mxu3 %v4845_v4  ;;  %v12186_v33 = vsel %vm789_vm3, %v4337_v53, %v4338_v23  ;;  %v6870_v19 = vunpack.i.l.bf16 %v12113_v29  ;;  %v12213_v9 = vsel %vm789_vm3, %v4338_v23, %v4340_v44  ;;  %v6871_v3 = vunpack.i.h.bf16 %v12113_v29  ;;  %v12263_v44 = vld [vmem:[%s12803_s4 + $0x1] ss:$0 sm:$0xff] }
 0x6f3   : > { %7058 = vrot.lane.b32.xlu1 %v7037_v10, %s7552_s25  ;;  %v3855_v10 = vrot.slane %v12053_v42, 1  ;;  %v4687_v7 = vsel %vm1797_vm10, %v4655_v27, %v6845_v46  ;;  %v4688_v35 = vsel %vm1797_vm10, %v4656_v58, %v6846_v30  ;;  %v3860_v27 = vrot.slane %v12110_v0, 1  ;;  %v7517_v30 = vld [vmem:[#allocation3 + $0xb0] sm:$0xff] }
 0x6f4   : > { %5949 = vmatmul.msk.f32.gmra.mxu2 %vm389_vm4, %v12152_v56  ;;  %v7107_v53 = vpack.i.bf16 %v12102_v17, %v12110_v0  ;;  %v6886_v54 = vunpack.i.h.bf16 %v12139_v5 }
 0x6f5   : > { %v3857_v1 = vsel %vm612_vm1, %v3855_v10, %v3856_v28  ;;  %v3861_v28 = vrot.slane %v12102_v17, 1  ;;  %v7516_v10 = vld [vmem:[#allocation3 + $0xa8] sm:$0xff] }
 0x6f6   : > { %v6849_v61 = vpop.permute.xlu1 %6848  ;;  %7068 = vrot.lane.b32.xlu0 %v7067_v63, %s7554_s27  ;;  %7063 = vrot.lane.b32.xlu2 %v12117_v25, %s7553_s26  ;;  %v12188_v18 = vpack.i.bf16 %v3859_v31, %v3857_v1  ;;  %v6885_v31 = vunpack.i.l.bf16 %v12139_v5 }
 0x6f7   : > { %v6850_v26 = vunpack.i.l.bf16 %v6849_v61  ;;  %v6851_v43 = vunpack.i.h.bf16 %v6849_v61  ;;  %v3863_v61 = vrot.slane %v12132_v62, 1  ;;  %v7102_v62 = vpack.i.bf16 %v12094_v11, %v12068_v48 }
 0x6f8   : > { %v6859_v49 = vpop.permute.xlu0 %6858 }
 0x6f9   : > { %v12170_v36 = vpop.permute.xlu2 %6898  ;;  %v4719_v40 = vsel %vm3142_vm14, %v4687_v7, %v6850_v26  ;;  %v6860_v37 = vunpack.i.l.bf16 %v6859_v49  ;;  %v4720_v13 = vsel %vm3142_vm14, %v4688_v35, %v6851_v43  ;;  %v6861_v60 = vunpack.i.h.bf16 %v6859_v49 }
 0x6fa   : > { %5004 = vmatmul.f32.gmra.mxu3 %v4846_v8  ;;  %v4751_v42 = vsel %vm3175_vm0, %v4719_v40, %v6855_v52  ;;  %v3864_v1 = vsel %vm612_vm1, %v3861_v28, %v3863_v61  ;;  %v6900_v58 = vunpack.i.l.bf16 %v12170_v36 }
 0x6fb   : > { %7073 = vrot.lane.b32.xlu1 %v7072_v51, %s7555_s28  ;;  %v4783_v24 = vsel %vm3208_vm15, %v4751_v42, %v6860_v37 }
 0x6fc   : > { %5950 = vmatmul.msk.f32.gmra.mxu2 %vm389_vm4, %v12186_v33 }
 0x6fe   : > { %v6864_v16 = vpop.permute.xlu1 %6863  ;;  %7083 = vrot.lane.b32.xlu0 %v12117_v25, %s7547_s18  ;;  %7078 = vrot.lane.b32.xlu2 %v12188_v18, %s7556_s29  ;;  %v6856_v25 = vunpack.i.h.bf16 %v12080_v12 }
 0x6ff   : > { %v6865_v47 = vunpack.i.l.bf16 %v6864_v16  ;;  %v6866_v45 = vunpack.i.h.bf16 %v6864_v16 }
 0x700   : > { %v6874_v14 = vpop.permute.xlu0 %6873  ;;  %v4752_v2 = vsel %vm3175_vm0, %v4720_v13, %v6856_v25  ;;  %v5527_v25 = vld [vmem:[%s12806_s7 + $0x18] sm:$0xff] }
 0x701   : > { %v12204_v4 = vpop.permute.xlu2 %6913  ;;  %v4815_v32 = vsel %vm3241_vm2, %v4783_v24, %v6865_v47  ;;  %v6875_v46 = vunpack.i.l.bf16 %v6874_v14  ;;  %v6876_v23 = vunpack.i.h.bf16 %v6874_v14  ;;  %5640 = vmatpush.msrb.mxu1 %v5527_v25 }
 0x702   : > { %v4847_v55 = vsel %vm3274_vm5, %v4815_v32, %v6870_v19 }
 0x703   : > { %5007 = vmatmul.f32.gmra.mxu3 %v4847_v55  ;;  %7088 = vrot.lane.b32.xlu1 %v7067_v63, %s7551_s22  ;;  %v4784_v63 = vsel %vm3208_vm15, %v4752_v2, %v6861_v60  ;;  %v4657_v7 = vsel %vm389_vm4, %v7516_v10, %v6875_v46  ;;  %v4658_v37 = vsel %vm389_vm4, %v7517_v30, %v6876_v23  ;;  %v4237_v10 = vrot.slane %v12158_v50, 1 }
 0x704   : > { %5951 = vmatmul.msk.f32.gmra.mxu2 %vm389_vm4, %v12213_v9  ;;  %v4816_v15 = vsel %vm3241_vm2, %v4784_v63, %v6866_v45  ;;  %v4236_v23 = vrot.slane %v12166_v20, 1 }
 0x705   : > { %v4848_v48 = vsel %vm3274_vm5, %v4816_v15, %v6871_v3  ;;  %v7518_v3 = vld [vmem:[#allocation3 + $0xc0] sm:$0xff] }
 0x706   : > { %v6879_v12 = vpop.permute.xlu1 %6878  ;;  %7098 = vrot.lane.b32.xlu0 %v12188_v18, %s7553_s26  ;;  %7093 = vrot.lane.b32.xlu2 %v7072_v51, %s7552_s25  ;;  %v3862_v51 = vsel %vm612_vm1, %v3860_v27, %v3861_v28  ;;  %v4239_v27 = vrot.slane %v12193_v21, 1  ;;  %v7142_v21 = vpack.i.bf16 %v12158_v50, %v12166_v20 }
 0x707   : > { %v6880_v26 = vunpack.i.l.bf16 %v6879_v12  ;;  %v6881_v38 = vunpack.i.h.bf16 %v6879_v12  ;;  %v12240_v52 = vpack.i.bf16 %v3864_v1, %v3862_v51 }
 0x708   : > { %v6889_v49 = vpop.permute.xlu0 %6888 }
 0x709   : > { %v12231_v8 = vpop.permute.xlu2 %6928  ;;  %v4689_v40 = vsel %vm1797_vm10, %v4657_v7, %v6880_v26  ;;  %v6890_v11 = vunpack.i.l.bf16 %v6889_v49  ;;  %v4690_v42 = vsel %vm1797_vm10, %v4658_v37, %v6881_v38  ;;  %v6891_v35 = vunpack.i.h.bf16 %v6889_v49 }
 0x70a   : > { %v4721_v29 = vsel %vm3142_vm14, %v4689_v40, %v6885_v31  ;;  %v4722_v24 = vsel %vm3142_vm14, %v4690_v42, %v6886_v54  ;;  %v6915_v7 = vunpack.i.l.bf16 %v12204_v4  ;;  %v7519_v42 = vld [vmem:[#allocation3 + $0xc8] sm:$0xff]  ;;  %v6916_v54 = vunpack.i.h.bf16 %v12204_v4 }
 0x70b   : > { %5010 = vmatmul.f32.gmra.mxu3 %v4848_v48  ;;  %7103 = vrot.lane.b32.xlu1 %v7102_v62, %s7554_s27  ;;  %v4753_v47 = vsel %vm3175_vm0, %v4721_v29, %v6890_v11  ;;  %v4754_v60 = vsel %vm3175_vm0, %v4722_v24, %v6891_v35  ;;  %v4238_v48 = vsel %vm612_vm1, %v4236_v23, %v4237_v10 }
 0x70e   : > { %v6894_v43 = vpop.permute.xlu1 %6893  ;;  %7113 = vrot.lane.b32.xlu0 %v12240_v52, %s7556_s29  ;;  %7108 = vrot.lane.b32.xlu2 %v7107_v53, %s7555_s28 }
 0x70f   : > { %v6895_v16 = vunpack.i.l.bf16 %v6894_v43  ;;  %v6896_v19 = vunpack.i.h.bf16 %v6894_v43  ;;  %v6930_v43 = vunpack.i.l.bf16 %v12231_v8 }
 0x710   : > { %v6904_v17 = vpop.permute.xlu0 %6903 }
 0x711   : > { %v4785_v0 = vsel %vm3208_vm15, %v4753_v47, %v6895_v16  ;;  %v6905_v13 = vunpack.i.l.bf16 %v6904_v17  ;;  %v12254_v14 = vpop.permute.xlu2 %6943  ;;  %v4786_v45 = vsel %vm3208_vm15, %v4754_v60, %v6896_v19  ;;  %v6906_v61 = vunpack.i.h.bf16 %v6904_v17 }
 0x712   : > { %v4817_v32 = vsel %vm3241_vm2, %v4785_v0, %v6900_v58 }
 0x713   : > { %7118 = vrot.lane.b32.xlu1 %v12188_v18, %s7547_s18  ;;  %v4849_v5 = vsel %vm3274_vm5, %v4817_v32, %v6905_v13  ;;  %v6901_v18 = vunpack.i.h.bf16 %v12170_v36 }
 0x714   : > { %5013 = vmatmul.f32.gmra.mxu3 %v4849_v5 }
 0x715   : > { %v4818_v26 = vsel %vm3241_vm2, %v4786_v45, %v6901_v18 }
 0x716   : > { %v6909_v55 = vpop.permute.xlu1 %6908  ;;  %v4972_v46 = vpop.f32.mrf.mxu3  ;;  %7128 = vrot.lane.b32.xlu0 %v7107_v53, %s7552_s25  ;;  %7123 = vrot.lane.b32.xlu2 %v7102_v62, %s7551_s22  ;;  %v4850_v62 = vsel %vm3274_vm5, %v4818_v26, %v6906_v61 }
 0x717   : > { %v6910_v2 = vunpack.i.l.bf16 %v6909_v55  ;;  %v4973_v12 = vadd.f32 %v12263_v44, %v4972_v46  ;;  %v6911_v1 = vunpack.i.h.bf16 %v6909_v55  ;;  %v6945_v46 = vunpack.i.l.bf16 %v12254_v14 }
 0x718   : > { %v6919_v28 = vpop.permute.xlu0 %6918 }
 0x719   : > { %v5086_v63 = vadd.f32 %v12031_v41, %v4973_v12  ;;  %v12276_v15 = vpop.permute.xlu2 %6958  ;;  %v4659_v36 = vsel %vm389_vm4, %v7518_v3, %v6910_v2  ;;  %v7137_v41 = vpack.i.bf16 %v12152_v56, %v12126_v22  ;;  %v6920_v49 = vunpack.i.l.bf16 %v6919_v28  ;;  %v7520_v3 = vld [vmem:[#allocation3 + $0xd8] sm:$0xff] }
 0x71a   : > { %v4691_v40 = vsel %vm1797_vm10, %v4659_v36, %v6915_v7  ;;  %v4240_v22 = vsel %vm612_vm1, %v4237_v10, %v4239_v27  ;;  %v4660_v16 = vsel %vm389_vm4, %v7519_v42, %v6911_v1  ;;  %v6921_v47 = vunpack.i.h.bf16 %v6919_v28 }
 0x71b   : > { %7305 = vtanh.f32 %v5086_v63  ;;  %7133 = vrot.lane.b32.xlu1 %v12240_v52, %s7553_s26  ;;  %v4723_v50 = vsel %vm3142_vm14, %v4691_v40, %v6920_v49  ;;  %v7147_v37 = vpack.i.bf16 %v4240_v22, %v4238_v48  ;;  %v6931_v2 = vunpack.i.h.bf16 %v12231_v8  ;;  %v12330_v8 = vld [vmem:[#allocation3 + $0x1a0] sm:$0xff] }
 0x71c   : > { %5016 = vmatmul.f32.gmra.mxu3 %v4850_v62  ;;  %v4661_v36 = vsel %vm389_vm4, %v7520_v3, %v6945_v46  ;;  %v6946_v40 = vunpack.i.h.bf16 %v12254_v14  ;;  %v6960_v48 = vunpack.i.l.bf16 %v12276_v15 }
 0x71e   : > { %v6924_v51 = vpop.permute.xlu1 %6923  ;;  %v4975_v38 = vpop.f32.mrf.mxu3  ;;  %7143 = vrot.lane.b32.xlu0 %v7142_v21, %s7555_s28  ;;  %7138 = vrot.lane.b32.xlu2 %v7137_v41, %s7554_s27 }
 0x71f   : > { %v6925_v31 = vunpack.i.l.bf16 %v6924_v51  ;;  %v4976_v56 = vadd.f32 %v12263_v44, %v4975_v38  ;;  %v6926_v17 = vunpack.i.h.bf16 %v6924_v51 }
 0x720   : > { %v6934_v11 = vpop.permute.xlu0 %6933 }
 0x721   : > { %v7306_v20 = vpop.eup %7305  ;;  %v4755_v29 = vsel %vm3175_vm0, %v4723_v50, %v6925_v31  ;;  %v5089_v53 = vadd.f32 %v12070_v39, %v4976_v56  ;;  %v12299_v30 = vpop.permute.xlu2 %6973  ;;  %v6935_v58 = vunpack.i.l.bf16 %v6934_v11  ;;  %v4692_v39 = vsel %vm1797_vm10, %v4660_v16, %v6916_v54 }
 0x722   : > { %5213 = vst.msk [vmem:[#allocation3 + $0x19] sm:$0xff] %vm389_vm4, %v7306_v20  ;;  %v4787_v35 = vsel %vm3208_vm15, %v4755_v29, %v6930_v43  ;;  %v4724_v13 = vsel %vm3142_vm14, %v4692_v39, %v6921_v47  ;;  %v6936_v61 = vunpack.i.h.bf16 %v6934_v11  ;;  %v7521_v29 = vld [vmem:[#allocation3 + $0xe0] sm:$0xff]  ;;  %v6975_v42 = vunpack.i.l.bf16 %v12299_v30 }
 0x723   : > { %7307 = vtanh.f32 %v5089_v53  ;;  %7148 = vrot.lane.b32.xlu1 %v7147_v37, %s7556_s29  ;;  %v4819_v4 = vsel %vm3241_vm2, %v4787_v35, %v6935_v58  ;;  %v4756_v55 = vsel %vm3175_vm0, %v4724_v13, %v6926_v17  ;;  %v4662_v53 = vsel %vm389_vm4, %v7521_v29, %v6946_v40  ;;  %v5526_v13 = vld [vmem:[%s12806_s7 + $0x10] sm:$0xff] }
 0x724   : > { %v4788_v26 = vsel %vm3208_vm15, %v4756_v55, %v6931_v2  ;;  %v6961_v58 = vunpack.i.h.bf16 %v12276_v15  ;;  %5641 = vmatpush.msrb.mxu1 %v5526_v13 }
 0x725   : > { %v4820_v7 = vsel %vm3241_vm2, %v4788_v26, %v6936_v61 }
 0x726   : > { %v6939_v0 = vpop.permute.xlu1 %6938  ;;  %7158 = vrot.lane.b32.xlu0 %v7137_v41, %s7551_s22  ;;  %7153 = vrot.lane.b32.xlu2 %v12240_v52, %s7547_s18  ;;  %v4538_v41 = vrot.slane %v12330_v8, 1 }
 0x727   : > { %v6940_v24 = vunpack.i.l.bf16 %v6939_v0  ;;  %v4978_v19 = vpop.f32.mrf.mxu3  ;;  %v6941_v12 = vunpack.i.h.bf16 %v6939_v0 }
 0x728   : > { %v4979_v32 = vadd.f32 %v12263_v44, %v4978_v19  ;;  %v6949_v5 = vpop.permute.xlu0 %6948 }
 0x729   : > { %v4851_v25 = vsel %vm3274_vm5, %v4819_v4, %v6940_v24  ;;  %v7308_v60 = vpop.eup %7307  ;;  %v12316_v45 = vpop.permute.xlu2 %6988  ;;  %v5245_v18 = vld [vmem:[#allocation3 + $0x19] sm:$0xff]  ;;  %v6950_v28 = vunpack.i.l.bf16 %v6949_v5  ;;  %v4852_v23 = vsel %vm3274_vm5, %v4820_v7, %v6941_v12  ;;  %v6951_v22 = vunpack.i.h.bf16 %v6949_v5 }
 0x72a   : > { %5019 = vmatmul.f32.gmra.mxu3 %v4851_v25  ;;  %5214 = vst.msk [vmem:[#allocation3 + $0x21] sm:$0xff] %vm389_vm4, %v7308_v60  ;;  %v5092_v52 = vadd.f32 %v12108_v57, %v4979_v32  ;;  %5954 = vmatmul.msk.f32.vlgmr.msrb.gmra.mxu0 %vm389_vm4, %v5245_v18  ;;  %v12328_v57 = vld [vmem:[#allocation3 + $0x198] sm:$0xff]  ;;  %v12368_v32 = vld [vmem:[#allocation3 + $0x1a8] sm:$0x3]  ;;  %v12375_v5 = vpop.f32.mrf.mxu2  ;;  %v6976_v12 = vunpack.i.h.bf16 %v12299_v30 }
 0x72b   : > { %7163 = vrot.lane.b32.xlu1 %v7142_v21, %s7552_s25  ;;  %v4537_v62 = vrot.slane %v12328_v57, 1  ;;  %v4693_v49 = vsel %vm1797_vm10, %v4661_v36, %v6950_v28  ;;  %v4540_v15 = vrot.slane %v12368_v32, 1 }
 0x72c   : > { %7309 = vtanh.f32 %v5092_v52 }
 0x72d   : > { %v4539_v14 = vsel %vm612_vm1, %v4537_v62, %v4538_v41  ;;  %v4541_v52 = vsel %vm612_vm1, %v4538_v41, %v4540_v15  ;;  %v6990_v41 = vunpack.i.l.bf16 %v12316_v45  ;;  %vm5741_vm1 = vcmask 23552  }
 0x72e   : > { %v6954_v63 = vpop.permute.xlu1 %6953  ;;  %4402 = vrot.lane.b32.xlu0 %v12186_v33, %s7554_s27  ;;  %7168 = vrot.lane.b32.xlu2 %v7147_v37, %s7553_s26 }
 0x72f   : > { %v6955_v27 = vunpack.i.l.bf16 %v6954_v63  ;;  %v4981_v10 = vpop.f32.mrf.mxu3  ;;  %v6956_v50 = vunpack.i.h.bf16 %v6954_v63  ;;  %v7522_v63 = vld [vmem:[#allocation3 + $0xf0] sm:$0xff] }
 0x730   : > { %v4982_v33 = vadd.f32 %v12263_v44, %v4981_v10  ;;  %v6964_v21 = vpop.permute.xlu0 %6963 }
 0x731   : > { %v4725_v51 = vsel %vm3142_vm14, %v4693_v49, %v6955_v27  ;;  %v12341_v1 = vpop.permute.xlu2 %7003  ;;  %v5246_v31 = vld [vmem:[#allocation3 + $0x21] sm:$0xff]  ;;  %v6965_v11 = vunpack.i.l.bf16 %v6964_v21  ;;  %v6966_v39 = vunpack.i.h.bf16 %v6964_v21 }
 0x732   : > { %5022 = vmatmul.f32.gmra.mxu3 %v4852_v23  ;;  %v7310_v38 = vpop.eup %7309  ;;  %v5095_v56 = vadd.f32 %v12143_v59, %v4982_v33  ;;  %5955 = vmatmul.msk.f32.gmra.mxu0 %vm389_vm4, %v5246_v31  ;;  %v4757_v20 = vsel %vm3175_vm0, %v4725_v51, %v6960_v48  ;;  %v4694_v59 = vsel %vm1797_vm10, %v4662_v53, %v6951_v22  ;;  %v6991_v48 = vunpack.i.h.bf16 %v12316_v45 }
 0x733   : > { %5215 = vst.msk [vmem:[#allocation3 + $0x31] sm:$0xff] %vm389_vm4, %v7310_v38  ;;  %4500 = vrot.lane.b32.xlu1 %v12328_v57, %s7555_s28  ;;  %v4726_v16 = vsel %vm3142_vm14, %v4694_v59, %v6956_v50  ;;  %v4789_v54 = vsel %vm3208_vm15, %v4757_v20, %v6965_v11  ;;  %v5106_v38 = vpop.f32.mrf.mxu2  ;;  %v7005_v50 = vunpack.i.l.bf16 %v12341_v1 }
 0x734   : > { %7311 = vtanh.f32 %v5095_v56  ;;  %v4758_v4 = vsel %vm3175_vm0, %v4726_v16, %v6961_v58 }
 0x735   : > { %v4790_v2 = vsel %vm3208_vm15, %v4758_v4, %v6966_v39 }
 0x736   : > { %v6969_v37 = vpop.permute.xlu1 %6968  ;;  %4404 = vrot.lane.b32.xlu0 %v12213_v9, %s7554_s27  ;;  %4602 = vrot.lane.b32.xlu2 %v4539_v14, %s7556_s29 }
 0x737   : > { %v6970_v43 = vunpack.i.l.bf16 %v6969_v37  ;;  %v6971_v9 = vunpack.i.h.bf16 %v6969_v37 }
 0x738   : > { %v6979_v47 = vpop.permute.xlu0 %6978 }
 0x739   : > { %v4821_v35 = vsel %vm3241_vm2, %v4789_v54, %v6970_v43  ;;  %v12361_v17 = vpop.permute.xlu2 %7018  ;;  %v6980_v25 = vunpack.i.l.bf16 %v6979_v47  ;;  %v4822_v61 = vsel %vm3241_vm2, %v4790_v2, %v6971_v9  ;;  %v6981_v26 = vunpack.i.h.bf16 %v6979_v47 }
 0x73a   : > { %v4853_v0 = vsel %vm3274_vm5, %v4821_v35, %v6975_v42  ;;  %v7312_v24 = vpop.eup %7311  ;;  %v5247_v19 = vld [vmem:[#allocation3 + $0x31] sm:$0xff]  ;;  %v4854_v62 = vsel %vm3274_vm5, %v4822_v61, %v6976_v12  ;;  %v7006_v47 = vunpack.i.h.bf16 %v12341_v1 }
 0x73b   : > { %5025 = vmatmul.f32.gmra.mxu3 %v4853_v0  ;;  %5216 = vst.msk [vmem:[#allocation3 + $0x39] sm:$0xff] %vm389_vm4, %v7312_v24  ;;  %4502 = vrot.lane.b32.xlu1 %v12330_v8, %s7555_s28  ;;  %v4663_v27 = vsel %vm389_vm4, %v7522_v63, %v6980_v25  ;;  %v5109_v4 = vpop.f32.mrf.mxu2 }
 0x73c   : > { %5956 = vmatmul.msk.f32.gmra.mxu0 %vm389_vm4, %v5247_v19 }
 0x73d   : > { %v4984_v60 = vpop.f32.mrf.mxu3 }
 0x73e   : > { %v4985_v55 = vadd.f32 %v12263_v44, %v4984_v60  ;;  %v6984_v18 = vpop.permute.xlu1 %6983  ;;  %4604 = vrot.lane.b32.xlu2 %v4541_v52, %s7556_s29  ;;  %v7524_v60 = vld [vmem:[#allocation3 + $0x108] sm:$0xff] }
 0x73f   : > { %v6985_v46 = vunpack.i.l.bf16 %v6984_v18  ;;  %v6986_v36 = vunpack.i.h.bf16 %v6984_v18 }
 0x740   : > { %v5098_v28 = vadd.f32 %v12182_v34, %v4985_v55  ;;  %v6994_v3 = vpop.permute.xlu0 %6993  ;;  %v7523_v34 = vld [vmem:[#allocation3 + $0xf8] sm:$0xff]  ;;  %v7020_v55 = vunpack.i.l.bf16 %v12361_v17 }
 0x741   : > { %v4695_v10 = vsel %vm1797_vm10, %v4663_v27, %v6985_v46  ;;  %v12386_v7 = vpop.permute.xlu2 %7033  ;;  %v6995_v30 = vunpack.i.l.bf16 %v6994_v3  ;;  %v4664_v33 = vsel %vm389_vm4, %v7523_v34, %v6981_v26  ;;  %v6996_v20 = vunpack.i.h.bf16 %v6994_v3 }
 0x742   : > { %7313 = vtanh.f32 %v5098_v28  ;;  %v5248_v49 = vld [vmem:[#allocation3 + $0x39] sm:$0xff]  ;;  %v4727_v21 = vsel %vm3142_vm14, %v4695_v10, %v6990_v41  ;;  %v4696_v40 = vsel %vm1797_vm10, %v4664_v33, %v6986_v36  ;;  %v7021_v33 = vunpack.i.h.bf16 %v12361_v17 }
 0x743   : > { %5028 = vmatmul.f32.gmra.mxu3 %v4854_v62  ;;  %v4759_v11 = vsel %vm3175_vm0, %v4727_v21, %v6995_v30  ;;  %v4728_v29 = vsel %vm3142_vm14, %v4696_v40, %v6991_v48  ;;  %v5112_v41 = vpop.f32.mrf.mxu2  ;;  %v7525_v30 = vld [vmem:[#allocation3 + $0x110] sm:$0xff] }
 0x744   : > { %5957 = vmatmul.msk.f32.gmra.mxu0 %vm389_vm4, %v5248_v49  ;;  %v4760_v54 = vsel %vm3175_vm0, %v4728_v29, %v6996_v20  ;;  %v7035_v49 = vunpack.i.l.bf16 %v12386_v7 }
 0x745   : > { %v4987_v23 = vpop.f32.mrf.mxu3 }
 0x746   : > { %v4988_v51 = vadd.f32 %v12263_v44, %v4987_v23  ;;  %v6999_v31 = vpop.permute.xlu1 %6998 }
 0x747   : > { %v7000_v22 = vunpack.i.l.bf16 %v6999_v31  ;;  %v7001_v59 = vunpack.i.h.bf16 %v6999_v31 }
 0x748   : > { %v7314_v56 = vpop.eup %7313  ;;  %v5101_v14 = vadd.f32 %v12215_v6, %v4988_v51  ;;  %v7009_v53 = vpop.permute.xlu0 %7008 }
 0x749   : > { %5217 = vst.msk [vmem:[#allocation3 + $0x49] sm:$0xff] %vm389_vm4, %v7314_v56  ;;  %v4791_v37 = vsel %vm3208_vm15, %v4759_v11, %v7000_v22  ;;  %v7010_v43 = vunpack.i.l.bf16 %v7009_v53  ;;  %v12403_v42 = vpop.permute.xlu2 %7048  ;;  %v4792_v58 = vsel %vm3208_vm15, %v4760_v54, %v7001_v59  ;;  %v7011_v24 = vunpack.i.h.bf16 %v7009_v53 }
 0x74a   : > { %7315 = vtanh.f32 %v5101_v14  ;;  %v4823_v45 = vsel %vm3241_vm2, %v4791_v37, %v7005_v50  ;;  %v4824_v15 = vsel %vm3241_vm2, %v4792_v58, %v7006_v47  ;;  %v7036_v59 = vunpack.i.h.bf16 %v12386_v7 }
 0x74b   : > { %v4855_v16 = vsel %vm3274_vm5, %v4823_v45, %v7010_v43  ;;  %v4856_v18 = vsel %vm3274_vm5, %v4824_v15, %v7011_v24  ;;  %v7050_v45 = vunpack.i.l.bf16 %v12403_v42  ;;  %v5115_v54 = vpop.f32.mrf.mxu2 }
 0x74c   : > { %5031 = vmatmul.f32.gmra.mxu3 %v4855_v16 }
 0x74e   : > { %v7014_v6 = vpop.permute.xlu1 %7013  ;;  %v4990_v39 = vpop.f32.mrf.mxu3 }
 0x74f   : > { %v7015_v35 = vunpack.i.l.bf16 %v7014_v6  ;;  %v4991_v9 = vadd.f32 %v12263_v44, %v4990_v39  ;;  %v7016_v12 = vunpack.i.h.bf16 %v7014_v6 }
 0x750   : > { %v7316_v0 = vpop.eup %7315  ;;  %v5249_v19 = vld [vmem:[#allocation3 + $0x49] sm:$0xff]  ;;  %v7024_v13 = vpop.permute.xlu0 %7023 }
 0x751   : > { %5218 = vst.msk [vmem:[#allocation3 + $0x51] sm:$0xff] %vm389_vm4, %v7316_v0  ;;  %5958 = vmatmul.msk.f32.gmra.mxu0 %vm389_vm4, %v5249_v19  ;;  %v5104_v25 = vadd.f32 %v12375_v5, %v4991_v9  ;;  %v4665_v1 = vsel %vm389_vm4, %v7524_v60, %v7015_v35  ;;  %v7025_v2 = vunpack.i.l.bf16 %v7024_v13  ;;  %v12417_v52 = vpop.permute.xlu2 %7063  ;;  %v4666_v34 = vsel %vm389_vm4, %v7525_v30, %v7016_v12  ;;  %v7526_v0 = vld [vmem:[#allocation3 + $0x120] sm:$0xff]  ;;  %v5525_v60 = vld [vmem:[%s12806_s7 + $0x8] sm:$0xff] }
 0x752   : > { %v4697_v46 = vsel %vm1797_vm10, %v4665_v1, %v7020_v55  ;;  %v7026_v23 = vunpack.i.h.bf16 %v7024_v13  ;;  %v4698_v51 = vsel %vm1797_vm10, %v4666_v34, %v7021_v33  ;;  %v4667_v24 = vsel %vm389_vm4, %v7526_v0, %v7050_v45  ;;  %5642 = vmatpush.msrb.mxu1 %v5525_v60 }
 0x753   : > { %7317 = vtanh.f32 %v5104_v25  ;;  %v4729_v27 = vsel %vm3142_vm14, %v4697_v46, %v7025_v2  ;;  %v7051_v1 = vunpack.i.h.bf16 %v12403_v42  ;;  %v7065_v46 = vunpack.i.l.bf16 %v12417_v52  ;;  %v7527_v42 = vld [vmem:[#allocation3 + $0x128] sm:$0xff] }
 0x754   : > { %5034 = vmatmul.f32.gmra.mxu3 %v4856_v18  ;;  %v4730_v11 = vsel %vm3142_vm14, %v4698_v51, %v7026_v23  ;;  %v7066_v30 = vunpack.i.h.bf16 %v12417_v52 }
 0x756   : > { %v7029_v61 = vpop.permute.xlu1 %7028  ;;  %v4993_v26 = vpop.f32.mrf.mxu3 }
 0x757   : > { %v7030_v28 = vunpack.i.l.bf16 %v7029_v61  ;;  %v4994_v5 = vadd.f32 %v12263_v44, %v4993_v26  ;;  %v7031_v31 = vunpack.i.h.bf16 %v7029_v61 }
 0x758   : > { %v5250_v63 = vld [vmem:[#allocation3 + $0x51] sm:$0xff]  ;;  %v7039_v3 = vpop.permute.xlu0 %7038 }
 0x759   : > { %5959 = vmatmul.msk.f32.gmra.mxu0 %vm389_vm4, %v5250_v63  ;;  %v7318_v36 = vpop.eup %7317  ;;  %v4761_v10 = vsel %vm3175_vm0, %v4729_v27, %v7030_v28  ;;  %v5107_v62 = vadd.f32 %v5106_v38, %v4994_v5  ;;  %v7040_v21 = vunpack.i.l.bf16 %v7039_v3  ;;  %v12430_v38 = vpop.permute.xlu2 %7078  ;;  %v4762_v53 = vsel %vm3175_vm0, %v4730_v11, %v7031_v31 }
 0x75a   : > { %5219 = vst.msk [vmem:[#allocation3 + $0x61] sm:$0xff] %vm389_vm4, %v7318_v36  ;;  %v4793_v40 = vsel %vm3208_vm15, %v4761_v10, %v7035_v49  ;;  %v7041_v16 = vunpack.i.h.bf16 %v7039_v3  ;;  %v4794_v47 = vsel %vm3208_vm15, %v4762_v53, %v7036_v59  ;;  %v4668_v63 = vsel %vm389_vm4, %v7527_v42, %v7051_v1  ;;  %v5118_v3 = vpop.f32.mrf.mxu2 }
 0x75b   : > { %7319 = vtanh.f32 %v5107_v62  ;;  %v4825_v50 = vsel %vm3241_vm2, %v4793_v40, %v7040_v21  ;;  %v7080_v62 = vunpack.i.l.bf16 %v12430_v38 }
 0x75c   : > { %v4826_v9 = vsel %vm3241_vm2, %v4794_v47, %v7041_v16 }
 0x75e   : > { %v7044_v48 = vpop.permute.xlu1 %7043 }
 0x75f   : > { %v7045_v22 = vunpack.i.l.bf16 %v7044_v48  ;;  %v4996_v56 = vpop.f32.mrf.mxu3  ;;  %v7046_v6 = vunpack.i.h.bf16 %v7044_v48 }
 0x760   : > { %v4997_v14 = vadd.f32 %v12263_v44, %v4996_v56  ;;  %v7054_v17 = vpop.permute.xlu0 %7053 }
 0x761   : > { %v4857_v20 = vsel %vm3274_vm5, %v4825_v50, %v7045_v22  ;;  %v7320_v29 = vpop.eup %7319  ;;  %v5251_v37 = vld [vmem:[#allocation3 + $0x61] sm:$0xff]  ;;  %v7055_v58 = vunpack.i.l.bf16 %v7054_v17  ;;  %v4858_v25 = vsel %vm3274_vm5, %v4826_v9, %v7046_v6  ;;  %v7056_v61 = vunpack.i.h.bf16 %v7054_v17 }
 0x762   : > { %5037 = vmatmul.f32.gmra.mxu3 %v4857_v20  ;;  %5220 = vst.msk [vmem:[#allocation3 + $0x69] sm:$0xff] %vm389_vm4, %v7320_v29  ;;  %v5110_v43 = vadd.f32 %v5109_v4, %v4997_v14  ;;  %5960 = vmatmul.msk.f32.gmra.mxu0 %vm389_vm4, %v5251_v37  ;;  %v12445_v4 = vpop.permute.xlu2 %7093  ;;  %v7081_v29 = vunpack.i.h.bf16 %v12430_v38  ;;  %v5121_v37 = vpop.f32.mrf.mxu2  ;;  %v7529_v38 = vld [vmem:[#allocation3 + $0x140] sm:$0xff] }
 0x763   : > { %v4699_v19 = vsel %vm1797_vm10, %v4667_v24, %v7055_v58  ;;  %v4700_v36 = vsel %vm1797_vm10, %v4668_v63, %v7056_v61 }
 0x764   : > { %7321 = vtanh.f32 %v5110_v43  ;;  %v7528_v43 = vld [vmem:[#allocation3 + $0x138] sm:$0xff] }
 0x766   : > { %v7059_v35 = vpop.permute.xlu1 %7058 }
 0x767   : > { %v7060_v39 = vunpack.i.l.bf16 %v7059_v35  ;;  %v4999_v7 = vpop.f32.mrf.mxu3  ;;  %v7061_v28 = vunpack.i.h.bf16 %v7059_v35  ;;  %v7095_v35 = vunpack.i.l.bf16 %v12445_v4 }
 0x768   : > { %v5000_v13 = vadd.f32 %v12263_v44, %v4999_v7  ;;  %v7069_v15 = vpop.permute.xlu0 %7068 }
 0x769   : > { %v4731_v55 = vsel %vm3142_vm14, %v4699_v19, %v7060_v39  ;;  %v5252_v18 = vld [vmem:[#allocation3 + $0x69] sm:$0xff]  ;;  %v7070_v26 = vunpack.i.l.bf16 %v7069_v15  ;;  %v7071_v21 = vunpack.i.h.bf16 %v7069_v15 }
 0x76a   : > { %5040 = vmatmul.f32.gmra.mxu3 %v4858_v25  ;;  %v7322_v2 = vpop.eup %7321  ;;  %v5113_v12 = vadd.f32 %v5112_v41, %v5000_v13  ;;  %5961 = vmatmul.msk.f32.gmra.mxu0 %vm389_vm4, %v5252_v18  ;;  %v4763_v5 = vsel %vm3175_vm0, %v4731_v55, %v7065_v46  ;;  %v4732_v41 = vsel %vm3142_vm14, %v4700_v36, %v7061_v28  ;;  %v12466_v51 = vpop.permute.xlu2 %7108  ;;  %v7096_v25 = vunpack.i.h.bf16 %v12445_v4 }
 0x76b   : > { %5221 = vst.msk [vmem:[#allocation3 + $0x79] sm:$0xff] %vm389_vm4, %v7322_v2  ;;  %v4795_v49 = vsel %vm3208_vm15, %v4763_v5, %v7070_v26  ;;  %v4764_v22 = vsel %vm3175_vm0, %v4732_v41, %v7066_v30  ;;  %v7110_v55 = vunpack.i.l.bf16 %v12466_v51  ;;  %v5124_v42 = vpop.f32.mrf.mxu2 }
 0x76c   : > { %7323 = vtanh.f32 %v5113_v12  ;;  %v4796_v14 = vsel %vm3208_vm15, %v4764_v22, %v7071_v21  ;;  %v7530_v22 = vld [vmem:[#allocation3 + $0x150] sm:$0xff] }
 0x76e   : > { %v7074_v27 = vpop.permute.xlu1 %7073 }
 0x76f   : > { %v7075_v10 = vunpack.i.l.bf16 %v7074_v27  ;;  %v7076_v31 = vunpack.i.h.bf16 %v7074_v27 }
 0x770   : > { %v7084_v34 = vpop.permute.xlu0 %7083 }
 0x771   : > { %v4827_v33 = vsel %vm3241_vm2, %v4795_v49, %v7075_v10  ;;  %v7085_v56 = vunpack.i.l.bf16 %v7084_v34  ;;  %v4828_v20 = vsel %vm3241_vm2, %v4796_v14, %v7076_v31  ;;  %v7086_v59 = vunpack.i.h.bf16 %v7084_v34 }
 0x772   : > { %v4859_v23 = vsel %vm3274_vm5, %v4827_v33, %v7080_v62  ;;  %v7324_v40 = vpop.eup %7323  ;;  %v5253_v48 = vld [vmem:[#allocation3 + $0x79] sm:$0xff]  ;;  %v4860_v47 = vsel %vm3274_vm5, %v4828_v20, %v7081_v29  ;;  %v12481_v24 = vpop.permute.xlu2 %7123  ;;  %v7111_v10 = vunpack.i.h.bf16 %v12466_v51  ;;  %v4638_v34 = vrot.slane %v12328_v57, 2 }
 0x773   : > { %5043 = vmatmul.f32.gmra.mxu3 %v4859_v23  ;;  %5222 = vst.msk [vmem:[#allocation3 + $0x81] sm:$0xff] %vm389_vm4, %v7324_v40  ;;  %5962 = vmatmul.msk.f32.gmra.mxu0 %vm389_vm4, %v5253_v48  ;;  %v4669_v45 = vsel %vm389_vm4, %v7528_v43, %v7085_v56  ;;  %v4639_v33 = vrot.slane %v12330_v8, 2  ;;  %v5127_v14 = vpop.f32.mrf.mxu2 }
 0x775   : > { %v5002_v52 = vpop.f32.mrf.mxu3 }
 0x776   : > { %v5003_v50 = vadd.f32 %v12263_v44, %v5002_v52  ;;  %v7089_v11 = vpop.permute.xlu1 %7088  ;;  %v7125_v52 = vunpack.i.l.bf16 %v12481_v24 }
 0x777   : > { %v7090_v17 = vunpack.i.l.bf16 %v7089_v11  ;;  %v7091_v6 = vunpack.i.h.bf16 %v7089_v11  ;;  %v5524_v11 = vld [vmem:[%s12806_s7] sm:$0xff] }
 0x778   : > { %v5116_v53 = vadd.f32 %v5115_v54, %v5003_v50  ;;  %v7099_v16 = vpop.permute.xlu0 %7098  ;;  %v4670_v54 = vsel %vm389_vm4, %v7529_v38, %v7086_v59  ;;  %v4640_v50 = vsel %vm789_vm3, %v4638_v34, %v4639_v33  ;;  %5643 = vmatpush.msrb.mxu1 %v5524_v11  ;;  %v7531_v38 = vld [vmem:[#allocation3 + $0x158] sm:$0xff] }
 0x779   : > { %v4701_v58 = vsel %vm1797_vm10, %v4669_v45, %v7090_v17  ;;  %v7100_v0 = vunpack.i.l.bf16 %v7099_v16  ;;  %v4702_v19 = vsel %vm1797_vm10, %v4670_v54, %v7091_v6  ;;  %v7101_v46 = vunpack.i.h.bf16 %v7099_v16  ;;  %5952 = vmatmul.msk.f32.gmra.mxu2 %vm389_vm4, %v4640_v50 }
 0x77a   : > { %7325 = vtanh.f32 %v5116_v53  ;;  %v5254_v39 = vld [vmem:[#allocation3 + $0x81] sm:$0xff]  ;;  %v4733_v7 = vsel %vm3142_vm14, %v4701_v58, %v7095_v35  ;;  %v4734_v61 = vsel %vm3142_vm14, %v4702_v19, %v7096_v25  ;;  %v12497_v62 = vpop.permute.xlu2 %7138 }
 0x77b   : > { %5046 = vmatmul.f32.gmra.mxu3 %v4860_v47  ;;  %5963 = vmatmul.msk.f32.gmra.mxu0 %vm389_vm4, %v5254_v39  ;;  %v4765_v18 = vsel %vm3175_vm0, %v4733_v7, %v7100_v0  ;;  %v4766_v27 = vsel %vm3175_vm0, %v4734_v61, %v7101_v46  ;;  %v7140_v0 = vunpack.i.l.bf16 %v12497_v62  ;;  %v7126_v7 = vunpack.i.h.bf16 %v12481_v24 }
 0x77d   : > { %v5005_v9 = vpop.f32.mrf.mxu3 }
 0x77e   : > { %v5006_v13 = vadd.f32 %v12263_v44, %v5005_v9  ;;  %v7104_v15 = vpop.permute.xlu1 %7103 }
 0x77f   : > { %v7105_v60 = vunpack.i.l.bf16 %v7104_v15  ;;  %v7106_v26 = vunpack.i.h.bf16 %v7104_v15 }
 0x780   : > { %v7326_v1 = vpop.eup %7325  ;;  %v5119_v2 = vadd.f32 %v5118_v3, %v5006_v13  ;;  %v7114_v12 = vpop.permute.xlu0 %7113 }
 0x781   : > { %5223 = vst.msk [vmem:[#allocation3 + $0x91] sm:$0xff] %vm389_vm4, %v7326_v1  ;;  %v4797_v28 = vsel %vm3208_vm15, %v4765_v18, %v7105_v60  ;;  %v7115_v5 = vunpack.i.l.bf16 %v7114_v12  ;;  %v4798_v36 = vsel %vm3208_vm15, %v4766_v27, %v7106_v26  ;;  %v7116_v21 = vunpack.i.h.bf16 %v7114_v12  ;;  %v5130_v1 = vpop.f32.mrf.mxu2 }
 0x782   : > { %7327 = vtanh.f32 %v5119_v2  ;;  %v4829_v4 = vsel %vm3241_vm2, %v4797_v28, %v7110_v55  ;;  %v4830_v51 = vsel %vm3241_vm2, %v4798_v36, %v7111_v10  ;;  %v12517_v16 = vpop.permute.xlu2 %7153  ;;  %v4641_v28 = vrot.slane %v12368_v32, 2 }
 0x783   : > { %v4861_v63 = vsel %vm3274_vm5, %v4829_v4, %v7115_v5  ;;  %v4862_v57 = vsel %vm3274_vm5, %v4830_v51, %v7116_v21 }
 0x784   : > { %5049 = vmatmul.f32.gmra.mxu3 %v4861_v63  ;;  %v7155_v63 = vunpack.i.l.bf16 %v12517_v16  ;;  %v4642_v36 = vsel %vm789_vm3, %v4639_v33, %v4641_v28 }
 0x785   : > { %5953 = vmatmul.msk.f32.gmra.mxu2 %vm389_vm4, %v4642_v36 }
 0x786   : > { %v7119_v3 = vpop.permute.xlu1 %7118  ;;  %v5008_v49 = vpop.f32.mrf.mxu3 }
 0x787   : > { %v7120_v41 = vunpack.i.l.bf16 %v7119_v3  ;;  %v5009_v23 = vadd.f32 %v12263_v44, %v5008_v49  ;;  %v7121_v53 = vunpack.i.h.bf16 %v7119_v3 }
 0x788   : > { %v7328_v30 = vpop.eup %7327  ;;  %v5255_v40 = vld [vmem:[#allocation3 + $0x91] sm:$0xff]  ;;  %v7129_v31 = vpop.permute.xlu0 %7128 }
 0x789   : > { %5224 = vst.msk [vmem:[#allocation3 + $0x99] sm:$0xff] %vm389_vm4, %v7328_v30  ;;  %5964 = vmatmul.msk.f32.gmra.mxu0 %vm389_vm4, %v5255_v40  ;;  %v5122_v48 = vadd.f32 %v5121_v37, %v5009_v23  ;;  %v4671_v56 = vsel %vm389_vm4, %v7530_v22, %v7120_v41  ;;  %v7130_v17 = vunpack.i.l.bf16 %v7129_v31  ;;  %v4672_v54 = vsel %vm389_vm4, %v7531_v38, %v7121_v53  ;;  %v7532_v30 = vld [vmem:[#allocation3 + $0x168] sm:$0xff] }
 0x78a   : > { %v4703_v20 = vsel %vm1797_vm10, %v4671_v56, %v7125_v52  ;;  %v7131_v19 = vunpack.i.h.bf16 %v7129_v31  ;;  %v4704_v15 = vsel %vm1797_vm10, %v4672_v54, %v7126_v7  ;;  %v7169_v27 = vpop.permute.xlu2 %7168  ;;  %v4673_v34 = vsel %vm389_vm4, %v7532_v30, %v7155_v63  ;;  %v5133_v31 = vpop.f32.mrf.mxu2 }
 0x78b   : > { %7329 = vtanh.f32 %v5122_v48  ;;  %v4735_v6 = vsel %vm3142_vm14, %v4703_v20, %v7130_v17  ;;  %v7170_v33 = vunpack.i.l.bf16 %v7169_v27  ;;  %v7156_v17 = vunpack.i.h.bf16 %v12517_v16 }
 0x78c   : > { %5052 = vmatmul.f32.gmra.mxu3 %v4862_v57  ;;  %v4736_v46 = vsel %vm3142_vm14, %v4704_v15, %v7131_v19  ;;  %v7171_v54 = vunpack.i.h.bf16 %v7169_v27 }
 0x78e   : > { %v7134_v29 = vpop.permute.xlu1 %7133  ;;  %v5011_v59 = vpop.f32.mrf.mxu3 }
 0x78f   : > { %v7135_v37 = vunpack.i.l.bf16 %v7134_v29  ;;  %v5012_v43 = vadd.f32 %v12263_v44, %v5011_v59  ;;  %v7136_v25 = vunpack.i.h.bf16 %v7134_v29  ;;  %v12556_v29 = vld [vmem:[%s12805_s6] ss:$0 sm:$0xff] }
 0x790   : > { %v5256_v45 = vld [vmem:[#allocation3 + $0x99] sm:$0xff]  ;;  %v7144_v58 = vpop.permute.xlu0 %7143 }
 0x791   : > { %5965 = vmatmul.msk.f32.gmra.mxu0 %vm389_vm4, %v5256_v45  ;;  %v7330_v47 = vpop.eup %7329  ;;  %v4767_v35 = vsel %vm3175_vm0, %v4735_v6, %v7135_v37  ;;  %v5125_v39 = vadd.f32 %v5124_v42, %v5012_v43  ;;  %v7145_v9 = vunpack.i.l.bf16 %v7144_v58  ;;  %v4768_v5 = vsel %vm3175_vm0, %v4736_v46, %v7136_v25  ;;  %v7533_v45 = vld [vmem:[#allocation3 + $0x170] sm:$0xff] }
 0x792   : > { %5225 = vst.msk [vmem:[#allocation3 + $0xa9] sm:$0xff] %vm389_vm4, %v7330_v47  ;;  %v4799_v13 = vsel %vm3208_vm15, %v4767_v35, %v7140_v0  ;;  %v7141_v42 = vunpack.i.h.bf16 %v12497_v62  ;;  %v7146_v32 = vunpack.i.h.bf16 %v7144_v58  ;;  %v4674_v6 = vsel %vm389_vm4, %v7533_v45, %v7156_v17  ;;  %v5136_v38 = vpop.f32.mrf.mxu2 }
 0x793   : > { %7331 = vtanh.f32 %v5125_v39  ;;  %v4831_v2 = vsel %vm3241_vm2, %v4799_v13, %v7145_v9 }
 0x794   : > { %v4800_v62 = vsel %vm3208_vm15, %v4768_v5, %v7141_v42 }
 0x795   : > { %v4832_v8 = vsel %vm3241_vm2, %v4800_v62, %v7146_v32 }
 0x796   : > { %v7149_v60 = vpop.permute.xlu1 %7148 }
 0x797   : > { %v7150_v55 = vunpack.i.l.bf16 %v7149_v60  ;;  %v5014_v18 = vpop.f32.mrf.mxu3  ;;  %v7151_v41 = vunpack.i.h.bf16 %v7149_v60 }
 0x798   : > { %v5015_v61 = vadd.f32 %v12263_v44, %v5014_v18  ;;  %v7159_v12 = vpop.permute.xlu0 %7158 }
 0x799   : > { %v4863_v24 = vsel %vm3274_vm5, %v4831_v2, %v7150_v55  ;;  %v7332_v26 = vpop.eup %7331  ;;  %v5257_v4 = vld [vmem:[#allocation3 + $0xa9] sm:$0xff]  ;;  %v7160_v10 = vunpack.i.l.bf16 %v7159_v12  ;;  %v4864_v56 = vsel %vm3274_vm5, %v4832_v8, %v7151_v41  ;;  %v7161_v20 = vunpack.i.h.bf16 %v7159_v12 }
 0x79a   : > { %5055 = vmatmul.f32.gmra.mxu3 %v4863_v24  ;;  %5226 = vst.msk [vmem:[#allocation3 + $0xb1] sm:$0xff] %vm389_vm4, %v7332_v26  ;;  %v5128_v3 = vadd.f32 %v5127_v14, %v5015_v61  ;;  %5966 = vmatmul.msk.f32.gmra.mxu0 %vm389_vm4, %v5257_v4  ;;  %v4603_v14 = vpop.permute.xlu2 %4602  ;;  %v5139_v28 = vpop.f32.mrf.mxu2 }
 0x79b   : > { %v4705_v23 = vsel %vm1797_vm10, %v4673_v34, %v7160_v10  ;;  %v4706_v47 = vsel %vm1797_vm10, %v4674_v6, %v7161_v20  ;;  %v12582_v10 = vld [vmem:[%s12803_s4 + $0x1] ss:$0 sm:$0xff] }
 0x79c   : > { %7333 = vtanh.f32 %v5128_v3 }
 0x79e   : > { %v7164_v49 = vpop.permute.xlu1 %7163 }
 0x79f   : > { %v7165_v21 = vunpack.i.l.bf16 %v7164_v49  ;;  %v5017_v40 = vpop.f32.mrf.mxu3  ;;  %v7166_v53 = vunpack.i.h.bf16 %v7164_v49 }
 0x7a0   : > { %v5018_v51 = vadd.f32 %v12263_v44, %v5017_v40  ;;  %v4403_v48 = vpop.permute.xlu0 %4402 }
 0x7a1   : > { %v4737_v22 = vsel %vm3142_vm14, %v4705_v23, %v7165_v21  ;;  %v5258_v52 = vld [vmem:[#allocation3 + $0xb1] sm:$0xff]  ;;  %v4738_v39 = vsel %vm3142_vm14, %v4706_v47, %v7166_v53 }
 0x7a2   : > { %5058 = vmatmul.f32.gmra.mxu3 %v4864_v56  ;;  %v7334_v57 = vpop.eup %7333  ;;  %v5131_v50 = vadd.f32 %v5130_v1, %v5018_v51  ;;  %v4769_v11 = vsel %vm3175_vm0, %v4737_v22, %v7170_v33  ;;  %5967 = vmatmul.msk.f32.gmra.mxu0 %vm389_vm4, %v5258_v52  ;;  %v4770_v19 = vsel %vm3175_vm0, %v4738_v39, %v7171_v54  ;;  %v4605_v15 = vpop.permute.xlu2 %4604 }
 0x7a3   : > { %5227 = vst.msk [vmem:[#allocation3 + $0xc1] sm:$0xff] %vm389_vm4, %v7334_v57  ;;  %v4801_v37 = vsel %vm3208_vm15, %v4769_v11, %v4403_v48  ;;  %v5142_v32 = vpop.f32.mrf.mxu2 }
 0x7a4   : > { %7335 = vtanh.f32 %v5131_v50 }
 0x7a6   : > { %v4501_v59 = vpop.permute.xlu1 %4500 }
 0x7a7   : > { %v4833_v43 = vsel %vm3241_vm2, %v4801_v37, %v4501_v59  ;;  %v5396_v58 = vpop.f32.mrf.mxu0 }
 0x7a8   : > { %v4865_v16 = vsel %vm3274_vm5, %v4833_v43, %v4603_v14  ;;  %v5397_v35 = vadd.f32 %v12556_v29, %v5396_v58  ;;  %v4405_v7 = vpop.permute.xlu0 %4404 }
 0x7a9   : > { %v4802_v25 = vsel %vm3208_vm15, %v4770_v19, %v4405_v7 }
 0x7aa   : > { %5061 = vmatmul.f32.gmra.mxu3 %v4865_v16  ;;  %v7336_v0 = vpop.eup %7335  ;;  %7337 = vtanh.f32 %v5397_v35  ;;  %v5259_v9 = vld [vmem:[#allocation3 + $0xc1] sm:$0xff] }
 0x7ab   : > { %5228 = vst.msk [vmem:[#allocation3 + $0xc9] sm:$0xff] %vm389_vm4, %v7336_v0  ;;  %5968 = vmatmul.msk.f32.gmra.mxu0 %vm389_vm4, %v5259_v9  ;;  %v5145_v33 = vpop.f32.mrf.mxu2 }
 0x7ad   : > { %v5020_v13 = vpop.f32.mrf.mxu3 }
 0x7ae   : > { %v5021_v60 = vadd.f32 %v12263_v44, %v5020_v13  ;;  %v4503_v1 = vpop.permute.xlu1 %4502 }
 0x7af   : > { %v4834_v55 = vsel %vm3241_vm2, %v4802_v25, %v4503_v1  ;;  %v5399_v2 = vpop.f32.mrf.mxu0 }
 0x7b0   : > { %v5134_v18 = vadd.f32 %v5133_v31, %v5021_v60  ;;  %v4866_v46 = vsel %vm3274_vm5, %v4834_v55, %v4605_v15  ;;  %v7338_v61 = vpop.eup %7337  ;;  %v5400_v12 = vadd.f32 %v12556_v29, %v5399_v2 }
 0x7b1   : > { %5986 = vmatmul.msk.f32.vlgmr.msrb.gmra.mxu1 %vm1797_vm10, %v7338_v61 }
 0x7b2   : > { %7339 = vtanh.f32 %v5134_v18  ;;  %5064 = vmatmul.f32.gmra.mxu3 %v4866_v46  ;;  %v5260_v24 = vld [vmem:[#allocation3 + $0xc9] sm:$0xff] }
 0x7b3   : > { %7341 = vtanh.f32 %v5400_v12  ;;  %5969 = vmatmul.msk.f32.gmra.mxu0 %vm389_vm4, %v5260_v24  ;;  %v5148_v14 = vpop.f32.mrf.mxu2 }
 0x7b5   : > { %v5023_v26 = vpop.f32.mrf.mxu3 }
 0x7b6   : > { %v5024_v5 = vadd.f32 %v12263_v44, %v5023_v26 }
 0x7b8   : > { %v7340_v4 = vpop.eup %7339  ;;  %v5137_v42 = vadd.f32 %v5136_v38, %v5024_v5 }
 0x7b9   : > { %v7342_v63 = vpop.eup %7341  ;;  %5229 = vst.msk [vmem:[#allocation3 + $0xd9] sm:$0xff] %vm389_vm4, %v7340_v4  ;;  %v5402_v27 = vpop.f32.mrf.mxu0 }
 0x7ba   : > { %7343 = vtanh.f32 %v5137_v42  ;;  %v5403_v3 = vadd.f32 %v12556_v29, %v5402_v27  ;;  %5987 = vmatmul.msk.f32.gmra.mxu1 %vm1797_vm10, %v7342_v63 }
 0x7bb   : > { %v5151_v16 = vpop.f32.mrf.mxu2 }
 0x7bc   : > { %7345 = vtanh.f32 %v5403_v3 }
 0x7be   : > { %v5026_v36 = vpop.f32.mrf.mxu3 }
 0x7bf   : > { %v5027_v44 = vadd.f32 %v12582_v10, %v5026_v36 }
 0x7c0   : > { %v7344_v41 = vpop.eup %7343  ;;  %v5261_v62 = vld [vmem:[#allocation3 + $0xd9] sm:$0xff] }
 0x7c1   : > { %5230 = vst.msk [vmem:[#allocation3 + $0xe1] sm:$0xff] %vm389_vm4, %v7344_v41  ;;  %v5140_v49 = vadd.f32 %v5139_v28, %v5027_v44  ;;  %v5405_v30 = vpop.f32.mrf.mxu0  ;;  %5970 = vmatmul.msk.f32.gmra.mxu0 %vm389_vm4, %v5261_v62 }
 0x7c2   : > { %v7346_v34 = vpop.eup %7345  ;;  %v5406_v21 = vadd.f32 %v12556_v29, %v5405_v30 }
 0x7c3   : > { %7347 = vtanh.f32 %v5140_v49  ;;  %5988 = vmatmul.msk.f32.gmra.mxu1 %vm1797_vm10, %v7346_v34  ;;  %v5154_v9 = vpop.f32.mrf.mxu2 }
 0x7c4   : > { %7349 = vtanh.f32 %v5406_v21 }
 0x7c6   : > { %v5029_v23 = vpop.f32.mrf.mxu3 }
 0x7c7   : > { %v5030_v40 = vadd.f32 %v12582_v10, %v5029_v23 }
 0x7c8   : > { %v5262_v8 = vld [vmem:[#allocation3 + $0xe1] sm:$0xff] }
 0x7c9   : > { %v7348_v31 = vpop.eup %7347  ;;  %v5143_v51 = vadd.f32 %v5142_v32, %v5030_v40  ;;  %5971 = vmatmul.msk.f32.gmra.mxu0 %vm389_vm4, %v5262_v8 }
 0x7ca   : > { %v7350_v48 = vpop.eup %7349  ;;  %5231 = vst.msk [vmem:[#allocation3 + $0xf1] sm:$0xff] %vm389_vm4, %v7348_v31 }
 0x7cb   : > { %7351 = vtanh.f32 %v5143_v51  ;;  %5989 = vmatmul.msk.f32.gmra.mxu1 %vm1797_vm10, %v7350_v48  ;;  %v5157_v61 = vpop.f32.mrf.mxu2 }
 0x7ce   : > { %v5408_v22 = vpop.f32.mrf.mxu0 }
 0x7cf   : > { %v5409_v56 = vadd.f32 %v12556_v29, %v5408_v22  ;;  %v5032_v52 = vpop.f32.mrf.mxu3 }
 0x7d0   : > { %v5033_v50 = vadd.f32 %v12582_v10, %v5032_v52 }
 0x7d1   : > { %v7352_v57 = vpop.eup %7351  ;;  %7353 = vtanh.f32 %v5409_v56  ;;  %v5263_v11 = vld [vmem:[#allocation3 + $0xf1] sm:$0xff] }
 0x7d2   : > { %5232 = vst.msk [vmem:[#allocation3 + $0xf9] sm:$0xff] %vm389_vm4, %v7352_v57  ;;  %5972 = vmatmul.msk.f32.gmra.mxu0 %vm389_vm4, %v5263_v11  ;;  %v5146_v17 = vadd.f32 %v5145_v33, %v5033_v50 }
 0x7d3   : > { %v5160_v36 = vpop.f32.mrf.mxu2 }
 0x7d4   : > { %7355 = vtanh.f32 %v5146_v17 }
 0x7d6   : > { %v5411_v20 = vpop.f32.mrf.mxu0 }
 0x7d7   : > { %v7354_v53 = vpop.eup %7353  ;;  %v5412_v37 = vadd.f32 %v12556_v29, %v5411_v20  ;;  %v5035_v59 = vpop.f32.mrf.mxu3 }
 0x7d8   : > { %5990 = vmatmul.msk.f32.gmra.mxu1 %vm1797_vm10, %v7354_v53  ;;  %v5036_v43 = vadd.f32 %v12582_v10, %v5035_v59 }
 0x7d9   : > { %7357 = vtanh.f32 %v5412_v37  ;;  %v5264_v45 = vld [vmem:[#allocation3 + $0xf9] sm:$0xff] }
 0x7da   : > { %5973 = vmatmul.msk.f32.gmra.mxu0 %vm389_vm4, %v5264_v45  ;;  %v7356_v6 = vpop.eup %7355  ;;  %v5149_v58 = vadd.f32 %v5148_v14, %v5036_v43 }
 0x7db   : > { %5233 = vst.msk [vmem:[#allocation3 + $0x109] sm:$0xff] %vm389_vm4, %v7356_v6  ;;  %v5163_v34 = vpop.f32.mrf.mxu2 }
 0x7dc   : > { %7359 = vtanh.f32 %v5149_v58 }
 0x7df   : > { %v7358_v47 = vpop.eup %7357  ;;  %v5414_v35 = vpop.f32.mrf.mxu0 }
 0x7e0   : > { %5991 = vmatmul.msk.f32.gmra.mxu1 %vm1797_vm10, %v7358_v47  ;;  %v5415_v39 = vadd.f32 %v12556_v29, %v5414_v35 }
 0x7e2   : > { %v7360_v0 = vpop.eup %7359  ;;  %7361 = vtanh.f32 %v5415_v39  ;;  %v5265_v38 = vld [vmem:[#allocation3 + $0x109] sm:$0xff] }
 0x7e3   : > { %5234 = vst.msk [vmem:[#allocation3 + $0x111] sm:$0xff] %vm389_vm4, %v7360_v0  ;;  %5974 = vmatmul.msk.f32.gmra.mxu0 %vm389_vm4, %v5265_v38  ;;  %v5166_v56 = vpop.f32.mrf.mxu2 }
 0x7e5   : > { %v5038_v54 = vpop.f32.mrf.mxu3 }
 0x7e6   : > { %v5039_v7 = vadd.f32 %v12582_v10, %v5038_v54 }
 0x7e7   : > { %v5417_v13 = vpop.f32.mrf.mxu0 }
 0x7e8   : > { %v5152_v19 = vadd.f32 %v5151_v16, %v5039_v7  ;;  %v7362_v15 = vpop.eup %7361  ;;  %v5418_v25 = vadd.f32 %v12556_v29, %v5417_v13 }
 0x7e9   : > { %5992 = vmatmul.msk.f32.gmra.mxu1 %vm1797_vm10, %v7362_v15 }
 0x7ea   : > { %7363 = vtanh.f32 %v5152_v19  ;;  %v5266_v60 = vld [vmem:[#allocation3 + $0x111] sm:$0xff] }
 0x7eb   : > { %7365 = vtanh.f32 %v5418_v25  ;;  %5975 = vmatmul.msk.f32.gmra.mxu0 %vm389_vm4, %v5266_v60  ;;  %v5169_v37 = vpop.f32.mrf.mxu2 }
 0x7ed   : > { %v5041_v1 = vpop.f32.mrf.mxu3 }
 0x7ee   : > { %v5042_v55 = vadd.f32 %v12582_v10, %v5041_v1  ;;  %v12647_v1 = vld [vmem:[%s12807_s8] ss:$0 sm:$0xff] }
 0x7f0   : > { %v7364_v18 = vpop.eup %7363  ;;  %v5155_v2 = vadd.f32 %v5154_v9, %v5042_v55  ;;  %v5420_v12 = vpop.f32.mrf.mxu0 }
 0x7f1   : > { %v7366_v46 = vpop.eup %7365  ;;  %5235 = vst.msk [vmem:[#allocation3 + $0x121] sm:$0xff] %vm389_vm4, %v7364_v18  ;;  %v5421_v24 = vadd.f32 %v12556_v29, %v5420_v12 }
 0x7f2   : > { %7367 = vtanh.f32 %v5155_v2  ;;  %5993 = vmatmul.msk.f32.gmra.mxu1 %vm1797_vm10, %v7366_v46 }
 0x7f3   : > { %7369 = vtanh.f32 %v5421_v24  ;;  %v5172_v0 = vpop.f32.mrf.mxu2 }
 0x7f6   : > { %v5044_v28 = vpop.f32.mrf.mxu3 }
 0x7f7   : > { %v5045_v26 = vadd.f32 %v12582_v10, %v5044_v28 }
 0x7f8   : > { %v7368_v5 = vpop.eup %7367  ;;  %v5267_v4 = vld [vmem:[#allocation3 + $0x121] sm:$0xff]  ;;  %v5423_v63 = vpop.f32.mrf.mxu0 }
 0x7f9   : > { %5236 = vst.msk [vmem:[#allocation3 + $0x129] sm:$0xff] %vm389_vm4, %v7368_v5  ;;  %v5158_v42 = vadd.f32 %v5157_v61, %v5045_v26  ;;  %5976 = vmatmul.msk.f32.gmra.mxu0 %vm389_vm4, %v5267_v4  ;;  %v7370_v27 = vpop.eup %7369  ;;  %v5424_v3 = vadd.f32 %v12556_v29, %v5423_v63 }
 0x7fa   : > { %5994 = vmatmul.msk.f32.gmra.mxu1 %vm1797_vm10, %v7370_v27 }
 0x7fb   : > { %7371 = vtanh.f32 %v5158_v42 }
 0x7fc   : > { %7373 = vtanh.f32 %v5424_v3  ;;  %v5175_v60 = vpop.f32.mrf.mxu2 }
 0x7fe   : > { %v5047_v32 = vpop.f32.mrf.mxu3 }
 0x7ff   : > { %v5048_v44 = vadd.f32 %v12582_v10, %v5047_v32 }
 0x800   : > { %v5268_v41 = vld [vmem:[#allocation3 + $0x129] sm:$0xff] }
 0x801   : > { %v7372_v62 = vpop.eup %7371  ;;  %v5161_v49 = vadd.f32 %v5160_v36, %v5048_v44  ;;  %5977 = vmatmul.msk.f32.gmra.mxu0 %vm389_vm4, %v5268_v41 }
 0x802   : > { %v7374_v30 = vpop.eup %7373  ;;  %5237 = vst.msk [vmem:[#allocation3 + $0x139] sm:$0xff] %vm389_vm4, %v7372_v62 }
 0x803   : > { %7375 = vtanh.f32 %v5161_v49  ;;  %5995 = vmatmul.msk.f32.gmra.mxu1 %vm1797_vm10, %v7374_v30 }
 0x806   : > { %v5426_v21 = vpop.f32.mrf.mxu0 }
 0x807   : > { %v5427_v23 = vadd.f32 %v12556_v29, %v5426_v21  ;;  %v5050_v40 = vpop.f32.mrf.mxu3 }
 0x808   : > { %v5051_v31 = vadd.f32 %v12582_v10, %v5050_v40  ;;  %v5178_v42 = vpop.f32.mrf.mxu2 }
 0x809   : > { %v7376_v8 = vpop.eup %7375  ;;  %7377 = vtanh.f32 %v5427_v23  ;;  %v5269_v33 = vld [vmem:[#allocation3 + $0x139] sm:$0xff] }
 0x80a   : > { %5238 = vst.msk [vmem:[#allocation3 + $0x141] sm:$0xff] %vm389_vm4, %v7376_v8  ;;  %5978 = vmatmul.msk.f32.gmra.mxu0 %vm389_vm4, %v5269_v33  ;;  %v5164_v51 = vadd.f32 %v5163_v34, %v5051_v31 }
 0x80c   : > { %7379 = vtanh.f32 %v5164_v51 }
 0x80e   : > { %v5429_v48 = vpop.f32.mrf.mxu0 }
 0x80f   : > { %v7378_v22 = vpop.eup %7377  ;;  %v5430_v52 = vadd.f32 %v12556_v29, %v5429_v48  ;;  %v5053_v57 = vpop.f32.mrf.mxu3 }
 0x810   : > { %5996 = vmatmul.msk.f32.gmra.mxu1 %vm1797_vm10, %v7378_v22  ;;  %v5054_v50 = vadd.f32 %v12582_v10, %v5053_v57 }
 0x811   : > { %7381 = vtanh.f32 %v5430_v52  ;;  %v5270_v11 = vld [vmem:[#allocation3 + $0x141] sm:$0xff] }
 0x812   : > { %5979 = vmatmul.msk.f32.gmra.mxu0 %vm389_vm4, %v5270_v11  ;;  %v7380_v14 = vpop.eup %7379  ;;  %v5167_v17 = vadd.f32 %v5166_v56, %v5054_v50 }
 0x813   : > { %5239 = vst.msk [vmem:[#allocation3 + $0x151] sm:$0xff] %vm389_vm4, %v7380_v14 }
 0x814   : > { %7383 = vtanh.f32 %v5167_v17 }
 0x817   : > { %v7382_v20 = vpop.eup %7381  ;;  %v5432_v53 = vpop.f32.mrf.mxu0 }
 0x818   : > { %5997 = vmatmul.msk.f32.gmra.mxu1 %vm1797_vm10, %v7382_v20  ;;  %v5433_v59 = vadd.f32 %v12556_v29, %v5432_v53 }
 0x81a   : > { %v7384_v43 = vpop.eup %7383  ;;  %7385 = vtanh.f32 %v5433_v59  ;;  %v5271_v45 = vld [vmem:[#allocation3 + $0x151] sm:$0xff] }
 0x81b   : > { %5240 = vst.msk [vmem:[#allocation3 + $0x159] sm:$0xff] %vm389_vm4, %v7384_v43  ;;  %5980 = vmatmul.msk.f32.gmra.mxu0 %vm389_vm4, %v5271_v45 }
 0x81d   : > { %v5056_v6 = vpop.f32.mrf.mxu3 }
 0x81e   : > { %v5057_v58 = vadd.f32 %v12582_v10, %v5056_v6 }
 0x81f   : > { %v5435_v47 = vpop.f32.mrf.mxu0 }
 0x820   : > { %v5170_v16 = vadd.f32 %v5169_v37, %v5057_v58  ;;  %v7386_v35 = vpop.eup %7385  ;;  %v5436_v39 = vadd.f32 %v12556_v29, %v5435_v47 }
 0x821   : > { %5998 = vmatmul.msk.f32.gmra.mxu1 %vm1797_vm10, %v7386_v35 }
 0x822   : > { %7387 = vtanh.f32 %v5170_v16  ;;  %v5272_v38 = vld [vmem:[#allocation3 + $0x159] sm:$0xff] }
 0x823   : > { %7389 = vtanh.f32 %v5436_v39  ;;  %5981 = vmatmul.msk.f32.gmra.mxu0 %vm389_vm4, %v5272_v38 }
 0x825   : > { %v5059_v54 = vpop.f32.mrf.mxu3 }
 0x826   : > { %v5060_v7 = vadd.f32 %v12582_v10, %v5059_v54 }
 0x828   : > { %v7388_v9 = vpop.eup %7387  ;;  %v5173_v19 = vadd.f32 %v5172_v0, %v5060_v7  ;;  %v5438_v15 = vpop.f32.mrf.mxu0 }
 0x829   : > { %v7390_v13 = vpop.eup %7389  ;;  %5241 = vst.msk [vmem:[#allocation3 + $0x169] sm:$0xff] %vm389_vm4, %v7388_v9  ;;  %v5439_v25 = vadd.f32 %v12556_v29, %v5438_v15 }
 0x82a   : > { %7391 = vtanh.f32 %v5173_v19  ;;  %5999 = vmatmul.msk.f32.gmra.mxu1 %vm1797_vm10, %v7390_v13 }
 0x82b   : > { %7393 = vtanh.f32 %v5439_v25 }
 0x82d   : > { %v5062_v55 = vpop.f32.mrf.mxu3 }
 0x82e   : > { %v5063_v18 = vadd.f32 %v12582_v10, %v5062_v55  ;;  %v5645_v2 = vpop.f32.mrf.mxu1 }
 0x82f   : > { %v5646_v61 = vadd.f32 %v12647_v1, %v5645_v2 }
 0x830   : > { %v7392_v46 = vpop.eup %7391  ;;  %v5176_v12 = vadd.f32 %v5175_v60, %v5063_v18  ;;  %v5273_v24 = vld [vmem:[#allocation3 + $0x169] sm:$0xff]  ;;  %v5441_v28 = vpop.f32.mrf.mxu0 }
 0x831   : > { %5242 = vst.msk [vmem:[#allocation3 + $0x171] sm:$0xff] %vm389_vm4, %v7392_v46  ;;  %5982 = vmatmul.msk.f32.gmra.mxu0 %vm389_vm4, %v5273_v24  ;;  %v7394_v26 = vpop.eup %7393  ;;  %v5442_v5 = vadd.f32 %v12556_v29, %v5441_v28 }
 0x832   : > { %5742 = vst.msk [vmem:[%s12655_s15] sm:$0xff] %vm5741_vm1, %v5646_v61  ;;  %7395 = vtanh.f32 %v5176_v12  ;;  %6000 = vmatmul.msk.f32.gmra.mxu1 %vm1797_vm10, %v7394_v26 }
 0x833   : > { %7397 = vtanh.f32 %v5442_v5 }
 0x835   : > { %v5065_v4 = vpop.f32.mrf.mxu3 }
 0x836   : > { %v5066_v63 = vadd.f32 %v12582_v10, %v5065_v4 }
 0x837   : > { %v5648_v27 = vpop.f32.mrf.mxu1 }
 0x838   : > { %v7396_v3 = vpop.eup %7395  ;;  %v5649_v36 = vadd.f32 %v12647_v1, %v5648_v27  ;;  %v5179_v32 = vadd.f32 %v5178_v42, %v5066_v63  ;;  %v5274_v44 = vld [vmem:[#allocation3 + $0x171] sm:$0xff] }
 0x839   : > { %5243 = vst.msk [vmem:[#allocation3 + $0x181] sm:$0xff] %vm389_vm4, %v7396_v3  ;;  %5983 = vmatmul.msk.f32.gmra.mxu0 %vm389_vm4, %v5274_v44  ;;  %v7398_v41 = vpop.eup %7397 }
 0x83a   : > { %5743 = vst.msk [vmem:[%s12655_s15 + $0x8] sm:$0xff] %vm5741_vm1, %v5649_v36  ;;  %7399 = vtanh.f32 %v5179_v32  ;;  %6001 = vmatmul.msk.f32.gmra.mxu1 %vm1797_vm10, %v7398_v41 }
 0x83e   : > { %v5444_v62 = vpop.f32.mrf.mxu0 }
 0x83f   : > { %v5445_v10 = vadd.f32 %v12556_v29, %v5444_v62 }
 0x840   : > { %v7400_v49 = vpop.eup %7399  ;;  %v5651_v30 = vpop.f32.mrf.mxu1  ;;  %v5275_v34 = vld [vmem:[#allocation3 + $0x181] sm:$0xff] }
 0x841   : > { %5244 = vst.msk [vmem:[#allocation3 + $0x189] sm:$0xff] %vm389_vm4, %v7400_v49  ;;  %7401 = vtanh.f32 %v5445_v10  ;;  %v5652_v21 = vadd.f32 %v12647_v1, %v5651_v30  ;;  %5984 = vmatmul.msk.f32.gmra.mxu0 %vm389_vm4, %v5275_v34 }
 0x843   : > { %5744 = vst.msk [vmem:[%s12655_s15 + $0x10] sm:$0xff] %vm5741_vm1, %v5652_v21 }
 0x846   : > { %v5447_v23 = vpop.f32.mrf.mxu0 }
 0x847   : > { %v7402_v40 = vpop.eup %7401  ;;  %v5448_v8 = vadd.f32 %v12556_v29, %v5447_v23 }
 0x848   : > { %v5654_v31 = vpop.f32.mrf.mxu1  ;;  %6002 = vmatmul.msk.f32.gmra.mxu1 %vm1797_vm10, %v7402_v40  ;;  %v5276_v33 = vld [vmem:[#allocation3 + $0x189] sm:$0xff] }
 0x849   : > { %7403 = vtanh.f32 %v5448_v8  ;;  %v5655_v51 = vadd.f32 %v12647_v1, %v5654_v31  ;;  %5985 = vmatmul.msk.f32.gmra.mxu0 %vm389_vm4, %v5276_v33 }
 0x84b   : > { %5745 = vst.msk [vmem:[%s12655_s15 + $0x18] sm:$0xff] %vm5741_vm1, %v5655_v51 }
 0x84f   : > { %v7404_v48 = vpop.eup %7403  ;;  %v5450_v22 = vpop.f32.mrf.mxu0 }
 0x850   : > { %v5451_v56 = vadd.f32 %v12556_v29, %v5450_v22  ;;  %6003 = vmatmul.msk.f32.gmra.mxu1 %vm1797_vm10, %v7404_v48 }
 0x852   : > { %7405 = vtanh.f32 %v5451_v56 }
 0x855   : > { %v5657_v52 = vpop.f32.mrf.mxu1 }
 0x856   : > { %v5658_v57 = vadd.f32 %v12647_v1, %v5657_v52 }
 0x857   : > { %v5453_v50 = vpop.f32.mrf.mxu0 }
 0x858   : > { %v7406_v11 = vpop.eup %7405  ;;  %5746 = vst.msk [vmem:[%s12655_s15 + $0x20] sm:$0xff] %vm5741_vm1, %v5658_v57  ;;  %v5454_v14 = vadd.f32 %v12556_v29, %v5453_v50 }
 0x859   : > { %6004 = vmatmul.msk.f32.gmra.mxu1 %vm1797_vm10, %v7406_v11 }
 0x85a   : > { %7407 = vtanh.f32 %v5454_v14 }
 0x85d   : > { %v5660_v17 = vpop.f32.mrf.mxu1 }
 0x85e   : > { %v5661_v20 = vadd.f32 %v12647_v1, %v5660_v17 }
 0x860   : > { %v7408_v53 = vpop.eup %7407  ;;  %5747 = vst.msk [vmem:[%s12655_s15 + $0x28] sm:$0xff] %vm5741_vm1, %v5661_v20  ;;  %v5456_v37 = vpop.f32.mrf.mxu0 }
 0x861   : > { %6005 = vmatmul.msk.f32.gmra.mxu1 %vm1797_vm10, %v7408_v53  ;;  %v5457_v59 = vadd.f32 %v12556_v29, %v5456_v37 }
 0x863   : > { %7409 = vtanh.f32 %v5457_v59 }
 0x866   : > { %v5663_v43 = vpop.f32.mrf.mxu1 }
 0x867   : > { %v5664_v45 = vadd.f32 %v12647_v1, %v5663_v43 }
 0x868   : > { %v5459_v6 = vpop.f32.mrf.mxu0 }
 0x869   : > { %v7410_v58 = vpop.eup %7409  ;;  %5748 = vst.msk [vmem:[%s12655_s15 + $0x30] sm:$0xff] %vm5741_vm1, %v5664_v45  ;;  %v5460_v16 = vadd.f32 %v12556_v29, %v5459_v6 }
 0x86a   : > { %6006 = vmatmul.msk.f32.gmra.mxu1 %vm1797_vm10, %v7410_v58 }
 0x86b   : > { %7411 = vtanh.f32 %v5460_v16 }
 0x86f   : > { %v5666_v47 = vpop.f32.mrf.mxu1 }
 0x870   : > { %v5667_v35 = vadd.f32 %v12647_v1, %v5666_v47 }
 0x871   : > { %v7412_v39 = vpop.eup %7411 }
 0x872   : > { %5749 = vst.msk [vmem:[%s12655_s15 + $0x38] sm:$0xff] %vm5741_vm1, %v5667_v35  ;;  %6007 = vmatmul.msk.f32.gmra.mxu1 %vm1797_vm10, %v7412_v39 }
 0x876   : > { %v5462_v0 = vpop.f32.mrf.mxu0 }
 0x877   : > { %v5463_v38 = vadd.f32 %v12556_v29, %v5462_v0  ;;  %v5669_v54 = vpop.f32.mrf.mxu1 }
 0x878   : > { %v5670_v7 = vadd.f32 %v12647_v1, %v5669_v54 }
 0x879   : > { %7413 = vtanh.f32 %v5463_v38 }
 0x87a   : > { %5750 = vst.msk [vmem:[%s12655_s15 + $0x40] sm:$0xff] %vm5741_vm1, %v5670_v7 }
 0x87e   : > { %v5465_v9 = vpop.f32.mrf.mxu0 }
 0x87f   : > { %v7414_v19 = vpop.eup %7413  ;;  %v5466_v13 = vadd.f32 %v12556_v29, %v5465_v9 }
 0x880   : > { %v5672_v15 = vpop.f32.mrf.mxu1  ;;  %6008 = vmatmul.msk.f32.gmra.mxu1 %vm1797_vm10, %v7414_v19 }
 0x881   : > { %7415 = vtanh.f32 %v5466_v13  ;;  %v5673_v25 = vadd.f32 %v12647_v1, %v5672_v15 }
 0x883   : > { %5751 = vst.msk [vmem:[%s12655_s15 + $0x48] sm:$0xff] %vm5741_vm1, %v5673_v25 }
 0x887   : > { %v7416_v60 = vpop.eup %7415  ;;  %v5468_v55 = vpop.f32.mrf.mxu0 }
 0x888   : > { %v5469_v18 = vadd.f32 %v12556_v29, %v5468_v55  ;;  %6009 = vmatmul.msk.f32.gmra.mxu1 %vm1797_vm10, %v7416_v60 }
 0x88a   : > { %7417 = vtanh.f32 %v5469_v18 }
 0x88d   : > { %v5675_v2 = vpop.f32.mrf.mxu1 }
 0x88e   : > { %v5676_v46 = vadd.f32 %v12647_v1, %v5675_v2 }
 0x88f   : > { %v5471_v61 = vpop.f32.mrf.mxu0 }
 0x890   : > { %v7418_v12 = vpop.eup %7417  ;;  %5752 = vst.msk [vmem:[%s12655_s15 + $0x50] sm:$0xff] %vm5741_vm1, %v5676_v46  ;;  %v5472_v24 = vadd.f32 %v12556_v29, %v5471_v61 }
 0x891   : > { %6010 = vmatmul.msk.f32.gmra.mxu1 %vm1797_vm10, %v7418_v12 }
 0x892   : > { %7419 = vtanh.f32 %v5472_v24 }
 0x895   : > { %v5678_v28 = vpop.f32.mrf.mxu1 }
 0x896   : > { %v5679_v26 = vadd.f32 %v12647_v1, %v5678_v28 }
 0x898   : > { %v7420_v5 = vpop.eup %7419  ;;  %5753 = vst.msk [vmem:[%s12655_s15 + $0x58] sm:$0xff] %vm5741_vm1, %v5679_v26  ;;  %v5474_v4 = vpop.f32.mrf.mxu0 }
 0x899   : > { %6011 = vmatmul.msk.f32.gmra.mxu1 %vm1797_vm10, %v7420_v5  ;;  %v5475_v42 = vadd.f32 %v12556_v29, %v5474_v4 }
 0x89b   : > { %7421 = vtanh.f32 %v5475_v42 }
 0x89e   : > { %v5681_v63 = vpop.f32.mrf.mxu1 }
 0x89f   : > { %v5682_v27 = vadd.f32 %v12647_v1, %v5681_v63 }
 0x8a0   : > { %v5477_v3 = vpop.f32.mrf.mxu0 }
 0x8a1   : > { %v7422_v36 = vpop.eup %7421  ;;  %5754 = vst.msk [vmem:[%s12655_s15 + $0x60] sm:$0xff] %vm5741_vm1, %v5682_v27  ;;  %v5478_v32 = vadd.f32 %v12556_v29, %v5477_v3 }
 0x8a2   : > { %6012 = vmatmul.msk.f32.gmra.mxu1 %vm1797_vm10, %v7422_v36 }
 0x8a3   : > { %7423 = vtanh.f32 %v5478_v32 }
 0x8a7   : > { %v5684_v44 = vpop.f32.mrf.mxu1 }
 0x8a8   : > { %v5685_v41 = vadd.f32 %v12647_v1, %v5684_v44 }
 0x8a9   : > { %v7424_v62 = vpop.eup %7423 }
 0x8aa   : > { %5755 = vst.msk [vmem:[%s12655_s15 + $0x68] sm:$0xff] %vm5741_vm1, %v5685_v41  ;;  %6013 = vmatmul.msk.f32.gmra.mxu1 %vm1797_vm10, %v7424_v62 }
 0x8ae   : > { %v5480_v10 = vpop.f32.mrf.mxu0 }
 0x8af   : > { %v5481_v49 = vadd.f32 %v12556_v29, %v5480_v10  ;;  %v5687_v30 = vpop.f32.mrf.mxu1 }
 0x8b0   : > { %v5688_v34 = vadd.f32 %v12647_v1, %v5687_v30 }
 0x8b1   : > { %7425 = vtanh.f32 %v5481_v49 }
 0x8b2   : > { %5756 = vst.msk [vmem:[%s12655_s15 + $0x70] sm:$0xff] %vm5741_vm1, %v5688_v34 }
 0x8b6   : > { %v5483_v21 = vpop.f32.mrf.mxu0 }
 0x8b7   : > { %v7426_v23 = vpop.eup %7425  ;;  %v5484_v40 = vadd.f32 %v12556_v29, %v5483_v21  ;;  %v5690_v8 = vpop.f32.mrf.mxu1 }
 0x8b8   : > { %6014 = vmatmul.msk.f32.gmra.mxu1 %vm1797_vm10, %v7426_v23  ;;  %v5691_v31 = vadd.f32 %v12647_v1, %v5690_v8 }
 0x8b9   : > { %7427 = vtanh.f32 %v5484_v40 }
 0x8ba   : > { %5757 = vst.msk [vmem:[%s12655_s15 + $0x78] sm:$0xff] %vm5741_vm1, %v5691_v31 }
 0x8be   : > { %v5486_v33 = vpop.f32.mrf.mxu0 }
 0x8bf   : > { %v7428_v51 = vpop.eup %7427  ;;  %v5487_v48 = vadd.f32 %v12556_v29, %v5486_v33 }
 0x8c0   : > { %6015 = vmatmul.msk.f32.gmra.mxu1 %vm1797_vm10, %v7428_v51 }
 0x8c1   : > { %7429 = vtanh.f32 %v5487_v48 }
 0x8c5   : > { %v5693_v22 = vpop.f32.mrf.mxu1 }
 0x8c6   : > { %v5694_v56 = vadd.f32 %v12647_v1, %v5693_v22  ;;  %v5489_v52 = vpop.f32.mrf.mxu0 }
 0x8c7   : > { %v7430_v57 = vpop.eup %7429  ;;  %v5490_v50 = vadd.f32 %v12556_v29, %v5489_v52 }
 0x8c8   : > { %5758 = vst.msk [vmem:[%s12655_s15 + $0x80] sm:$0xff] %vm5741_vm1, %v5694_v56  ;;  %6016 = vmatmul.msk.f32.gmra.mxu1 %vm1797_vm10, %v7430_v57 }
 0x8c9   : > { %7431 = vtanh.f32 %v5490_v50 }
 0x8cd   : > { %v5696_v11 = vpop.f32.mrf.mxu1 }
 0x8ce   : > { %v5697_v14 = vadd.f32 %v12647_v1, %v5696_v11 }
 0x8cf   : > { %v7432_v17 = vpop.eup %7431 }
 0x8d0   : > { %5759 = vst.msk [vmem:[%s12655_s15 + $0x88] sm:$0xff] %vm5741_vm1, %v5697_v14  ;;  %6017 = vmatmul.msk.f32.gmra.mxu1 %vm1797_vm10, %v7432_v17 }
 0x8d6   : > { %v5699_v20 = vpop.f32.mrf.mxu1 }
 0x8d7   : > { %v5700_v53 = vadd.f32 %v12647_v1, %v5699_v20 }
 0x8d9   : > { %5760 = vst.msk [vmem:[%s12655_s15 + $0x90] sm:$0xff] %vm5741_vm1, %v5700_v53 }
 0x8de   : > { %v5702_v29 = vpop.f32.mrf.mxu1 }
 0x8df   : > { %v5703_v37 = vadd.f32 %v12647_v1, %v5702_v29 }
 0x8e1   : > { %5761 = vst.msk [vmem:[%s12655_s15 + $0x98] sm:$0xff] %vm5741_vm1, %v5703_v37 }
 0x8e7   : > { %v5705_v59 = vpop.f32.mrf.mxu1 }
 0x8e8   : > { %v5706_v43 = vadd.f32 %v12647_v1, %v5705_v59 }
 0x8ea   : > { %5762 = vst.msk [vmem:[%s12655_s15 + $0xa0] sm:$0xff] %vm5741_vm1, %v5706_v43 }
 0x8ef   : > { %v5708_v45 = vpop.f32.mrf.mxu1 }
 0x8f0   : > { %v5709_v6 = vadd.f32 %v12647_v1, %v5708_v45 }
 0x8f2   : > { %5763 = vst.msk [vmem:[%s12655_s15 + $0xa8] sm:$0xff] %vm5741_vm1, %v5709_v6 }
 0x8fd   : > { %v5711_v58 = vpop.f32.mrf.mxu1 }
 0x8fe   : > { %v5712_v16 = vadd.f32 %v12647_v1, %v5711_v58 }
 0x900   : > { %5764 = vst.msk [vmem:[%s12655_s15 + $0xb0] sm:$0xff] %vm5741_vm1, %v5712_v16 }
 0x905   : > { %v5714_v47 = vpop.f32.mrf.mxu1 }
 0x906   : > { %v5715_v35 = vadd.f32 %v12647_v1, %v5714_v47 }
 0x908   : > { %5765 = vst.msk [vmem:[%s12655_s15 + $0xb8] sm:$0xff] %vm5741_vm1, %v5715_v35 }
 0x90e   : > { %v5717_v39 = vpop.f32.mrf.mxu1 }
 0x90f   : > { %v5718_v0 = vadd.f32 %v12647_v1, %v5717_v39 }
 0x911   : > { %5766 = vst.msk [vmem:[%s12655_s15 + $0xc0] sm:$0xff] %vm5741_vm1, %v5718_v0 }
 0x916   : > { %v5720_v38 = vpop.f32.mrf.mxu1 }
 0x917   : > { %v5721_v54 = vadd.f32 %v12647_v1, %v5720_v38 }
 0x919   : > { %5767 = vst.msk [vmem:[%s12655_s15 + $0xc8] sm:$0xff] %vm5741_vm1, %v5721_v54 }
 0x91f   : > { %v5723_v7 = vpop.f32.mrf.mxu1 }
 0x920   : > { %v5724_v9 = vadd.f32 %v12647_v1, %v5723_v7 }
 0x922   : > { %5768 = vst.msk [vmem:[%s12655_s15 + $0xd0] sm:$0xff] %vm5741_vm1, %v5724_v9 }
 0x927   : > { %v5726_v19 = vpop.f32.mrf.mxu1 }
 0x928   : > { %v5727_v13 = vadd.f32 %v12647_v1, %v5726_v19 }
 0x92a   : > { %5769 = vst.msk [vmem:[%s12655_s15 + $0xd8] sm:$0xff] %vm5741_vm1, %v5727_v13 }
 0x935   : > { %v5729_v15 = vpop.f32.mrf.mxu1 }
 0x936   : > { %v5730_v25 = vadd.f32 %v12647_v1, %v5729_v15 }
 0x938   : > { %5770 = vst.msk [vmem:[%s12655_s15 + $0xe0] sm:$0xff] %vm5741_vm1, %v5730_v25 }
 0x93d   : > { %v5732_v60 = vpop.f32.mrf.mxu1 }
 0x93e   : > { %v5733_v55 = vadd.f32 %v12647_v1, %v5732_v60 }
 0x940   : > { %5771 = vst.msk [vmem:[%s12655_s15 + $0xe8] sm:$0xff] %vm5741_vm1, %v5733_v55 }
 0x945   : > { %v5735_v18 = vpop.f32.mrf.mxu1 }
 0x946   : > { %v5736_v2 = vadd.f32 %v12647_v1, %v5735_v18 }
 0x948   : > { %5772 = vst.msk [vmem:[%s12655_s15 + $0xf0] sm:$0xff] %vm5741_vm1, %v5736_v2 }
 0x94d   : > { %v5738_v46 = vpop.f32.mrf.mxu1 }
 0x94e   : > { %v5739_v61 = vadd.f32 %v12647_v1, %v5738_v46 }
 0x950   : > { %5773 = vst.msk [vmem:[%s12655_s15 + $0xf8] sm:$0xff] %vm5741_vm1, %v5739_v61 }
 0x951 PF: > { %s19_s30 = sadd.s32 1, %s7541_s30  }
 0x952   : > { %p16_p4 = scmp.ge.s32.totalorder %s19_s30, 4  }
 0x954   :  { %18 = sbr.rel (!%p16_p4) target bundleno = 1 (0x1), region = 90 }

</bundles_post_ra>
